<compile_context>
chip_gen: v7x
topology: tpu7x:2x2x1
jax: 0.10.0
libtpu: 0.0.40
codegen_flags: <defaults>
</compile_context>

<pallas_src>
import numpy as np

import jax
import jax.numpy as jnp
from jax.experimental import pallas as pl
from jax.experimental.pallas import tpu as pltpu


_PREC = jax.lax.Precision.HIGHEST


def _dot(a, b):
    return jnp.dot(a, b, preferred_element_type=jnp.float32, precision=_PREC)


# ----------------------------------------------------------------------------
# The single fused kernel (one image per grid step)
# ----------------------------------------------------------------------------
def _lenet_kernel(x_ref, t1_ref, b1_ref, re1_ref, ro1_ref, ce1_ref, co1_ref,
                  t2_ref, b2_ref, re2_ref, ro2_ref, ce2_ref, co2_ref,
                  wf1_ref, bf1_ref, wf2_ref, bf2_ref, wo_ref, bo_ref, o_ref):
    x = x_ref[0]                                         # (28, 28) image

    # ---- conv1 (5x5, 1->6) + bias + ReLU : layout (h, oc*24 + w) ----------
    y1 = _dot(x[0:24, :], t1_ref[0])
    for i in range(1, 5):
        y1 = y1 + _dot(x[i:i + 24, :], t1_ref[i])
    a1 = jnp.maximum(y1 + b1_ref[...], 0.0)              # (24, 144)

    # ---- maxpool 2x2 via exact selection matmuls --------------------------
    rp1 = jnp.maximum(_dot(re1_ref[...], a1), _dot(ro1_ref[...], a1))   # (12,144)
    p1 = jnp.maximum(_dot(rp1, ce1_ref[...]), _dot(rp1, co1_ref[...]))  # (12, 72)

    # ---- conv2 (5x5, 6->12) + bias + ReLU : layout (h, oc*8 + w) ----------
    y2 = _dot(p1[0:8, :], t2_ref[0])
    for i in range(1, 5):
        y2 = y2 + _dot(p1[i:i + 8, :], t2_ref[i])
    a2 = jnp.maximum(y2 + b2_ref[...], 0.0)              # (8, 96)

    # ---- maxpool 2x2 -------------------------------------------------------
    rp2 = jnp.maximum(_dot(re2_ref[...], a2), _dot(ro2_ref[...], a2))   # (4, 96)
    p2 = jnp.maximum(_dot(rp2, ce2_ref[...]), _dot(rp2, co2_ref[...]))  # (4, 48)

    # ---- fc1 (NCHW-flatten permutation folded into the weight) + ReLU -----
    t = bf1_ref[...]                                     # (1, 120)
    for h in range(4):
        t = t + _dot(p2[h:h + 1, :], wf1_ref[h])
    t = jnp.maximum(t, 0.0)

    # ---- fc2 + ReLU, output layer ------------------------------------------
    t = jnp.maximum(_dot(t, wf2_ref[...]) + bf2_ref[...], 0.0)          # (1, 60)
    o_ref[0] = _dot(t, wo_ref[...]) + bo_ref[...]                       # (1, 10)


# ----------------------------------------------------------------------------
# One-time (trace-time) weight restructuring
# ----------------------------------------------------------------------------
def _shift_struct(kw, in_w, out_w):
    """m[j, p, w] = 1.0 iff p == w + j  (valid-conv column structure)."""
    m = np.zeros((kw, in_w, out_w), np.float32)
    for j in range(kw):
        for w in range(out_w):
            m[j, w + j, w] = 1.0
    return m


def _row_pool_mats(out_rows):
    re = np.zeros((out_rows, 2 * out_rows), np.float32)
    ro = np.zeros((out_rows, 2 * out_rows), np.float32)
    idx = np.arange(out_rows)
    re[idx, 2 * idx] = 1.0
    ro[idx, 2 * idx + 1] = 1.0
    return re, ro


def _col_pool_mats(channels, in_w):
    out_w = in_w // 2
    ce = np.zeros((channels * in_w, channels * out_w), np.float32)
    co = np.zeros_like(ce)
    for c in range(channels):
        for v in range(out_w):
            ce[c * in_w + 2 * v, c * out_w + v] = 1.0
            co[c * in_w + 2 * v + 1, c * out_w + v] = 1.0
    return ce, co


def prepare_params(params):
    """Fold conv kernels / pooling / flatten into kernel-ready matrices (run once)."""
    # conv1: T1[i] : (28, 6*24)  with  T1[i][p, oc*24+w] = w1[oc,0,i,p-w]
    m1 = jnp.asarray(_shift_struct(5, 28, 24))
    t1 = jnp.einsum("oij,jpw->ipow", params["w1"][:, 0], m1,
                    precision=_PREC).reshape(5, 28, 6 * 24)
    b1r = jnp.repeat(params["b1"], 24)[None, :]                       # (1, 144)

    # conv2: T2[i] : (6*12, 12*8)  with  T2[i][ic*12+p, oc*8+w] = w2[oc,ic,i,p-w]
    m2 = jnp.asarray(_shift_struct(5, 12, 8))
    t2 = jnp.einsum("ocij,jpw->icpow", params["w2"], m2,
                    precision=_PREC).reshape(5, 6 * 12, 12 * 8)
    b2r = jnp.repeat(params["b2"], 8)[None, :]                        # (1, 96)

    # 2x2 max-pool selectors (exact 0/1 matrices)
    re1, ro1 = _row_pool_mats(12)
    ce1, co1 = _col_pool_mats(6, 24)
    re2, ro2 = _row_pool_mats(4)
    ce2, co2 = _col_pool_mats(12, 8)

    # fc1 with the PyTorch NCHW flatten folded in:
    # wf1[h, oc*4 + w, n] = wfc1[oc*16 + h*4 + w, n]
    wf1 = params["wfc1"].reshape(12, 4, 4, 120).transpose(1, 0, 2, 3).reshape(4, 48, 120)

    kp = {
        "t1": t1, "b1r": b1r,
        "re1": jnp.asarray(re1), "ro1": jnp.asarray(ro1),
        "ce1": jnp.asarray(ce1), "co1": jnp.asarray(co1),
        "t2": t2, "b2r": b2r,
        "re2": jnp.asarray(re2), "ro2": jnp.asarray(ro2),
        "ce2": jnp.asarray(ce2), "co2": jnp.asarray(co2),
        "wf1": wf1, "bf1": params["bfc1"][None, :],
        "wf2": params["wfc2"], "bf2": params["bfc2"][None, :],
        "wo": params["wout"], "bo": params["bout"][None, :],
    }
    return {k: v.astype(jnp.float32) for k, v in kp.items()}


_W_ORDER = ("t1", "b1r", "re1", "ro1", "ce1", "co1",
            "t2", "b2r", "re2", "ro2", "ce2", "co2",
            "wf1", "bf1", "wf2", "bf2", "wo", "bo")


# ----------------------------------------------------------------------------
# Public forward pass (single pallas_call, grid over batch)
# ----------------------------------------------------------------------------
def lenet_forward(x_nchw, kp):
    B = x_nchw.shape[0]
    x = x_nchw.reshape(B, 28, 28)               # drop the unit channel dim (free)
    weights = [kp[k] for k in _W_ORDER]

    def resident(a):
        if a.ndim == 3:
            return pl.BlockSpec(a.shape, lambda b: (0, 0, 0))
        return pl.BlockSpec(a.shape, lambda b: (0, 0))

    out = pl.pallas_call(
        _lenet_kernel,
        out_shape=jax.ShapeDtypeStruct((B, 1, 10), jnp.float32),
        grid=(B,),
        in_specs=[pl.BlockSpec((1, 28, 28), lambda b: (b, 0, 0))]
                 + [resident(a) for a in weights],
        out_specs=pl.BlockSpec((1, 1, 10), lambda b: (b, 0, 0)),
        compiler_params=pltpu.CompilerParams(
            dimension_semantics=("parallel",),
            vmem_limit_bytes=32 * 1024 * 1024,
        ),
    )(x, *weights)
    return out.reshape(B, 10)


# ----------------------------------------------------------------------------
# Pure-JAX reference (same math as the PyTorch module) for a sanity check
# ----------------------------------------------------------------------------
def reference_forward(x_nchw, params):
    dn = ("NCHW", "OIHW", "NCHW")
    t = jax.lax.conv_general_dilated(x_nchw, params["w1"], (1, 1), "VALID",
                                     dimension_numbers=dn, precision=_PREC)
    t = jax.nn.relu(t + params["b1"][None, :, None, None])
    t = jax.lax.reduce_window(t, -jnp.inf, jax.lax.max,
                              (1, 1, 2, 2), (1, 1, 2, 2), "VALID")
    t = jax.lax.conv_general_dilated(t, params["w2"], (1, 1), "VALID",
                                     dimension_numbers=dn, precision=_PREC)
    t = jax.nn.relu(t + params["b2"][None, :, None, None])
    t = jax.lax.reduce_window(t, -jnp.inf, jax.lax.max,
                              (1, 1, 2, 2), (1, 1, 2, 2), "VALID")
    t = t.reshape(t.shape[0], 12 * 4 * 4)
    t = jax.nn.relu(jnp.dot(t, params["wfc1"], precision=_PREC) + params["bfc1"])
    t = jax.nn.relu(jnp.dot(t, params["wfc2"], precision=_PREC) + params["bfc2"])
    return jnp.dot(t, params["wout"], precision=_PREC) + params["bout"]


# ----------------------------------------------------------------------------
# Deterministic parameter init (synthetic; matches the module's shapes)
# ----------------------------------------------------------------------------
def init_params(key):
    ks = jax.random.split(key, 10)

    def uniform(k, shape, fan_in):
        bound = 1.0 / jnp.sqrt(float(fan_in))
        return jax.random.uniform(k, shape, jnp.float32, -bound, bound)

    return {
        # conv weights in PyTorch layout (OC, IC, KH, KW)
        "w1": uniform(ks[0], (6, 1, 5, 5), 1 * 5 * 5),
        "b1": uniform(ks[1], (6,), 1 * 5 * 5),
        "w2": uniform(ks[2], (12, 6, 5, 5), 6 * 5 * 5),
        "b2": uniform(ks[3], (12,), 6 * 5 * 5),
        # fc weights stored as (in, out) for direct matmul
        "wfc1": uniform(ks[4], (192, 120), 192),
        "bfc1": uniform(ks[5], (120,), 192),
        "wfc2": uniform(ks[6], (120, 60), 120),
        "bfc2": uniform(ks[7], (60,), 120),
        "wout": uniform(ks[8], (60, 10), 60),
        "bout": uniform(ks[9], (10,), 60),
    }


if __name__ == "__main__":
    key = jax.random.PRNGKey(0)
    k_x, k_p = jax.random.split(key)
    # fc1's in_features = 12*4*4 implies a 28x28 single-channel input.
    x = jax.random.normal(k_x, (2, 1, 28, 28), dtype=jnp.float32)
    params = init_params(k_p)
    kparams = prepare_params(params)            # one-time weight restructuring

    fwd = jax.jit(lenet_forward)
    out = jax.block_until_ready(fwd(x, kparams))

    assert out.shape == (2, 10), out.shape
    assert bool(jnp.all(jnp.isfinite(out)))

    ref = reference_forward(x, params)
    err = float(jnp.max(jnp.abs(out - ref)))
    assert err < 5e-2, f"kernel/reference mismatch: max abs err {err}"
    print("KERNEL_OK")
</pallas_src>

<mosaic_0001>
module attributes {stable_mosaic.version = 11 : i64} {
  func.func @_lenet_kernel(%arg0: i32, %arg1: memref<1x28x28xf32, #tpu.memory_space<vmem>>, %arg2: memref<5x28x144xf32, #tpu.memory_space<vmem>>, %arg3: memref<1x144xf32, #tpu.memory_space<vmem>>, %arg4: memref<12x24xf32, #tpu.memory_space<vmem>>, %arg5: memref<12x24xf32, #tpu.memory_space<vmem>>, %arg6: memref<144x72xf32, #tpu.memory_space<vmem>>, %arg7: memref<144x72xf32, #tpu.memory_space<vmem>>, %arg8: memref<5x72x96xf32, #tpu.memory_space<vmem>>, %arg9: memref<1x96xf32, #tpu.memory_space<vmem>>, %arg10: memref<4x8xf32, #tpu.memory_space<vmem>>, %arg11: memref<4x8xf32, #tpu.memory_space<vmem>>, %arg12: memref<96x48xf32, #tpu.memory_space<vmem>>, %arg13: memref<96x48xf32, #tpu.memory_space<vmem>>, %arg14: memref<4x48x120xf32, #tpu.memory_space<vmem>>, %arg15: memref<1x120xf32, #tpu.memory_space<vmem>>, %arg16: memref<120x60xf32, #tpu.memory_space<vmem>>, %arg17: memref<1x60xf32, #tpu.memory_space<vmem>>, %arg18: memref<60x10xf32, #tpu.memory_space<vmem>>, %arg19: memref<1x10xf32, #tpu.memory_space<vmem>>, %arg20: memref<1x1x10xf32, #tpu.memory_space<vmem>>) attributes {dimension_semantics = [#tpu.dimension_semantics<parallel>], iteration_bounds = array<i64: 2>, scalar_prefetch = 0 : i64, scratch_operands = 0 : i64, tpu.core_type = #tpu.core_type<tc>, window_params = [{transform_indices = @transform_0, window_bounds = array<i64: 1, 28, 28>}, {pipeline_mode = #tpu.pipeline_mode<synchronous>, transform_indices = @transform_1, window_bounds = array<i64: 5, 28, 144>}, {pipeline_mode = #tpu.pipeline_mode<synchronous>, transform_indices = @transform_2, window_bounds = array<i64: 1, 144>}, {pipeline_mode = #tpu.pipeline_mode<synchronous>, transform_indices = @transform_3, window_bounds = array<i64: 12, 24>}, {pipeline_mode = #tpu.pipeline_mode<synchronous>, transform_indices = @transform_4, window_bounds = array<i64: 12, 24>}, {pipeline_mode = #tpu.pipeline_mode<synchronous>, transform_indices = @transform_5, window_bounds = array<i64: 144, 72>}, {pipeline_mode = #tpu.pipeline_mode<synchronous>, transform_indices = @transform_6, window_bounds = array<i64: 144, 72>}, {pipeline_mode = #tpu.pipeline_mode<synchronous>, transform_indices = @transform_7, window_bounds = array<i64: 5, 72, 96>}, {pipeline_mode = #tpu.pipeline_mode<synchronous>, transform_indices = @transform_8, window_bounds = array<i64: 1, 96>}, {pipeline_mode = #tpu.pipeline_mode<synchronous>, transform_indices = @transform_9, window_bounds = array<i64: 4, 8>}, {pipeline_mode = #tpu.pipeline_mode<synchronous>, transform_indices = @transform_10, window_bounds = array<i64: 4, 8>}, {pipeline_mode = #tpu.pipeline_mode<synchronous>, transform_indices = @transform_11, window_bounds = array<i64: 96, 48>}, {pipeline_mode = #tpu.pipeline_mode<synchronous>, transform_indices = @transform_12, window_bounds = array<i64: 96, 48>}, {pipeline_mode = #tpu.pipeline_mode<synchronous>, transform_indices = @transform_13, window_bounds = array<i64: 4, 48, 120>}, {pipeline_mode = #tpu.pipeline_mode<synchronous>, transform_indices = @transform_14, window_bounds = array<i64: 1, 120>}, {pipeline_mode = #tpu.pipeline_mode<synchronous>, transform_indices = @transform_15, window_bounds = array<i64: 120, 60>}, {pipeline_mode = #tpu.pipeline_mode<synchronous>, transform_indices = @transform_16, window_bounds = array<i64: 1, 60>}, {pipeline_mode = #tpu.pipeline_mode<synchronous>, transform_indices = @transform_17, window_bounds = array<i64: 60, 10>}, {pipeline_mode = #tpu.pipeline_mode<synchronous>, transform_indices = @transform_18, window_bounds = array<i64: 1, 10>}, {transform_indices = @transform_19, window_bounds = array<i64: 1, 1, 10>}]} {
    %c0 = arith.constant 0 : index
    %c0_0 = arith.constant 0 : index
    %c0_1 = arith.constant 0 : index
    %0 = vector.load %arg1[%c0, %c0_0, %c0_1] : memref<1x28x28xf32, #tpu.memory_space<vmem>>, vector<1x28x28xf32>
    %1 = vector.shape_cast %0 : vector<1x28x28xf32> to vector<28x28xf32>
    %2 = vector.extract_strided_slice %1 {offsets = [0, 0], sizes = [24, 28], strides = [1, 1]} : vector<28x28xf32> to vector<24x28xf32>
    %c0_2 = arith.constant 0 : index
    %c0_3 = arith.constant 0 : index
    %c0_4 = arith.constant 0 : index
    %3 = vector.load %arg2[%c0_2, %c0_3, %c0_4] : memref<5x28x144xf32, #tpu.memory_space<vmem>>, vector<1x28x144xf32>
    %4 = vector.shape_cast %3 : vector<1x28x144xf32> to vector<28x144xf32>
    %cst = arith.constant dense<0.000000e+00> : vector<24x144xf32>
    %5 = tpu.matmul %2, %4, %cst {dimension_numbers = #tpu.dot_dimension_numbers<[1], [0], [0], [1], [0, 0, 1, 1], [], []>, precision = #tpu.contract_precision<fp32>} : vector<24x28xf32>, vector<28x144xf32>, vector<24x144xf32> -> vector<24x144xf32>
    %6 = vector.extract_strided_slice %1 {offsets = [1, 0], sizes = [24, 28], strides = [1, 1]} : vector<28x28xf32> to vector<24x28xf32>
    %c1 = arith.constant 1 : index
    %c0_5 = arith.constant 0 : index
    %c0_6 = arith.constant 0 : index
    %7 = vector.load %arg2[%c1, %c0_5, %c0_6] : memref<5x28x144xf32, #tpu.memory_space<vmem>>, vector<1x28x144xf32>
    %8 = vector.shape_cast %7 : vector<1x28x144xf32> to vector<28x144xf32>
    %cst_7 = arith.constant dense<0.000000e+00> : vector<24x144xf32>
    %9 = tpu.matmul %6, %8, %cst_7 {dimension_numbers = #tpu.dot_dimension_numbers<[1], [0], [0], [1], [0, 0, 1, 1], [], []>, precision = #tpu.contract_precision<fp32>} : vector<24x28xf32>, vector<28x144xf32>, vector<24x144xf32> -> vector<24x144xf32>
    %10 = arith.addf %5, %9 : vector<24x144xf32>
    %11 = vector.extract_strided_slice %1 {offsets = [2, 0], sizes = [24, 28], strides = [1, 1]} : vector<28x28xf32> to vector<24x28xf32>
    %c2 = arith.constant 2 : index
    %c0_8 = arith.constant 0 : index
    %c0_9 = arith.constant 0 : index
    %12 = vector.load %arg2[%c2, %c0_8, %c0_9] : memref<5x28x144xf32, #tpu.memory_space<vmem>>, vector<1x28x144xf32>
    %13 = vector.shape_cast %12 : vector<1x28x144xf32> to vector<28x144xf32>
    %cst_10 = arith.constant dense<0.000000e+00> : vector<24x144xf32>
    %14 = tpu.matmul %11, %13, %cst_10 {dimension_numbers = #tpu.dot_dimension_numbers<[1], [0], [0], [1], [0, 0, 1, 1], [], []>, precision = #tpu.contract_precision<fp32>} : vector<24x28xf32>, vector<28x144xf32>, vector<24x144xf32> -> vector<24x144xf32>
    %15 = arith.addf %10, %14 : vector<24x144xf32>
    %16 = vector.extract_strided_slice %1 {offsets = [3, 0], sizes = [24, 28], strides = [1, 1]} : vector<28x28xf32> to vector<24x28xf32>
    %c3 = arith.constant 3 : index
    %c0_11 = arith.constant 0 : index
    %c0_12 = arith.constant 0 : index
    %17 = vector.load %arg2[%c3, %c0_11, %c0_12] : memref<5x28x144xf32, #tpu.memory_space<vmem>>, vector<1x28x144xf32>
    %18 = vector.shape_cast %17 : vector<1x28x144xf32> to vector<28x144xf32>
    %cst_13 = arith.constant dense<0.000000e+00> : vector<24x144xf32>
    %19 = tpu.matmul %16, %18, %cst_13 {dimension_numbers = #tpu.dot_dimension_numbers<[1], [0], [0], [1], [0, 0, 1, 1], [], []>, precision = #tpu.contract_precision<fp32>} : vector<24x28xf32>, vector<28x144xf32>, vector<24x144xf32> -> vector<24x144xf32>
    %20 = arith.addf %15, %19 : vector<24x144xf32>
    %21 = vector.extract_strided_slice %1 {offsets = [4, 0], sizes = [24, 28], strides = [1, 1]} : vector<28x28xf32> to vector<24x28xf32>
    %c4 = arith.constant 4 : index
    %c0_14 = arith.constant 0 : index
    %c0_15 = arith.constant 0 : index
    %22 = vector.load %arg2[%c4, %c0_14, %c0_15] : memref<5x28x144xf32, #tpu.memory_space<vmem>>, vector<1x28x144xf32>
    %23 = vector.shape_cast %22 : vector<1x28x144xf32> to vector<28x144xf32>
    %cst_16 = arith.constant dense<0.000000e+00> : vector<24x144xf32>
    %24 = tpu.matmul %21, %23, %cst_16 {dimension_numbers = #tpu.dot_dimension_numbers<[1], [0], [0], [1], [0, 0, 1, 1], [], []>, precision = #tpu.contract_precision<fp32>} : vector<24x28xf32>, vector<28x144xf32>, vector<24x144xf32> -> vector<24x144xf32>
    %25 = arith.addf %20, %24 : vector<24x144xf32>
    %c0_17 = arith.constant 0 : index
    %c0_18 = arith.constant 0 : index
    %26 = vector.load %arg3[%c0_17, %c0_18] : memref<1x144xf32, #tpu.memory_space<vmem>>, vector<1x144xf32>
    %27 = vector.broadcast %26 : vector<1x144xf32> to vector<24x144xf32>
    %28 = arith.addf %25, %27 : vector<24x144xf32>
    %cst_19 = arith.constant 0.000000e+00 : f32
    %29 = vector.broadcast %cst_19 : f32 to vector<24x144xf32>
    %30 = arith.maximumf %28, %29 : vector<24x144xf32>
    %c0_20 = arith.constant 0 : index
    %c0_21 = arith.constant 0 : index
    %31 = vector.load %arg4[%c0_20, %c0_21] : memref<12x24xf32, #tpu.memory_space<vmem>>, vector<12x24xf32>
    %cst_22 = arith.constant dense<0.000000e+00> : vector<12x144xf32>
    %32 = tpu.matmul %31, %30, %cst_22 {dimension_numbers = #tpu.dot_dimension_numbers<[1], [0], [0], [1], [0, 0, 1, 1], [], []>, precision = #tpu.contract_precision<fp32>} : vector<12x24xf32>, vector<24x144xf32>, vector<12x144xf32> -> vector<12x144xf32>
    %c0_23 = arith.constant 0 : index
    %c0_24 = arith.constant 0 : index
    %33 = vector.load %arg5[%c0_23, %c0_24] : memref<12x24xf32, #tpu.memory_space<vmem>>, vector<12x24xf32>
    %cst_25 = arith.constant dense<0.000000e+00> : vector<12x144xf32>
    %34 = tpu.matmul %33, %30, %cst_25 {dimension_numbers = #tpu.dot_dimension_numbers<[1], [0], [0], [1], [0, 0, 1, 1], [], []>, precision = #tpu.contract_precision<fp32>} : vector<12x24xf32>, vector<24x144xf32>, vector<12x144xf32> -> vector<12x144xf32>
    %35 = arith.maximumf %32, %34 : vector<12x144xf32>
    %c0_26 = arith.constant 0 : index
    %c0_27 = arith.constant 0 : index
    %36 = vector.load %arg6[%c0_26, %c0_27] : memref<144x72xf32, #tpu.memory_space<vmem>>, vector<144x72xf32>
    %cst_28 = arith.constant dense<0.000000e+00> : vector<12x72xf32>
    %37 = tpu.matmul %35, %36, %cst_28 {dimension_numbers = #tpu.dot_dimension_numbers<[1], [0], [0], [1], [0, 0, 1, 1], [], []>, precision = #tpu.contract_precision<fp32>} : vector<12x144xf32>, vector<144x72xf32>, vector<12x72xf32> -> vector<12x72xf32>
    %c0_29 = arith.constant 0 : index
    %c0_30 = arith.constant 0 : index
    %38 = vector.load %arg7[%c0_29, %c0_30] : memref<144x72xf32, #tpu.memory_space<vmem>>, vector<144x72xf32>
    %cst_31 = arith.constant dense<0.000000e+00> : vector<12x72xf32>
    %39 = tpu.matmul %35, %38, %cst_31 {dimension_numbers = #tpu.dot_dimension_numbers<[1], [0], [0], [1], [0, 0, 1, 1], [], []>, precision = #tpu.contract_precision<fp32>} : vector<12x144xf32>, vector<144x72xf32>, vector<12x72xf32> -> vector<12x72xf32>
    %40 = arith.maximumf %37, %39 : vector<12x72xf32>
    %41 = vector.extract_strided_slice %40 {offsets = [0, 0], sizes = [8, 72], strides = [1, 1]} : vector<12x72xf32> to vector<8x72xf32>
    %c0_32 = arith.constant 0 : index
    %c0_33 = arith.constant 0 : index
    %c0_34 = arith.constant 0 : index
    %42 = vector.load %arg8[%c0_32, %c0_33, %c0_34] : memref<5x72x96xf32, #tpu.memory_space<vmem>>, vector<1x72x96xf32>
    %43 = vector.shape_cast %42 : vector<1x72x96xf32> to vector<72x96xf32>
    %cst_35 = arith.constant dense<0.000000e+00> : vector<8x96xf32>
    %44 = tpu.matmul %41, %43, %cst_35 {dimension_numbers = #tpu.dot_dimension_numbers<[1], [0], [0], [1], [0, 0, 1, 1], [], []>, precision = #tpu.contract_precision<fp32>} : vector<8x72xf32>, vector<72x96xf32>, vector<8x96xf32> -> vector<8x96xf32>
    %45 = vector.extract_strided_slice %40 {offsets = [1, 0], sizes = [8, 72], strides = [1, 1]} : vector<12x72xf32> to vector<8x72xf32>
    %c1_36 = arith.constant 1 : index
    %c0_37 = arith.constant 0 : index
    %c0_38 = arith.constant 0 : index
    %46 = vector.load %arg8[%c1_36, %c0_37, %c0_38] : memref<5x72x96xf32, #tpu.memory_space<vmem>>, vector<1x72x96xf32>
    %47 = vector.shape_cast %46 : vector<1x72x96xf32> to vector<72x96xf32>
    %cst_39 = arith.constant dense<0.000000e+00> : vector<8x96xf32>
    %48 = tpu.matmul %45, %47, %cst_39 {dimension_numbers = #tpu.dot_dimension_numbers<[1], [0], [0], [1], [0, 0, 1, 1], [], []>, precision = #tpu.contract_precision<fp32>} : vector<8x72xf32>, vector<72x96xf32>, vector<8x96xf32> -> vector<8x96xf32>
    %49 = arith.addf %44, %48 : vector<8x96xf32>
    %50 = vector.extract_strided_slice %40 {offsets = [2, 0], sizes = [8, 72], strides = [1, 1]} : vector<12x72xf32> to vector<8x72xf32>
    %c2_40 = arith.constant 2 : index
    %c0_41 = arith.constant 0 : index
    %c0_42 = arith.constant 0 : index
    %51 = vector.load %arg8[%c2_40, %c0_41, %c0_42] : memref<5x72x96xf32, #tpu.memory_space<vmem>>, vector<1x72x96xf32>
    %52 = vector.shape_cast %51 : vector<1x72x96xf32> to vector<72x96xf32>
    %cst_43 = arith.constant dense<0.000000e+00> : vector<8x96xf32>
    %53 = tpu.matmul %50, %52, %cst_43 {dimension_numbers = #tpu.dot_dimension_numbers<[1], [0], [0], [1], [0, 0, 1, 1], [], []>, precision = #tpu.contract_precision<fp32>} : vector<8x72xf32>, vector<72x96xf32>, vector<8x96xf32> -> vector<8x96xf32>
    %54 = arith.addf %49, %53 : vector<8x96xf32>
    %55 = vector.extract_strided_slice %40 {offsets = [3, 0], sizes = [8, 72], strides = [1, 1]} : vector<12x72xf32> to vector<8x72xf32>
    %c3_44 = arith.constant 3 : index
    %c0_45 = arith.constant 0 : index
    %c0_46 = arith.constant 0 : index
    %56 = vector.load %arg8[%c3_44, %c0_45, %c0_46] : memref<5x72x96xf32, #tpu.memory_space<vmem>>, vector<1x72x96xf32>
    %57 = vector.shape_cast %56 : vector<1x72x96xf32> to vector<72x96xf32>
    %cst_47 = arith.constant dense<0.000000e+00> : vector<8x96xf32>
    %58 = tpu.matmul %55, %57, %cst_47 {dimension_numbers = #tpu.dot_dimension_numbers<[1], [0], [0], [1], [0, 0, 1, 1], [], []>, precision = #tpu.contract_precision<fp32>} : vector<8x72xf32>, vector<72x96xf32>, vector<8x96xf32> -> vector<8x96xf32>
    %59 = arith.addf %54, %58 : vector<8x96xf32>
    %60 = vector.extract_strided_slice %40 {offsets = [4, 0], sizes = [8, 72], strides = [1, 1]} : vector<12x72xf32> to vector<8x72xf32>
    %c4_48 = arith.constant 4 : index
    %c0_49 = arith.constant 0 : index
    %c0_50 = arith.constant 0 : index
    %61 = vector.load %arg8[%c4_48, %c0_49, %c0_50] : memref<5x72x96xf32, #tpu.memory_space<vmem>>, vector<1x72x96xf32>
    %62 = vector.shape_cast %61 : vector<1x72x96xf32> to vector<72x96xf32>
    %cst_51 = arith.constant dense<0.000000e+00> : vector<8x96xf32>
    %63 = tpu.matmul %60, %62, %cst_51 {dimension_numbers = #tpu.dot_dimension_numbers<[1], [0], [0], [1], [0, 0, 1, 1], [], []>, precision = #tpu.contract_precision<fp32>} : vector<8x72xf32>, vector<72x96xf32>, vector<8x96xf32> -> vector<8x96xf32>
    %64 = arith.addf %59, %63 : vector<8x96xf32>
    %c0_52 = arith.constant 0 : index
    %c0_53 = arith.constant 0 : index
    %65 = vector.load %arg9[%c0_52, %c0_53] : memref<1x96xf32, #tpu.memory_space<vmem>>, vector<1x96xf32>
    %66 = vector.broadcast %65 : vector<1x96xf32> to vector<8x96xf32>
    %67 = arith.addf %64, %66 : vector<8x96xf32>
    %cst_54 = arith.constant 0.000000e+00 : f32
    %68 = vector.broadcast %cst_54 : f32 to vector<8x96xf32>
    %69 = arith.maximumf %67, %68 : vector<8x96xf32>
    %c0_55 = arith.constant 0 : index
    %c0_56 = arith.constant 0 : index
    %70 = vector.load %arg10[%c0_55, %c0_56] : memref<4x8xf32, #tpu.memory_space<vmem>>, vector<4x8xf32>
    %cst_57 = arith.constant dense<0.000000e+00> : vector<4x96xf32>
    %71 = tpu.matmul %70, %69, %cst_57 {dimension_numbers = #tpu.dot_dimension_numbers<[1], [0], [0], [1], [0, 0, 1, 1], [], []>, precision = #tpu.contract_precision<fp32>} : vector<4x8xf32>, vector<8x96xf32>, vector<4x96xf32> -> vector<4x96xf32>
    %c0_58 = arith.constant 0 : index
    %c0_59 = arith.constant 0 : index
    %72 = vector.load %arg11[%c0_58, %c0_59] : memref<4x8xf32, #tpu.memory_space<vmem>>, vector<4x8xf32>
    %cst_60 = arith.constant dense<0.000000e+00> : vector<4x96xf32>
    %73 = tpu.matmul %72, %69, %cst_60 {dimension_numbers = #tpu.dot_dimension_numbers<[1], [0], [0], [1], [0, 0, 1, 1], [], []>, precision = #tpu.contract_precision<fp32>} : vector<4x8xf32>, vector<8x96xf32>, vector<4x96xf32> -> vector<4x96xf32>
    %74 = arith.maximumf %71, %73 : vector<4x96xf32>
    %c0_61 = arith.constant 0 : index
    %c0_62 = arith.constant 0 : index
    %75 = vector.load %arg12[%c0_61, %c0_62] : memref<96x48xf32, #tpu.memory_space<vmem>>, vector<96x48xf32>
    %cst_63 = arith.constant dense<0.000000e+00> : vector<4x48xf32>
    %76 = tpu.matmul %74, %75, %cst_63 {dimension_numbers = #tpu.dot_dimension_numbers<[1], [0], [0], [1], [0, 0, 1, 1], [], []>, precision = #tpu.contract_precision<fp32>} : vector<4x96xf32>, vector<96x48xf32>, vector<4x48xf32> -> vector<4x48xf32>
    %c0_64 = arith.constant 0 : index
    %c0_65 = arith.constant 0 : index
    %77 = vector.load %arg13[%c0_64, %c0_65] : memref<96x48xf32, #tpu.memory_space<vmem>>, vector<96x48xf32>
    %cst_66 = arith.constant dense<0.000000e+00> : vector<4x48xf32>
    %78 = tpu.matmul %74, %77, %cst_66 {dimension_numbers = #tpu.dot_dimension_numbers<[1], [0], [0], [1], [0, 0, 1, 1], [], []>, precision = #tpu.contract_precision<fp32>} : vector<4x96xf32>, vector<96x48xf32>, vector<4x48xf32> -> vector<4x48xf32>
    %79 = arith.maximumf %76, %78 : vector<4x48xf32>
    %c0_67 = arith.constant 0 : index
    %c0_68 = arith.constant 0 : index
    %80 = vector.load %arg15[%c0_67, %c0_68] : memref<1x120xf32, #tpu.memory_space<vmem>>, vector<1x120xf32>
    %81 = vector.extract_strided_slice %79 {offsets = [0, 0], sizes = [1, 48], strides = [1, 1]} : vector<4x48xf32> to vector<1x48xf32>
    %c0_69 = arith.constant 0 : index
    %c0_70 = arith.constant 0 : index
    %c0_71 = arith.constant 0 : index
    %82 = vector.load %arg14[%c0_69, %c0_70, %c0_71] : memref<4x48x120xf32, #tpu.memory_space<vmem>>, vector<1x48x120xf32>
    %83 = vector.shape_cast %82 : vector<1x48x120xf32> to vector<48x120xf32>
    %cst_72 = arith.constant dense<0.000000e+00> : vector<1x120xf32>
    %84 = tpu.matmul %81, %83, %cst_72 {dimension_numbers = #tpu.dot_dimension_numbers<[1], [0], [0], [1], [0, 0, 1, 1], [], []>, precision = #tpu.contract_precision<fp32>} : vector<1x48xf32>, vector<48x120xf32>, vector<1x120xf32> -> vector<1x120xf32>
    %85 = arith.addf %80, %84 : vector<1x120xf32>
    %86 = vector.extract_strided_slice %79 {offsets = [1, 0], sizes = [1, 48], strides = [1, 1]} : vector<4x48xf32> to vector<1x48xf32>
    %c1_73 = arith.constant 1 : index
    %c0_74 = arith.constant 0 : index
    %c0_75 = arith.constant 0 : index
    %87 = vector.load %arg14[%c1_73, %c0_74, %c0_75] : memref<4x48x120xf32, #tpu.memory_space<vmem>>, vector<1x48x120xf32>
    %88 = vector.shape_cast %87 : vector<1x48x120xf32> to vector<48x120xf32>
    %cst_76 = arith.constant dense<0.000000e+00> : vector<1x120xf32>
    %89 = tpu.matmul %86, %88, %cst_76 {dimension_numbers = #tpu.dot_dimension_numbers<[1], [0], [0], [1], [0, 0, 1, 1], [], []>, precision = #tpu.contract_precision<fp32>} : vector<1x48xf32>, vector<48x120xf32>, vector<1x120xf32> -> vector<1x120xf32>
    %90 = arith.addf %85, %89 : vector<1x120xf32>
    %91 = vector.extract_strided_slice %79 {offsets = [2, 0], sizes = [1, 48], strides = [1, 1]} : vector<4x48xf32> to vector<1x48xf32>
    %c2_77 = arith.constant 2 : index
    %c0_78 = arith.constant 0 : index
    %c0_79 = arith.constant 0 : index
    %92 = vector.load %arg14[%c2_77, %c0_78, %c0_79] : memref<4x48x120xf32, #tpu.memory_space<vmem>>, vector<1x48x120xf32>
    %93 = vector.shape_cast %92 : vector<1x48x120xf32> to vector<48x120xf32>
    %cst_80 = arith.constant dense<0.000000e+00> : vector<1x120xf32>
    %94 = tpu.matmul %91, %93, %cst_80 {dimension_numbers = #tpu.dot_dimension_numbers<[1], [0], [0], [1], [0, 0, 1, 1], [], []>, precision = #tpu.contract_precision<fp32>} : vector<1x48xf32>, vector<48x120xf32>, vector<1x120xf32> -> vector<1x120xf32>
    %95 = arith.addf %90, %94 : vector<1x120xf32>
    %96 = vector.extract_strided_slice %79 {offsets = [3, 0], sizes = [1, 48], strides = [1, 1]} : vector<4x48xf32> to vector<1x48xf32>
    %c3_81 = arith.constant 3 : index
    %c0_82 = arith.constant 0 : index
    %c0_83 = arith.constant 0 : index
    %97 = vector.load %arg14[%c3_81, %c0_82, %c0_83] : memref<4x48x120xf32, #tpu.memory_space<vmem>>, vector<1x48x120xf32>
    %98 = vector.shape_cast %97 : vector<1x48x120xf32> to vector<48x120xf32>
    %cst_84 = arith.constant dense<0.000000e+00> : vector<1x120xf32>
    %99 = tpu.matmul %96, %98, %cst_84 {dimension_numbers = #tpu.dot_dimension_numbers<[1], [0], [0], [1], [0, 0, 1, 1], [], []>, precision = #tpu.contract_precision<fp32>} : vector<1x48xf32>, vector<48x120xf32>, vector<1x120xf32> -> vector<1x120xf32>
    %100 = arith.addf %95, %99 : vector<1x120xf32>
    %cst_85 = arith.constant 0.000000e+00 : f32
    %101 = vector.broadcast %cst_85 : f32 to vector<1x120xf32>
    %102 = arith.maximumf %100, %101 : vector<1x120xf32>
    %c0_86 = arith.constant 0 : index
    %c0_87 = arith.constant 0 : index
    %103 = vector.load %arg16[%c0_86, %c0_87] : memref<120x60xf32, #tpu.memory_space<vmem>>, vector<120x60xf32>
    %cst_88 = arith.constant dense<0.000000e+00> : vector<1x60xf32>
    %104 = tpu.matmul %102, %103, %cst_88 {dimension_numbers = #tpu.dot_dimension_numbers<[1], [0], [0], [1], [0, 0, 1, 1], [], []>, precision = #tpu.contract_precision<fp32>} : vector<1x120xf32>, vector<120x60xf32>, vector<1x60xf32> -> vector<1x60xf32>
    %c0_89 = arith.constant 0 : index
    %c0_90 = arith.constant 0 : index
    %105 = vector.load %arg17[%c0_89, %c0_90] : memref<1x60xf32, #tpu.memory_space<vmem>>, vector<1x60xf32>
    %106 = arith.addf %104, %105 : vector<1x60xf32>
    %cst_91 = arith.constant 0.000000e+00 : f32
    %107 = vector.broadcast %cst_91 : f32 to vector<1x60xf32>
    %108 = arith.maximumf %106, %107 : vector<1x60xf32>
    %c0_92 = arith.constant 0 : index
    %c0_93 = arith.constant 0 : index
    %109 = vector.load %arg18[%c0_92, %c0_93] : memref<60x10xf32, #tpu.memory_space<vmem>>, vector<60x10xf32>
    %cst_94 = arith.constant dense<0.000000e+00> : vector<1x10xf32>
    %110 = tpu.matmul %108, %109, %cst_94 {dimension_numbers = #tpu.dot_dimension_numbers<[1], [0], [0], [1], [0, 0, 1, 1], [], []>, precision = #tpu.contract_precision<fp32>} : vector<1x60xf32>, vector<60x10xf32>, vector<1x10xf32> -> vector<1x10xf32>
    %c0_95 = arith.constant 0 : index
    %c0_96 = arith.constant 0 : index
    %111 = vector.load %arg19[%c0_95, %c0_96] : memref<1x10xf32, #tpu.memory_space<vmem>>, vector<1x10xf32>
    %112 = arith.addf %110, %111 : vector<1x10xf32>
    %c0_97 = arith.constant 0 : index
    %c0_98 = arith.constant 0 : index
    %c0_99 = arith.constant 0 : index
    %113 = vector.load %arg20[%c0_97, %c0_98, %c0_99] : memref<1x1x10xf32, #tpu.memory_space<vmem>>, vector<1x1x10xf32>
    %114 = vector.shape_cast %113 : vector<1x1x10xf32> to vector<1x10xf32>
    %115 = vector.shape_cast %112 : vector<1x10xf32> to vector<1x1x10xf32>
    tpu.vector_store %arg20[%c0_97, %c0_98, %c0_99], %115 {strides = array<i32>} : memref<1x1x10xf32, #tpu.memory_space<vmem>>, vector<1x1x10xf32>,
    return
  }
  func.func @transform_0(%arg0: i32) -> (i32, i32, i32) {
    %c0_i32 = arith.constant 0 : i32
    %c0_i32_0 = arith.constant 0 : i32
    %c0_i32_1 = arith.constant 0 : i32
    return %arg0, %c0_i32, %c0_i32_0 : i32, i32, i32
  }
  func.func @transform_1(%arg0: i32) -> (i32, i32, i32) {
    %c0_i32 = arith.constant 0 : i32
    %c0_i32_0 = arith.constant 0 : i32
    %c0_i32_1 = arith.constant 0 : i32
    %c0_i32_2 = arith.constant 0 : i32
    return %c0_i32, %c0_i32_0, %c0_i32_1 : i32, i32, i32
  }
  func.func @transform_2(%arg0: i32) -> (i32, i32) {
    %c0_i32 = arith.constant 0 : i32
    %c0_i32_0 = arith.constant 0 : i32
    %c0_i32_1 = arith.constant 0 : i32
    return %c0_i32, %c0_i32_0 : i32, i32
  }
  func.func @transform_3(%arg0: i32) -> (i32, i32) {
    %c0_i32 = arith.constant 0 : i32
    %c0_i32_0 = arith.constant 0 : i32
    %c0_i32_1 = arith.constant 0 : i32
    return %c0_i32, %c0_i32_0 : i32, i32
  }
  func.func @transform_4(%arg0: i32) -> (i32, i32) {
    %c0_i32 = arith.constant 0 : i32
    %c0_i32_0 = arith.constant 0 : i32
    %c0_i32_1 = arith.constant 0 : i32
    return %c0_i32, %c0_i32_0 : i32, i32
  }
  func.func @transform_5(%arg0: i32) -> (i32, i32) {
    %c0_i32 = arith.constant 0 : i32
    %c0_i32_0 = arith.constant 0 : i32
    %c0_i32_1 = arith.constant 0 : i32
    return %c0_i32, %c0_i32_0 : i32, i32
  }
  func.func @transform_6(%arg0: i32) -> (i32, i32) {
    %c0_i32 = arith.constant 0 : i32
    %c0_i32_0 = arith.constant 0 : i32
    %c0_i32_1 = arith.constant 0 : i32
    return %c0_i32, %c0_i32_0 : i32, i32
  }
  func.func @transform_7(%arg0: i32) -> (i32, i32, i32) {
    %c0_i32 = arith.constant 0 : i32
    %c0_i32_0 = arith.constant 0 : i32
    %c0_i32_1 = arith.constant 0 : i32
    %c0_i32_2 = arith.constant 0 : i32
    return %c0_i32, %c0_i32_0, %c0_i32_1 : i32, i32, i32
  }
  func.func @transform_8(%arg0: i32) -> (i32, i32) {
    %c0_i32 = arith.constant 0 : i32
    %c0_i32_0 = arith.constant 0 : i32
    %c0_i32_1 = arith.constant 0 : i32
    return %c0_i32, %c0_i32_0 : i32, i32
  }
  func.func @transform_9(%arg0: i32) -> (i32, i32) {
    %c0_i32 = arith.constant 0 : i32
    %c0_i32_0 = arith.constant 0 : i32
    %c0_i32_1 = arith.constant 0 : i32
    return %c0_i32, %c0_i32_0 : i32, i32
  }
  func.func @transform_10(%arg0: i32) -> (i32, i32) {
    %c0_i32 = arith.constant 0 : i32
    %c0_i32_0 = arith.constant 0 : i32
    %c0_i32_1 = arith.constant 0 : i32
    return %c0_i32, %c0_i32_0 : i32, i32
  }
  func.func @transform_11(%arg0: i32) -> (i32, i32) {
    %c0_i32 = arith.constant 0 : i32
    %c0_i32_0 = arith.constant 0 : i32
    %c0_i32_1 = arith.constant 0 : i32
    return %c0_i32, %c0_i32_0 : i32, i32
  }
  func.func @transform_12(%arg0: i32) -> (i32, i32) {
    %c0_i32 = arith.constant 0 : i32
    %c0_i32_0 = arith.constant 0 : i32
    %c0_i32_1 = arith.constant 0 : i32
    return %c0_i32, %c0_i32_0 : i32, i32
  }
  func.func @transform_13(%arg0: i32) -> (i32, i32, i32) {
    %c0_i32 = arith.constant 0 : i32
    %c0_i32_0 = arith.constant 0 : i32
    %c0_i32_1 = arith.constant 0 : i32
    %c0_i32_2 = arith.constant 0 : i32
    return %c0_i32, %c0_i32_0, %c0_i32_1 : i32, i32, i32
  }
  func.func @transform_14(%arg0: i32) -> (i32, i32) {
    %c0_i32 = arith.constant 0 : i32
    %c0_i32_0 = arith.constant 0 : i32
    %c0_i32_1 = arith.constant 0 : i32
    return %c0_i32, %c0_i32_0 : i32, i32
  }
  func.func @transform_15(%arg0: i32) -> (i32, i32) {
    %c0_i32 = arith.constant 0 : i32
    %c0_i32_0 = arith.constant 0 : i32
    %c0_i32_1 = arith.constant 0 : i32
    return %c0_i32, %c0_i32_0 : i32, i32
  }
  func.func @transform_16(%arg0: i32) -> (i32, i32) {
    %c0_i32 = arith.constant 0 : i32
    %c0_i32_0 = arith.constant 0 : i32
    %c0_i32_1 = arith.constant 0 : i32
    return %c0_i32, %c0_i32_0 : i32, i32
  }
  func.func @transform_17(%arg0: i32) -> (i32, i32) {
    %c0_i32 = arith.constant 0 : i32
    %c0_i32_0 = arith.constant 0 : i32
    %c0_i32_1 = arith.constant 0 : i32
    return %c0_i32, %c0_i32_0 : i32, i32
  }
  func.func @transform_18(%arg0: i32) -> (i32, i32) {
    %c0_i32 = arith.constant 0 : i32
    %c0_i32_0 = arith.constant 0 : i32
    %c0_i32_1 = arith.constant 0 : i32
    return %c0_i32, %c0_i32_0 : i32, i32
  }
  func.func @transform_19(%arg0: i32) -> (i32, i32, i32) {
    %c0_i32 = arith.constant 0 : i32
    %c0_i32_0 = arith.constant 0 : i32
    %c0_i32_1 = arith.constant 0 : i32
    return %arg0, %c0_i32, %c0_i32_0 : i32, i32, i32
  }
}

</mosaic_0001>

<bundles_post_ra>
// kernel: lenet_forward.1
= control target key start
LH: loop header
LB: loop body
LE: loop exit
PB: predicated region body
PF: predicated region fallthrough
CT: control target
= control target key end

     0   :  { %s25083_s0 = inlined_call_operand.vmem [shape: f32[2,28,28], index: 0, kind: input, shape index: {}]   ;;  %s25084_s1 = inlined_call_operand.vmem [shape: f32[5,28,144], index: 1, kind: input, shape index: {}]   ;;  %s25085_s2 = inlined_call_operand.hbm [shape: f32[1,144], index: 2, kind: input, shape index: {}]   ;;  %s25086_s3 = inlined_call_operand.vmem [shape: f32[12,24], index: 3, kind: input, shape index: {}]   ;;  %s25087_s4 = inlined_call_operand.vmem [shape: f32[12,24], index: 4, kind: input, shape index: {}]   ;;  %s25088_s5 = inlined_call_operand.hbm [shape: f32[144,72], index: 5, kind: input, shape index: {}]   ;;  %s25089_s6 = inlined_call_operand.hbm [shape: f32[144,72], index: 6, kind: input, shape index: {}]   ;;  %s25090_s7 = inlined_call_operand.vmem [shape: f32[5,72,96], index: 7, kind: input, shape index: {}]   ;;  %s25091_s8 = inlined_call_operand.hbm [shape: f32[1,96], index: 8, kind: input, shape index: {}]   ;;  %s25092_s9 = inlined_call_operand.hbm [shape: f32[4,8], index: 9, kind: input, shape index: {}]   ;;  %s25093_s10 = inlined_call_operand.hbm [shape: f32[4,8], index: 10, kind: input, shape index: {}]   ;;  %s25094_s11 = inlined_call_operand.vmem [shape: f32[96,48], index: 11, kind: input, shape index: {}]   ;;  %s25095_s12 = inlined_call_operand.vmem [shape: f32[96,48], index: 12, kind: input, shape index: {}]   ;;  %s25096_s13 = inlined_call_operand.hbm [shape: f32[4,48,120], index: 13, kind: input, shape index: {}]   ;;  %s25097_s14 = inlined_call_operand.hbm [shape: f32[1,120], index: 14, kind: input, shape index: {}]   ;;  %s25098_s15 = inlined_call_operand.vmem [shape: f32[120,60], index: 15, kind: input, shape index: {}]   ;;  %s25099_s16 = inlined_call_operand.hbm [shape: f32[1,60], index: 16, kind: input, shape index: {}]   ;;  %s25100_s17 = inlined_call_operand.vmem [shape: f32[60,10], index: 17, kind: input, shape index: {}]   ;;  %s25101_s18 = inlined_call_operand.hbm [shape: f32[1,10], index: 18, kind: input, shape index: {}]   ;;  %s25102_s19 = inlined_call_operand.hbm [shape: f32[2,1,10], index: 19, kind: output, shape index: {}]  }
   0x1   :  { %25293 = sst [smem:[#allocation67_spill]] %s25083_s0 }
   0x2   :  { %25294 = sst [smem:[#allocation68_spill]] %s25084_s1 }
   0x3   :  { %25295 = sst [smem:[#allocation69_spill]] %s25085_s2 }
   0x4   :  { %25296 = sst [smem:[#allocation70_spill]] %s25086_s3 }
   0x5   :  { %25297 = sst [smem:[#allocation71_spill]] %s25088_s5 }
   0x6   :  { %25298 = sst [smem:[#allocation72_spill]] %s25089_s6 }
   0x7   :  { %25299 = sst [smem:[#allocation73_spill]] %s25098_s15 }
   0x8   :  { %25300 = sst [smem:[#allocation74_spill]] %s25100_s17 }
   0x9   :  { %25301 = sst [smem:[#allocation75_spill]] %s25102_s19 }
   0xa   :  { %24 = vsyncpa [#allocation3], 0 }
   0xb   :  { %25 = vsyncpa [#allocation6], 0 }
   0xc   :  { %26 = vsyncpa [#allocation9], 0 }
   0xd   :  { %27 = vsyncpa [#allocation12], 0 }
   0xe   :  { %28 = vsyncpa [#allocation15], 0 }
   0xf   :  { %29 = vsyncpa [#allocation18], 0 }
  0x10   :  { %30 = vsyncpa [#allocation4], 0 }
  0x11   :  { %32 = vsyncpa [#allocation4 + $0x1], 0  ;;  %s20380_s0 = smov 0   ;;  %s20382_s30 = smov 0  }
  0x12   :  { %s20384_s20 = smov 0   ;;  %s20386_s21 = smov 0  }
  0x13 LB: > { %25302 = sst [smem:[#allocation27_spill]] %s20250_s0  ;;  %s20401_s1 = sadd.s32 4294967295, %s20262_s21   ;;  %s20262_s21 = sphi %s20386_s21, %s25535_s21   ;;  %s20258_s20 = sphi %s20384_s20, %s25538_s20   ;;  %s20254_s30 = sphi %s20382_s30, %s25537_s30   ;;  %s20250_s0 = sphi %s20380_s0, %s25536_s0  }
  0x14   : > { %25303 = sst [smem:[#allocation28_spill]] %s20254_s30  ;;  %s15199_s22 = sadd.s32 4294967294, %s20262_s21  }
  0x15   : > { %25304 = sst [smem:[#allocation29_spill]] %s20258_s20  ;;  %s20405_s2 = sadd.s32 1, %s20262_s21  }
  0x16   : > { %25305 = sst [smem:[#allocation30_spill]] %s20262_s21  ;;  %s449_s23 = sadd.s32 1, %s20258_s20 }
  0x17   : > { %25306 = sst [smem:[#allocation31_spill]] %s20405_s2  ;;  %s446_s24 = ssub.s32 %s20262_s21, %s20405_s2 }
  0x18   : > { %p459_p0 = scmp.ne.s32.totalorder %s20258_s20, %s20254_s30  ;;  %p447_p1 = scmp.eq.s32.totalorder %s446_s24, 0 }
  0x19   : > { %p460_p2 = scmp.eq.s32.totalorder %s20401_s1, 1  ;;  %p465_p3 = scmp.ne.s32.totalorder %s20254_s30, %s20250_s0 }
  0x1a   : > { %p466_p4 = scmp.eq.s32.totalorder %s15199_s22, 1  ;;  %p15200_p7 = scmp.ge.s32.totalorder %s20262_s21, 1 }
  0x1b   : > { %s20416_s25 = scalar_select %p447_p1, %s20258_s20, %s449_s23  }
  0x1c   : > { %p20418_p5 = por %p460_p2, %p459_p0  ;;  %p20422_p6 = por %p466_p4, %p465_p3 }
  0x1d   : > { %25307 = sst [smem:[#allocation32_spill]] %s20416_s25  ;;  %p473_p8 = scmp.lt.s32.totalorder %s20262_s21, 3 }
  0x1e   : > { %s25308_s3 = scalar_select %p20418_p5, 1, 0 }
  0x1f   : > { %s25310_s26 = scalar_select %p20422_p6, 1, 0 }
  0x20   : > { %25309 = sst [smem:[#allocation33_spill]] %s25308_s3  ;;  %p25113_p9 = scmp.eq.s32.totalorder %s20401_s1, 0 }
  0x21   : > { %25311 = sst [smem:[#allocation34_spill]] %s25310_s26  ;;  %p20429_p10 = pnand %p15200_p7, %p473_p8 }
  0x22   : > { %s20264_s28 = smov [#allocation5]   ;;  %s20265_s23 = smov [#allocation8]  }
  0x23   : > { %s25312_s27 = scalar_select %p20429_p10, 1, 0 }
  0x24   : > { %s505_s29 = sshll.u32 %s20264_s28, 4  ;;  %p19789_p11 = pneg %p20429_p10  ;;  %s20435_s29 = int_to_ptr.vmem [resolvable:$true] %s505_s29 }
  0x25   : > { %s535_s24 = sshll.u32 %s20265_s23, 4  ;;  %s20266_s25 = smov [#allocation11]   ;;  %s20443_s24 = int_to_ptr.vmem [resolvable:$true] %s535_s24 }
  0x26   : > { %p20439_p12 = pnand %p25113_p9, %p19789_p11  ;;  %s20445_s20 = sshll.u32 %s20266_s25, 4  ;;  %s558_s20 = int_to_ptr.vmem [resolvable:$true] %s20445_s20 }
  0x27   : > { %s25314_s5 = sld [smem:[#allocation71_spill]] }
  0x28   : > { %p20455_p0 = pneg %p20439_p12 }
  0x2d   : > { %s19896_s28 = scalar_lea.hbm %s25314_s5, 2304 }
  0x2e   : > { %p19897_p13 = scmp.ne.s32.totalorder %s25314_s5, %s19896_s28  ;;  %p19903_p3 = scmp.lt.u32.totalorder %s19896_s28, %s25314_s5 }
  0x30   : > { %p19899_p1 = pnand %p20455_p0, %p19897_p13 }
  0x32   : > { %p19900_p2 = pneg %p19899_p1 }
  0x34   : > { %p19905_p4 = pnand %p19903_p3, %p19900_p2 }
  0x36   : > { %19908 = shalt.err (!%p19905_p4)
}
  0x37   : > { %s19909_s0 = scalar_lea.vmem %s20435_s29, 2304  ;;  %p19917_p9 = scmp.lt.s32.totalorder %s20435_s29, %s20435_s29 }
  0x38   : > { %p19910_p7 = scmp.ne.s32.totalorder %s20435_s29, %s19909_s0  ;;  %p19918_p6 = scmp.lt.s32.totalorder %s19909_s0, %s19909_s0 }
  0x3a   : > { %p19912_p8 = pnand %p19910_p7, %p20455_p0  ;;  %p19919_p13 = por %p19918_p6, %p19917_p9 }
  0x3c   : > { %p19913_p11 = pneg %p19912_p8 }
  0x3e   : > { %p19920_p1 = pnand %p19919_p13, %p19913_p11 }
  0x40   : > { %19923 = shalt.err (!%p19920_p1)
}
  0x41   : > { %s25121_s21 = smov 128   ;;  %s25123_s2 = smov 8  }
  0x42   : > { %19795 = dma.hbm_to_vmem [thread:$0]  (!%p20439_p12), %s25314_s5, 2304, %s20435_s29, [#allocation6], %s25121_s21, %s25121_s21, %s25123_s2  }
  0x43   : > { %s19924_s0 = scalar_lea.hbm %s25091_s8, 16 }
  0x44   : > { %p19925_p6 = scmp.ne.s32.totalorder %s25091_s8, %s19924_s0  ;;  %p19931_p3 = scmp.lt.u32.totalorder %s19924_s0, %s25091_s8 }
  0x46   : > { %p19927_p9 = pnand %p19925_p6, %p20455_p0 }
  0x48   : > { %p19928_p2 = pneg %p19927_p9 }
  0x4a   : > { %p19933_p4 = pnand %p19931_p3, %p19928_p2 }
  0x4c   : > { %19936 = shalt.err (!%p19933_p4)
}
  0x4d   : > { %s19937_s29 = scalar_lea.vmem %s20443_s24, 16  ;;  %s19944_s30 = scalar_lea.vmem %s20443_s24, 32 }
  0x4e   : > { %p19938_p7 = scmp.ne.s32.totalorder %s20443_s24, %s19937_s29  ;;  %p19945_p13 = scmp.lt.s32.totalorder %s20443_s24, %s20443_s24 }
  0x4f   : > { %p19946_p1 = scmp.lt.s32.totalorder %s19944_s30, %s19937_s29 }
  0x50   : > { %p19940_p8 = pnand %p19938_p7, %p20455_p0 }
  0x51   : > { %p19947_p6 = por %p19946_p1, %p19945_p13 }
  0x52   : > { %p19941_p11 = pneg %p19940_p8 }
  0x54   : > { %p19948_p9 = pnand %p19947_p6, %p19941_p11 }
  0x56   : > { %19951 = shalt.err (!%p19948_p9)
}
  0x57   : > { %19801 = dma.hbm_to_vmem [thread:$0]  (!%p20439_p12), %s25091_s8, 16, %s20443_s24, [#allocation9]  }
  0x58   : > { %s19952_s28 = scalar_lea.hbm %s25093_s10, 64 }
  0x59   : > { %p19953_p2 = scmp.ne.s32.totalorder %s25093_s10, %s19952_s28  ;;  %p19959_p7 = scmp.lt.u32.totalorder %s19952_s28, %s25093_s10 }
  0x5b   : > { %p19955_p3 = pnand %p19953_p2, %p20455_p0 }
  0x5d   : > { %p19956_p4 = pneg %p19955_p3 }
  0x5f   : > { %p19961_p8 = pnand %p19959_p7, %p19956_p4 }
  0x61   : > { %19964 = shalt.err (!%p19961_p8)
}
  0x62   : > { %s19965_s30 = scalar_lea.vmem %s558_s20, 64  ;;  %p19973_p6 = scmp.lt.s32.totalorder %s558_s20, %s558_s20 }
  0x63   : > { %p19966_p11 = scmp.ne.s32.totalorder %s558_s20, %s19965_s30  ;;  %p19974_p9 = scmp.lt.s32.totalorder %s19965_s30, %s19965_s30 }
  0x65   : > { %p19968_p13 = pnand %p19966_p11, %p20455_p0  ;;  %p19975_p5 = por %p19974_p9, %p19973_p6 }
  0x67   : > { %p19969_p1 = pneg %p19968_p13 }
  0x69   : > { %p19976_p10 = pnand %p19975_p5, %p19969_p1 }
  0x6b   : > { %19979 = shalt.err (!%p19976_p10)
}
  0x6c   : > { %19807 = dma.hbm_to_vmem [thread:$0]  (!%p20439_p12), %s25093_s10, 64, %s558_s20, [#allocation12]  }
  0x6d   : > { %s20269_s17 = smov [#allocation14]   ;;  %s20270_s26 = smov [#allocation2]  }
  0x6e   : > { %s587_s3 = sshll.u32 %s20269_s17, 4  ;;  %s489_s28 = sshll.u32 %s20270_s26, 4  ;;  %s588_s3 = int_to_ptr.vmem [resolvable:$true] %s587_s3  ;;  %s490_s28 = int_to_ptr.vmem [resolvable:$true] %s489_s28 }
  0x6f   : > { %s19980_s0 = scalar_lea.hbm %s25097_s14, 16 }
  0x70   : > { %p19981_p5 = scmp.ne.s32.totalorder %s25097_s14, %s19980_s0  ;;  %p19987_p3 = scmp.lt.u32.totalorder %s19980_s0, %s25097_s14 }
  0x72   : > { %p19983_p10 = pnand %p19981_p5, %p20455_p0 }
  0x74   : > { %p19984_p2 = pneg %p19983_p10 }
  0x76   : > { %p19989_p4 = pnand %p19987_p3, %p19984_p2 }
  0x78   : > { %19992 = shalt.err (!%p19989_p4)
}
  0x79   : > { %s19993_s20 = scalar_lea.vmem %s588_s3, 16  ;;  %s20000_s15 = scalar_lea.vmem %s588_s3, 32 }
  0x7a   : > { %p19994_p7 = scmp.ne.s32.totalorder %s588_s3, %s19993_s20  ;;  %p20001_p13 = scmp.lt.s32.totalorder %s588_s3, %s588_s3 }
  0x7b   : > { %p20002_p1 = scmp.lt.s32.totalorder %s20000_s15, %s19993_s20 }
  0x7c   : > { %p19996_p8 = pnand %p19994_p7, %p20455_p0 }
  0x7d   : > { %p20003_p6 = por %p20002_p1, %p20001_p13 }
  0x7e   : > { %p19997_p11 = pneg %p19996_p8 }
  0x80   : > { %p20004_p9 = pnand %p20003_p6, %p19997_p11 }
  0x82   : > { %20007 = shalt.err (!%p20004_p9)
}
  0x83   : > { %19813 = dma.hbm_to_vmem [thread:$0]  (!%p20439_p12), %s25097_s14, 16, %s588_s3, [#allocation15]  }
  0x84   : > { %s25316_s25 = sld [smem:[#allocation69_spill]] }
  0x8a   : > { %s20008_s0 = scalar_lea.hbm %s25316_s25, 32 }
  0x8b   : > { %p20009_p5 = scmp.ne.s32.totalorder %s25316_s25, %s20008_s0  ;;  %p20015_p3 = scmp.lt.u32.totalorder %s20008_s0, %s25316_s25 }
  0x8d   : > { %p20011_p10 = pnand %p20009_p5, %p20455_p0 }
  0x8f   : > { %p20012_p2 = pneg %p20011_p10 }
  0x91   : > { %p20017_p4 = pnand %p20015_p3, %p20012_p2 }
  0x93   : > { %20020 = shalt.err (!%p20017_p4)
}
  0x94   : > { %s20021_s15 = scalar_lea.vmem %s490_s28, 32  ;;  %p20029_p13 = scmp.lt.s32.totalorder %s490_s28, %s490_s28 }
  0x95   : > { %p20022_p7 = scmp.ne.s32.totalorder %s490_s28, %s20021_s15  ;;  %p20030_p1 = scmp.lt.s32.totalorder %s20021_s15, %s20021_s15 }
  0x97   : > { %p20024_p8 = pnand %p20022_p7, %p20455_p0  ;;  %p20031_p6 = por %p20030_p1, %p20029_p13 }
  0x99   : > { %p20025_p11 = pneg %p20024_p8 }
  0x9b   : > { %p20032_p9 = pnand %p20031_p6, %p20025_p11 }
  0x9d   : > { %20035 = shalt.err (!%p20032_p9)
}
  0x9e   : > { %19792 = dma.hbm_to_vmem [thread:$0]  (!%p20439_p12), %s25316_s25, 32, %s490_s28, [#allocation3]  }
  0x9f   : > { %s20271_s26 = smov [#allocation7]   ;;  %s20272_s23 = smov [#allocation10]  }
  0xa0   : > { %s518_s21 = sshll.u32 %s20271_s26, 4  ;;  %s546_s0 = sshll.u32 %s20272_s23, 4  ;;  %s519_s21 = int_to_ptr.vmem [resolvable:$true] %s518_s21  ;;  %s547_s0 = int_to_ptr.vmem [resolvable:$true] %s546_s0 }
  0xa1   : > { %s25317_s6 = sld [smem:[#allocation72_spill]] }
  0xa7   : > { %s20036_s24 = scalar_lea.hbm %s25317_s6, 2304 }
  0xa8   : > { %p20037_p5 = scmp.ne.s32.totalorder %s25317_s6, %s20036_s24  ;;  %p20043_p3 = scmp.lt.u32.totalorder %s20036_s24, %s25317_s6 }
  0xaa   : > { %p20039_p10 = pnand %p20037_p5, %p20455_p0 }
  0xac   : > { %p20040_p2 = pneg %p20039_p10 }
  0xae   : > { %p20045_p4 = pnand %p20043_p3, %p20040_p2 }
  0xb0   : > { %20048 = shalt.err (!%p20045_p4)
}
  0xb1   : > { %s20049_s28 = scalar_lea.vmem %s519_s21, 2304  ;;  %p20057_p13 = scmp.lt.s32.totalorder %s519_s21, %s519_s21 }
  0xb2   : > { %p20050_p7 = scmp.ne.s32.totalorder %s519_s21, %s20049_s28  ;;  %p20058_p1 = scmp.lt.s32.totalorder %s20049_s28, %s20049_s28 }
  0xb4   : > { %p20052_p8 = pnand %p20050_p7, %p20455_p0  ;;  %p20059_p6 = por %p20058_p1, %p20057_p13 }
  0xb6   : > { %p20053_p11 = pneg %p20052_p8 }
  0xb8   : > { %p20060_p9 = pnand %p20059_p6, %p20053_p11 }
  0xba   : > { %20063 = shalt.err (!%p20060_p9)
}
  0xbb   : > { %s25318_s17 = smov 8   ;;  %s25319_s26 = smov 128  }
  0xbc   : > { %19798 = dma.hbm_to_vmem [thread:$0]  (!%p20439_p12), %s25317_s6, 2304, %s519_s21, [#allocation6], %s25319_s26, %s25319_s26, %s25318_s17  }
  0xbd   : > { %s20064_s24 = scalar_lea.hbm %s25092_s9, 64 }
  0xbe   : > { %p20065_p5 = scmp.ne.s32.totalorder %s25092_s9, %s20064_s24  ;;  %p20071_p3 = scmp.lt.u32.totalorder %s20064_s24, %s25092_s9 }
  0xc0   : > { %p20067_p10 = pnand %p20065_p5, %p20455_p0 }
  0xc2   : > { %p20068_p2 = pneg %p20067_p10 }
  0xc4   : > { %p20073_p4 = pnand %p20071_p3, %p20068_p2 }
  0xc6   : > { %20076 = shalt.err (!%p20073_p4)
}
  0xc7   : > { %s20077_s2 = scalar_lea.vmem %s547_s0, 64  ;;  %p20085_p13 = scmp.lt.s32.totalorder %s547_s0, %s547_s0 }
  0xc8   : > { %p20078_p7 = scmp.ne.s32.totalorder %s547_s0, %s20077_s2  ;;  %p20086_p1 = scmp.lt.s32.totalorder %s20077_s2, %s20077_s2 }
  0xca   : > { %p20080_p8 = pnand %p20078_p7, %p20455_p0  ;;  %p20087_p6 = por %p20086_p1, %p20085_p13 }
  0xcc   : > { %p20081_p11 = pneg %p20080_p8 }
  0xce   : > { %p20088_p9 = pnand %p20087_p6, %p20081_p11 }
  0xd0   : > { %20091 = shalt.err (!%p20088_p9)
}
  0xd1   : > { %19804 = dma.hbm_to_vmem [thread:$0]  (!%p20439_p12), %s25092_s9, 64, %s547_s0, [#allocation9]  }
  0xd2   : > { %s20273_s29 = smov [#allocation13]   ;;  %s20274_s24 = smov [#allocation16]  }
  0xd3   : > { %s573_s30 = sshll.u32 %s20273_s29, 4  ;;  %s601_s20 = sshll.u32 %s20274_s24, 4  ;;  %s574_s30 = int_to_ptr.vmem [resolvable:$true] %s573_s30  ;;  %s602_s20 = int_to_ptr.vmem [resolvable:$true] %s601_s20 }
  0xd4   : > { %s20092_s28 = scalar_lea.hbm %s25096_s13, 3072 }
  0xd5   : > { %p20093_p5 = scmp.ne.s32.totalorder %s25096_s13, %s20092_s28  ;;  %p20099_p3 = scmp.lt.u32.totalorder %s20092_s28, %s25096_s13 }
  0xd7   : > { %p20095_p10 = pnand %p20093_p5, %p20455_p0 }
  0xd9   : > { %p20096_p2 = pneg %p20095_p10 }
  0xdb   : > { %p20101_p4 = pnand %p20099_p3, %p20096_p2 }
  0xdd   : > { %20104 = shalt.err (!%p20101_p4)
}
  0xde   : > { %s20105_s0 = scalar_lea.vmem %s574_s30, 3072  ;;  %p20113_p13 = scmp.lt.s32.totalorder %s574_s30, %s574_s30 }
  0xdf   : > { %p20106_p7 = scmp.ne.s32.totalorder %s574_s30, %s20105_s0  ;;  %p20114_p1 = scmp.lt.s32.totalorder %s20105_s0, %s20105_s0 }
  0xe1   : > { %p20108_p8 = pnand %p20106_p7, %p20455_p0  ;;  %p20115_p6 = por %p20114_p1, %p20113_p13 }
  0xe3   : > { %p20109_p11 = pneg %p20108_p8 }
  0xe5   : > { %p20116_p9 = pnand %p20115_p6, %p20109_p11 }
  0xe7   : > { %20119 = shalt.err (!%p20116_p9)
}
  0xe8   : > { %19810 = dma.hbm_to_vmem [thread:$0]  (!%p20439_p12), %s25096_s13, 3072, %s574_s30, [#allocation12], %s25319_s26, %s25319_s26, %s25318_s17  }
  0xe9   : > { %s20120_s24 = scalar_lea.hbm %s25099_s16, 16 }
  0xea   : > { %p20121_p5 = scmp.ne.s32.totalorder %s25099_s16, %s20120_s24  ;;  %p20127_p3 = scmp.lt.u32.totalorder %s20120_s24, %s25099_s16 }
  0xec   : > { %p20123_p10 = pnand %p20121_p5, %p20455_p0 }
  0xee   : > { %p20124_p2 = pneg %p20123_p10 }
  0xf0   : > { %p20129_p4 = pnand %p20127_p3, %p20124_p2 }
  0xf2   : > { %20132 = shalt.err (!%p20129_p4)
}
  0xf3   : > { %s20133_s21 = scalar_lea.vmem %s602_s20, 16  ;;  %s20140_s17 = scalar_lea.vmem %s602_s20, 32 }
  0xf4   : > { %p20134_p7 = scmp.ne.s32.totalorder %s602_s20, %s20133_s21  ;;  %p20141_p13 = scmp.lt.s32.totalorder %s602_s20, %s602_s20 }
  0xf5   : > { %p20142_p1 = scmp.lt.s32.totalorder %s20140_s17, %s20133_s21 }
  0xf6   : > { %p20136_p8 = pnand %p20134_p7, %p20455_p0 }
  0xf7   : > { %p20143_p6 = por %p20142_p1, %p20141_p13 }
  0xf8   : > { %p20137_p11 = pneg %p20136_p8 }
  0xfa   : > { %p20144_p9 = pnand %p20143_p6, %p20137_p11 }
  0xfc   : > { %20147 = shalt.err (!%p20144_p9)
}
  0xfd   : > { %19816 = dma.hbm_to_vmem [thread:$0]  (!%p20439_p12), %s25099_s16, 16, %s602_s20, [#allocation15]  }
  0xfe   : > { %s20275_s0 = smov [#allocation17]   ;;  %s20148_s29 = scalar_lea.hbm %s25101_s18, 16 }
  0xff   : > { %s615_s5 = sshll.u32 %s20275_s0, 4  ;;  %p20149_p5 = scmp.ne.s32.totalorder %s25101_s18, %s20148_s29  ;;  %s616_s5 = int_to_ptr.vmem [resolvable:$true] %s615_s5 }
 0x100   : > { %p20155_p3 = scmp.lt.u32.totalorder %s20148_s29, %s25101_s18 }
 0x101   : > { %p20151_p10 = pnand %p20149_p5, %p20455_p0 }
 0x103   : > { %p20152_p2 = pneg %p20151_p10 }
 0x105   : > { %p20157_p4 = pnand %p20155_p3, %p20152_p2 }
 0x107   : > { %20160 = shalt.err (!%p20157_p4)
}
 0x108   : > { %s20161_s20 = scalar_lea.vmem %s616_s5, 16  ;;  %s20168_s2 = scalar_lea.vmem %s616_s5, 32 }
 0x109   : > { %p20162_p7 = scmp.ne.s32.totalorder %s616_s5, %s20161_s20  ;;  %p20169_p13 = scmp.lt.s32.totalorder %s616_s5, %s616_s5 }
 0x10a   : > { %p20170_p1 = scmp.lt.s32.totalorder %s20168_s2, %s20161_s20 }
 0x10b   : > { %p20164_p8 = pnand %p20162_p7, %p20455_p0 }
 0x10c   : > { %p20171_p6 = por %p20170_p1, %p20169_p13 }
 0x10d   : > { %p20165_p11 = pneg %p20164_p8 }
 0x10f   : > { %p20172_p9 = pnand %p20171_p6, %p20165_p11 }
 0x111   : > { %20175 = shalt.err (!%p20172_p9)
}
 0x112   : > { %19819 = dma.hbm_to_vmem [thread:$0]  (!%p20439_p12), %s25101_s18, 16, %s616_s5, [#allocation18]  }
 0x113   : > { %p25320_p5 = scmp.ne.s32.totalorder %s25312_s27, 0 }
 0x115   : > { %636 = sbr.rel (%p25320_p5) target bundleno = 4216 (0x1078), region = 96 }
 0x11c   : > { %p25321_p10 = scmp.eq.s32.totalorder %s20401_s1, 0 }
 0x11e   : > { %20221 = dma.done.wait (%p25321_p10), [#allocation3], 32   ;;  %p25322_p0 = pmov %p25321_p10 }
 0x120   : > { %20223 = vsyncadd (%p25322_p0), [#allocation3], 4294967264  ;;  %p25323_p2 = pmov %p25322_p0 }
 0x121   : > { %p25324_p3 = pmov %p25322_p0 }
 0x122   : > { %20225 = dma.done.wait (%p25323_p2), [#allocation6], 4608  }
 0x123   : > { %20227 = vsyncadd (%p25324_p3), [#allocation6], 4294962688  ;;  %p25325_p4 = pmov %p25322_p0 }
 0x124   : > { %p25326_p12 = pmov %p25322_p0 }
 0x125   : > { %20229 = dma.done.wait (%p25325_p4), [#allocation9], 80  }
 0x126   : > { %20231 = vsyncadd (%p25326_p12), [#allocation9], 4294967216  ;;  %p25327_p7 = pmov %p25322_p0 }
 0x127   : > { %p25328_p8 = pmov %p25322_p0 }
 0x128   : > { %20233 = dma.done.wait (%p25327_p7), [#allocation12], 3136  }
 0x129   : > { %20235 = vsyncadd (%p25328_p8), [#allocation12], 4294964160  ;;  %p25329_p11 = pmov %p25322_p0 }
 0x12a   : > { %p25330_p13 = pmov %p25322_p0 }
 0x12b   : > { %20237 = dma.done.wait (%p25329_p11), [#allocation15], 32  }
 0x12c   : > { %20239 = vsyncadd (%p25330_p13), [#allocation15], 4294967264  ;;  %p25331_p1 = pmov %p25322_p0 }
 0x12d   : > { %p25332_p6 = pmov %p25322_p0 }
 0x12e   : > { %20241 = dma.done.wait (%p25331_p1), [#allocation18], 16  }
 0x12f   : > { %20243 = vsyncadd (%p25332_p6), [#allocation18], 4294967280  ;;  %p727_p9 = scmp.lt.s32.totalorder %s20401_s1, 1  ;;  %v25125_v0 = vmov 0.0   ;;  %s25333_s30 = sld [smem:[#allocation68_spill]]  ;;  %vm772_vm0 = vcmask 1043456  }
 0x130   : > { %851 = vmatprep.mubr.f32.mxu0 %v25125_v0  ;;  %4203 = vmatprep.mubr.f32.mxu1 %v25125_v0  ;;  %s25335_s3 = sld [smem:[#allocation67_spill]]  ;;  %vm757_vm1 = vcmask 1046528   ;;  %vm765_vm2 = vcmask 228352   ;;  %vm2082_vm3 = vcmask 1045504   ;;  %vm2758_vm4 = vcmask 1044480   ;;  %s25336_s23 = sld [smem:[#allocation70_spill]] }
 0x131   : > { %s728_s19 = scalar_select %p727_p9, %s20401_s1, 1  ;;  %vm4126_vm5 = vcmask 195584   ;;  %vm5295_vm6 = vcmask 130048   ;;  %vm20278_vm7 = vmmov 0   ;;  %vm6818_vm8 = vcmask 588800  }
 0x132   : > { %vm9631_vm9 = vcmask 64512   ;;  %vm10544_vm10 = vcmask 785408   ;;  %vm11746_vm11 = vcmask 392192   ;;  %s25524_s15 = sld [smem:[#allocation73_spill]]  ;;  %vm13845_vm12 = vcmask 982016   ;;  %s25526_s20 = sld [smem:[#allocation28_spill]] }
 0x133   : > { %s15297_s27 = sshll.u32 %s728_s19, 5  ;;  %vm14487_vm13 = vcmask 490496   ;;  %s25527_s2 = sld [smem:[#allocation33_spill]]  ;;  %vm15031_vm14 = vcmask 73728  }
 0x134   : > { %s15294_s17 = sshll.u32 %s20401_s1, 4  ;;  %s20279_s1 = smov [#allocation19]  }
 0x135   : > { %s25334_s5 = smov %s25333_s30  ;;  %v15226_v1 = vld [vmem:[%s25333_s30 + $0x48] sm:$0xff]  ;;  %s25528_s30 = sld [smem:[#allocation75_spill]] }
 0x136   : > { %v15228_v2 = vld [vmem:[%s25334_s5 + $0x58] sm:$0xff]  ;;  %v15225_v3 = vld [vmem:[%s25334_s5 + $0x40] sm:$0xff]  ;;  %s20696_s28 = scalar_lea.vmem %s25335_s3, %s15297_s27  ;;  %v779_v4 = vand.u32 4294901760, %v15226_v1  ;;  %v15227_v6 = vld [vmem:[%s25334_s5 + $0x50] sm:$0xff]  ;;  %s25525_s3 = sld [smem:[#allocation74_spill]] }
 0x137   : > { %v783_v5 = vand.u32 4294901760, %v15228_v2  ;;  %v781_v7 = vand.u32 4294901760, %v15225_v3  ;;  %v15230_v8 = vld [vmem:[%s25334_s5 + $0x68] sm:$0xff]  ;;  %v15229_v9 = vld [vmem:[%s25334_s5 + $0x60] sm:$0xff]  ;;  %v785_v10 = vand.u32 4294901760, %v15227_v6  ;;  %v20728_v20 = vld [vmem:[%s20696_s28 + $0x10] sm:$0xff] }
 0x138   : > { %v15232_v11 = vld [vmem:[%s25334_s5 + $0x78] sm:$0xf]  ;;  %v787_v12 = vand.u32 4294901760, %v15230_v8  ;;  %v15231_v13 = vld [vmem:[%s25334_s5 + $0x70] sm:$0xf]  ;;  %v20715_v15 = vsub.f32 %v15226_v1, %v779_v4  ;;  %v20722_v18 = vld [vmem:[%s20696_s28] sm:$0xff] }
 0x139   : > { %v20713_v14 = vpack.c.bf16 %v783_v5, %v779_v4  ;;  %v20717_v16 = vsub.f32 %v15228_v2, %v783_v5  ;;  %v20719_v17 = vsub.f32 %v15225_v3, %v781_v7  ;;  %v20725_v19 = vld [vmem:[%s20696_s28 + $0x8] sm:$0xff]  ;;  %v20730_v21 = vpack.c.bf16 %v785_v10, %v781_v7  ;;  %v20758_v41 = vld [vmem:[%s20696_s28 + $0x18] sm:$0xf]  ;;  %s725_s21 = sand.u32 1, %s25526_s20   ;;  %p25530_p10 = scmp.ne.s32.totalorder %s25527_s2, 0 }
 0x13a   : > { %v20732_v22 = vsub.f32 %v15227_v6, %v785_v10  ;;  %v777_v23 = vsel %vm772_vm0, %v15232_v11, 0  ;;  %v20735_v24 = vsub.f32 %v15230_v8, %v787_v12  ;;  %v774_v26 = vsel %vm772_vm0, %v15231_v13, 0  ;;  %s726_s19 = scalar_lea.vmem [#allocation19], %s725_s21  ;;  %s15034_s6 = scalar_lea.sflag [#allocation4], %s725_s21 }
 0x13b   : > { %17783 = vmatprep.subr.bf16.mxu0 %v20713_v14  ;;  %v791_v25 = vand.u32 4294901760, %v777_v23  ;;  %v789_v27 = vand.u32 4294901760, %v15229_v9  ;;  %v758_v28 = vrot.slane %v20722_v18, 1  ;;  %v793_v29 = vand.u32 4294901760, %v774_v26  ;;  %s15046_s22 = sshll.u32 %s726_s19, 4  ;;  %s25041_s0 = scalar_lea.hbm %s25528_s30, %s15294_s17  ;;  %s25043_s22 = int_to_ptr.vmem [resolvable:$true] %s15046_s22 }
 0x13c   : > { %17785 = vmatpush1.bf16.msra.mxu0 %v20730_v21  ;;  %v759_v30 = vrot.slane %v20725_v19, 1  ;;  %v761_v31 = vrot.slane %v20728_v20, 1  ;;  %v887_v32 = vand.u32 4294901760, %v20715_v15  ;;  %v899_v36 = vand.u32 4294901760, %v20717_v16  ;;  %s20176_s29 = scalar_lea.vmem %s25043_s22, 16  ;;  %s20180_s24 = sshll.u32 %s20279_s1, 4  ;;  %s20181_s24 = int_to_ptr.vmem [resolvable:$false] %s20180_s24 }
 0x13d   : > { %v20744_v33 = vpack.c.bf16 %v791_v25, %v787_v12  ;;  %v20746_v34 = vsub.f32 %v777_v23, %v791_v25  ;;  %v20748_v35 = vsub.f32 %v15229_v9, %v789_v27  ;;  %v20751_v37 = vpack.c.bf16 %v793_v29, %v789_v27  ;;  %p20177_p5 = scmp.ne.s32.totalorder %s25043_s22, %s20176_s29  ;;  %s20182_s20 = scalar_lea.vmem %s20181_s24, 32 }
 0x13e   : > { %v20753_v38 = vsub.f32 %v774_v26, %v793_v29  ;;  %v760_v39 = vsel %vm757_vm1, %v758_v28, %v759_v30  ;;  %v762_v40 = vsel %vm757_vm1, %v759_v30, %v761_v31  ;;  %v888_v44 = vsub.f32 %v20715_v15, %v887_v32  ;;  %p20183_p3 = scmp.lt.s32.totalorder %s25043_s22, %s20181_s24  ;;  %p20184_p4 = scmp.lt.s32.totalorder %s20182_s20, %s20176_s29 }
 0x13f   : > { %17787 = vmatprep.subr.bf16.mxu0 %v20744_v33  ;;  %v766_v42 = vsel %vm765_vm2, %v760_v39, 0  ;;  %v768_v43 = vsel %vm765_vm2, %v762_v40, 0  ;;  %v900_v45 = vsub.f32 %v20717_v16, %v899_v36  ;;  %v893_v48 = vand.u32 4294901760, %v20719_v17  ;;  %p20178_p0 = pnand %p20177_p5, %p25530_p10 }
 0x140   : > { %17789 = vmatpush1.bf16.msra.mxu0 %v20751_v37  ;;  %v20770_v46 = vand.u32 4294901760, %v766_v42  ;;  %v20772_v47 = vand.u32 4294901760, %v768_v43  ;;  %v905_v49 = vand.u32 4294901760, %v20732_v22  ;;  %v889_v50 = vand.u32 4294901760, %v888_v44  ;;  %p20185_p12 = por %p20184_p4, %p20183_p3 }
 0x141   : > { %v901_v51 = vand.u32 4294901760, %v900_v45  ;;  %v763_v52 = vrot.slane %v20758_v41, 1  ;;  %v911_v53 = vand.u32 4294901760, %v20735_v24  ;;  %v894_v56 = vsub.f32 %v20719_v17, %v893_v48  ;;  %p20179_p2 = pneg %p20178_p0 }
 0x142   : > { %v20779_v54 = vsub.f32 %v766_v42, %v20770_v46  ;;  %v20782_v55 = vsub.f32 %v768_v43, %v20772_v47  ;;  %v906_v57 = vsub.f32 %v20732_v22, %v905_v49  ;;  %v923_v61 = vand.u32 4294901760, %v20746_v34 }
 0x143   : > { %v17790_v58 = vpack.c.bf16 %v901_v51, %v889_v50  ;;  %v764_v59 = vsel %vm757_vm1, %v761_v31, %v763_v52  ;;  %v912_v60 = vsub.f32 %v20735_v24, %v911_v53  ;;  %v895_v1 = vand.u32 4294901760, %v894_v56  ;;  %v741_v51 = vld [vmem:[%s25334_s5 + $0x28] sm:$0xff]  ;;  %p20186_p7 = pnand %p20185_p12, %p20179_p2 }
 0x144   : > { %v854_v62 = vand.u32 4294901760, %v20779_v54  ;;  %v865_v63 = vand.u32 4294901760, %v20782_v55  ;;  %v907_v2 = vand.u32 4294901760, %v906_v57  ;;  %v770_v3 = vsel %vm765_vm2, %v764_v59, 0 }
 0x145   : > { %17791 = vmatprep.subr.bf16.mxu0 %v17790_v58  ;;  %v913_v4 = vand.u32 4294901760, %v912_v60  ;;  %v924_v5 = vsub.f32 %v20746_v34, %v923_v61  ;;  %v917_v6 = vand.u32 4294901760, %v20748_v35  ;;  %v20808_v9 = vand.u32 4294901760, %v770_v3  ;;  %v740_v60 = vld [vmem:[%s25334_s5 + $0x20] sm:$0xff] }
 0x146   : > { %v855_v7 = vsub.f32 %v20779_v54, %v854_v62  ;;  %v866_v8 = vsub.f32 %v20782_v55, %v865_v63  ;;  %v17792_v10 = vpack.c.bf16 %v907_v2, %v895_v1  ;;  %v929_v13 = vand.u32 4294901760, %v20753_v38 }
 0x147   : > { %v925_v11 = vand.u32 4294901760, %v924_v5  ;;  %v918_v12 = vsub.f32 %v20748_v35, %v917_v6  ;;  %v875_v25 = vsub.f32 %v770_v3, %v20808_v9  ;;  %v17798_v40 = vpack.c.bf16 %v20717_v16, %v20715_v15 }
 0x148   : > { %v856_v23 = vand.u32 4294901760, %v855_v7  ;;  %v930_v28 = vsub.f32 %v20753_v38, %v929_v13  ;;  %v867_v29 = vand.u32 4294901760, %v866_v8  ;;  %v17800_v44 = vpack.c.bf16 %v20732_v22, %v20719_v17  ;;  %v737_v17 = vld [vmem:[%s25334_s5 + $0x8] sm:$0xff]  ;;  %v739_v22 = vld [vmem:[%s25334_s5 + $0x18] sm:$0xff] }
 0x149   : > { %v17794_v26 = vpack.c.bf16 %v925_v11, %v913_v4  ;;  %v919_v27 = vand.u32 4294901760, %v918_v12  ;;  %v876_v30 = vand.u32 4294901760, %v875_v25  ;;  %v17802_v45 = vpack.c.bf16 %v20746_v34, %v20735_v24 }
 0x14a   : > { %857 = vmatmul.mubr.f32.vlgmr.msra.gmra.mrb[0].mxu0 %v856_v23  ;;  %v931_v31 = vand.u32 4294901760, %v930_v28  ;;  %v17804_v50 = vpack.c.bf16 %v20753_v38, %v20748_v35  ;;  %v17814_v35 = vpack.c.bf16 %v899_v36, %v887_v32  ;;  %v17816_v38 = vpack.c.bf16 %v905_v49, %v893_v48  ;;  %v743_v48 = vld [vmem:[%s25334_s5 + $0x38] sm:$0xf]  ;;  %v736_v49 = vld [vmem:[%s25334_s5] sm:$0xff] }
 0x14b   : > { %862 = vmatprep.mubr.f32.mxu0 %v25125_v0  ;;  %17793 = vmatpush1.bf16.msra.mxu0 %v17792_v10  ;;  %v877_v39 = vsub.f32 %v875_v25, %v876_v30  ;;  %v17818_v15 = vpack.c.bf16 %v923_v61, %v911_v53  ;;  %v17820_v16 = vpack.c.bf16 %v929_v13, %v917_v6  ;;  %v1432_v24 = vand.u32 4294901760, %v737_v17  ;;  %v742_v53 = vld [vmem:[%s25334_s5 + $0x30] sm:$0xf] }
 0x14c   : > { %17795 = vmatprep.subr.bf16.mxu0 %v17794_v26  ;;  %v17796_v42 = vpack.c.bf16 %v931_v31, %v919_v27  ;;  %v1436_v32 = vand.u32 4294901760, %v739_v22  ;;  %v1430_v52 = vsel %vm772_vm0, %v743_v48, 0  ;;  %v1434_v58 = vand.u32 4294901760, %v736_v49 }
 0x14d   : > { %v878_v43 = vand.u32 4294901760, %v877_v39  ;;  %v20866_v34 = vsub.f32 %v737_v17, %v1432_v24  ;;  %v1444_v61 = vand.u32 4294901760, %v1430_v52  ;;  %v1422_v3 = vsel %vm765_vm2, %v20725_v19, 0 }
 0x14e   : > { %868 = vmatmul.mubr.f32.gmra.mrb[2].mxu0 %v867_v29  ;;  %v20868_v36 = vsub.f32 %v739_v22, %v1436_v32  ;;  %v1442_v5 = vand.u32 4294901760, %v740_v60  ;;  %v20932_v13 = vand.u32 4294901760, %v1422_v3  ;;  %v1424_v27 = vsel %vm765_vm2, %v20728_v20, 0 }
 0x14f   : > { %873 = vmatprep.mubr.f32.mxu0 %v25125_v0  ;;  %17797 = vmatpush1.bf16.msra.mxu0 %v17796_v42  ;;  %v1540_v56 = vand.u32 4294901760, %v20866_v34  ;;  %v20914_v4 = vsub.f32 %v1430_v52, %v1444_v61 }
 0x150   : > { %17799 = vmatprep.subr.bf16.mxu0 %v17798_v40  ;;  %v1552_v57 = vand.u32 4294901760, %v20868_v36  ;;  %v20927_v11 = vsub.f32 %v740_v60, %v1442_v5  ;;  %v20948_v42 = vsub.f32 %v1422_v3, %v20932_v13 }
 0x151   : > { %v1541_v6 = vsub.f32 %v20866_v34, %v1540_v56  ;;  %v1576_v31 = vand.u32 4294901760, %v20914_v4 }
 0x152   : > { %879 = vmatmul.mubr.f32.gmra.mrb[4].mxu0 %v878_v43  ;;  %v20950_v43 = vand.u32 4294901760, %v1424_v27  ;;  %v1518_v17 = vand.u32 4294901760, %v20948_v42 }
 0x153   : > { %989 = vmatprep.mubr.f32.mxu0 %v25125_v0  ;;  %v1542_v28 = vand.u32 4294901760, %v1541_v6 }
 0x154   : > { %v20975_v22 = vsub.f32 %v1424_v27, %v20950_v43  ;;  %v1519_v52 = vsub.f32 %v20948_v42, %v1518_v17 }
 0x156   : > { %991 = vmatmul.mubr.f32.vlgmr.msra.gmra.mrb[0].mxu0 %v20770_v46  ;;  %v1520_v60 = vand.u32 4294901760, %v1519_v52 }
 0x157   : > { %996 = vmatprep.mubr.f32.mxu0 %v25125_v0  ;;  %17801 = vmatpush1.bf16.msra.mxu0 %v17800_v44 }
 0x158   : > { %17803 = vmatprep.subr.bf16.mxu0 %v17802_v45  ;;  %v1570_v45 = vand.u32 4294901760, %v20927_v11 }
 0x15a   : > { %998 = vmatmul.mubr.f32.gmra.mrb[2].mxu0 %v20772_v47  ;;  %v1571_v48 = vsub.f32 %v20927_v11, %v1570_v45 }
 0x15b   : > { %1003 = vmatprep.mubr.f32.mxu0 %v25125_v0  ;;  %17805 = vmatpush1.bf16.msra.mxu0 %v17804_v50 }
 0x15c   : > { %17807 = vmatprep.subr.bf16.mxu0 %v20713_v14 }
 0x15e   : > { %1005 = vmatmul.mubr.f32.gmra.mrb[4].mxu0 %v20808_v9 }
 0x15f   : > { %1091 = vmatprep.mubr.f32.mxu0 %v25125_v0 }
 0x162   : > { %1094 = vmatmul.mubr.f32.vlgmr.msra.gmra.mrb[0].mxu0 %v20779_v54  ;;  %v1420_v54 = vsel %vm765_vm2, %v20722_v18, 0 }
 0x163   : > { %1099 = vmatprep.mubr.f32.mxu0 %v25125_v0  ;;  %17809 = vmatpush1.bf16.msra.mxu0 %v20730_v21 }
 0x164   : > { %17811 = vmatprep.subr.bf16.mxu0 %v20744_v33 }
 0x166   : > { %1102 = vmatmul.mubr.f32.gmra.mrb[2].mxu0 %v20782_v55  ;;  %v20892_v55 = vpack.c.bf16 %v1436_v32, %v1432_v24 }
 0x167   : > { %1107 = vmatprep.mubr.f32.mxu0 %v25125_v0  ;;  %17813 = vmatpush1.bf16.msra.mxu0 %v20751_v37 }
 0x168   : > { %17815 = vmatprep.subr.bf16.mxu0 %v17814_v35 }
 0x16a   : > { %1110 = vmatmul.mubr.f32.gmra.mrb[4].mxu0 %v875_v25 }
 0x16b   : > { %1188 = vmatprep.mubr.f32.mxu0 %v25125_v0 }
 0x16e   : > { %1192 = vmatmul.mubr.f32.vlgmr.msra.gmra.mrb[0].mxu0 %v854_v62  ;;  %v1427_v62 = vsel %vm772_vm0, %v742_v53, 0  ;;  %v1529_v53 = vand.u32 4294901760, %v20975_v22 }
 0x16f   : > { %1197 = vmatprep.mubr.f32.mxu0 %v25125_v0  ;;  %17817 = vmatpush1.bf16.msra.mxu0 %v17816_v38  ;;  %v1446_v8 = vand.u32 4294901760, %v1427_v62 }
 0x170   : > { %17819 = vmatprep.subr.bf16.mxu0 %v17818_v15  ;;  %v1577_v15 = vsub.f32 %v20914_v4, %v1576_v31 }
 0x171   : > { %v20935_v23 = vsub.f32 %v1427_v62, %v1446_v8  ;;  %v20944_v39 = vpack.c.bf16 %v1446_v8, %v1442_v5  ;;  %v17846_v62 = vpack.c.bf16 %v20868_v36, %v20866_v34  ;;  %v17862_v8 = vpack.c.bf16 %v1552_v57, %v1540_v56  ;;  %v15234_v56 = vld [vmem:[%s25334_s5 + $0x88] sm:$0xff] }
 0x172   : > { %1201 = vmatmul.mubr.f32.gmra.mrb[2].mxu0 %v865_v63  ;;  %v20901_v63 = vand.u32 4294901760, %v1420_v54 }
 0x173   : > { %1206 = vmatprep.mubr.f32.mxu0 %v25125_v0  ;;  %17821 = vmatpush1.bf16.msra.mxu0 %v17820_v16  ;;  %v1582_v50 = vand.u32 4294901760, %v20935_v23 }
 0x174   : > { %17823 = vmatprep.subr.bf16.mxu0 %v20713_v14  ;;  %v738_v14 = vld [vmem:[%s25334_s5 + $0x10] sm:$0xff]  ;;  %v20930_v12 = vsub.f32 %v1420_v54, %v20901_v63 }
 0x175   : > { %v1438_v59 = vand.u32 4294901760, %v738_v14 }
 0x176   : > { %1210 = vmatmul.mubr.f32.gmra.mrb[4].mxu0 %v876_v30  ;;  %v1507_v40 = vand.u32 4294901760, %v20930_v12 }
 0x177   : > { %1304 = vmatprep.mubr.f32.mxu0 %v25125_v0  ;;  %v20907_v1 = vsub.f32 %v738_v14, %v1438_v59  ;;  %v20922_v7 = vpack.c.bf16 %v1438_v59, %v1434_v58  ;;  %v1578_v14 = vand.u32 4294901760, %v1577_v15 }
 0x178   : > { %v1508_v16 = vsub.f32 %v20930_v12, %v1507_v40 }
 0x179   : > { %v1558_v26 = vand.u32 4294901760, %v20907_v1 }
 0x17a   : > { %1306 = vmatmul.mubr.f32.vlgmr.msra.gmra.mrb[0].mxu0 %v20770_v46 }
 0x17b   : > { %1311 = vmatprep.mubr.f32.mxu0 %v25125_v0  ;;  %17825 = vmatpush1.bf16.msra.mxu0 %v20730_v21  ;;  %v1440_v21 = vand.u32 4294901760, %v741_v51 }
 0x17c   : > { %17827 = vmatprep.subr.bf16.mxu0 %v20744_v33  ;;  %v20905_v33 = vsub.f32 %v736_v49, %v1434_v58  ;;  %v1572_v58 = vand.u32 4294901760, %v1571_v48 }
 0x17d   : > { %v20909_v2 = vsub.f32 %v741_v51, %v1440_v21  ;;  %v20925_v10 = vpack.c.bf16 %v1444_v61, %v1440_v21  ;;  %v1509_v51 = vand.u32 4294901760, %v1508_v16  ;;  %v1530_v61 = vsub.f32 %v20975_v22, %v1529_v53 }
 0x17e   : > { %1313 = vmatmul.mubr.f32.gmra.mrb[2].mxu0 %v20772_v47  ;;  %v1546_v25 = vand.u32 4294901760, %v20905_v33  ;;  %v17848_v5 = vpack.c.bf16 %v20907_v1, %v20905_v33 }
 0x17f   : > { %1318 = vmatprep.mubr.f32.mxu0 %v25125_v0  ;;  %17829 = vmatpush1.bf16.msra.mxu0 %v20751_v37  ;;  %v1553_v37 = vsub.f32 %v20868_v36, %v1552_v57  ;;  %v1564_v30 = vand.u32 4294901760, %v20909_v2  ;;  %v1531_v3 = vand.u32 4294901760, %v1530_v61  ;;  %v17850_v6 = vpack.c.bf16 %v20914_v4, %v20909_v2  ;;  %v15236_v57 = vld [vmem:[%s25334_s5 + $0x98] sm:$0xff] }
 0x180   : > { %17831 = vmatprep.subr.bf16.mxu0 %v20892_v55  ;;  %v1547_v44 = vsub.f32 %v20905_v33, %v1546_v25  ;;  %v17864_v27 = vpack.c.bf16 %v1558_v26, %v1546_v25  ;;  %v17868_v36 = vpack.c.bf16 %v1582_v50, %v1570_v45  ;;  %v2083_v33 = vrot.slane %v20722_v18, 2 }
 0x181   : > { %v1554_v29 = vand.u32 4294901760, %v1553_v37  ;;  %v1565_v38 = vsub.f32 %v20909_v2, %v1564_v30  ;;  %v17852_v37 = vpack.c.bf16 %v20935_v23, %v20927_v11  ;;  %v17866_v34 = vpack.c.bf16 %v1576_v31, %v1564_v30 }
 0x182   : > { %1320 = vmatmul.mubr.f32.gmra.mrb[4].mxu0 %v20808_v9  ;;  %v1548_v24 = vand.u32 4294901760, %v1547_v44  ;;  %v2102_v2 = vand.u32 4294901760, %v15234_v56  ;;  %v2106_v4 = vand.u32 4294901760, %v15236_v57 }
 0x183   : > { %1398 = vmatprep.mubr.f32.mxu0 %v25125_v0  ;;  %v17838_v35 = vpack.c.bf16 %v1554_v29, %v1542_v28  ;;  %v1566_v49 = vand.u32 4294901760, %v1565_v38  ;;  %v15235_v28 = vld [vmem:[%s25334_s5 + $0x90] sm:$0xff]  ;;  %v15238_v29 = vld [vmem:[%s25334_s5 + $0xa8] sm:$0xff] }
 0x184   : > { %v21051_v11 = vsub.f32 %v15234_v56, %v2102_v2  ;;  %v21072_v30 = vpack.c.bf16 %v2106_v4, %v2102_v2  ;;  %v2108_v38 = vand.u32 4294901760, %v15235_v28  ;;  %v2110_v15 = vand.u32 4294901760, %v15238_v29 }
 0x185   : > { %v17842_v21 = vpack.c.bf16 %v1578_v14, %v1566_v49 }
 0x186   : > { %1400 = vmatmul.mubr.f32.vlgmr.msra.gmra.mrb[0].mxu0 %v20770_v46  ;;  %v1559_v46 = vsub.f32 %v20907_v1, %v1558_v26  ;;  %v2084_v1 = vrot.slane %v20725_v19, 2  ;;  %v2086_v26 = vrot.slane %v20728_v20, 2 }
 0x187   : > { %1405 = vmatprep.mubr.f32.mxu0 %v25125_v0  ;;  %17833 = vmatpush1.bf16.msra.mxu0 %v20922_v7 }
 0x188   : > { %17835 = vmatprep.subr.bf16.mxu0 %v20925_v10  ;;  %v1560_v32 = vand.u32 4294901760, %v1559_v46  ;;  %v2085_v25 = vsel %vm2082_vm3, %v2083_v33, %v2084_v1  ;;  %v15237_v46 = vld [vmem:[%s25334_s5 + $0xa0] sm:$0xff]  ;;  %v2087_v45 = vsel %vm2082_vm3, %v2084_v1, %v2086_v26 }
 0x189   : > { %v2090_v44 = vsel %vm765_vm2, %v2085_v25, 0  ;;  %v2112_v48 = vand.u32 4294901760, %v15237_v46 }
 0x18a   : > { %1407 = vmatmul.mubr.f32.gmra.mrb[2].mxu0 %v20772_v47  ;;  %v1583_v47 = vsub.f32 %v20935_v23, %v1582_v50  ;;  %v17840_v54 = vpack.c.bf16 %v1560_v32, %v1548_v24  ;;  %v15233_v23 = vld [vmem:[%s25334_s5 + $0x80] sm:$0xff]  ;;  %v21095_v24 = vsub.f32 %v15235_v28, %v2108_v38  ;;  %v21097_v32 = vsub.f32 %v15238_v29, %v2110_v15 }
 0x18b   : > { %1412 = vmatprep.mubr.f32.mxu0 %v25125_v0  ;;  %17837 = vmatpush1.bf16.msra.mxu0 %v20944_v39  ;;  %v2104_v31 = vand.u32 4294901760, %v15233_v23 }
 0x18c   : > { %17839 = vmatprep.subr.bf16.mxu0 %v17838_v35  ;;  %v1584_v59 = vand.u32 4294901760, %v1583_v47  ;;  %v2088_v35 = vrot.slane %v20758_v41, 2  ;;  %v2092_v47 = vsel %vm765_vm2, %v2087_v45, 0 }
 0x18d   : > { %v21088_v16 = vsub.f32 %v15233_v23, %v2104_v31  ;;  %v21110_v52 = vpack.c.bf16 %v2108_v38, %v2104_v31 }
 0x18e   : > { %1414 = vmatmul.mubr.f32.gmra.mrb[4].mxu0 %v20808_v9  ;;  %v17844_v9 = vpack.c.bf16 %v1584_v59, %v1572_v58  ;;  %v21115_v58 = vsub.f32 %v15237_v46, %v2112_v48 }
 0x18f   : > { %1504 = vmatprep.mubr.f32.mxu0 %v25125_v0  ;;  %v2216_v61 = vand.u32 4294901760, %v21088_v16 }
 0x191   : > { %v2217_v56 = vsub.f32 %v21088_v16, %v2216_v61 }
 0x192   : > { %1510 = vmatmul.mubr.f32.vlgmr.msra.gmra.mrb[0].mxu0 %v1509_v51 }
 0x193   : > { %1515 = vmatprep.mubr.f32.mxu0 %v25125_v0  ;;  %17841 = vmatpush1.bf16.msra.mxu0 %v17840_v54 }
 0x194   : > { %17843 = vmatprep.subr.bf16.mxu0 %v17842_v21  ;;  %v21120_v21 = vand.u32 4294901760, %v2092_v47 }
 0x196   : > { %1521 = vmatmul.mubr.f32.gmra.mrb[2].mxu0 %v1520_v60 }
 0x197   : > { %1526 = vmatprep.mubr.f32.mxu0 %v25125_v0  ;;  %17845 = vmatpush1.bf16.msra.mxu0 %v17844_v9  ;;  %v2228_v9 = vand.u32 4294901760, %v21095_v24 }
 0x198   : > { %17847 = vmatprep.subr.bf16.mxu0 %v17846_v62 }
 0x19a   : > { %1532 = vmatmul.mubr.f32.gmra.mrb[4].mxu0 %v1531_v3 }
 0x19b   : > { %1642 = vmatprep.mubr.f32.mxu0 %v25125_v0 }
 0x19e   : > { %1644 = vmatmul.mubr.f32.vlgmr.msra.gmra.mrb[0].mxu0 %v20901_v63 }
 0x19f   : > { %1649 = vmatprep.mubr.f32.mxu0 %v25125_v0  ;;  %17849 = vmatpush1.bf16.msra.mxu0 %v17848_v5 }
 0x1a0   : > { %17851 = vmatprep.subr.bf16.mxu0 %v17850_v6  ;;  %v2234_v6 = vand.u32 4294901760, %v21097_v32 }
 0x1a2   : > { %1651 = vmatmul.mubr.f32.gmra.mrb[2].mxu0 %v20932_v13  ;;  %v2235_v2 = vsub.f32 %v21097_v32, %v2234_v6 }
 0x1a3   : > { %1656 = vmatprep.mubr.f32.mxu0 %v25125_v0  ;;  %17853 = vmatpush1.bf16.msra.mxu0 %v17852_v37 }
 0x1a4   : > { %17855 = vmatprep.subr.bf16.mxu0 %v20892_v55  ;;  %v2236_v31 = vand.u32 4294901760, %v2235_v2 }
 0x1a6   : > { %1658 = vmatmul.mubr.f32.gmra.mrb[4].mxu0 %v20950_v43 }
 0x1a7   : > { %1744 = vmatprep.mubr.f32.mxu0 %v25125_v0 }
 0x1aa   : > { %1747 = vmatmul.mubr.f32.vlgmr.msra.gmra.mrb[0].mxu0 %v20930_v12  ;;  %v21053_v12 = vsub.f32 %v15236_v57, %v2106_v4  ;;  %v2240_v57 = vand.u32 4294901760, %v21115_v58 }
 0x1ab   : > { %1752 = vmatprep.mubr.f32.mxu0 %v25125_v0  ;;  %17857 = vmatpush1.bf16.msra.mxu0 %v20922_v7 }
 0x1ac   : > { %17859 = vmatprep.subr.bf16.mxu0 %v20925_v10  ;;  %v2222_v50 = vand.u32 4294901760, %v21053_v12  ;;  %v2241_v29 = vsub.f32 %v21115_v58, %v2240_v57 }
 0x1ae   : > { %1755 = vmatmul.mubr.f32.gmra.mrb[2].mxu0 %v20948_v42  ;;  %v15239_v42 = vld [vmem:[%s25334_s5 + $0xb0] sm:$0xf]  ;;  %v2223_v51 = vsub.f32 %v21053_v12, %v2222_v50 }
 0x1af   : > { %1760 = vmatprep.mubr.f32.mxu0 %v25125_v0  ;;  %17861 = vmatpush1.bf16.msra.mxu0 %v20944_v39 }
 0x1b0   : > { %17863 = vmatprep.subr.bf16.mxu0 %v17862_v8  ;;  %v2224_v5 = vand.u32 4294901760, %v2223_v51 }
 0x1b2   : > { %1763 = vmatmul.mubr.f32.gmra.mrb[4].mxu0 %v20975_v22  ;;  %v21091_v22 = vand.u32 4294901760, %v2090_v44 }
 0x1b3   : > { %1841 = vmatprep.mubr.f32.mxu0 %v25125_v0 }
 0x1b4   : > { %v21118_v59 = vsub.f32 %v2090_v44, %v21091_v22 }
 0x1b6   : > { %1845 = vmatmul.mubr.f32.vlgmr.msra.gmra.mrb[0].mxu0 %v1507_v40 }
 0x1b7   : > { %1850 = vmatprep.mubr.f32.mxu0 %v25125_v0  ;;  %17865 = vmatpush1.bf16.msra.mxu0 %v17864_v27  ;;  %v2177_v27 = vand.u32 4294901760, %v21118_v59 }
 0x1b8   : > { %17867 = vmatprep.subr.bf16.mxu0 %v17866_v34  ;;  %v21135_v34 = vsub.f32 %v2092_v47, %v21120_v21 }
 0x1b9   : > { %v2178_v23 = vsub.f32 %v21118_v59, %v2177_v27 }
 0x1ba   : > { %1854 = vmatmul.mubr.f32.gmra.mrb[2].mxu0 %v1518_v17 }
 0x1bb   : > { %1859 = vmatprep.mubr.f32.mxu0 %v25125_v0  ;;  %17869 = vmatpush1.bf16.msra.mxu0 %v17868_v36 }
 0x1bc   : > { %17871 = vmatprep.subr.bf16.mxu0 %v20892_v55  ;;  %v15240_v55 = vld [vmem:[%s25334_s5 + $0xb8] sm:$0xf] }
 0x1bd   : > { %v2100_v40 = vsel %vm772_vm0, %v15240_v55, 0  ;;  %v2188_v55 = vand.u32 4294901760, %v21135_v34 }
 0x1be   : > { %1863 = vmatmul.mubr.f32.gmra.mrb[4].mxu0 %v1529_v53  ;;  %v2114_v17 = vand.u32 4294901760, %v2100_v40 }
 0x1bf   : > { %1957 = vmatprep.mubr.f32.mxu0 %v25125_v0  ;;  %v2189_v44 = vsub.f32 %v21135_v34, %v2188_v55 }
 0x1c0   : > { %v21101_v49 = vsub.f32 %v2100_v40, %v2114_v17  ;;  %v21113_v54 = vpack.c.bf16 %v2114_v17, %v2110_v15 }
 0x1c1   : > { %v2190_v17 = vand.u32 4294901760, %v2189_v44 }
 0x1c2   : > { %1959 = vmatmul.mubr.f32.vlgmr.msra.gmra.mrb[0].mxu0 %v20901_v63  ;;  %v2246_v37 = vand.u32 4294901760, %v21101_v49  ;;  %v17898_v51 = vpack.c.bf16 %v21101_v49, %v21097_v32 }
 0x1c3   : > { %1964 = vmatprep.mubr.f32.mxu0 %v25125_v0  ;;  %17873 = vmatpush1.bf16.msra.mxu0 %v20922_v7  ;;  %v2210_v7 = vand.u32 4294901760, %v21051_v11 }
 0x1c4   : > { %17875 = vmatprep.subr.bf16.mxu0 %v20925_v10  ;;  %v2097_v10 = vsel %vm772_vm0, %v15239_v42, 0  ;;  %v2247_v4 = vsub.f32 %v21101_v49, %v2246_v37  ;;  %v2179_v42 = vand.u32 4294901760, %v2178_v23 }
 0x1c5   : > { %v2211_v14 = vsub.f32 %v21051_v11, %v2210_v7  ;;  %v2116_v53 = vand.u32 4294901760, %v2097_v10 }
 0x1c6   : > { %1966 = vmatmul.mubr.f32.gmra.mrb[2].mxu0 %v20932_v13  ;;  %v2248_v40 = vand.u32 4294901760, %v2247_v4 }
 0x1c7   : > { %1971 = vmatprep.mubr.f32.mxu0 %v25125_v0  ;;  %17877 = vmatpush1.bf16.msra.mxu0 %v20944_v39  ;;  %v2089_v39 = vsel %vm2082_vm3, %v2086_v26, %v2088_v35  ;;  %v21123_v60 = vsub.f32 %v2097_v10, %v2116_v53  ;;  %v2212_v3 = vand.u32 4294901760, %v2211_v14  ;;  %v21131_v8 = vpack.c.bf16 %v2116_v53, %v2112_v48 }
 0x1c8   : > { %17879 = vmatprep.subr.bf16.mxu0 %v21072_v30  ;;  %v2094_v62 = vsel %vm765_vm2, %v2089_v39, 0  ;;  %v2218_v26 = vand.u32 4294901760, %v2217_v56  ;;  %v2242_v35 = vand.u32 4294901760, %v2241_v29  ;;  %v17890_v15 = vpack.c.bf16 %v2248_v40, %v2236_v31 }
 0x1c9   : > { %v21137_v36 = vand.u32 4294901760, %v2094_v62  ;;  %v2252_v33 = vand.u32 4294901760, %v21123_v60  ;;  %v17886_v1 = vpack.c.bf16 %v2224_v5, %v2212_v3  ;;  %v17894_v48 = vpack.c.bf16 %v21053_v12, %v21051_v11 }
 0x1ca   : > { %1973 = vmatmul.mubr.f32.gmra.mrb[4].mxu0 %v20950_v43  ;;  %v17896_v14 = vpack.c.bf16 %v21095_v24, %v21088_v16  ;;  %v17900_v39 = vpack.c.bf16 %v21123_v60, %v21115_v58  ;;  %v17910_v53 = vpack.c.bf16 %v2222_v50, %v2210_v7  ;;  %v17914_v11 = vpack.c.bf16 %v2246_v37, %v2234_v6  ;;  %v15242_v7 = vld [vmem:[%s25334_s5 + $0xc8] sm:$0xff]  ;;  %v15244_v50 = vld [vmem:[%s25334_s5 + $0xd8] sm:$0xff] }
 0x1cb   : > { %2051 = vmatprep.mubr.f32.mxu0 %v25125_v0  ;;  %v21162_v25 = vsub.f32 %v2094_v62, %v21137_v36  ;;  %v17912_v62 = vpack.c.bf16 %v2228_v9, %v2216_v61  ;;  %v17916_v12 = vpack.c.bf16 %v2252_v33, %v2240_v57  ;;  %v2759_v16 = vrot.slane %v20722_v18, 3  ;;  %v15248_v18 = vld [vmem:[%s25334_s5 + $0xf8] sm:$0xf]  ;;  %v15243_v61 = vld [vmem:[%s25334_s5 + $0xd0] sm:$0xff] }
 0x1cc   : > { %v2778_v32 = vand.u32 4294901760, %v15242_v7  ;;  %v2782_v49 = vand.u32 4294901760, %v15244_v50  ;;  %v2776_v6 = vsel %vm772_vm0, %v15248_v18, 0  ;;  %v2784_v57 = vand.u32 4294901760, %v15243_v61 }
 0x1cd   : > { %v2199_v46 = vand.u32 4294901760, %v21162_v25  ;;  %v2790_v2 = vand.u32 4294901760, %v2776_v6 }
 0x1ce   : > { %2053 = vmatmul.mubr.f32.vlgmr.msra.gmra.mrb[0].mxu0 %v20901_v63  ;;  %v2229_v63 = vsub.f32 %v21095_v24, %v2228_v9  ;;  %v2760_v24 = vrot.slane %v20725_v19, 3  ;;  %v21238_v58 = vsub.f32 %v15242_v7, %v2778_v32  ;;  %v15246_v9 = vld [vmem:[%s25334_s5 + $0xe8] sm:$0xff]  ;;  %v21259_v3 = vpack.c.bf16 %v2782_v49, %v2778_v32 }
 0x1cf   : > { %2058 = vmatprep.mubr.f32.mxu0 %v25125_v0  ;;  %17881 = vmatpush1.bf16.msra.mxu0 %v21110_v52  ;;  %v2200_v10 = vsub.f32 %v21162_v25, %v2199_v46  ;;  %v21282_v23 = vsub.f32 %v15243_v61, %v2784_v57 }
 0x1d0   : > { %17883 = vmatprep.subr.bf16.mxu0 %v21113_v54  ;;  %v2230_v28 = vand.u32 4294901760, %v2229_v63  ;;  %v2761_v19 = vsel %vm2758_vm4, %v2759_v16, %v2760_v24  ;;  %v2764_v63 = vrot.slane %v20758_v41, 3 }
 0x1d1   : > { %v2201_v47 = vand.u32 4294901760, %v2200_v10  ;;  %v2766_v37 = vsel %vm765_vm2, %v2761_v19, 0 }
 0x1d2   : > { %2060 = vmatmul.mubr.f32.gmra.mrb[2].mxu0 %v20932_v13  ;;  %v2253_v13 = vsub.f32 %v21123_v60, %v2252_v33  ;;  %v17888_v45 = vpack.c.bf16 %v2230_v28, %v2218_v26  ;;  %v15241_v60 = vld [vmem:[%s25334_s5 + $0xc0] sm:$0xff]  ;;  %v2786_v33 = vand.u32 4294901760, %v15246_v9  ;;  %v21278_v4 = vand.u32 4294901760, %v2766_v37 }
 0x1d3   : > { %2065 = vmatprep.mubr.f32.mxu0 %v25125_v0  ;;  %17885 = vmatpush1.bf16.msra.mxu0 %v21131_v8  ;;  %v2780_v5 = vand.u32 4294901760, %v15241_v60  ;;  %v21288_v26 = vsub.f32 %v2776_v6, %v2790_v2 }
 0x1d4   : > { %17887 = vmatprep.subr.bf16.mxu0 %v17886_v1  ;;  %v2254_v38 = vand.u32 4294901760, %v2253_v13  ;;  %v21300_v40 = vpack.c.bf16 %v2790_v2, %v2786_v33  ;;  %v21305_v44 = vsub.f32 %v2766_v37, %v21278_v4 }
 0x1d5   : > { %v21275_v1 = vsub.f32 %v15241_v60, %v2780_v5  ;;  %v21297_v13 = vpack.c.bf16 %v2784_v57, %v2780_v5 }
 0x1d6   : > { %2067 = vmatmul.mubr.f32.gmra.mrb[4].mxu0 %v20950_v43  ;;  %v17892_v43 = vpack.c.bf16 %v2254_v38, %v2242_v35  ;;  %v2904_v38 = vand.u32 4294901760, %v21282_v23 }
 0x1d7   : > { %2174 = vmatprep.mubr.f32.mxu0 %v25125_v0  ;;  %v2892_v35 = vand.u32 4294901760, %v21275_v1  ;;  %v17944_v2 = vpack.c.bf16 %v21282_v23, %v21275_v1 }
 0x1da   : > { %2180 = vmatmul.mubr.f32.vlgmr.msra.gmra.mrb[0].mxu0 %v2179_v42 }
 0x1db   : > { %2185 = vmatprep.mubr.f32.mxu0 %v25125_v0  ;;  %17889 = vmatpush1.bf16.msra.mxu0 %v17888_v45 }
 0x1dc   : > { %17891 = vmatprep.subr.bf16.mxu0 %v17890_v15 }
 0x1de   : > { %2191 = vmatmul.mubr.f32.gmra.mrb[2].mxu0 %v2190_v17 }
 0x1df   : > { %2196 = vmatprep.mubr.f32.mxu0 %v25125_v0  ;;  %17893 = vmatpush1.bf16.msra.mxu0 %v17892_v43 }
 0x1e0   : > { %17895 = vmatprep.subr.bf16.mxu0 %v17894_v48  ;;  %v2922_v48 = vand.u32 4294901760, %v21288_v26 }
 0x1e2   : > { %2202 = vmatmul.mubr.f32.gmra.mrb[4].mxu0 %v2201_v47 }
 0x1e3   : > { %2312 = vmatprep.mubr.f32.mxu0 %v25125_v0 }
 0x1e6   : > { %2314 = vmatmul.mubr.f32.vlgmr.msra.gmra.mrb[0].mxu0 %v21091_v22 }
 0x1e7   : > { %2319 = vmatprep.mubr.f32.mxu0 %v25125_v0  ;;  %17897 = vmatpush1.bf16.msra.mxu0 %v17896_v14  ;;  %v2853_v14 = vand.u32 4294901760, %v21305_v44 }
 0x1e8   : > { %17899 = vmatprep.subr.bf16.mxu0 %v17898_v51 }
 0x1e9   : > { %v2854_v16 = vsub.f32 %v21305_v44, %v2853_v14 }
 0x1ea   : > { %2321 = vmatmul.mubr.f32.gmra.mrb[2].mxu0 %v21120_v21 }
 0x1eb   : > { %2326 = vmatprep.mubr.f32.mxu0 %v25125_v0  ;;  %17901 = vmatpush1.bf16.msra.mxu0 %v17900_v39  ;;  %v2855_v61 = vand.u32 4294901760, %v2854_v16 }
 0x1ec   : > { %17903 = vmatprep.subr.bf16.mxu0 %v21072_v30 }
 0x1ee   : > { %2328 = vmatmul.mubr.f32.gmra.mrb[4].mxu0 %v21137_v36 }
 0x1ef   : > { %2414 = vmatprep.mubr.f32.mxu0 %v25125_v0 }
 0x1f2   : > { %2417 = vmatmul.mubr.f32.vlgmr.msra.gmra.mrb[0].mxu0 %v21118_v59  ;;  %v21240_v59 = vsub.f32 %v15244_v50, %v2782_v49  ;;  %v2923_v50 = vsub.f32 %v21288_v26, %v2922_v48 }
 0x1f3   : > { %2422 = vmatprep.mubr.f32.mxu0 %v25125_v0  ;;  %17905 = vmatpush1.bf16.msra.mxu0 %v21110_v52 }
 0x1f4   : > { %17907 = vmatprep.subr.bf16.mxu0 %v21113_v54  ;;  %v2898_v56 = vand.u32 4294901760, %v21240_v59  ;;  %v17942_v57 = vpack.c.bf16 %v21240_v59, %v21238_v58 }
 0x1f6   : > { %2425 = vmatmul.mubr.f32.gmra.mrb[2].mxu0 %v21135_v34  ;;  %v2899_v29 = vsub.f32 %v21240_v59, %v2898_v56 }
 0x1f7   : > { %2430 = vmatprep.mubr.f32.mxu0 %v25125_v0  ;;  %17909 = vmatpush1.bf16.msra.mxu0 %v21131_v8 }
 0x1f8   : > { %17911 = vmatprep.subr.bf16.mxu0 %v17910_v53  ;;  %v2900_v10 = vand.u32 4294901760, %v2899_v29  ;;  %v2893_v53 = vsub.f32 %v21275_v1, %v2892_v35  ;;  %v15252_v1 = vld [vmem:[%s25334_s5 + $0x118] sm:$0xff] }
 0x1fa   : > { %2433 = vmatmul.mubr.f32.gmra.mrb[4].mxu0 %v21162_v25  ;;  %v2894_v49 = vand.u32 4294901760, %v2893_v53  ;;  %v15253_v53 = vld [vmem:[%s25334_s5 + $0x120] sm:$0xff] }
 0x1fb   : > { %2511 = vmatprep.mubr.f32.mxu0 %v25125_v0 }
 0x1fe   : > { %2515 = vmatmul.mubr.f32.vlgmr.msra.gmra.mrb[0].mxu0 %v2177_v27  ;;  %v15245_v27 = vld [vmem:[%s25334_s5 + $0xe0] sm:$0xff] }
 0x1ff   : > { %2520 = vmatprep.mubr.f32.mxu0 %v25125_v0  ;;  %17913 = vmatpush1.bf16.msra.mxu0 %v17912_v62  ;;  %v2788_v41 = vand.u32 4294901760, %v15245_v27 }
 0x200   : > { %17915 = vmatprep.subr.bf16.mxu0 %v17914_v11 }
 0x201   : > { %v21302_v42 = vsub.f32 %v15245_v27, %v2788_v41 }
 0x202   : > { %2524 = vmatmul.mubr.f32.gmra.mrb[2].mxu0 %v2188_v55  ;;  %v21284_v55 = vsub.f32 %v15246_v9, %v2786_v33 }
 0x203   : > { %2529 = vmatprep.mubr.f32.mxu0 %v25125_v0  ;;  %17917 = vmatpush1.bf16.msra.mxu0 %v17916_v12  ;;  %v2916_v62 = vand.u32 4294901760, %v21302_v42 }
 0x204   : > { %17919 = vmatprep.subr.bf16.mxu0 %v21072_v30  ;;  %v2762_v30 = vrot.slane %v20728_v20, 3  ;;  %v15247_v20 = vld [vmem:[%s25334_s5 + $0xf0] sm:$0xf]  ;;  %v2910_v43 = vand.u32 4294901760, %v21284_v55 }
 0x205   : > { %v2917_v18 = vsub.f32 %v21302_v42, %v2916_v62 }
 0x206   : > { %2533 = vmatmul.mubr.f32.gmra.mrb[4].mxu0 %v2199_v46  ;;  %v2763_v34 = vsel %vm2758_vm4, %v2760_v24, %v2762_v30  ;;  %v2911_v7 = vsub.f32 %v21284_v55, %v2910_v43  ;;  %v17962_v59 = vpack.c.bf16 %v2922_v48, %v2910_v43 }
 0x207   : > { %2627 = vmatprep.mubr.f32.mxu0 %v25125_v0  ;;  %v2768_v25 = vsel %vm765_vm2, %v2763_v34, 0 }
 0x208   : > { %v21307_v46 = vand.u32 4294901760, %v2768_v25  ;;  %v2912_v19 = vand.u32 4294901760, %v2911_v7 }
 0x20a   : > { %2629 = vmatmul.mubr.f32.vlgmr.msra.gmra.mrb[0].mxu0 %v21091_v22  ;;  %v21322_v51 = vsub.f32 %v2768_v25, %v21307_v46 }
 0x20b   : > { %2634 = vmatprep.mubr.f32.mxu0 %v25125_v0  ;;  %17921 = vmatpush1.bf16.msra.mxu0 %v21110_v52  ;;  %v2886_v52 = vand.u32 4294901760, %v21238_v58 }
 0x20c   : > { %17923 = vmatprep.subr.bf16.mxu0 %v21113_v54  ;;  %v2773_v54 = vsel %vm772_vm0, %v15247_v20, 0  ;;  %v2864_v24 = vand.u32 4294901760, %v21322_v51  ;;  %v2918_v20 = vand.u32 4294901760, %v2917_v18  ;;  %v3463_v18 = vand.u32 4294901760, %v15253_v53 }
 0x20d   : > { %v2887_v28 = vsub.f32 %v21238_v58, %v2886_v52  ;;  %v2792_v31 = vand.u32 4294901760, %v2773_v54  ;;  %v17958_v25 = vpack.c.bf16 %v2898_v56, %v2886_v52  ;;  %v17960_v58 = vpack.c.bf16 %v2904_v38, %v2892_v35  ;;  %v15250_v56 = vld [vmem:[%s25334_s5 + $0x108] sm:$0xff]  ;;  %v19894_v35 = vld [vmem:[%s20696_s28 + $0x10] sm:$0xff] }
 0x20e   : > { %2636 = vmatmul.mubr.f32.gmra.mrb[2].mxu0 %v21120_v21  ;;  %v2865_v9 = vsub.f32 %v21322_v51, %v2864_v24  ;;  %v3453_v29 = vand.u32 4294901760, %v15250_v56 }
 0x20f   : > { %2641 = vmatprep.mubr.f32.mxu0 %v25125_v0  ;;  %17925 = vmatpush1.bf16.msra.mxu0 %v21131_v8  ;;  %v2765_v8 = vsel %vm2758_vm4, %v2762_v30, %v2764_v63  ;;  %v21310_v45 = vsub.f32 %v2773_v54, %v2792_v31  ;;  %v2888_v17 = vand.u32 4294901760, %v2887_v28  ;;  %v21318_v47 = vpack.c.bf16 %v2792_v31, %v2788_v41 }
 0x210   : > { %17927 = vmatprep.subr.bf16.mxu0 %v21259_v3  ;;  %v2770_v15 = vsel %vm765_vm2, %v2765_v8, 0  ;;  %v2924_v30 = vand.u32 4294901760, %v2923_v50  ;;  %v2866_v34 = vand.u32 4294901760, %v2865_v9  ;;  %v17946_v54 = vpack.c.bf16 %v21288_v26, %v21284_v55  ;;  %v19893_v26 = vld [vmem:[%s20696_s28 + $0x8] sm:$0xff] }
 0x211   : > { %v21324_v39 = vand.u32 4294901760, %v2770_v15  ;;  %v2928_v11 = vand.u32 4294901760, %v21310_v45  ;;  %v17934_v12 = vpack.c.bf16 %v2900_v10, %v2888_v17  ;;  %v17948_v41 = vpack.c.bf16 %v21310_v45, %v21302_v42  ;;  %v15254_v17 = vld [vmem:[%s25334_s5 + $0x128] sm:$0xff] }
 0x212   : > { %2643 = vmatmul.mubr.f32.gmra.mrb[4].mxu0 %v21137_v36  ;;  %v17938_v27 = vpack.c.bf16 %v2924_v30, %v2912_v19  ;;  %v3435_v28 = vrot.slane %v19893_v26, 4  ;;  %v3457_v8 = vand.u32 4294901760, %v15252_v1  ;;  %v21425_v31 = vsub.f32 %v15250_v56, %v3453_v29 }
 0x213   : > { %2721 = vmatprep.mubr.f32.mxu0 %v25125_v0  ;;  %v21349_v32 = vsub.f32 %v2770_v15, %v21324_v39  ;;  %v17964_v52 = vpack.c.bf16 %v2928_v11, %v2916_v62  ;;  %v15251_v15 = vld [vmem:[%s25334_s5 + $0x110] sm:$0xff]  ;;  %v3461_v50 = vand.u32 4294901760, %v15254_v17 }
 0x214   : > { %v21427_v42 = vsub.f32 %v15252_v1, %v3457_v8  ;;  %v21446_v10 = vpack.c.bf16 %v3457_v8, %v3453_v29  ;;  %v3459_v7 = vand.u32 4294901760, %v15251_v15 }
 0x215   : > { %v2875_v5 = vand.u32 4294901760, %v21349_v32 }
 0x216   : > { %2723 = vmatmul.mubr.f32.vlgmr.msra.gmra.mrb[0].mxu0 %v21091_v22  ;;  %v2905_v22 = vsub.f32 %v21282_v23, %v2904_v38  ;;  %v19892_v23 = vld [vmem:[%s20696_s28] sm:$0xff]  ;;  %v3437_v38 = vrot.slane %v19894_v35, 4  ;;  %v3573_v62 = vand.u32 4294901760, %v21427_v42 }
 0x217   : > { %2728 = vmatprep.mubr.f32.mxu0 %v25125_v0  ;;  %17929 = vmatpush1.bf16.msra.mxu0 %v21297_v13  ;;  %v2876_v63 = vsub.f32 %v21349_v32, %v2875_v5  ;;  %v3434_v55 = vrot.slane %v19892_v23, 4 }
 0x218   : > { %17931 = vmatprep.subr.bf16.mxu0 %v21300_v40  ;;  %v2906_v60 = vand.u32 4294901760, %v2905_v22  ;;  %v3438_v22 = vsel %vm772_vm0, %v3435_v28, %v3437_v38 }
 0x219   : > { %v2877_v33 = vand.u32 4294901760, %v2876_v63 }
 0x21a   : > { %2730 = vmatmul.mubr.f32.gmra.mrb[2].mxu0 %v21120_v21  ;;  %v2929_v21 = vsub.f32 %v21310_v45, %v2928_v11  ;;  %v17936_v6 = vpack.c.bf16 %v2906_v60, %v2894_v49  ;;  %v3436_v45 = vsel %vm772_vm0, %v3434_v55, %v3435_v28  ;;  %v19895_v11 = vld [vmem:[%s20696_s28 + $0x18] sm:$0xf]  ;;  %v21469_v49 = vsub.f32 %v15251_v15, %v3459_v7  ;;  %s25529_s28 = smov %s25528_s30 }
 0x21b   : > { %2735 = vmatprep.mubr.f32.mxu0 %v25125_v0  ;;  %17933 = vmatpush1.bf16.msra.mxu0 %v21318_v47  ;;  %v21471_v60 = vsub.f32 %v15254_v17, %v3461_v50 }
 0x21c   : > { %17935 = vmatprep.subr.bf16.mxu0 %v17934_v12  ;;  %v2930_v37 = vand.u32 4294901760, %v2929_v21  ;;  %v3439_v12 = vrot.slane %v19895_v11, 4  ;;  %v3443_v21 = vsel %vm765_vm2, %v3438_v22, 0 }
 0x21e   : > { %2737 = vmatmul.mubr.f32.gmra.mrb[4].mxu0 %v21137_v36  ;;  %v17940_v36 = vpack.c.bf16 %v2930_v37, %v2918_v20  ;;  %v21489_v20 = vsub.f32 %v15253_v53, %v3463_v18 }
 0x21f   : > { %2850 = vmatprep.mubr.f32.mxu0 %v25125_v0 }
 0x220   : > { %v3591_v1 = vand.u32 4294901760, %v21489_v20 }
 0x222   : > { %2856 = vmatmul.mubr.f32.vlgmr.msra.gmra.mrb[0].mxu0 %v2855_v61  ;;  %v3574_v61 = vsub.f32 %v21427_v42, %v3573_v62  ;;  %v3592_v35 = vsub.f32 %v21489_v20, %v3591_v1 }
 0x223   : > { %2861 = vmatprep.mubr.f32.mxu0 %v25125_v0  ;;  %17937 = vmatpush1.bf16.msra.mxu0 %v17936_v6 }
 0x224   : > { %17939 = vmatprep.subr.bf16.mxu0 %v17938_v27  ;;  %v21494_v27 = vand.u32 4294901760, %v3443_v21 }
 0x226   : > { %2867 = vmatmul.mubr.f32.gmra.mrb[2].mxu0 %v2866_v34 }
 0x227   : > { %2872 = vmatprep.mubr.f32.mxu0 %v25125_v0  ;;  %17941 = vmatpush1.bf16.msra.mxu0 %v17940_v36  ;;  %v3579_v36 = vand.u32 4294901760, %v21469_v49 }
 0x228   : > { %17943 = vmatprep.subr.bf16.mxu0 %v17942_v57 }
 0x22a   : > { %2878 = vmatmul.mubr.f32.gmra.mrb[4].mxu0 %v2877_v33 }
 0x22b   : > { %2988 = vmatprep.mubr.f32.mxu0 %v25125_v0 }
 0x22e   : > { %2990 = vmatmul.mubr.f32.vlgmr.msra.gmra.mrb[0].mxu0 %v21278_v4 }
 0x22f   : > { %2995 = vmatprep.mubr.f32.mxu0 %v25125_v0  ;;  %17945 = vmatpush1.bf16.msra.mxu0 %v17944_v2  ;;  %v3575_v2 = vand.u32 4294901760, %v3574_v61 }
 0x230   : > { %17947 = vmatprep.subr.bf16.mxu0 %v17946_v54  ;;  %v3585_v54 = vand.u32 4294901760, %v21471_v60 }
 0x232   : > { %2997 = vmatmul.mubr.f32.gmra.mrb[2].mxu0 %v21307_v46  ;;  %v3586_v26 = vsub.f32 %v21471_v60, %v3585_v54 }
 0x233   : > { %3002 = vmatprep.mubr.f32.mxu0 %v25125_v0  ;;  %17949 = vmatpush1.bf16.msra.mxu0 %v17948_v41 }
 0x234   : > { %17951 = vmatprep.subr.bf16.mxu0 %v21259_v3 }
 0x236   : > { %3004 = vmatmul.mubr.f32.gmra.mrb[4].mxu0 %v21324_v39 }
 0x237   : > { %3090 = vmatprep.mubr.f32.mxu0 %v25125_v0 }
 0x23a   : > { %3093 = vmatmul.mubr.f32.vlgmr.msra.gmra.mrb[0].mxu0 %v21305_v44  ;;  %v15249_v44 = vld [vmem:[%s25334_s5 + $0x100] sm:$0xff] }
 0x23b   : > { %3098 = vmatprep.mubr.f32.mxu0 %v25125_v0  ;;  %17953 = vmatpush1.bf16.msra.mxu0 %v21297_v13  ;;  %v3455_v43 = vand.u32 4294901760, %v15249_v44 }
 0x23c   : > { %17955 = vmatprep.subr.bf16.mxu0 %v21300_v40 }
 0x23d   : > { %v21462_v16 = vsub.f32 %v15249_v44, %v3455_v43  ;;  %v21484_v9 = vpack.c.bf16 %v3459_v7, %v3455_v43  ;;  %v17990_v7 = vpack.c.bf16 %v21427_v42, %v21425_v31 }
 0x23e   : > { %3101 = vmatmul.mubr.f32.gmra.mrb[2].mxu0 %v21322_v51  ;;  %v3441_v51 = vsel %vm765_vm2, %v3436_v45, 0 }
 0x23f   : > { %3106 = vmatprep.mubr.f32.mxu0 %v25125_v0  ;;  %17957 = vmatpush1.bf16.msra.mxu0 %v21318_v47  ;;  %v3567_v63 = vand.u32 4294901760, %v21462_v16 }
 0x240   : > { %17959 = vmatprep.subr.bf16.mxu0 %v17958_v25 }
 0x241   : > { %v3568_v56 = vsub.f32 %v21462_v16, %v3567_v63 }
 0x242   : > { %3109 = vmatmul.mubr.f32.gmra.mrb[4].mxu0 %v21349_v32  ;;  %v21465_v32 = vand.u32 4294901760, %v3441_v51 }
 0x243   : > { %3187 = vmatprep.mubr.f32.mxu0 %v25125_v0 }
 0x244   : > { %v21492_v37 = vsub.f32 %v3441_v51, %v21465_v32  ;;  %v3593_v51 = vand.u32 4294901760, %v3592_v35 }
 0x246   : > { %3191 = vmatmul.mubr.f32.vlgmr.msra.gmra.mrb[0].mxu0 %v2853_v14  ;;  %v15255_v14 = vld [vmem:[%s25334_s5 + $0x130] sm:$0xf] }
 0x247   : > { %3196 = vmatprep.mubr.f32.mxu0 %v25125_v0  ;;  %17961 = vmatpush1.bf16.msra.mxu0 %v17960_v58  ;;  %v3528_v58 = vand.u32 4294901760, %v21492_v37 }
 0x248   : > { %17963 = vmatprep.subr.bf16.mxu0 %v17962_v59  ;;  %v21509_v59 = vsub.f32 %v3443_v21, %v21494_v27 }
 0x249   : > { %v3529_v29 = vsub.f32 %v21492_v37, %v3528_v58 }
 0x24a   : > { %3200 = vmatmul.mubr.f32.gmra.mrb[2].mxu0 %v2864_v24  ;;  %v3539_v8 = vand.u32 4294901760, %v21509_v59 }
 0x24b   : > { %3205 = vmatprep.mubr.f32.mxu0 %v25125_v0  ;;  %17965 = vmatpush1.bf16.msra.mxu0 %v17964_v52  ;;  %v3530_v17 = vand.u32 4294901760, %v3529_v29 }
 0x24c   : > { %17967 = vmatprep.subr.bf16.mxu0 %v21259_v3  ;;  %v15256_v3 = vld [vmem:[%s25334_s5 + $0x138] sm:$0xf]  ;;  %v3540_v43 = vsub.f32 %v21509_v59, %v3539_v8 }
 0x24d   : > { %v3451_v48 = vsel %vm772_vm0, %v15256_v3, 0  ;;  %v3569_v3 = vand.u32 4294901760, %v3568_v56 }
 0x24e   : > { %3209 = vmatmul.mubr.f32.gmra.mrb[4].mxu0 %v2875_v5  ;;  %v3465_v24 = vand.u32 4294901760, %v3451_v48  ;;  %v3541_v11 = vand.u32 4294901760, %v3540_v43 }
 0x24f   : > { %3303 = vmatprep.mubr.f32.mxu0 %v25125_v0 }
 0x250   : > { %v21475_v19 = vsub.f32 %v3451_v48, %v3465_v24  ;;  %v21487_v6 = vpack.c.bf16 %v3465_v24, %v3461_v50  ;;  %v17992_v24 = vpack.c.bf16 %v21469_v49, %v21462_v16  ;;  %v4124_v16 = vld [vmem:[%s25336_s23] sm:$0xff] }
 0x252   : > { %3305 = vmatmul.mubr.f32.vlgmr.msra.gmra.mrb[0].mxu0 %v21278_v4  ;;  %v3597_v41 = vand.u32 4294901760, %v21475_v19 }
 0x253   : > { %3310 = vmatprep.mubr.f32.mxu0 %v25125_v0  ;;  %17969 = vmatpush1.bf16.msra.mxu0 %v21297_v13  ;;  %v3561_v13 = vand.u32 4294901760, %v21425_v31 }
 0x254   : > { %17971 = vmatprep.subr.bf16.mxu0 %v21300_v40  ;;  %v3448_v40 = vsel %vm772_vm0, %v15255_v14, 0  ;;  %v3598_v28 = vsub.f32 %v21475_v19, %v3597_v41 }
 0x255   : > { %v3562_v30 = vsub.f32 %v21425_v31, %v3561_v13  ;;  %v3467_v5 = vand.u32 4294901760, %v3448_v40  ;;  %v18006_v21 = vpack.c.bf16 %v3573_v62, %v3561_v13  ;;  %v18010_v31 = vpack.c.bf16 %v3597_v41, %v3585_v54 }
 0x256   : > { %3312 = vmatmul.mubr.f32.gmra.mrb[2].mxu0 %v21307_v46  ;;  %v3599_v15 = vand.u32 4294901760, %v3598_v28 }
 0x257   : > { %3317 = vmatprep.mubr.f32.mxu0 %v25125_v0  ;;  %17973 = vmatpush1.bf16.msra.mxu0 %v21318_v47  ;;  %v3440_v47 = vsel %vm772_vm0, %v3437_v38, %v3439_v12  ;;  %v21497_v34 = vsub.f32 %v3448_v40, %v3467_v5  ;;  %v3563_v33 = vand.u32 4294901760, %v3562_v30  ;;  %v21505_v25 = vpack.c.bf16 %v3467_v5, %v3463_v18 }
 0x258   : > { %17975 = vmatprep.subr.bf16.mxu0 %v21446_v10  ;;  %v3445_v57 = vsel %vm765_vm2, %v3440_v47, 0  ;;  %v3587_v38 = vand.u32 4294901760, %v3586_v26  ;;  %v17994_v40 = vpack.c.bf16 %v21475_v19, %v21471_v60  ;;  %v18008_v30 = vpack.c.bf16 %v3579_v36, %v3567_v63  ;;  %v4125_v47 = vld [vmem:[%s25336_s23 + $0x8] sm:$0xf] }
 0x259   : > { %v21511_v52 = vand.u32 4294901760, %v3445_v57  ;;  %v3603_v23 = vand.u32 4294901760, %v21497_v34  ;;  %v17982_v55 = vpack.c.bf16 %v3575_v2, %v3563_v33  ;;  %v17996_v18 = vpack.c.bf16 %v21497_v34, %v21489_v20 }
 0x25a   : > { %3319 = vmatmul.mubr.f32.gmra.mrb[4].mxu0 %v21324_v39  ;;  %v17986_v22 = vpack.c.bf16 %v3599_v15, %v3587_v38 }
 0x25b   : > { %3397 = vmatprep.mubr.f32.mxu0 %v25125_v0  ;;  %v21536_v44 = vsub.f32 %v3445_v57, %v21511_v52  ;;  %v18012_v42 = vpack.c.bf16 %v3603_v23, %v3591_v1 }
 0x25d   : > { %v3550_v48 = vand.u32 4294901760, %v21536_v44 }
 0x25e   : > { %3399 = vmatmul.mubr.f32.vlgmr.msra.gmra.mrb[0].mxu0 %v21278_v4  ;;  %v3580_v4 = vsub.f32 %v21469_v49, %v3579_v36  ;;  %v4100_v49 = vld [vmem:[#allocation2] sm:$0x3] }
 0x25f   : > { %3404 = vmatprep.mubr.f32.mxu0 %v25125_v0  ;;  %17977 = vmatpush1.bf16.msra.mxu0 %v21484_v9  ;;  %v3551_v12 = vsub.f32 %v21536_v44, %v3550_v48 }
 0x260   : > { %17979 = vmatprep.subr.bf16.mxu0 %v21487_v6  ;;  %v3581_v45 = vand.u32 4294901760, %v3580_v4 }
 0x261   : > { %v3552_v50 = vand.u32 4294901760, %v3551_v12 }
 0x262   : > { %3406 = vmatmul.mubr.f32.gmra.mrb[2].mxu0 %v21307_v46  ;;  %v3604_v46 = vsub.f32 %v21497_v34, %v3603_v23  ;;  %v17984_v14 = vpack.c.bf16 %v3581_v45, %v3569_v3 }
 0x263   : > { %3411 = vmatprep.mubr.f32.mxu0 %v25125_v0  ;;  %17981 = vmatpush1.bf16.msra.mxu0 %v21505_v25 }
 0x264   : > { %17983 = vmatprep.subr.bf16.mxu0 %v17982_v55  ;;  %v3605_v53 = vand.u32 4294901760, %v3604_v46 }
 0x266   : > { %3413 = vmatmul.mubr.f32.gmra.mrb[4].mxu0 %v21324_v39  ;;  %v17988_v39 = vpack.c.bf16 %v3605_v53, %v3593_v51 }
 0x267   : > { %3525 = vmatprep.mubr.f32.mxu0 %v25125_v0 }
 0x26a   : > { %3531 = vmatmul.mubr.f32.vlgmr.msra.gmra.mrb[0].mxu0 %v3530_v17 }
 0x26b   : > { %3536 = vmatprep.mubr.f32.mxu0 %v25125_v0  ;;  %17985 = vmatpush1.bf16.msra.mxu0 %v17984_v14 }
 0x26c   : > { %17987 = vmatprep.subr.bf16.mxu0 %v17986_v22 }
 0x26e   : > { %3542 = vmatmul.mubr.f32.gmra.mrb[2].mxu0 %v3541_v11 }
 0x26f   : > { %3547 = vmatprep.mubr.f32.mxu0 %v25125_v0  ;;  %17989 = vmatpush1.bf16.msra.mxu0 %v17988_v39 }
 0x270   : > { %17991 = vmatprep.subr.bf16.mxu0 %v17990_v7 }
 0x272   : > { %3553 = vmatmul.mubr.f32.gmra.mrb[4].mxu0 %v3552_v50 }
 0x273   : > { %3663 = vmatprep.mubr.f32.mxu0 %v25125_v0 }
 0x276   : > { %3665 = vmatmul.mubr.f32.vlgmr.msra.gmra.mrb[0].mxu0 %v21465_v32 }
 0x277   : > { %3670 = vmatprep.mubr.f32.mxu0 %v25125_v0  ;;  %17993 = vmatpush1.bf16.msra.mxu0 %v17992_v24 }
 0x278   : > { %17995 = vmatprep.subr.bf16.mxu0 %v17994_v40 }
 0x27a   : > { %3672 = vmatmul.mubr.f32.gmra.mrb[2].mxu0 %v21494_v27 }
 0x27b   : > { %3677 = vmatprep.mubr.f32.mxu0 %v25125_v0  ;;  %17997 = vmatpush1.bf16.msra.mxu0 %v17996_v18 }
 0x27c   : > { %17999 = vmatprep.subr.bf16.mxu0 %v21446_v10 }
 0x27e   : > { %3679 = vmatmul.mubr.f32.gmra.mrb[4].mxu0 %v21511_v52 }
 0x27f   : > { %3765 = vmatprep.mubr.f32.mxu0 %v25125_v0 }
 0x282   : > { %3768 = vmatmul.mubr.f32.vlgmr.msra.gmra.mrb[0].mxu0 %v21492_v37  ;;  %v4131_v37 = vsel %vm4126_vm5, %v4125_v47, 0 }
 0x283   : > { %3773 = vmatprep.mubr.f32.mxu0 %v25125_v0  ;;  %18001 = vmatpush1.bf16.msra.mxu0 %v21484_v9  ;;  %v21631_v33 = vand.u32 4294901760, %v4131_v37 }
 0x284   : > { %18003 = vmatprep.subr.bf16.mxu0 %v21487_v6 }
 0x285   : > { %v21635_v55 = vsub.f32 %v4131_v37, %v21631_v33 }
 0x286   : > { %3776 = vmatmul.mubr.f32.gmra.mrb[2].mxu0 %v21509_v59 }
 0x287   : > { %3781 = vmatprep.mubr.f32.mxu0 %v25125_v0  ;;  %18005 = vmatpush1.bf16.msra.mxu0 %v21505_v25  ;;  %v4217_v14 = vand.u32 4294901760, %v21635_v55 }
 0x288   : > { %18007 = vmatprep.subr.bf16.mxu0 %v18006_v21 }
 0x28a   : > { %3784 = vmatmul.mubr.f32.gmra.mrb[4].mxu0 %v21536_v44 }
 0x28b   : > { %3862 = vmatprep.mubr.f32.mxu0 %v25125_v0 }
 0x28e   : > { %3866 = vmatmul.mubr.f32.vlgmr.msra.gmra.mrb[0].mxu0 %v3528_v58 }
 0x28f   : > { %3871 = vmatprep.mubr.f32.mxu0 %v25125_v0  ;;  %18009 = vmatpush1.bf16.msra.mxu0 %v18008_v30 }
 0x290   : > { %18011 = vmatprep.subr.bf16.mxu0 %v18010_v31 }
 0x292   : > { %3875 = vmatmul.mubr.f32.gmra.mrb[2].mxu0 %v3539_v8 }
 0x293   : > { %3880 = vmatprep.mubr.f32.mxu0 %v25125_v0  ;;  %18013 = vmatpush1.bf16.msra.mxu0 %v18012_v42  ;;  %v4218_v42 = vsub.f32 %v21635_v55, %v4217_v14 }
 0x294   : > { %18015 = vmatprep.subr.bf16.mxu0 %v21446_v10  ;;  %v4102_v10 = vlaneseq }
 0x295   : > { %v4219_v47 = vand.u32 4294901760, %v4218_v42 }
 0x296   : > { %3884 = vmatmul.mubr.f32.gmra.mrb[4].mxu0 %v3550_v48  ;;  %v4103_v13 = vshrl.u32 %v4102_v10, 7 }
 0x297   : > { %3978 = vmatprep.mubr.f32.mxu0 %v25125_v0 }
 0x298   : > { %v4104_v62 = vsub.s32 0, %v4103_v13  ;;  %v4108_v60 = vsub.s32 1, %v4103_v13 }
 0x29a   : > { %3980 = vmatmul.mubr.f32.vlgmr.msra.gmra.mrb[0].mxu0 %v21465_v32  ;;  %v4105_v19 = vrot.slane %v4100_v49, %v4104_v62  ;;  %v4109_v61 = vrot.slane %v4100_v49, %v4108_v60 }
 0x29b   : > { %3985 = vmatprep.mubr.f32.mxu0 %v25125_v0  ;;  %18017 = vmatpush1.bf16.msra.mxu0 %v21484_v9 }
 0x29c   : > { %18019 = vmatprep.subr.bf16.mxu0 %v21487_v6 }
 0x29e   : > { %3987 = vmatmul.mubr.f32.gmra.mrb[2].mxu0 %v21494_v27 }
 0x29f   : > { %3992 = vmatprep.mubr.f32.mxu0 %v25125_v0  ;;  %18021 = vmatpush1.bf16.msra.mxu0 %v21505_v25 }
 0x2a2   : > { %3994 = vmatmul.mubr.f32.gmra.mrb[4].mxu0 %v21511_v52 }
 0x2a3   : > { %4072 = vmatprep.mubr.f32.mxu0 %v25125_v0 }
 0x2a6   : > { %4074 = vmatmul.mubr.f32.vlgmr.msra.gmra.mrb[0].mxu0 %v21465_v32  ;;  %v4128_v32 = vsel %vm4126_vm5, %v4124_v16, 0 }
 0x2a7   : > { %4079 = vmatprep.mubr.f32.mxu0 %v25125_v0  ;;  %v21625_v9 = vand.u32 4294901760, %v4128_v32 }
 0x2a9   : > { %v21629_v63 = vsub.f32 %v4128_v32, %v21625_v9 }
 0x2aa   : > { %4081 = vmatmul.mubr.f32.gmra.mrb[2].mxu0 %v21494_v27 }
 0x2ab   : > { %4086 = vmatprep.mubr.f32.mxu0 %v25125_v0  ;;  %v4206_v56 = vand.u32 4294901760, %v21629_v63 }
 0x2ad   : > { %v4207_v15 = vsub.f32 %v21629_v63, %v4206_v56 }
 0x2ae   : > { %4088 = vmatmul.mubr.f32.gmra.mrb[4].mxu0 %v21511_v52 }
 0x2af   : > { %v4208_v18 = vand.u32 4294901760, %v4207_v15  ;;  %v5285_v15 = vld [vmem:[#allocation5 + $0x40] sm:$0xff] }
 0x379   : > { %v4075_v5 = vpop.f32.mrb[0].mxu0 }
 0x37a   : > { %v4112_v6 = vadd.f32 %v4105_v19, %v4075_v5  ;;  %v4077_v20 = vpop.f32.mrb[1].mxu0 }
 0x37b   : > { %v4113_v27 = vadd.f32 %v4109_v61, %v4077_v20 }
 0x37c   : > { %v4118_v34 = vmax.f32 %v4112_v6, 0.0 }
 0x37d   : > { %v4119_v36 = vmax.f32 %v4113_v27, 0.0  ;;  %v4082_v57 = vpop.f32.mrb[2].mxu0  ;;  %v4699_v27 = vld [vmem:[%s25087_s4] sm:$0xff] }
 0x37e   : > { %v4135_v2 = vand.u32 4294901760, %v4118_v34  ;;  %v4114_v54 = vadd.f32 %v4105_v19, %v4082_v57  ;;  %v4084_v41 = vpop.f32.mrb[3].mxu0 }
 0x37f   : > { %v4133_v25 = vand.u32 4294901760, %v4119_v36  ;;  %v4115_v58 = vadd.f32 %v4109_v61, %v4084_v41 }
 0x380   : > { %v4233_v59 = vsub.f32 %v4118_v34, %v4135_v2  ;;  %v4120_v52 = vmax.f32 %v4114_v54, 0.0  ;;  %v4702_v34 = vsel %vm4126_vm5, %v4699_v27, 0 }
 0x381   : > { %v4227_v4 = vsub.f32 %v4119_v36, %v4133_v25  ;;  %v4121_v1 = vmax.f32 %v4115_v58, 0.0  ;;  %v4089_v23 = vpop.f32.mrb[4].mxu0  ;;  %v4700_v36 = vld [vmem:[%s25087_s4 + $0x8] sm:$0xf]  ;;  %v21722_v57 = vand.u32 4294901760, %v4702_v34 }
 0x382   : > { %v4234_v26 = vand.u32 4294901760, %v4233_v59  ;;  %v4139_v28 = vand.u32 4294901760, %v4120_v52  ;;  %v4116_v29 = vadd.f32 %v4105_v19, %v4089_v23  ;;  %v4091_v8 = vpop.f32.mrb[5].mxu0  ;;  %v25172_v23 = vmov 0.0|0.0  }
 0x383   : > { %v4228_v44 = vand.u32 4294901760, %v4227_v4  ;;  %v4137_v3 = vand.u32 4294901760, %v4121_v1  ;;  %v4117_v45 = vadd.f32 %v4109_v61, %v4091_v8  ;;  %v5281_v8 = vld [vmem:[#allocation5 + $0x20] sm:$0xff]  ;;  %18394 = vmatprep.subr.bf16.mxu0 %v25172_v23 }
 0x384   : > { %v21637_v35 = vpack.c.bf16 %v4139_v28, %v4135_v2  ;;  %v4245_v46 = vsub.f32 %v4120_v52, %v4139_v28  ;;  %v4122_v38 = vmax.f32 %v4116_v29, 0.0  ;;  %v4235_v51 = vsub.f32 %v4233_v59, %v4234_v26  ;;  %v5280_v28 = vld [vmem:[#allocation5 + $0x18] sm:$0xff] }
 0x385   : > { %v21642_v17 = vpack.c.bf16 %v4137_v3, %v4133_v25  ;;  %v4239_v43 = vsub.f32 %v4121_v1, %v4137_v3  ;;  %v4123_v48 = vmax.f32 %v4117_v45, 0.0  ;;  %v4229_v7 = vsub.f32 %v4227_v4, %v4228_v44  ;;  %v5279_v1 = vld [vmem:[#allocation5 + $0x10] sm:$0xff] }
 0x386   : > { %v4246_v53 = vand.u32 4294901760, %v4245_v46  ;;  %v21645_v22 = vand.u32 4294901760, %v4122_v38  ;;  %v21647_v11 = vpack.c.bf16 %v4245_v46, %v4233_v59  ;;  %v4236_v13 = vand.u32 4294901760, %v4235_v51  ;;  %v5286_v51 = vld [vmem:[#allocation5 + $0x48] sm:$0xff] }
 0x387   : > { %v4240_v12 = vand.u32 4294901760, %v4239_v43  ;;  %v21649_v39 = vand.u32 4294901760, %v4123_v48  ;;  %18023 = vmatprep.subr.bf16.mxu1 %v21642_v17  ;;  %v21652_v50 = vpack.c.bf16 %v4239_v43, %v4227_v4  ;;  %v4230_v49 = vand.u32 4294901760, %v4229_v7  ;;  %v5278_v4 = vld [vmem:[#allocation5 + $0x8] sm:$0xff] }
 0x388   : > { %v4247_v24 = vsub.f32 %v4245_v46, %v4246_v53  ;;  %v21655_v40 = vsub.f32 %v4122_v38, %v21645_v22  ;;  %18025 = vmatpush1.bf16.msra.mxu1 %v21637_v35  ;;  %v21658_v21 = vpack.c.bf16 %v4246_v53, %v4234_v26  ;;  %v4779_v2 = vsub.f32 %v4702_v34, %v21722_v57  ;;  %v5283_v46 = vld [vmem:[#allocation5 + $0x30] sm:$0xff]  ;;  %v5284_v38 = vld [vmem:[#allocation5 + $0x38] sm:$0xff] }
 0x389   : > { %v21661_v30 = vsub.f32 %v4123_v48, %v21649_v39  ;;  %4142 = vmatprep.subr.mxu1 %v21649_v39  ;;  %v4241_v31 = vsub.f32 %v4239_v43, %v4240_v12  ;;  %v21667_v10 = vpack.c.bf16 %v4240_v12, %v4228_v44  ;;  %v5306_v26 = vand.u32 4294901760, %v5278_v4  ;;  %v5282_v44 = vld [vmem:[#allocation5 + $0x28] sm:$0xff] }
 0x38a   : > { %v4248_v62 = vand.u32 4294901760, %v4247_v24  ;;  %v21670_v16 = vand.u32 4294901760, %v21655_v40  ;;  %v4780_v41 = vand.u32 4294901760, %v4779_v2  ;;  %v5309_v29 = vand.u32 4294901760, %v5279_v1 }
 0x38b   : > { %v4242_v60 = vand.u32 4294901760, %v4241_v31  ;;  %v21673_v32 = vand.u32 4294901760, %v21661_v30  ;;  %v5312_v3 = vand.u32 4294901760, %v5280_v28  ;;  %v5315_v45 = vand.u32 4294901760, %v5281_v8 }
 0x38c   : > { %4144 = vmatpush1.msra.mxu1 %v21645_v22  ;;  %v21676_v19 = vpack.c.bf16 %v4248_v62, %v4236_v13  ;;  %v4259_v6 = vsub.f32 %v21655_v40, %v21670_v16  ;;  %v4781_v58 = vsub.f32 %v4779_v2, %v4780_v41  ;;  %v21789_v48 = vsub.f32 %v5278_v4, %v5306_v26  ;;  %v5287_v13 = vld [vmem:[#allocation5 + $0x50] sm:$0xff]  ;;  %v5288_v62 = vld [vmem:[#allocation5 + $0x58] sm:$0xff] }
 0x38d   : > { %4209 = vmatmul.mubr.f32.vlgmr.msra.gmra.mrb[0].mxu1 %v4208_v18  ;;  %v21678_v61 = vpack.c.bf16 %v4242_v60, %v4230_v49  ;;  %v4253_v5 = vsub.f32 %v21661_v30, %v21673_v32  ;;  %v21793_v53 = vpack.c.bf16 %v5312_v3, %v5309_v29  ;;  %v5324_v7 = vand.u32 4294901760, %v5284_v38 }
 0x38e   : > { %4214 = vmatprep.mubr.f32.mxu1 %v25125_v0  ;;  %v4260_v37 = vand.u32 4294901760, %v4259_v6  ;;  %v4782_v52 = vand.u32 4294901760, %v4781_v58  ;;  %v5330_v24 = vand.u32 4294901760, %v5286_v51  ;;  %v5336_v49 = vand.u32 4294901760, %v5288_v62  ;;  %v5291_v6 = vld [vmem:[#allocation5 + $0x70] sm:$0xff] }
 0x38f   : > { %18027 = vmatprep.subr.bf16.mxu1 %v21678_v61  ;;  %v21686_v20 = vand.u32 4294901760, %v4253_v5  ;;  %v21805_v18 = vsub.f32 %v5284_v38, %v5324_v7 }
 0x390   : > { %18029 = vmatpush1.bf16.msra.mxu1 %v21676_v19  ;;  %v21841_v58 = vsub.f32 %v5288_v62, %v5336_v49 }
 0x391   : > { %4220 = vmatmul.mubr.f32.gmra.mrb[2].mxu1 %v4219_v47  ;;  %4255 = vmatprep.subr.mxu1 %v21686_v20 }
 0x392   : > { %4320 = vmatprep.mubr.f32.mxu1 %v25125_v0 }
 0x394   : > { %4261 = vmatpush1.msra.mxu1 %v4260_v37 }
 0x395   : > { %4322 = vmatmul.mubr.f32.vlgmr.msra.gmra.mrb[0].mxu1 %v21625_v9  ;;  %18031 = vmatprep.subr.bf16.mxu1 %v21652_v50 }
 0x396   : > { %18033 = vmatpush1.bf16.msra.mxu1 %v21647_v11  ;;  %4327 = vmatprep.mubr.f32.mxu1 %v25125_v0 }
 0x397   : > { %4349 = vmatprep.subr.mxu1 %v21661_v30 }
 0x399   : > { %4329 = vmatmul.mubr.f32.gmra.mrb[2].mxu1 %v21631_v33 }
 0x39a   : > { %4352 = vmatpush1.msra.mxu1 %v21655_v40  ;;  %4411 = vmatprep.mubr.f32.mxu1 %v25125_v0 }
 0x39b   : > { %18035 = vmatprep.subr.bf16.mxu1 %v21642_v17 }
 0x39d   : > { %4414 = vmatmul.mubr.f32.vlgmr.msra.gmra.mrb[0].mxu1 %v21629_v63  ;;  %v4705_v63 = vsel %vm4126_vm5, %v4700_v36, 0  ;;  %v5293_v36 = vld [vmem:[#allocation5 + $0x80] sm:$0xff] }
 0x39e   : > { %18037 = vmatpush1.bf16.msra.mxu1 %v21637_v35  ;;  %4419 = vmatprep.mubr.f32.mxu1 %v25125_v0  ;;  %v21730_v54 = vand.u32 4294901760, %v4705_v63 }
 0x39f   : > { %4437 = vmatprep.subr.mxu1 %v21649_v39 }
 0x3a0   : > { %v4790_v25 = vsub.f32 %v4705_v63, %v21730_v54  ;;  %v5351_v63 = vand.u32 4294901760, %v5293_v36 }
 0x3a1   : > { %4422 = vmatmul.mubr.f32.gmra.mrb[2].mxu1 %v21635_v55 }
 0x3a2   : > { %4439 = vmatpush1.msra.mxu1 %v21645_v22  ;;  %4498 = vmatprep.mubr.f32.mxu1 %v25125_v0  ;;  %v4791_v59 = vand.u32 4294901760, %v4790_v25  ;;  %v21853_v4 = vsub.f32 %v5293_v36, %v5351_v63 }
 0x3a3   : > { %18039 = vmatprep.subr.bf16.mxu1 %v21667_v10 }
 0x3a5   : > { %4502 = vmatmul.mubr.f32.vlgmr.msra.gmra.mrb[0].mxu1 %v4206_v56  ;;  %v4792_v56 = vsub.f32 %v4790_v25, %v4791_v59 }
 0x3a6   : > { %18041 = vmatpush1.bf16.msra.mxu1 %v21658_v21  ;;  %4507 = vmatprep.mubr.f32.mxu1 %v25125_v0 }
 0x3a7   : > { %4536 = vmatprep.subr.mxu1 %v21673_v32 }
 0x3a9   : > { %4511 = vmatmul.mubr.f32.gmra.mrb[2].mxu1 %v4217_v14  ;;  %v21791_v14 = vsub.f32 %v5279_v1, %v5309_v29 }
 0x3aa   : > { %4540 = vmatpush1.msra.mxu1 %v21670_v16  ;;  %4599 = vmatprep.mubr.f32.mxu1 %v25125_v0 }
 0x3ab   : > { %18043 = vmatprep.subr.bf16.mxu1 %v21642_v17 }
 0x3ad   : > { %4601 = vmatmul.mubr.f32.vlgmr.msra.gmra.mrb[0].mxu1 %v21625_v9 }
 0x3ae   : > { %18045 = vmatpush1.bf16.msra.mxu1 %v21637_v35  ;;  %4606 = vmatprep.mubr.f32.mxu1 %v25125_v0 }
 0x3af   : > { %4623 = vmatprep.subr.mxu1 %v21649_v39 }
 0x3b1   : > { %4608 = vmatmul.mubr.f32.gmra.mrb[2].mxu1 %v21631_v33 }
 0x3b2   : > { %4625 = vmatpush1.msra.mxu1 %v21645_v22  ;;  %4684 = vmatprep.mubr.f32.mxu1 %v25125_v0 }
 0x3b3   : > { %18047 = vmatprep.subr.bf16.mxu1 %v21642_v17 }
 0x3b5   : > { %4686 = vmatmul.mubr.f32.vlgmr.msra.gmra.mrb[0].mxu1 %v21625_v9  ;;  %v4793_v9 = vand.u32 4294901760, %v4792_v56 }
 0x3b6   : > { %18049 = vmatpush1.bf16.msra.mxu1 %v21637_v35  ;;  %4691 = vmatprep.mubr.f32.mxu1 %v25125_v0 }
 0x3b7   : > { %4716 = vmatprep.subr.mxu1 %v21649_v39 }
 0x3b9   : > { %4693 = vmatmul.mubr.f32.gmra.mrb[2].mxu1 %v21631_v33  ;;  %v5277_v33 = vld [vmem:[#allocation5] sm:$0xff] }
 0x3ba   : > { %4718 = vmatpush1.msra.mxu1 %v21645_v22  ;;  %4777 = vmatprep.mubr.f32.mxu1 %v25125_v0  ;;  %v5303_v55 = vand.u32 4294901760, %v5277_v33 }
 0x3bb   : > { %18051 = vmatprep.subr.bf16.mxu1 %v21678_v61 }
 0x3bc   : > { %v21787_v43 = vsub.f32 %v5277_v33, %v5303_v55 }
 0x3bd   : > { %4783 = vmatmul.mubr.f32.vlgmr.msra.gmra.mrb[4].mxu1 %v4782_v52 }
 0x3be   : > { %18053 = vmatpush1.bf16.msra.mxu1 %v21676_v19  ;;  %4788 = vmatprep.mubr.f32.mxu1 %v25125_v0  ;;  %v5290_v19 = vld [vmem:[#allocation5 + $0x68] sm:$0xff] }
 0x3bf   : > { %4829 = vmatprep.subr.mxu1 %v21686_v20  ;;  %v5342_v47 = vand.u32 4294901760, %v5290_v19  ;;  %v5292_v20 = vld [vmem:[#allocation5 + $0x78] sm:$0xff] }
 0x3c0   : > { %v5348_v27 = vand.u32 4294901760, %v5292_v20 }
 0x3c1   : > { %4794 = vmatmul.mubr.f32.gmra.mrb[6].mxu1 %v4793_v9  ;;  %v21845_v52 = vsub.f32 %v5290_v19, %v5342_v47 }
 0x3c2   : > { %4835 = vmatpush1.msra.mxu1 %v4260_v37  ;;  %4894 = vmatprep.mubr.f32.mxu1 %v25125_v0  ;;  %v5345_v37 = vand.u32 4294901760, %v5291_v6  ;;  %v21849_v9 = vsub.f32 %v5292_v20, %v5348_v27 }
 0x3c3   : > { %18055 = vmatprep.subr.bf16.mxu1 %v21652_v50  ;;  %v5327_v50 = vand.u32 4294901760, %v5285_v15 }
 0x3c4   : > { %v21833_v34 = vpack.c.bf16 %v5348_v27, %v5345_v37  ;;  %v21847_v56 = vsub.f32 %v5291_v6, %v5345_v37 }
 0x3c5   : > { %4896 = vmatmul.mubr.f32.vlgmr.msra.gmra.mrb[4].mxu1 %v21722_v57 }
 0x3c6   : > { %18057 = vmatpush1.bf16.msra.mxu1 %v21647_v11  ;;  %4901 = vmatprep.mubr.f32.mxu1 %v25125_v0  ;;  %v21797_v11 = vsub.f32 %v5281_v8, %v5315_v45 }
 0x3c7   : > { %4923 = vmatprep.subr.mxu1 %v21661_v30  ;;  %v21809_v30 = vsub.f32 %v5286_v51, %v5330_v24 }
 0x3c8   : > { %v25140_v38 = vand.u32 4294901760, %v21797_v11 }
 0x3c9   : > { %4903 = vmatmul.mubr.f32.gmra.mrb[6].mxu1 %v21730_v54  ;;  %v25135_v20 = vand.u32 4294901760, %v21809_v30 }
 0x3ca   : > { %4926 = vmatpush1.msra.mxu1 %v21655_v40  ;;  %4985 = vmatprep.mubr.f32.mxu1 %v25125_v0 }
 0x3cb   : > { %18059 = vmatprep.subr.bf16.mxu1 %v21642_v17  ;;  %v5482_v36 = vsub.f32 %v21809_v30, %v25135_v20 }
 0x3cd   : > { %4988 = vmatmul.mubr.f32.vlgmr.msra.gmra.mrb[4].mxu1 %v4779_v2 }
 0x3ce   : > { %18061 = vmatpush1.bf16.msra.mxu1 %v21637_v35  ;;  %4993 = vmatprep.mubr.f32.mxu1 %v25125_v0 }
 0x3cf   : > { %5011 = vmatprep.subr.mxu1 %v21649_v39 }
 0x3d1   : > { %4996 = vmatmul.mubr.f32.gmra.mrb[6].mxu1 %v4790_v25 }
 0x3d2   : > { %5013 = vmatpush1.msra.mxu1 %v21645_v22  ;;  %5072 = vmatprep.mubr.f32.mxu1 %v25125_v0 }
 0x3d3   : > { %18063 = vmatprep.subr.bf16.mxu1 %v21667_v10  ;;  %v21820_v10 = vpack.c.bf16 %v5330_v24, %v5327_v50 }
 0x3d5   : > { %5076 = vmatmul.mubr.f32.vlgmr.msra.gmra.mrb[4].mxu1 %v4780_v41  ;;  %v25143_v41 = vand.u32 4294901760, %v21789_v48 }
 0x3d6   : > { %18065 = vmatpush1.bf16.msra.mxu1 %v21658_v21  ;;  %5081 = vmatprep.mubr.f32.mxu1 %v25125_v0  ;;  %v21807_v21 = vsub.f32 %v5285_v15, %v5327_v50 }
 0x3d7   : > { %5110 = vmatprep.subr.mxu1 %v21673_v32  ;;  %v5289_v32 = vld [vmem:[#allocation5 + $0x60] sm:$0xff] }
 0x3d8   : > { %v5339_v61 = vand.u32 4294901760, %v5289_v32  ;;  %v25136_v6 = vand.u32 4294901760, %v21807_v21 }
 0x3d9   : > { %5085 = vmatmul.mubr.f32.gmra.mrb[6].mxu1 %v4791_v59 }
 0x3da   : > { %5114 = vmatpush1.msra.mxu1 %v21670_v16  ;;  %5173 = vmatprep.mubr.f32.mxu1 %v25125_v0  ;;  %v5333_v16 = vand.u32 4294901760, %v5287_v13  ;;  %v21829_v5 = vpack.c.bf16 %v5342_v47, %v5339_v61  ;;  %v21843_v59 = vsub.f32 %v5289_v32, %v5339_v61  ;;  %v5475_v27 = vsub.f32 %v21807_v21, %v25136_v6 }
 0x3db   : > { %18067 = vmatprep.subr.bf16.mxu1 %v21642_v17  ;;  %v21785_v17 = vpack.c.bf16 %v5306_v26, %v5303_v55  ;;  %v5426_v26 = vsub.f32 %v21789_v48, %v25143_v41 }
 0x3dc   : > { %v21825_v60 = vpack.c.bf16 %v5336_v49, %v5333_v16  ;;  %v21839_v25 = vsub.f32 %v5287_v13, %v5333_v16  ;;  %v25137_v16 = vand.u32 4294901760, %v21805_v18 }
 0x3dd   : > { %5175 = vmatmul.mubr.f32.vlgmr.msra.gmra.mrb[4].mxu1 %v21722_v57 }
 0x3de   : > { %18069 = vmatpush1.bf16.msra.mxu1 %v21637_v35  ;;  %5180 = vmatprep.mubr.f32.mxu1 %v25125_v0  ;;  %v5318_v35 = vand.u32 4294901760, %v5282_v44  ;;  %v5468_v19 = vsub.f32 %v21805_v18, %v25137_v16 }
 0x3df   : > { %5197 = vmatprep.subr.mxu1 %v21649_v39  ;;  %v5321_v39 = vand.u32 4294901760, %v5283_v46 }
 0x3e0   : > { %v21800_v12 = vsub.f32 %v5282_v44, %v5318_v35  ;;  %v21812_v31 = vpack.c.bf16 %v5318_v35, %v5315_v45  ;;  %v5427_v44 = vand.u32 4294901760, %v5426_v26  ;;  %v5469_v47 = vand.u32 4294901760, %v5468_v19 }
 0x3e1   : > { %5182 = vmatmul.mubr.f32.gmra.mrb[6].mxu1 %v21730_v54  ;;  %v21803_v40 = vsub.f32 %v5283_v46, %v5321_v39  ;;  %v21816_v42 = vpack.c.bf16 %v5324_v7, %v5321_v39  ;;  %v5447_v39 = vsub.f32 %v21797_v11, %v25140_v38  ;;  %v25130_v19 = vand.u32 4294901760, %v21847_v56 }
 0x3e2   : > { %5199 = vmatpush1.msra.mxu1 %v21645_v22  ;;  %5258 = vmatprep.mubr.f32.mxu1 %v25125_v0  ;;  %v21795_v22 = vsub.f32 %v5280_v28, %v5312_v3  ;;  %v25142_v28 = vand.u32 4294901760, %v21791_v14  ;;  %v25139_v15 = vand.u32 4294901760, %v21800_v12 }
 0x3e3   : > { %18070 = vmatprep.subr.bf16.mxu1 %v25172_v23  ;;  %v5448_v24 = vand.u32 4294901760, %v5447_v39  ;;  %v25138_v62 = vand.u32 4294901760, %v21803_v40 }
 0x3e4   : > { %v25141_v29 = vand.u32 4294901760, %v21795_v22  ;;  %v5433_v3 = vsub.f32 %v21791_v14, %v25142_v28  ;;  %v5454_v7 = vsub.f32 %v21800_v12, %v25139_v15 }
 0x3e5   : > { %5260 = vmatmul.mubr.f32.vlgmr.msra.gmra.mrb[4].mxu1 %v21722_v57  ;;  %v5294_v57 = vld [vmem:[#allocation5 + $0x88] sm:$0xff]  ;;  %v5461_v32 = vsub.f32 %v21803_v40, %v25138_v62 }
 0x3e6   : > { %5265 = vmatprep.mubr.f32.mxu1 %v25125_v0  ;;  %18072 = vmatpush1.bf16.msra.mxu1 %v21785_v17  ;;  %v5354_v2 = vand.u32 4294901760, %v5294_v57  ;;  %v5440_v45 = vsub.f32 %v21795_v22, %v25141_v29  ;;  %v5434_v46 = vand.u32 4294901760, %v5433_v3  ;;  %v5455_v13 = vand.u32 4294901760, %v5454_v7 }
 0x3e7   : > { %18073 = vmatprep.subr.bf16.mxu1 %v25172_v23  ;;  %v5462_v61 = vand.u32 4294901760, %v5461_v32  ;;  %v18137_v0 = vpack.c.bf16 %v21809_v30, %v21807_v21 }
 0x3e8   : > { %v21851_v33 = vpack.c.bf16 %v5354_v2, %v5351_v63  ;;  %v21855_v1 = vsub.f32 %v5294_v57, %v5354_v2  ;;  %v5441_v51 = vand.u32 4294901760, %v5440_v45  ;;  %v21887_v49 = vpack.c.bf16 %v5455_v13, %v5448_v24 }
 0x3e9   : > { %5267 = vmatmul.mubr.f32.gmra.mrb[6].mxu1 %v21730_v54  ;;  %v25144_v54 = vand.u32 4294901760, %v21787_v43  ;;  %v21897_v37 = vpack.c.bf16 %v5469_v47, %v5462_v61  ;;  %v5476_v57 = vand.u32 4294901760, %v5475_v27  ;;  %v5483_v63 = vand.u32 4294901760, %v5482_v36 }
 0x3ea   : > { %18075 = vmatpush1.bf16.msra.mxu1 %v21793_v53  ;;  %v21883_v50 = vpack.c.bf16 %v5441_v51, %v5434_v46  ;;  %v25134_v2 = vand.u32 4294901760, %v21839_v25  ;;  %v25132_v46 = vand.u32 4294901760, %v21843_v59  ;;  %v25131_v51 = vand.u32 4294901760, %v21845_v52 }
 0x3eb   : > { %18076 = vmatprep.subr.bf16.mxu1 %v25172_v23  ;;  %v5419_v55 = vsub.f32 %v21787_v43, %v25144_v54  ;;  %v21907_v26 = vpack.c.bf16 %v5483_v63, %v5476_v57  ;;  %v25129_v61 = vand.u32 4294901760, %v21849_v9  ;;  %v5517_v27 = vsub.f32 %v21847_v56, %v25130_v19 }
 0x3ec   : > { %v5503_v7 = vsub.f32 %v21843_v59, %v25132_v46  ;;  %v5510_v24 = vsub.f32 %v21845_v52, %v25131_v51 }
 0x3ed   : > { %v5420_v8 = vand.u32 4294901760, %v5419_v55  ;;  %v25133_v55 = vand.u32 4294901760, %v21841_v58  ;;  %v5524_v36 = vsub.f32 %v21849_v9, %v25129_v61  ;;  %v5518_v57 = vand.u32 4294901760, %v5517_v27 }
 0x3ee   : > { %18078 = vmatpush1.bf16.msra.mxu1 %v21812_v31  ;;  %v5504_v13 = vand.u32 4294901760, %v5503_v7  ;;  %v5511_v32 = vand.u32 4294901760, %v5510_v24  ;;  %v18125_v27 = vpack.c.bf16 %v21789_v48, %v21787_v43 }
 0x3ef   : > { %18079 = vmatprep.subr.bf16.mxu1 %v25172_v23  ;;  %v21873_v35 = vpack.c.bf16 %v5427_v44, %v5420_v8  ;;  %v5489_v8 = vsub.f32 %v21839_v25, %v25134_v2  ;;  %v5496_v44 = vsub.f32 %v21841_v58, %v25133_v55  ;;  %v5525_v63 = vand.u32 4294901760, %v5524_v36 }
 0x3f0   : > { %v21927_v47 = vpack.c.bf16 %v5511_v32, %v5504_v13  ;;  %v18128_v36 = vpack.c.bf16 %v21795_v22, %v21791_v14 }
 0x3f1   : > { %v5490_v3 = vand.u32 4294901760, %v5489_v8  ;;  %v5497_v45 = vand.u32 4294901760, %v5496_v44  ;;  %v25128_v8 = vand.u32 4294901760, %v21853_v4  ;;  %v25127_v44 = vand.u32 4294901760, %v21855_v1 }
 0x3f2   : > { %18081 = vmatpush1.bf16.msra.mxu1 %v21816_v42 }
 0x3f3   : > { %18082 = vmatprep.subr.bf16.mxu1 %v25172_v23  ;;  %v21917_v39 = vpack.c.bf16 %v5497_v45, %v5490_v3  ;;  %v21937_v3 = vpack.c.bf16 %v5525_v63, %v5518_v57  ;;  %v5531_v45 = vsub.f32 %v21853_v4, %v25128_v8  ;;  %v5538_v7 = vsub.f32 %v21855_v1, %v25127_v44 }
 0x3f4   : > { %v18131_v57 = vpack.c.bf16 %v21800_v12, %v21797_v11  ;;  %v18134_v63 = vpack.c.bf16 %v21805_v18, %v21803_v40 }
 0x3f5   : > { %v5532_v24 = vand.u32 4294901760, %v5531_v45  ;;  %v5539_v13 = vand.u32 4294901760, %v5538_v7  ;;  %v18140_v45 = vpack.c.bf16 %v21841_v58, %v21839_v25  ;;  %v18143_v7 = vpack.c.bf16 %v21845_v52, %v21843_v59 }
 0x3f6   : > { %18084 = vmatpush1.bf16.msra.mxu1 %v21820_v10 }
 0x3f7   : > { %18085 = vmatprep.subr.bf16.mxu1 %v25172_v23  ;;  %v21945_v32 = vpack.c.bf16 %v5539_v13, %v5532_v24  ;;  %v18146_v24 = vpack.c.bf16 %v21849_v9, %v21847_v56 }
 0x3fa   : > { %18087 = vmatpush1.bf16.msra.mxu1 %v21825_v60 }
 0x3fb   : > { %18088 = vmatprep.subr.bf16.mxu1 %v25172_v23 }
 0x3fe   : > { %18090 = vmatpush1.bf16.msra.mxu1 %v21829_v5 }
 0x3ff   : > { %18091 = vmatprep.subr.bf16.mxu1 %v25172_v23 }
 0x402   : > { %18093 = vmatpush1.bf16.msra.mxu1 %v21833_v34 }
 0x403   : > { %18094 = vmatprep.subr.bf16.mxu1 %v25172_v23 }
 0x406   : > { %18096 = vmatpush1.bf16.msra.mxu1 %v21851_v33 }
 0x407   : > { %18097 = vmatprep.subr.bf16.mxu1 %v25172_v23 }
 0x488   : > { %v4687_v13 = vpop.f32.mrb[0].mxu1 }
 0x489   : > { %v4689_v44 = vpop.f32.mrb[1].mxu1 }
 0x48c   : > { %v4694_v61 = vpop.f32.mrb[2].mxu1 }
 0x48d   : > { %v4696_v19 = vpop.f32.mrb[3].mxu1 }
 0x4b8   : > { %v5261_v51 = vpop.f32.mrb[4].mxu1 }
 0x4b9   : > { %v5273_v46 = vmax.f32 %v4687_v13, %v5261_v51  ;;  %v5263_v55 = vpop.f32.mrb[5].mxu1 }
 0x4ba   : > { %v5274_v2 = vmax.f32 %v4689_v44, %v5263_v55 }
 0x4bb   : > { %v21965_v20 = vand.u32 4294901760, %v5273_v46 }
 0x4bc   : > { %v5297_v6 = vsel %vm5295_vm6, %v5274_v2, 0  ;;  %v5268_v16 = vpop.f32.mrb[6].mxu1 }
 0x4bd   : > { %v21968_v62 = vsub.f32 %v5273_v46, %v21965_v20  ;;  %v21970_v15 = vand.u32 4294901760, %v5297_v6  ;;  %v5275_v38 = vmax.f32 %v4694_v61, %v5268_v16  ;;  %v5270_v29 = vpop.f32.mrb[7].mxu1 }
 0x4be   : > { %v5276_v28 = vmax.f32 %v4696_v19, %v5270_v29 }
 0x4bf   : > { %v21973_v41 = vand.u32 4294901760, %v21968_v62  ;;  %v21976_v51 = vsub.f32 %v5297_v6, %v21970_v15  ;;  %v21978_v13 = vand.u32 4294901760, %v5275_v38 }
 0x4c0   : > { %v5300_v55 = vsel %vm5295_vm6, %v5276_v28, 0 }
 0x4c1   : > { %v21981_v2 = vsub.f32 %v5275_v38, %v21978_v13  ;;  %v21983_v44 = vand.u32 4294901760, %v5300_v55  ;;  %v21986_v46 = vand.u32 4294901760, %v21976_v51  ;;  %v5393_v29 = vsub.f32 %v21968_v62, %v21973_v41 }
 0x4c3   : > { %v21991_v16 = vsub.f32 %v5300_v55, %v21983_v44  ;;  %v5387_v6 = vsub.f32 %v21976_v51, %v21986_v46  ;;  %v21996_v19 = vand.u32 4294901760, %v21981_v2  ;;  %v22003_v61 = vand.u32 4294901760, %v5393_v29 }
 0x4c5   : > { %25337 = vst [vmem:[#allocation35_spill] sm:$0xff] %v21996_v19  ;;  %v21998_v28 = vand.u32 4294901760, %v5387_v6  ;;  %v22001_v38 = vand.u32 4294901760, %v21991_v16  ;;  %v5408_v54 = vsub.f32 %v21981_v2, %v21996_v19 }
 0x4c7   : > { %5389 = vmatprep.mubr.f32.mxu1 %v21998_v28  ;;  %v5402_v55 = vsub.f32 %v21991_v16, %v22001_v38  ;;  %v22015_v6 = vand.u32 4294901760, %v5408_v54  ;;  %v25339_v54 = vand.u32 4294901760, %v21787_v43  ;;  %v25343_v43 = vand.u32 4294901760, %v21797_v11 }
 0x4c8   : > { %5395 = vmatmul.mubr.f32.vlgmr.msra.gmra.mrb[8].mxu1 %v22003_v61  ;;  %v25349_v11 = vand.u32 4294901760, %v21839_v25  ;;  %v25355_v25 = vand.u32 4294901760, %v21853_v4 }
 0x4c9   : > { %18099 = vmatpush1.bf16.msra.mxu1 %v21873_v35  ;;  %v22012_v8 = vand.u32 4294901760, %v5402_v55  ;;  %v25340_v35 = vand.u32 4294901760, %v21789_v48  ;;  %v25344_v48 = vand.u32 4294901760, %v21800_v12  ;;  %v25350_v12 = vand.u32 4294901760, %v21841_v58 }
 0x4ca   : > { %18100 = vmatprep.subr.bf16.mxu1 %v25172_v23  ;;  %v25356_v58 = vand.u32 4294901760, %v21855_v1 }
 0x4cb   : > { %5404 = vmatprep.mubr.f32.mxu1 %v22012_v8 }
 0x4cc   : > { %5410 = vmatmul.mubr.f32.gmra.mrb[10].mxu1 %v22015_v6 }
 0x4cd   : > { %18102 = vmatpush1.bf16.msra.mxu1 %v21883_v50  ;;  %5570 = vmatprep.mubr.f32.mxu1 %v21970_v15  ;;  %v18179_v50 = vpack.c.bf16 %v25340_v35, %v25339_v54  ;;  %v6047_v54 = vld [vmem:[#allocation7 + $0x48] sm:$0xff] }
 0x4ce   : > { %18103 = vmatprep.subr.bf16.mxu1 %v25172_v23 }
 0x4d1   : > { %18105 = vmatpush1.bf16.msra.mxu1 %v21887_v49  ;;  %v25341_v49 = vand.u32 4294901760, %v21791_v14  ;;  %v25345_v14 = vand.u32 4294901760, %v21803_v40  ;;  %v25351_v40 = vand.u32 4294901760, %v21843_v59  ;;  %v6040_v59 = vld [vmem:[#allocation7 + $0x10] sm:$0xff] }
 0x4d2   : > { %18106 = vmatprep.subr.bf16.mxu1 %v25172_v23 }
 0x4d5   : > { %18108 = vmatpush1.bf16.msra.mxu1 %v21897_v37  ;;  %v25342_v37 = vand.u32 4294901760, %v21795_v22  ;;  %v25346_v22 = vand.u32 4294901760, %v21805_v18  ;;  %v25352_v18 = vand.u32 4294901760, %v21845_v52 }
 0x4d6   : > { %18109 = vmatprep.subr.bf16.mxu1 %v25172_v23 }
 0x4d9   : > { %18111 = vmatpush1.bf16.msra.mxu1 %v21907_v26  ;;  %v18182_v26 = vpack.c.bf16 %v25342_v37, %v25341_v49  ;;  %v6084_v49 = vand.u32 4294901760, %v6047_v54  ;;  %v6048_v37 = vld [vmem:[#allocation7 + $0x50] sm:$0xff] }
 0x4da   : > { %18112 = vmatprep.subr.bf16.mxu1 %v25172_v23 }
 0x4dd   : > { %18114 = vmatpush1.bf16.msra.mxu1 %v21917_v39  ;;  %v18185_v39 = vpack.c.bf16 %v25344_v48, %v25343_v43  ;;  %v6087_v43 = vand.u32 4294901760, %v6048_v37 }
 0x4de   : > { %18115 = vmatprep.subr.bf16.mxu1 %v25172_v23 }
 0x4e1   : > { %18117 = vmatpush1.bf16.msra.mxu1 %v21927_v47  ;;  %v18188_v47 = vpack.c.bf16 %v25346_v22, %v25345_v14  ;;  %v22193_v14 = vld [vmem:[#allocation7 + $0x68] sm:$0xff] }
 0x4e2   : > { %18118 = vmatprep.subr.bf16.mxu1 %v25172_v23 }
 0x4e5   : > { %18120 = vmatpush1.bf16.msra.mxu1 %v21937_v3  ;;  %v25347_v3 = vand.u32 4294901760, %v21807_v21  ;;  %v25353_v21 = vand.u32 4294901760, %v21847_v56 }
 0x4e6   : > { %18121 = vmatprep.subr.bf16.mxu1 %v25172_v23 }
 0x4e9   : > { %18123 = vmatpush1.bf16.msra.mxu1 %v21945_v32  ;;  %v25348_v32 = vand.u32 4294901760, %v21809_v30  ;;  %v25354_v30 = vand.u32 4294901760, %v21849_v9  ;;  %v6043_v9 = vld [vmem:[#allocation7 + $0x28] sm:$0xff] }
 0x4ea   : > { %18124 = vmatprep.subr.bf16.mxu1 %v25172_v23 }
 0x4ec   : > { %5572 = vmatmul.mubr.f32.vlgmr.msra.gmra.mrb[8].mxu1 %v21965_v20 }
 0x4ed   : > { %5577 = vmatprep.mubr.f32.mxu1 %v21983_v44  ;;  %18126 = vmatpush1.bf16.msra.mxu1 %v18125_v27  ;;  %v18191_v27 = vpack.c.bf16 %v25348_v32, %v25347_v3 }
 0x4ee   : > { %18127 = vmatprep.subr.bf16.mxu1 %v25172_v23 }
 0x4f0   : > { %5579 = vmatmul.mubr.f32.gmra.mrb[10].mxu1 %v21978_v13 }
 0x4f1   : > { %18129 = vmatpush1.bf16.msra.mxu1 %v18128_v36  ;;  %5686 = vmatprep.mubr.f32.mxu1 %v21976_v51  ;;  %v18194_v36 = vpack.c.bf16 %v25350_v12, %v25349_v11  ;;  %v22204_v11 = vld [vmem:[#allocation7 + $0x70] sm:$0xff]  ;;  %v22206_v12 = vld [vmem:[#allocation7 + $0x78] sm:$0xff] }
 0x4f2   : > { %18130 = vmatprep.subr.bf16.mxu1 %v25172_v23 }
 0x4f5   : > { %18132 = vmatpush1.bf16.msra.mxu1 %v18131_v57  ;;  %v18197_v57 = vpack.c.bf16 %v25352_v18, %v25351_v40  ;;  %v25150_v18 = vand.u32 4294901760, %v22204_v11 }
 0x4f6   : > { %18133 = vmatprep.subr.bf16.mxu1 %v25172_v23 }
 0x4f9   : > { %18135 = vmatpush1.bf16.msra.mxu1 %v18134_v63  ;;  %v18200_v63 = vpack.c.bf16 %v25354_v30, %v25353_v21 }
 0x4fa   : > { %18136 = vmatprep.subr.bf16.mxu1 %v25172_v23 }
 0x4fd   : > { %18138 = vmatpush1.bf16.msra.mxu1 %v18137_v0  ;;  %v25338_v0 = vpack.c.bf16 %v21855_v1, %v21853_v4  ;;  %v6072_v1 = vand.u32 4294901760, %v6043_v9 }
 0x4fe   : > { %18139 = vmatprep.subr.bf16.mxu1 %v25172_v23 }
 0x501   : > { %18141 = vmatpush1.bf16.msra.mxu1 %v18140_v45  ;;  %v18203_v45 = vpack.c.bf16 %v25356_v58, %v25355_v25  ;;  %v22221_v25 = vld [vmem:[#allocation7 + $0x80] sm:$0xff]  ;;  %v22223_v58 = vld [vmem:[#allocation7 + $0x88] sm:$0xff] }
 0x502   : > { %18142 = vmatprep.subr.bf16.mxu1 %v25172_v23 }
 0x505   : > { %18144 = vmatpush1.bf16.msra.mxu1 %v18143_v7  ;;  %v6045_v7 = vld [vmem:[#allocation7 + $0x38] sm:$0xff] }
 0x506   : > { %18145 = vmatprep.subr.bf16.mxu1 %v25172_v23  ;;  %v6078_v55 = vand.u32 4294901760, %v6045_v7 }
 0x509   : > { %18147 = vmatpush1.bf16.msra.mxu1 %v18146_v24 }
 0x50a   : > { %18148 = vmatprep.subr.bf16.mxu1 %v25172_v23 }
 0x50d   : > { %18150 = vmatpush1.bf16.msra.mxu1 %v25338_v0  ;;  %v6046_v0 = vld [vmem:[#allocation7 + $0x40] sm:$0xff] }
 0x50e   : > { %18151 = vmatprep.subr.bf16.mxu1 %v25172_v23 }
 0x510   : > { %5689 = vmatmul.mubr.f32.vlgmr.msra.gmra.mrb[8].mxu1 %v21968_v62 }
 0x511   : > { %5695 = vmatprep.mubr.f32.mxu1 %v21991_v16  ;;  %18153 = vmatpush1.bf16.msra.mxu1 %v21785_v17 }
 0x512   : > { %18154 = vmatprep.subr.bf16.mxu1 %v25172_v23 }
 0x514   : > { %5698 = vmatmul.mubr.f32.gmra.mrb[10].mxu1 %v21981_v2 }
 0x515   : > { %18156 = vmatpush1.bf16.msra.mxu1 %v21793_v53  ;;  %5788 = vmatprep.mubr.f32.mxu1 %v21986_v46 }
 0x516   : > { %18157 = vmatprep.subr.bf16.mxu1 %v25172_v23 }
 0x519   : > { %18159 = vmatpush1.bf16.msra.mxu1 %v21812_v31 }
 0x51a   : > { %18160 = vmatprep.subr.bf16.mxu1 %v25172_v23 }
 0x51d   : > { %18162 = vmatpush1.bf16.msra.mxu1 %v21816_v42 }
 0x51e   : > { %18163 = vmatprep.subr.bf16.mxu1 %v25172_v23 }
 0x521   : > { %18165 = vmatpush1.bf16.msra.mxu1 %v21820_v10 }
 0x522   : > { %18166 = vmatprep.subr.bf16.mxu1 %v25172_v23 }
 0x525   : > { %18168 = vmatpush1.bf16.msra.mxu1 %v21825_v60 }
 0x526   : > { %18169 = vmatprep.subr.bf16.mxu1 %v25172_v23 }
 0x529   : > { %18171 = vmatpush1.bf16.msra.mxu1 %v21829_v5 }
 0x52a   : > { %18172 = vmatprep.subr.bf16.mxu1 %v25172_v23 }
 0x52d   : > { %18174 = vmatpush1.bf16.msra.mxu1 %v21833_v34 }
 0x52e   : > { %18175 = vmatprep.subr.bf16.mxu1 %v25172_v23 }
 0x531   : > { %18177 = vmatpush1.bf16.msra.mxu1 %v21851_v33 }
 0x532   : > { %18178 = vmatprep.subr.bf16.mxu1 %v25172_v23 }
 0x534   : > { %5792 = vmatmul.mubr.f32.vlgmr.msra.gmra.mrb[8].mxu1 %v21973_v41 }
 0x535   : > { %5799 = vmatprep.mubr.f32.mxu1 %v22001_v38  ;;  %18180 = vmatpush1.bf16.msra.mxu1 %v18179_v50  ;;  %v6081_v50 = vand.u32 4294901760, %v6046_v0 }
 0x536   : > { %18181 = vmatprep.subr.bf16.mxu1 %v25172_v23 }
 0x538   : > { %5803 = vmatmul.mubr.f32.gmra.mrb[10].mxu1 %v21996_v19  ;;  %v22275_v19 = vsub.f32 %v6047_v54, %v6084_v49 }
 0x539   : > { %18183 = vmatpush1.bf16.msra.mxu1 %v18182_v26  ;;  %5927 = vmatprep.mubr.f32.mxu1 %v21970_v15  ;;  %v6049_v26 = vld [vmem:[#allocation7 + $0x58] sm:$0xff] }
 0x53a   : > { %18184 = vmatprep.subr.bf16.mxu1 %v25172_v23  ;;  %v6090_v48 = vand.u32 4294901760, %v6049_v26 }
 0x53c   : > { %v22200_v3 = vpack.c.bf16 %v6090_v48, %v6087_v43 }
 0x53d   : > { %18186 = vmatpush1.bf16.msra.mxu1 %v18185_v39  ;;  %v22191_v39 = vld [vmem:[#allocation7 + $0x60] sm:$0xff] }
 0x53e   : > { %18187 = vmatprep.subr.bf16.mxu1 %v25172_v23  ;;  %v6093_v32 = vand.u32 4294901760, %v22191_v39 }
 0x541   : > { %18189 = vmatpush1.bf16.msra.mxu1 %v18188_v47 }
 0x542   : > { %18190 = vmatprep.subr.bf16.mxu1 %v25172_v23 }
 0x545   : > { %18192 = vmatpush1.bf16.msra.mxu1 %v18191_v27  ;;  %v6096_v27 = vand.u32 4294901760, %v22193_v14 }
 0x546   : > { %18193 = vmatprep.subr.bf16.mxu1 %v25172_v23 }
 0x547   : > { %v22216_v21 = vpack.c.bf16 %v6096_v27, %v6093_v32 }
 0x549   : > { %18195 = vmatpush1.bf16.msra.mxu1 %v18194_v36 }
 0x54a   : > { %18196 = vmatprep.subr.bf16.mxu1 %v25172_v23 }
 0x54d   : > { %18198 = vmatpush1.bf16.msra.mxu1 %v18197_v57  ;;  %v25146_v57 = vand.u32 4294901760, %v22206_v12 }
 0x54e   : > { %18199 = vmatprep.subr.bf16.mxu1 %v25172_v23 }
 0x551   : > { %18201 = vmatpush1.bf16.msra.mxu1 %v18200_v63 }
 0x552   : > { %18202 = vmatprep.subr.bf16.mxu1 %v25172_v23 }
 0x555   : > { %18204 = vmatpush1.bf16.msra.mxu1 %v18203_v45 }
 0x556   : > { %18205 = vmatprep.subr.bf16.mxu1 %v25172_v23 }
 0x558   : > { %5929 = vmatmul.mubr.f32.vlgmr.msra.gmra.mrb[8].mxu1 %v21965_v20 }
 0x559   : > { %5934 = vmatprep.mubr.f32.mxu1 %v21983_v44  ;;  %18207 = vmatpush1.bf16.msra.mxu1 %v21785_v17  ;;  %v6038_v17 = vld [vmem:[#allocation7] sm:$0xff] }
 0x55a   : > { %18208 = vmatprep.subr.bf16.mxu1 %v25172_v23 }
 0x55c   : > { %5936 = vmatmul.mubr.f32.gmra.mrb[10].mxu1 %v21978_v13 }
 0x55d   : > { %18210 = vmatpush1.bf16.msra.mxu1 %v21793_v53  ;;  %6024 = vmatprep.mubr.f32.mxu1 %v21970_v15  ;;  %v6039_v53 = vld [vmem:[#allocation7 + $0x8] sm:$0xff] }
 0x55e   : > { %18211 = vmatprep.subr.bf16.mxu1 %v25172_v23 }
 0x561   : > { %18213 = vmatpush1.bf16.msra.mxu1 %v21812_v31  ;;  %v6057_v31 = vand.u32 4294901760, %v6038_v17 }
 0x562   : > { %18214 = vmatprep.subr.bf16.mxu1 %v25172_v23 }
 0x563   : > { %v22195_v22 = vsub.f32 %v6038_v17, %v6057_v31  ;;  %v22227_v17 = vsub.f32 %v6043_v9, %v6072_v1 }
 0x565   : > { %18216 = vmatpush1.bf16.msra.mxu1 %v21816_v42  ;;  %v6060_v42 = vand.u32 4294901760, %v6039_v53  ;;  %v25145_v30 = vand.u32 4294901760, %v22195_v22 }
 0x566   : > { %18217 = vmatprep.subr.bf16.mxu1 %v25172_v23 }
 0x567   : > { %v22168_v52 = vpack.c.bf16 %v6060_v42, %v6057_v31  ;;  %v22197_v47 = vsub.f32 %v6039_v53, %v6060_v42  ;;  %v22233_v53 = vpack.c.bf16 %v25146_v57, %v25150_v18  ;;  %v22257_v57 = vsub.f32 %v6045_v7, %v6078_v55 }
 0x569   : > { %18219 = vmatpush1.bf16.msra.mxu1 %v21820_v10  ;;  %v6041_v10 = vld [vmem:[#allocation7 + $0x18] sm:$0xff]  ;;  %v25148_v63 = vand.u32 4294901760, %v22197_v47 }
 0x56a   : > { %18220 = vmatprep.subr.bf16.mxu1 %v25172_v23  ;;  %v6066_v56 = vand.u32 4294901760, %v6041_v10 }
 0x56c   : > { %v22211_v40 = vsub.f32 %v6041_v10, %v6066_v56  ;;  %v6108_v10 = vand.u32 4294901760, %v22223_v58 }
 0x56d   : > { %18222 = vmatpush1.bf16.msra.mxu1 %v21825_v60  ;;  %v6063_v60 = vand.u32 4294901760, %v6040_v59 }
 0x56e   : > { %18223 = vmatprep.subr.bf16.mxu1 %v25172_v23  ;;  %v25149_v42 = vand.u32 4294901760, %v22211_v40 }
 0x56f   : > { %v22209_v36 = vsub.f32 %v6040_v59, %v6063_v60  ;;  %v6105_v59 = vand.u32 4294901760, %v22221_v25 }
 0x571   : > { %18225 = vmatpush1.bf16.msra.mxu1 %v21829_v5  ;;  %v6042_v5 = vld [vmem:[#allocation7 + $0x20] sm:$0xff]  ;;  %v25147_v31 = vand.u32 4294901760, %v22209_v36 }
 0x572   : > { %18226 = vmatprep.subr.bf16.mxu1 %v25172_v23  ;;  %v6069_v4 = vand.u32 4294901760, %v6042_v5 }
 0x573   : > { %v6187_v9 = vsub.f32 %v22209_v36, %v25147_v31 }
 0x574   : > { %v22180_v24 = vpack.c.bf16 %v6072_v1, %v6069_v4  ;;  %v22225_v45 = vsub.f32 %v6042_v5, %v6069_v4  ;;  %v6194_v4 = vsub.f32 %v22211_v40, %v25149_v42 }
 0x575   : > { %18228 = vmatpush1.bf16.msra.mxu1 %v21833_v34  ;;  %v22174_v34 = vpack.c.bf16 %v6066_v56, %v6063_v60  ;;  %v6173_v60 = vsub.f32 %v22195_v22, %v25145_v30  ;;  %v6180_v56 = vsub.f32 %v22197_v47, %v25148_v63  ;;  %v25153_v30 = vand.u32 4294901760, %v22227_v17 }
 0x576   : > { %18229 = vmatprep.subr.bf16.mxu1 %v25172_v23  ;;  %v25152_v1 = vand.u32 4294901760, %v22225_v45  ;;  %v22267_v63 = vsub.f32 %v6046_v0, %v6081_v50  ;;  %v6188_v42 = vand.u32 4294901760, %v6187_v9  ;;  %v6195_v18 = vand.u32 4294901760, %v6194_v4 }
 0x577   : > { %v6181_v31 = vand.u32 4294901760, %v6180_v56  ;;  %v6221_v0 = vand.u32 4294901760, %v22257_v57  ;;  %v22283_v9 = vsub.f32 %v6049_v26, %v6090_v48  ;;  %v6235_v26 = vand.u32 4294901760, %v22275_v19 }
 0x578   : > { %v6201_v7 = vsub.f32 %v22225_v45, %v25152_v1  ;;  %v18263_v4 = vpack.c.bf16 %v6195_v18, %v6188_v42 }
 0x579   : > { %18231 = vmatpush1.bf16.msra.mxu1 %v21851_v33  ;;  %v6044_v33 = vld [vmem:[#allocation7 + $0x30] sm:$0xff]  ;;  %v25154_v18 = vand.u32 4294901760, %v22283_v9 }
 0x57a   : > { %18232 = vmatprep.subr.bf16.mxu1 %v25172_v23  ;;  %v6075_v29 = vand.u32 4294901760, %v6044_v33  ;;  %v6202_v1 = vand.u32 4294901760, %v6201_v7  ;;  %v25358_v7 = vand.u32 4294901760, %v22206_v12 }
 0x57c   : > { %6026 = vmatmul.mubr.f32.vlgmr.msra.gmra.mrb[8].mxu1 %v21965_v20  ;;  %v22184_v35 = vpack.c.bf16 %v6078_v55, %v6075_v29  ;;  %v22247_v5 = vsub.f32 %v6044_v33, %v6075_v29  ;;  %v22264_v33 = vpack.c.bf16 %v6108_v10, %v6105_v59  ;;  %v6174_v29 = vand.u32 4294901760, %v6173_v60 }
 0x57d   : > { %6031 = vmatprep.mubr.f32.mxu1 %v21983_v44  ;;  %18234 = vmatpush1.bf16.msra.mxu1 %v22168_v52  ;;  %v6208_v55 = vsub.f32 %v22227_v17, %v25153_v30 }
 0x57e   : > { %18235 = vmatprep.subr.bf16.mxu1 %v25172_v23  ;;  %v18260_v60 = vpack.c.bf16 %v6181_v31, %v6174_v29  ;;  %v6214_v56 = vand.u32 4294901760, %v22247_v5 }
 0x57f   : > { %v6209_v30 = vand.u32 4294901760, %v6208_v55  ;;  %v22329_v55 = vsub.f32 %v22206_v12, %v25358_v7 }
 0x580   : > { %6033 = vmatmul.mubr.f32.gmra.mrb[10].mxu1 %v21978_v13  ;;  %v6215_v54 = vsub.f32 %v22247_v5, %v6214_v56 }
 0x581   : > { %18237 = vmatpush1.bf16.msra.mxu1 %v22174_v34  ;;  %6143 = vmatprep.mubr.f32.mxu1 %v21998_v28  ;;  %v22188_v28 = vpack.c.bf16 %v6084_v49, %v6081_v50  ;;  %v22281_v50 = vsub.f32 %v6048_v37, %v6087_v43  ;;  %v6222_v49 = vsub.f32 %v22257_v57, %v6221_v0  ;;  %v6228_v37 = vand.u32 4294901760, %v22267_v63 }
 0x582   : > { %18238 = vmatprep.subr.bf16.mxu1 %v25172_v23  ;;  %v18266_v43 = vpack.c.bf16 %v6209_v30, %v6202_v1  ;;  %v6216_v31 = vand.u32 4294901760, %v6215_v54  ;;  %v6250_v30 = vsub.f32 %v22283_v9, %v25154_v18  ;;  %v22335_v54 = vsub.f32 %v22221_v25, %v6105_v59 }
 0x583   : > { %v6242_v48 = vand.u32 4294901760, %v22281_v50  ;;  %v6223_v42 = vand.u32 4294901760, %v6222_v49  ;;  %v6277_v59 = vand.u32 4294901760, %v22329_v55 }
 0x585   : > { %18240 = vmatpush1.bf16.msra.mxu1 %v22180_v24 }
 0x586   : > { %18241 = vmatprep.subr.bf16.mxu1 %v25172_v23 }
 0x589   : > { %18243 = vmatpush1.bf16.msra.mxu1 %v22184_v35 }
 0x58a   : > { %18244 = vmatprep.subr.bf16.mxu1 %v25172_v23 }
 0x58d   : > { %18246 = vmatpush1.bf16.msra.mxu1 %v22188_v28 }
 0x58e   : > { %18247 = vmatprep.subr.bf16.mxu1 %v25172_v23 }
 0x591   : > { %18249 = vmatpush1.bf16.msra.mxu1 %v22200_v3 }
 0x592   : > { %18250 = vmatprep.subr.bf16.mxu1 %v25172_v23 }
 0x595   : > { %18252 = vmatpush1.bf16.msra.mxu1 %v22216_v21 }
 0x596   : > { %18253 = vmatprep.subr.bf16.mxu1 %v25172_v23 }
 0x599   : > { %18255 = vmatpush1.bf16.msra.mxu1 %v22233_v53 }
 0x59a   : > { %18256 = vmatprep.subr.bf16.mxu1 %v25172_v23 }
 0x59d   : > { %18258 = vmatpush1.bf16.msra.mxu1 %v22264_v33 }
 0x59e   : > { %18259 = vmatprep.subr.bf16.mxu1 %v25172_v23 }
 0x5a0   : > { %6149 = vmatmul.mubr.f32.vlgmr.msra.gmra.mrb[12].mxu1 %v22003_v61  ;;  %v22297_v61 = vsub.f32 %v22191_v39, %v6093_v32  ;;  %v6229_v39 = vsub.f32 %v22267_v63, %v6228_v37 }
 0x5a1   : > { %6158 = vmatprep.mubr.f32.mxu1 %v22012_v8  ;;  %18261 = vmatpush1.bf16.msra.mxu1 %v18260_v60  ;;  %v22300_v8 = vsub.f32 %v22193_v14, %v6096_v27  ;;  %v6236_v14 = vsub.f32 %v22275_v19, %v6235_v26  ;;  %v6243_v27 = vsub.f32 %v22281_v50, %v6242_v48 }
 0x5a2   : > { %18262 = vmatprep.subr.bf16.mxu1 %v25172_v23  ;;  %v6256_v1 = vand.u32 4294901760, %v22297_v61  ;;  %v6230_v60 = vand.u32 4294901760, %v6229_v39 }
 0x5a3   : > { %v6263_v29 = vand.u32 4294901760, %v22300_v8  ;;  %v6244_v49 = vand.u32 4294901760, %v6243_v27 }
 0x5a4   : > { %6164 = vmatmul.mubr.f32.gmra.mrb[14].mxu1 %v22015_v6  ;;  %v25357_v6 = vand.u32 4294901760, %v22204_v11  ;;  %v6257_v18 = vsub.f32 %v22297_v61, %v6256_v1 }
 0x5a5   : > { %18264 = vmatpush1.bf16.msra.mxu1 %v18263_v4  ;;  %6324 = vmatprep.mubr.f32.mxu1 %v21970_v15  ;;  %v6237_v4 = vand.u32 4294901760, %v6236_v14  ;;  %v6264_v12 = vsub.f32 %v22300_v8, %v6263_v29 }
 0x5a6   : > { %18265 = vmatprep.subr.bf16.mxu1 %v25172_v23  ;;  %v22316_v32 = vsub.f32 %v22204_v11, %v25357_v6  ;;  %v18269_v11 = vpack.c.bf16 %v6223_v42, %v6216_v31  ;;  %v6251_v6 = vand.u32 4294901760, %v6250_v30  ;;  %v6258_v39 = vand.u32 4294901760, %v6257_v18 }
 0x5a7   : > { %v18272_v31 = vpack.c.bf16 %v6237_v4, %v6230_v60  ;;  %v6265_v14 = vand.u32 4294901760, %v6264_v12 }
 0x5a8   : > { %v6270_v25 = vand.u32 4294901760, %v22316_v32  ;;  %v18275_v42 = vpack.c.bf16 %v6251_v6, %v6244_v49 }
 0x5a9   : > { %18267 = vmatpush1.bf16.msra.mxu1 %v18266_v43  ;;  %v22346_v43 = vsub.f32 %v22223_v58, %v6108_v10  ;;  %v6278_v58 = vsub.f32 %v22329_v55, %v6277_v59  ;;  %v6284_v10 = vand.u32 4294901760, %v22335_v54  ;;  %v18278_v7 = vpack.c.bf16 %v6265_v14, %v6258_v39 }
 0x5aa   : > { %18268 = vmatprep.subr.bf16.mxu1 %v25172_v23  ;;  %v6271_v27 = vsub.f32 %v22316_v32, %v6270_v25  ;;  %v18290_v39 = vpack.c.bf16 %v22211_v40, %v22209_v36  ;;  %v18293_v14 = vpack.c.bf16 %v22227_v17, %v22225_v45 }
 0x5ab   : > { %v6291_v30 = vand.u32 4294901760, %v22346_v43  ;;  %v6279_v18 = vand.u32 4294901760, %v6278_v58  ;;  %v6285_v60 = vsub.f32 %v22335_v54, %v6284_v10  ;;  %v18299_v58 = vpack.c.bf16 %v22275_v19, %v22267_v63 }
 0x5ac   : > { %v18362_v19 = vpack.c.bf16 %v6277_v59, %v6270_v25 }
 0x5ad   : > { %18270 = vmatpush1.bf16.msra.mxu1 %v18269_v11  ;;  %v6272_v11 = vand.u32 4294901760, %v6271_v27  ;;  %v6292_v4 = vsub.f32 %v22346_v43, %v6291_v30  ;;  %v6286_v6 = vand.u32 4294901760, %v6285_v60  ;;  %v18296_v27 = vpack.c.bf16 %v22257_v57, %v22247_v5 }
 0x5ae   : > { %18271 = vmatprep.subr.bf16.mxu1 %v25172_v23  ;;  %v25362_v60 = vand.u32 4294901760, %v22211_v40  ;;  %v25366_v40 = vand.u32 4294901760, %v22283_v9  ;;  %v18359_v57 = vpack.c.bf16 %v6263_v29, %v6256_v1  ;;  %v18365_v63 = vpack.c.bf16 %v6291_v30, %v6284_v10 }
 0x5af   : > { %v18281_v49 = vpack.c.bf16 %v6279_v18, %v6272_v11  ;;  %v6293_v12 = vand.u32 4294901760, %v6292_v4  ;;  %v18308_v11 = vpack.c.bf16 %v22329_v55, %v22316_v32  ;;  %v18311_v18 = vpack.c.bf16 %v22346_v43, %v22335_v54 }
 0x5b1   : > { %18273 = vmatpush1.bf16.msra.mxu1 %v18272_v31  ;;  %v18284_v31 = vpack.c.bf16 %v6293_v12, %v6286_v6 }
 0x5b2   : > { %18274 = vmatprep.subr.bf16.mxu1 %v25172_v23 }
 0x5b5   : > { %18276 = vmatpush1.bf16.msra.mxu1 %v18275_v42  ;;  %v18287_v42 = vpack.c.bf16 %v22197_v47, %v22195_v22 }
 0x5b6   : > { %18277 = vmatprep.subr.bf16.mxu1 %v25172_v23 }
 0x5b9   : > { %18279 = vmatpush1.bf16.msra.mxu1 %v18278_v7  ;;  %v18305_v7 = vpack.c.bf16 %v22300_v8, %v22297_v61 }
 0x5ba   : > { %18280 = vmatprep.subr.bf16.mxu1 %v25172_v23 }
 0x5bd   : > { %18282 = vmatpush1.bf16.msra.mxu1 %v18281_v49  ;;  %v25363_v49 = vld [vmem:[#allocation35_spill] sm:$0xff] }
 0x5be   : > { %18283 = vmatprep.subr.bf16.mxu1 %v25172_v23 }
 0x5c1   : > { %18285 = vmatpush1.bf16.msra.mxu1 %v18284_v31 }
 0x5c2   : > { %18286 = vmatprep.subr.bf16.mxu1 %v25172_v23 }
 0x5c4   : > { %6326 = vmatmul.mubr.f32.vlgmr.msra.gmra.mrb[12].mxu1 %v21965_v20 }
 0x5c5   : > { %6331 = vmatprep.mubr.f32.mxu1 %v21983_v44  ;;  %18288 = vmatpush1.bf16.msra.mxu1 %v18287_v42 }
 0x5c6   : > { %18289 = vmatprep.subr.bf16.mxu1 %v25172_v23 }
 0x5c8   : > { %6333 = vmatmul.mubr.f32.gmra.mrb[14].mxu1 %v21978_v13 }
 0x5c9   : > { %18291 = vmatpush1.bf16.msra.mxu1 %v18290_v39  ;;  %6440 = vmatprep.mubr.f32.mxu1 %v21976_v51  ;;  %v18302_v51 = vpack.c.bf16 %v22283_v9, %v22281_v50 }
 0x5ca   : > { %18292 = vmatprep.subr.bf16.mxu1 %v25172_v23 }
 0x5cd   : > { %18294 = vmatpush1.bf16.msra.mxu1 %v18293_v14  ;;  %v6802_v14 = vld [vmem:[%s25090_s7 + $0x40] sm:$0xff] }
 0x5ce   : > { %18295 = vmatprep.subr.bf16.mxu1 %v25172_v23 }
 0x5d1   : > { %18297 = vmatpush1.bf16.msra.mxu1 %v18296_v27 }
 0x5d2   : > { %18298 = vmatprep.subr.bf16.mxu1 %v25172_v23 }
 0x5d5   : > { %18300 = vmatpush1.bf16.msra.mxu1 %v18299_v58  ;;  %v15257_v58 = vld [vmem:[%s25090_s7 + $0x48] sm:$0xff] }
 0x5d6   : > { %18301 = vmatprep.subr.bf16.mxu1 %v25172_v23 }
 0x5d9   : > { %18303 = vmatpush1.bf16.msra.mxu1 %v18302_v51  ;;  %v15258_v51 = vld [vmem:[%s25090_s7 + $0x50] sm:$0xff] }
 0x5da   : > { %18304 = vmatprep.subr.bf16.mxu1 %v25172_v23 }
 0x5dd   : > { %18306 = vmatpush1.bf16.msra.mxu1 %v18305_v7  ;;  %v22625_v7 = vand.u32 4294901760, %v6802_v14 }
 0x5de   : > { %18307 = vmatprep.subr.bf16.mxu1 %v25172_v23 }
 0x5df   : > { %25378 = vst [vmem:[#allocation46_spill] sm:$0xff] %v22625_v7 }
 0x5e1   : > { %18309 = vmatpush1.bf16.msra.mxu1 %v18308_v11  ;;  %v6822_v11 = vand.u32 4294901760, %v15257_v58 }
 0x5e2   : > { %18310 = vmatprep.subr.bf16.mxu1 %v25172_v23 }
 0x5e5   : > { %18312 = vmatpush1.bf16.msra.mxu1 %v18311_v18  ;;  %v6825_v18 = vand.u32 4294901760, %v15258_v51 }
 0x5e6   : > { %18313 = vmatprep.subr.bf16.mxu1 %v25172_v23 }
 0x5e8   : > { %6443 = vmatmul.mubr.f32.vlgmr.msra.gmra.mrb[12].mxu1 %v21968_v62  ;;  %v25359_v62 = vand.u32 4294901760, %v22195_v22  ;;  %v25364_v22 = vand.u32 4294901760, %v22225_v45  ;;  %v18356_v45 = vpack.c.bf16 %v25366_v40, %v6242_v48  ;;  %v15262_v40 = vld [vmem:[%s25090_s7 + $0x70] sm:$0xff] }
 0x5e9   : > { %6449 = vmatprep.mubr.f32.mxu1 %v21991_v16  ;;  %18315 = vmatpush1.bf16.msra.mxu1 %v22168_v52  ;;  %v25361_v16 = vand.u32 4294901760, %v22209_v36  ;;  %v18353_v36 = vpack.c.bf16 %v6235_v26, %v6228_v37 }
 0x5ea   : > { %18316 = vmatprep.subr.bf16.mxu1 %v25172_v23 }
 0x5eb   : > { %v18344_v4 = vpack.c.bf16 %v25362_v60, %v25361_v16  ;;  %v22635_v60 = vsub.f32 %v15257_v58, %v6822_v11 }
 0x5ec   : > { %6452 = vmatmul.mubr.f32.gmra.mrb[14].mxu1 %v21981_v2  ;;  %v25360_v2 = vand.u32 4294901760, %v22197_v47  ;;  %v25365_v47 = vand.u32 4294901760, %v22227_v17 }
 0x5ed   : > { %18318 = vmatpush1.bf16.msra.mxu1 %v22174_v34  ;;  %6542 = vmatprep.mubr.f32.mxu1 %v21986_v46  ;;  %v6908_v58 = vand.u32 4294901760, %v22635_v60 }
 0x5ee   : > { %18319 = vmatprep.subr.bf16.mxu1 %v25172_v23  ;;  %v18341_v46 = vpack.c.bf16 %v25360_v2, %v25359_v62  ;;  %v22628_v62 = vsub.f32 %v6802_v14, %v22625_v7  ;;  %v22630_v2 = vpack.c.bf16 %v6825_v18, %v6822_v11 }
 0x5f0   : > { %25379 = vst [vmem:[#allocation47_spill] sm:$0xff] %v22628_v62  ;;  %v25155_v16 = vand.u32 4294901760, %v22628_v62  ;;  %18396 = vmatpush3.bf16.msra.mxu0 %v22630_v2 }
 0x5f1   : > { %18321 = vmatpush1.bf16.msra.mxu1 %v22180_v24  ;;  %18397 = vmatprep.subr.bf16.mxu0 %v25172_v23 }
 0x5f2   : > { %18322 = vmatprep.subr.bf16.mxu1 %v25172_v23 }
 0x5f5   : > { %18324 = vmatpush1.bf16.msra.mxu1 %v22184_v35 }
 0x5f6   : > { %18325 = vmatprep.subr.bf16.mxu1 %v25172_v23 }
 0x5f9   : > { %18327 = vmatpush1.bf16.msra.mxu1 %v22188_v28 }
 0x5fa   : > { %18328 = vmatprep.subr.bf16.mxu1 %v25172_v23 }
 0x5fd   : > { %18330 = vmatpush1.bf16.msra.mxu1 %v22200_v3 }
 0x5fe   : > { %18331 = vmatprep.subr.bf16.mxu1 %v25172_v23 }
 0x601   : > { %18333 = vmatpush1.bf16.msra.mxu1 %v22216_v21 }
 0x602   : > { %18334 = vmatprep.subr.bf16.mxu1 %v25172_v23 }
 0x605   : > { %18336 = vmatpush1.bf16.msra.mxu1 %v22233_v53 }
 0x606   : > { %18337 = vmatprep.subr.bf16.mxu1 %v25172_v23 }
 0x609   : > { %18339 = vmatpush1.bf16.msra.mxu1 %v22264_v33 }
 0x60a   : > { %18340 = vmatprep.subr.bf16.mxu1 %v25172_v23 }
 0x60c   : > { %6546 = vmatmul.mubr.f32.vlgmr.msra.gmra.mrb[12].mxu1 %v21973_v41  ;;  %v18347_v41 = vpack.c.bf16 %v25365_v47, %v25364_v22  ;;  %v15260_v22 = vld [vmem:[%s25090_s7 + $0x60] sm:$0xff] }
 0x60d   : > { %6553 = vmatprep.mubr.f32.mxu1 %v22001_v38  ;;  %18342 = vmatpush1.bf16.msra.mxu1 %v18341_v46  ;;  %v18350_v38 = vpack.c.bf16 %v6221_v0, %v6214_v56  ;;  %v22526_v0 = vld [vmem:[%s25090_s7 + $0x20] sm:$0xff]  ;;  %v25380_v46 = vmov 0.0  }
 0x60e   : > { %18343 = vmatprep.subr.bf16.mxu1 %v25172_v23  ;;  %v25167_v9 = vand.u32 4294901760, %v22526_v0  ;;  %16114 = vmatprep.mubr.msk.f32.mxu0 %vm20278_vm7, %v25380_v46 }
 0x610   : > { %6557 = vmatmul.mubr.f32.gmra.mrb[14].mxu1 %v25363_v49  ;;  %v22562_v55 = vsub.f32 %v22526_v0, %v25167_v9  ;;  %v15259_v49 = vld [vmem:[%s25090_s7 + $0x58] sm:$0xff] }
 0x611   : > { %18345 = vmatpush1.bf16.msra.mxu1 %v18344_v4  ;;  %6681 = vmatprep.mubr.f32.mxu1 %v21970_v15  ;;  %v22637_v4 = vsub.f32 %v15258_v51, %v6825_v18  ;;  %v6828_v47 = vand.u32 4294901760, %v15259_v49 }
 0x612   : > { %18346 = vmatprep.subr.bf16.mxu1 %v25172_v23  ;;  %25372 = vst [vmem:[#allocation40_spill] sm:$0xff] %v22562_v55  ;;  %v25159_v59 = vand.u32 4294901760, %v22562_v55 }
 0x615   : > { %18348 = vmatpush1.bf16.msra.mxu1 %v18347_v41  ;;  %v6831_v41 = vand.u32 4294901760, %v15260_v22 }
 0x616   : > { %18349 = vmatprep.subr.bf16.mxu1 %v25172_v23 }
 0x619   : > { %18351 = vmatpush1.bf16.msra.mxu1 %v18350_v38  ;;  %v22653_v38 = vpack.c.bf16 %v6831_v41, %v6828_v47 }
 0x61a   : > { %18352 = vmatprep.subr.bf16.mxu1 %v25172_v23 }
 0x61b   : > { %18399 = vmatpush3.bf16.msra.mxu0 %v22653_v38 }
 0x61c   : > { %18400 = vmatprep.subr.bf16.mxu0 %v25172_v23 }
 0x61d   : > { %18354 = vmatpush1.bf16.msra.mxu1 %v18353_v36  ;;  %v15261_v36 = vld [vmem:[%s25090_s7 + $0x68] sm:$0xff] }
 0x61e   : > { %18355 = vmatprep.subr.bf16.mxu1 %v25172_v23 }
 0x621   : > { %18357 = vmatpush1.bf16.msra.mxu1 %v18356_v45  ;;  %v6834_v45 = vand.u32 4294901760, %v15261_v36 }
 0x622   : > { %18358 = vmatprep.subr.bf16.mxu1 %v25172_v23 }
 0x625   : > { %18360 = vmatpush1.bf16.msra.mxu1 %v18359_v57  ;;  %v6837_v57 = vand.u32 4294901760, %v15262_v40 }
 0x626   : > { %18361 = vmatprep.subr.bf16.mxu1 %v25172_v23 }
 0x629   : > { %18363 = vmatpush1.bf16.msra.mxu1 %v18362_v19  ;;  %v22663_v19 = vpack.c.bf16 %v6837_v57, %v6834_v45 }
 0x62a   : > { %18364 = vmatprep.subr.bf16.mxu1 %v25172_v23 }
 0x62b   : > { %18402 = vmatpush3.bf16.msra.mxu0 %v22663_v19 }
 0x62c   : > { %18403 = vmatprep.subr.bf16.mxu0 %v25172_v23 }
 0x62d   : > { %18366 = vmatpush1.bf16.msra.mxu1 %v18365_v63  ;;  %v15263_v63 = vld [vmem:[%s25090_s7 + $0x78] sm:$0xff] }
 0x62e   : > { %18367 = vmatprep.subr.bf16.mxu1 %v25172_v23  ;;  %v6840_v14 = vand.u32 4294901760, %v15263_v63 }
 0x630   : > { %6683 = vmatmul.mubr.f32.vlgmr.msra.gmra.mrb[12].mxu1 %v21965_v20  ;;  %v22684_v11 = vsub.f32 %v15263_v63, %v6840_v14 }
 0x631   : > { %6688 = vmatprep.mubr.f32.mxu1 %v21983_v44  ;;  %18369 = vmatpush1.bf16.msra.mxu1 %v22168_v52  ;;  %v22489_v52 = vld [vmem:[%s25090_s7] sm:$0xff] }
 0x632   : > { %18370 = vmatprep.subr.bf16.mxu1 %v25172_v23 }
 0x634   : > { %6690 = vmatmul.mubr.f32.gmra.mrb[14].mxu1 %v21978_v13 }
 0x635   : > { %18372 = vmatpush1.bf16.msra.mxu1 %v22174_v34  ;;  %6778 = vmatprep.mubr.f32.mxu1 %v21970_v15  ;;  %v22494_v15 = vld [vmem:[%s25090_s7 + $0x8] sm:$0xff]  ;;  %v25171_v34 = vand.u32 4294901760, %v22489_v52 }
 0x636   : > { %18373 = vmatprep.subr.bf16.mxu1 %v25172_v23 }
 0x639   : > { %18375 = vmatpush1.bf16.msra.mxu1 %v22180_v24  ;;  %v25170_v24 = vand.u32 4294901760, %v22494_v15 }
 0x63a   : > { %18376 = vmatprep.subr.bf16.mxu1 %v25172_v23 }
 0x63b   : > { %v22520_v5 = vsub.f32 %v22494_v15, %v25170_v24  ;;  %v15270_v24 = vld [vmem:[%s25090_s7 + $0xb0] sm:$0xff] }
 0x63d   : > { %18378 = vmatpush1.bf16.msra.mxu1 %v22184_v35  ;;  %v22502_v35 = vld [vmem:[%s25090_s7 + $0x10] sm:$0xff]  ;;  %25368 = vst [vmem:[#allocation36_spill] sm:$0xff] %v22520_v5  ;;  %v25164_v26 = vand.u32 4294901760, %v22520_v5 }
 0x63e   : > { %18379 = vmatprep.subr.bf16.mxu1 %v25172_v23  ;;  %v25169_v17 = vand.u32 4294901760, %v22502_v35 }
 0x640   : > { %v22537_v50 = vsub.f32 %v22502_v35, %v25169_v17 }
 0x641   : > { %18381 = vmatpush1.bf16.msra.mxu1 %v22188_v28  ;;  %v22508_v28 = vld [vmem:[%s25090_s7 + $0x18] sm:$0xff] }
 0x642   : > { %18382 = vmatprep.subr.bf16.mxu1 %v25172_v23  ;;  %v25168_v56 = vand.u32 4294901760, %v22508_v28  ;;  %25370 = vst [vmem:[#allocation38_spill] sm:$0xff] %v22537_v50  ;;  %v25161_v1 = vand.u32 4294901760, %v22537_v50 }
 0x644   : > { %v22546_v61 = vsub.f32 %v22508_v28, %v25168_v56 }
 0x645   : > { %18384 = vmatpush1.bf16.msra.mxu1 %v22200_v3  ;;  %v22515_v3 = vsub.f32 %v22489_v52, %v25171_v34  ;;  %v15271_v34 = vld [vmem:[%s25090_s7 + $0xb8] sm:$0xff] }
 0x646   : > { %18385 = vmatprep.subr.bf16.mxu1 %v25172_v23  ;;  %25371 = vst [vmem:[#allocation39_spill] sm:$0xff] %v22546_v61  ;;  %v25160_v29 = vand.u32 4294901760, %v22546_v61  ;;  %v15273_v61 = vld [vmem:[%s25090_s7 + $0xc8] sm:$0xff] }
 0x647   : > { %25367 = vst [vmem:[#allocation35_spill] sm:$0xff] %v22515_v3  ;;  %v25165_v37 = vand.u32 4294901760, %v22515_v3 }
 0x648   : > { %v18518_v25 = vpack.c.bf16 %v25160_v29, %v25161_v1 }
 0x649   : > { %18387 = vmatpush1.bf16.msra.mxu1 %v22216_v21  ;;  %v22532_v21 = vld [vmem:[%s25090_s7 + $0x28] sm:$0xff] }
 0x64a   : > { %18388 = vmatprep.subr.bf16.mxu1 %v25172_v23  ;;  %25369 = vst [vmem:[#allocation37_spill] sm:$0xff] %v22532_v21  ;;  %v25166_v8 = vand.u32 4294901760, %v22532_v21 }
 0x64c   : > { %v22567_v54 = vsub.f32 %v22532_v21, %v25166_v8 }
 0x64d   : > { %18390 = vmatpush1.bf16.msra.mxu1 %v22233_v53  ;;  %v18515_v53 = vpack.c.bf16 %v25164_v26, %v25165_v37 }
 0x64e   : > { %18391 = vmatprep.subr.bf16.mxu1 %v25172_v23  ;;  %25373 = vst [vmem:[#allocation41_spill] sm:$0xff] %v22567_v54  ;;  %v25158_v10 = vand.u32 4294901760, %v22567_v54 }
 0x64f   : > { %v22550_v48 = vpop.f32.mrb[8].mxu1 }
 0x650   : > { %v6029_v32 = vpop.f32.mrb[9].mxu1 }
 0x651   : > { %18393 = vmatpush1.bf16.msra.mxu1 %v22264_v33  ;;  %v15264_v32 = vld [vmem:[%s25090_s7 + $0x80] sm:$0xff] }
 0x652   : > { %18514 = vmatprep.subr.bf16.mxu1 %v25172_v23 }
 0x653   : > { %v22570_v33 = vpop.f32.mrb[10].mxu1 }
 0x654   : > { %v6036_v43 = vpop.f32.mrb[11].mxu1  ;;  %6780 = vmatmul.mubr.f32.vlgmr.msra.gmra.mrb[12].mxu1 %v21965_v20  ;;  %v18521_v20 = vpack.c.bf16 %v25158_v10, %v25159_v59 }
 0x655   : > { %6785 = vmatprep.mubr.f32.mxu1 %v21983_v44  ;;  %18516 = vmatpush3.bf16.msra.mxu1 %v18515_v53  ;;  %v22591_v44 = vld [vmem:[%s25090_s7 + $0x30] sm:$0xff]  ;;  %v22671_v53 = vsub.f32 %v15259_v49, %v6828_v47  ;;  %v22673_v43 = vsub.f32 %v15260_v22, %v6831_v41  ;;  %v6909_v49 = vsub.f32 %v22635_v60, %v6908_v58  ;;  %v22692_v22 = vld [vmem:[%s25090_s7 + $0x88] sm:$0xff]  ;;  %v6915_v47 = vand.u32 4294901760, %v22637_v4 }
 0x656   : > { %18517 = vmatprep.subr.bf16.mxu1 %v25172_v23  ;;  %25374 = vst [vmem:[#allocation42_spill] sm:$0xff] %v22591_v44  ;;  %v25163_v30 = vand.u32 4294901760, %v22591_v44  ;;  %v22697_v41 = vand.u32 4294901760, %v22692_v22 }
 0x658   : > { %6787 = vmatmul.mubr.f32.gmra.mrb[14].mxu1 %v21978_v13  ;;  %v22596_v13 = vld [vmem:[%s25090_s7 + $0x38] sm:$0xff]  ;;  %v22603_v12 = vsub.f32 %v22591_v44, %v25163_v30 }
 0x659   : > { %18519 = vmatpush3.bf16.msra.mxu1 %v18518_v25  ;;  %25375 = vst [vmem:[#allocation43_spill] sm:$0xff] %v22596_v13  ;;  %v25162_v6 = vand.u32 4294901760, %v22596_v13  ;;  %16324 = vmatprep.mubr.msk.f32.mxu1 %vm20278_vm7, %v25380_v46  ;;  %v22676_v25 = vsub.f32 %v15261_v36, %v6834_v45  ;;  %v6922_v36 = vand.u32 4294901760, %v22671_v53  ;;  %v6910_v45 = vand.u32 4294901760, %v6909_v49 }
 0x65a   : > { %18520 = vmatprep.subr.bf16.mxu1 %v25172_v23  ;;  %25376 = vst [vmem:[#allocation44_spill] sm:$0xff] %v22603_v12  ;;  %v25157_v42 = vand.u32 4294901760, %v22603_v12  ;;  %v7954_v12 = vand.u32 4294901760, %v15271_v34 }
 0x65b   : > { %v22608_v31 = vsub.f32 %v22596_v13, %v25162_v6  ;;  %v6923_v63 = vsub.f32 %v22671_v53, %v6922_v36  ;;  %v6950_v6 = vand.u32 4294901760, %v22684_v11 }
 0x65d   : > { %18522 = vmatpush3.bf16.msra.mxu1 %v18521_v20  ;;  %25377 = vst [vmem:[#allocation45_spill] sm:$0xff] %v22608_v31  ;;  %v25156_v39 = vand.u32 4294901760, %v22608_v31  ;;  %v22678_v20 = vsub.f32 %v15262_v40, %v6837_v57  ;;  %v6929_v40 = vand.u32 4294901760, %v22673_v43  ;;  %v6916_v57 = vsub.f32 %v22637_v4, %v6915_v47 }
 0x65e   : > { %18523 = vmatprep.subr.bf16.mxu1 %v25172_v23  ;;  %v6951_v30 = vsub.f32 %v22684_v11, %v6950_v6 }
 0x65f   : > { %v18524_v27 = vpack.c.bf16 %v25156_v39, %v25157_v42  ;;  %v6936_v39 = vand.u32 4294901760, %v22676_v25  ;;  %v6943_v42 = vand.u32 4294901760, %v22678_v20  ;;  %v22733_v37 = vpack.c.bf16 %v6929_v40, %v6922_v36 }
 0x661   : > { %18525 = vmatpush3.bf16.msra.mxu1 %v18524_v27  ;;  %v6843_v27 = vand.u32 4294901760, %v15264_v32  ;;  %v6937_v59 = vsub.f32 %v22676_v25, %v6936_v39  ;;  %v6944_v29 = vsub.f32 %v22678_v20, %v6943_v42 }
 0x662   : > { %16322 = vmatprep.subr.mxu1 %v25380_v46 }
 0x663   : > { %v22682_v51 = vpack.c.bf16 %v6843_v27, %v6840_v14  ;;  %v22686_v18 = vsub.f32 %v15264_v32, %v6843_v27  ;;  %v6930_v32 = vsub.f32 %v22673_v43, %v6929_v40  ;;  %v6917_v14 = vand.u32 4294901760, %v6916_v57 }
 0x664   : > { %v6924_v27 = vand.u32 4294901760, %v6923_v63  ;;  %v6938_v1 = vand.u32 4294901760, %v6937_v59  ;;  %v6945_v57 = vand.u32 4294901760, %v6944_v29 }
 0x665   : > { %16323 = vmatpush3.msra.mxu1 %v25155_v16  ;;  %18405 = vmatpush3.bf16.msra.mxu0 %v22682_v51  ;;  %v6931_v16 = vand.u32 4294901760, %v6930_v32  ;;  %v22709_v10 = vpack.c.bf16 %v6917_v14, %v6910_v45  ;;  %v6957_v63 = vand.u32 4294901760, %v22686_v18  ;;  %v6952_v45 = vand.u32 4294901760, %v6951_v30 }
 0x666   : > { %18538 = vmatprep.subr.bf16.mxu1 %v25172_v23  ;;  %16112 = vmatprep.subr.mxu0 %v25380_v46  ;;  %v22717_v32 = vpack.c.bf16 %v6945_v57, %v6938_v1  ;;  %v22731_v57 = vpack.c.bf16 %v6915_v47, %v6908_v58  ;;  %v22735_v30 = vpack.c.bf16 %v6943_v42, %v6936_v39  ;;  %v15269_v42 = vld [vmem:[%s25090_s7 + $0xa8] sm:$0xff] }
 0x667   : > { %v22711_v49 = vpack.c.bf16 %v6931_v16, %v6924_v27  ;;  %v6958_v26 = vsub.f32 %v22686_v18, %v6957_v63  ;;  %v7948_v17 = vand.u32 4294901760, %v15269_v42 }
 0x669   : > { %16113 = vmatpush3.msra.mxu0 %v22697_v41  ;;  %v6959_v14 = vand.u32 4294901760, %v6958_v26  ;;  %v22737_v26 = vpack.c.bf16 %v6957_v63, %v6950_v6  ;;  %v15268_v6 = vld [vmem:[%s25090_s7 + $0xa0] sm:$0xff] }
 0x66a   : > { %18406 = vmatprep.subr.bf16.mxu0 %v25172_v23  ;;  %v7945_v63 = vand.u32 4294901760, %v15268_v6 }
 0x66b   : > { %v22721_v16 = vpack.c.bf16 %v6959_v14, %v6952_v45  ;;  %v15266_v45 = vld [vmem:[%s25090_s7 + $0x90] sm:$0xff]  ;;  %v15267_v14 = vld [vmem:[%s25090_s7 + $0x98] sm:$0xff] }
 0x66c   : > { %v7939_v9 = vand.u32 4294901760, %v15266_v45  ;;  %v7942_v56 = vand.u32 4294901760, %v15267_v14  ;;  %v22828_v21 = vsub.f32 %v15268_v6, %v7945_v63 }
 0x66e   : > { %v22755_v40 = vpack.c.bf16 %v7942_v56, %v7939_v9  ;;  %v22820_v44 = vsub.f32 %v15267_v14, %v7942_v56  ;;  %v22835_v56 = vsub.f32 %v22692_v22, %v22697_v41 }
 0x670   : > { %25381 = vst [vmem:[#allocation48_spill] sm:$0xff] %v22755_v40  ;;  %v25214_v22 = vand.u32 4294901760, %v22835_v56  ;;  %v25212_v6 = vand.u32 4294901760, %v22820_v44 }
 0x727   : > { %v6781_v8 = vpop.f32.mrb[12].mxu1 }
 0x728   : > { %v6792_v58 = vmax.f32 %v22550_v48, %v6781_v8  ;;  %v6783_v47 = vpop.f32.mrb[13].mxu1 }
 0x72a   : > { %v22753_v36 = vsel %vm6818_vm8, %v6792_v58, 0  ;;  %v6815_v1 = vrot.slane %v6792_v58, 1  ;;  %v7933_v59 = vrot.slane %v6792_v58, 2  ;;  %v8499_v29 = vrot.slane %v6792_v58, 3 }
 0x72b   : > { %v6788_v39 = vpop.f32.mrb[14].mxu1  ;;  %v22759_v47 = vand.u32 4294901760, %v22753_v36  ;;  %v9065_v27 = vrot.slane %v6792_v58, 4 }
 0x72c   : > { %v6793_v8 = vmax.f32 %v22570_v33, %v6788_v39  ;;  %v6790_v48 = vpop.f32.mrb[15].mxu1  ;;  %v22769_v39 = vpack.c.bf16 %v7948_v17, %v7945_v63  ;;  %v25211_v63 = vand.u32 4294901760, %v22828_v21 }
 0x72d   : > { %16325 = vmatmul.mubr.f32.vlgmr.msra.gmra.mrb[16].mxu1 %v22759_v47  ;;  %v7951_v48 = vand.u32 4294901760, %v15270_v24 }
 0x72e   : > { %v6816_v23 = vrot.slane %v6793_v8, 1  ;;  %v7934_v62 = vrot.slane %v6793_v8, 2  ;;  %v8500_v31 = vrot.slane %v6793_v8, 3  ;;  %v9066_v33 = vrot.slane %v6793_v8, 4  ;;  %18540 = vmatpush3.bf16.msra.mxu1 %v22755_v40  ;;  %25382 = vst [vmem:[#allocation49_spill] sm:$0xff] %v22769_v39  ;;  %16366 = vmatprep.mubr.msk.f32.mxu1 %vm20278_vm7, %v25380_v46  ;;  %v15272_v40 = vld [vmem:[%s25090_s7 + $0xc0] sm:$0xff] }
 0x72f   : > { %v25383_v8 = vmov 0.0|0.0  }
 0x730   : > { %v6817_v7 = vsel %vm757_vm1, %v6815_v1, %v6816_v23  ;;  %v7935_v54 = vsel %vm2082_vm3, %v7933_v59, %v7934_v62  ;;  %v8501_v58 = vsel %vm2758_vm4, %v8499_v29, %v8500_v31  ;;  %v9067_v55 = vsel %vm772_vm0, %v9065_v27, %v9066_v33  ;;  %18541 = vmatprep.subr.bf16.mxu1 %v25383_v8 }
 0x731   : > { %v6819_v50 = vsel %vm6818_vm8, %v6817_v7, 0  ;;  %v7936_v23 = vsel %vm6818_vm8, %v7935_v54, 0  ;;  %v22787_v62 = vsel %vm6818_vm8, %v8501_v58, 0  ;;  %v22794_v29 = vsel %vm6818_vm8, %v9067_v55, 0 }
 0x732   : > { %v22789_v31 = vand.u32 4294901760, %v6819_v50  ;;  %v22791_v27 = vand.u32 4294901760, %v7936_v23  ;;  %18543 = vmatpush3.bf16.msra.mxu1 %v22769_v39  ;;  %v22797_v59 = vpack.c.bf16 %v7954_v12, %v7951_v48  ;;  %v7957_v1 = vand.u32 4294901760, %v15272_v40  ;;  %v15274_v39 = vld [vmem:[%s25090_s7 + $0xd0] sm:$0xff] }
 0x733   : > { %v7960_v33 = vand.u32 4294901760, %v15273_v61  ;;  %18544 = vmatprep.subr.bf16.mxu1 %v25383_v8  ;;  %v22826_v3 = vand.u32 4294901760, %v15274_v39 }
 0x734   : > { %25384 = vst [vmem:[#allocation50_spill] sm:$0xff] %v22797_v59  ;;  %v22800_v7 = vsub.f32 %v6819_v50, %v22789_v31  ;;  %v22804_v54 = vsub.f32 %v7936_v23, %v22791_v27  ;;  %v22818_v23 = vsub.f32 %v15266_v45, %v7939_v9  ;;  %v22857_v14 = vsub.f32 %v15272_v40, %v7957_v1 }
 0x735   : > { %v22809_v55 = vpack.c.bf16 %v7960_v33, %v7957_v1 }
 0x736   : > { %v25203_v58 = vand.u32 4294901760, %v22800_v7  ;;  %v25204_v13 = vand.u32 4294901760, %v22804_v54  ;;  %18546 = vmatpush3.bf16.msra.mxu1 %v22797_v59  ;;  %v18563_v9 = vpack.c.bf16 %v22820_v44, %v22818_v23  ;;  %v25207_v1 = vand.u32 4294901760, %v22857_v14 }
 0x737   : > { %18547 = vmatprep.subr.bf16.mxu1 %v25383_v8 }
 0x738   : > { %v6898_v50 = vsub.f32 %v22800_v7, %v25203_v58  ;;  %v8015_v59 = vsub.f32 %v22804_v54, %v25204_v13  ;;  %v22831_v58 = vsub.f32 %v15269_v42, %v7948_v17  ;;  %v22845_v17 = vsub.f32 %v15270_v24, %v7951_v48 }
 0x739   : > { %v22859_v24 = vsub.f32 %v15273_v61, %v7960_v33  ;;  %v22877_v42 = vsub.f32 %v15274_v39, %v22826_v3 }
 0x73a   : > { %v6899_v5 = vand.u32 4294901760, %v6898_v50  ;;  %18549 = vmatpush3.bf16.msra.mxu1 %v22809_v55  ;;  %v8016_v45 = vand.u32 4294901760, %v8015_v59  ;;  %v25210_v39 = vand.u32 4294901760, %v22831_v58  ;;  %v25209_v48 = vand.u32 4294901760, %v22845_v17  ;;  %v15275_v50 = vld [vmem:[%s25090_s7 + $0xd8] sm:$0xff] }
 0x73b   : > { %16364 = vmatprep.subr.mxu1 %v25380_v46  ;;  %v18572_v61 = vpack.c.bf16 %v22859_v24, %v22857_v14  ;;  %v25206_v33 = vand.u32 4294901760, %v22859_v24 }
 0x73c   : > { %16115 = vmatmul.mubr.f32.vlgmr.msra.gmra.mrb[6].mxu0 %v6899_v5  ;;  %v22847_v5 = vsub.f32 %v15271_v34, %v7954_v12  ;;  %v6965_v12 = vsub.f32 %v22835_v56, %v25214_v22  ;;  %v25396_v22 = vand.u32 4294901760, %v22800_v7 }
 0x73d   : > { %18408 = vmatpush3.bf16.msra.mxu0 %v22709_v10  ;;  %16135 = vmatprep.mubr.msk.f32.mxu0 %vm20278_vm7, %v25380_v46  ;;  %v18566_v10 = vpack.c.bf16 %v22831_v58, %v22828_v21 }
 0x73e   : > { %18409 = vmatprep.subr.bf16.mxu0 %v25383_v8  ;;  %16365 = vmatpush3.msra.mxu1 %v22826_v3  ;;  %v18569_v34 = vpack.c.bf16 %v22847_v5, %v22845_v17  ;;  %v25208_v59 = vand.u32 4294901760, %v22847_v5 }
 0x73f   : > { %16367 = vmatmul.mubr.f32.vlgmr.msra.gmra.mrb[18].mxu1 %v8016_v45  ;;  %18562 = vmatprep.subr.bf16.mxu1 %v25383_v8  ;;  %v8505_v45 = vand.u32 4294901760, %v15275_v50 }
 0x740   : > { %18564 = vmatpush3.bf16.msra.mxu1 %v18563_v9  ;;  %16408 = vmatprep.mubr.msk.f32.mxu1 %vm20278_vm7, %v25380_v46  ;;  %v18596_v9 = vpack.c.bf16 %v25206_v33, %v25207_v1 }
 0x741   : > { %18411 = vmatpush3.bf16.msra.mxu0 %v22711_v49  ;;  %18565 = vmatprep.subr.bf16.mxu1 %v25383_v8  ;;  %v6966_v49 = vand.u32 4294901760, %v6965_v12 }
 0x742   : > { %18412 = vmatprep.subr.bf16.mxu0 %v25383_v8 }
 0x744   : > { %18567 = vmatpush3.bf16.msra.mxu1 %v18566_v10 }
 0x745   : > { %18414 = vmatpush3.bf16.msra.mxu0 %v22717_v32  ;;  %18568 = vmatprep.subr.bf16.mxu1 %v25383_v8  ;;  %v25213_v32 = vand.u32 4294901760, %v22818_v23 }
 0x746   : > { %18415 = vmatprep.subr.bf16.mxu0 %v25383_v8 }
 0x747   : > { %v18587_v40 = vpack.c.bf16 %v25212_v6, %v25213_v32 }
 0x748   : > { %18570 = vmatpush3.bf16.msra.mxu1 %v18569_v34  ;;  %v15277_v34 = vld [vmem:[%s25090_s7 + $0xe8] sm:$0xff] }
 0x749   : > { %18417 = vmatpush3.bf16.msra.mxu0 %v22721_v16  ;;  %18571 = vmatprep.subr.bf16.mxu1 %v25383_v8  ;;  %v25385_v16 = vpack.c.bf16 %v22637_v4, %v22635_v60  ;;  %v25386_v60 = vpack.c.bf16 %v22673_v43, %v22671_v53  ;;  %v18590_v4 = vpack.c.bf16 %v25210_v39, %v25211_v63 }
 0x74a   : > { %16133 = vmatprep.subr.mxu0 %v25380_v46  ;;  %v25387_v53 = vpack.c.bf16 %v22678_v20, %v22676_v25  ;;  %v18593_v43 = vpack.c.bf16 %v25208_v59, %v25209_v48  ;;  %v15276_v25 = vld [vmem:[%s25090_s7 + $0xe0] sm:$0xff]  ;;  %v25388_v20 = vpack.c.bf16 %v22686_v18, %v22684_v11  ;;  %v15278_v11 = vld [vmem:[%s25090_s7 + $0xf0] sm:$0xff]  ;;  %v25205_v18 = vand.u32 4294901760, %v22877_v42  ;;  %v15283_v48 = vld [vmem:[%s25090_s7 + $0x118] sm:$0xff] }
 0x74b   : > { %v8508_v10 = vand.u32 4294901760, %v15276_v25  ;;  %v23000_v39 = vsub.f32 %v15275_v50, %v8505_v45  ;;  %v23009_v32 = vand.u32 4294901760, %v15283_v48 }
 0x74c   : > { %18573 = vmatpush3.bf16.msra.mxu1 %v18572_v61  ;;  %v8511_v61 = vand.u32 4294901760, %v15277_v34 }
 0x74d   : > { %16134 = vmatpush3.msra.mxu0 %v6966_v49  ;;  %16406 = vmatprep.subr.mxu1 %v25380_v46  ;;  %v22948_v12 = vpack.c.bf16 %v8508_v10, %v8505_v45  ;;  %v8514_v49 = vand.u32 4294901760, %v15278_v11  ;;  %v23002_v63 = vsub.f32 %v15276_v25, %v8508_v10  ;;  %25395 = vst [vmem:[#allocation57_spill] sm:$0xff] %v23009_v32 }
 0x74e   : > { %16136 = vmatmul.mubr.f32.vlgmr.msra.gmra.mrb[8].mxu0 %v22789_v31  ;;  %18418 = vmatprep.subr.bf16.mxu0 %v25383_v8 }
 0x74f   : > { %18420 = vmatpush3.bf16.msra.mxu0 %v25385_v16  ;;  %16156 = vmatprep.mubr.msk.f32.mxu0 %vm20278_vm7, %v25380_v46  ;;  %25389 = vst [vmem:[#allocation51_spill] sm:$0xff] %v22948_v12  ;;  %v15279_v16 = vld [vmem:[%s25090_s7 + $0xf8] sm:$0xff]  ;;  %v23016_v50 = vsub.f32 %v15278_v11, %v8514_v49  ;;  %v18635_v25 = vpack.c.bf16 %v23002_v63, %v23000_v39 }
 0x750   : > { %18421 = vmatprep.subr.bf16.mxu0 %v25383_v8  ;;  %16407 = vmatpush3.msra.mxu1 %v22877_v42  ;;  %v23057_v11 = vsub.f32 %v15283_v48, %v23009_v32 }
 0x751   : > { %16409 = vmatmul.mubr.f32.vlgmr.msra.gmra.mrb[20].mxu1 %v22804_v54  ;;  %18586 = vmatprep.subr.bf16.mxu1 %v25383_v8  ;;  %25398 = vst [vmem:[#allocation59_spill] sm:$0xff] %v23016_v50 }
 0x752   : > { %18588 = vmatpush3.bf16.msra.mxu1 %v18587_v40  ;;  %16450 = vmatprep.mubr.msk.f32.mxu1 %vm20278_vm7, %v25380_v46  ;;  %v15280_v40 = vld [vmem:[%s25090_s7 + $0x100] sm:$0xff]  ;;  %25404 = vst [vmem:[#allocation64_spill] sm:$0xff] %v23057_v11 }
 0x753   : > { %18423 = vmatpush3.bf16.msra.mxu0 %v25386_v60  ;;  %18589 = vmatprep.subr.bf16.mxu1 %v25383_v8  ;;  %v22964_v60 = vand.u32 4294901760, %v22787_v62 }
 0x754   : > { %18424 = vmatprep.subr.bf16.mxu0 %v25383_v8 }
 0x755   : > { %25390 = vst [vmem:[#allocation52_spill] sm:$0xff] %v22964_v60  ;;  %v22982_v13 = vsub.f32 %v22787_v62, %v22964_v60 }
 0x756   : > { %18591 = vmatpush3.bf16.msra.mxu1 %v18590_v4  ;;  %v22968_v4 = vpack.c.bf16 %v8514_v49, %v8511_v61 }
 0x757   : > { %18426 = vmatpush3.bf16.msra.mxu0 %v25387_v53  ;;  %18592 = vmatprep.subr.bf16.mxu1 %v25383_v8  ;;  %v8517_v53 = vand.u32 4294901760, %v15279_v16  ;;  %25392 = vst [vmem:[#allocation54_spill] sm:$0xff] %v22982_v13  ;;  %v25217_v59 = vand.u32 4294901760, %v22982_v13 }
 0x758   : > { %18427 = vmatprep.subr.bf16.mxu0 %v25383_v8  ;;  %25391 = vst [vmem:[#allocation53_spill] sm:$0xff] %v22968_v4 }
 0x759   : > { %v8581_v6 = vsub.f32 %v22982_v13, %v25217_v59 }
 0x75a   : > { %18594 = vmatpush3.bf16.msra.mxu1 %v18593_v43  ;;  %v8520_v43 = vand.u32 4294901760, %v15280_v40 }
 0x75b   : > { %18429 = vmatpush3.bf16.msra.mxu0 %v25388_v20  ;;  %18595 = vmatprep.subr.bf16.mxu1 %v25383_v8  ;;  %v15281_v20 = vld [vmem:[%s25090_s7 + $0x108] sm:$0xff]  ;;  %v8582_v45 = vand.u32 4294901760, %v8581_v6 }
 0x75c   : > { %16154 = vmatprep.subr.mxu0 %v25380_v46  ;;  %v8523_v33 = vand.u32 4294901760, %v15281_v20 }
 0x75e   : > { %18597 = vmatpush3.bf16.msra.mxu1 %v18596_v9  ;;  %v15282_v9 = vld [vmem:[%s25090_s7 + $0x110] sm:$0xff]  ;;  %v23038_v6 = vsub.f32 %v15281_v20, %v8523_v33  ;;  %v25405_v20 = vand.u32 4294901760, %v22489_v52  ;;  %v25218_v52 = vand.u32 4294901760, %v23057_v11 }
 0x75f   : > { %16155 = vmatpush3.msra.mxu0 %v22835_v56  ;;  %16448 = vmatprep.subr.mxu1 %v25380_v46  ;;  %v8526_v1 = vand.u32 4294901760, %v15282_v9 }
 0x760   : > { %16157 = vmatmul.mubr.f32.vlgmr.msra.gmra.mrb[10].mxu0 %v22800_v7  ;;  %18430 = vmatprep.subr.bf16.mxu0 %v25383_v8  ;;  %v23027_v7 = vsub.f32 %v15279_v16, %v8517_v53  ;;  %25401 = vst [vmem:[#allocation62_spill] sm:$0xff] %v23038_v6  ;;  %v25220_v16 = vand.u32 4294901760, %v23038_v6 }
 0x761   : > { %18432 = vmatpush3.bf16.msra.mxu0 %v22630_v2  ;;  %16177 = vmatprep.mubr.msk.f32.mxu0 %vm20278_vm7, %v25380_v46  ;;  %v22993_v62 = vpack.c.bf16 %v8526_v1, %v8523_v33  ;;  %v23040_v10 = vsub.f32 %v15282_v9, %v8526_v1  ;;  %v25226_v1 = vand.u32 4294901760, %v23000_v39  ;;  %v25403_v33 = vand.u32 4294901760, %v22835_v56 }
 0x762   : > { %18433 = vmatprep.subr.bf16.mxu0 %v25383_v8  ;;  %16449 = vmatpush3.msra.mxu1 %v25205_v18  ;;  %v22986_v18 = vpack.c.bf16 %v8520_v43, %v8517_v53  ;;  %25399 = vst [vmem:[#allocation60_spill] sm:$0xff] %v23027_v7  ;;  %v25223_v56 = vand.u32 4294901760, %v23016_v50  ;;  %v25222_v48 = vand.u32 4294901760, %v23027_v7  ;;  %v23098_v53 = vld [vmem:[%s25090_s7 + $0x120] sm:$0xff]  ;;  %v25406_v9 = vand.u32 4294901760, %v22494_v15 }
 0x763   : > { %16451 = vmatmul.mubr.f32.vlgmr.msra.gmra.mrb[22].mxu1 %v22791_v27  ;;  %18610 = vmatprep.subr.bf16.mxu1 %v25383_v8  ;;  %25394 = vst [vmem:[#allocation56_spill] sm:$0xff] %v22993_v62  ;;  %25402 = vst [vmem:[#allocation63_spill] sm:$0xff] %v23040_v10 }
 0x764   : > { %18612 = vmatpush3.bf16.msra.mxu1 %v22948_v12  ;;  %16492 = vmatprep.mubr.msk.f32.mxu1 %vm20278_vm7, %v25380_v46  ;;  %25393 = vst [vmem:[#allocation55_spill] sm:$0xff] %v22986_v18 }
 0x765   : > { %18435 = vmatpush3.bf16.msra.mxu0 %v22653_v38  ;;  %18613 = vmatprep.subr.bf16.mxu1 %v25383_v8 }
 0x766   : > { %18436 = vmatprep.subr.bf16.mxu0 %v25383_v8 }
 0x768   : > { %18615 = vmatpush3.bf16.msra.mxu1 %v22968_v4 }
 0x769   : > { %18438 = vmatpush3.bf16.msra.mxu0 %v22663_v19  ;;  %18616 = vmatprep.subr.bf16.mxu1 %v25383_v8 }
 0x76a   : > { %18439 = vmatprep.subr.bf16.mxu0 %v25383_v8 }
 0x76c   : > { %18618 = vmatpush3.bf16.msra.mxu1 %v22986_v18  ;;  %v23014_v18 = vsub.f32 %v15277_v34, %v8511_v61  ;;  %v18644_v34 = vpack.c.bf16 %v23040_v10, %v23038_v6 }
 0x76d   : > { %18441 = vmatpush3.bf16.msra.mxu0 %v22682_v51  ;;  %18619 = vmatprep.subr.bf16.mxu1 %v25383_v8 }
 0x76e   : > { %16175 = vmatprep.subr.mxu0 %v25380_v46  ;;  %25397 = vst [vmem:[#allocation58_spill] sm:$0xff] %v23014_v18  ;;  %v25224_v61 = vand.u32 4294901760, %v23014_v18 }
 0x770   : > { %18621 = vmatpush3.bf16.msra.mxu1 %v22993_v62  ;;  %v25425_v62 = vld [vmem:[#allocation39_spill] sm:$0xff] }
 0x771   : > { %16176 = vmatpush3.msra.mxu0 %v22697_v41  ;;  %16490 = vmatprep.subr.mxu1 %v25380_v46  ;;  %v25426_v4 = vand.u32 4294901760, %v25425_v62 }
 0x772   : > { %16178 = vmatmul.mubr.f32.vlgmr.msra.gmra.mrb[12].mxu0 %v25396_v22  ;;  %18442 = vmatprep.subr.bf16.mxu0 %v25383_v8  ;;  %v23029_v22 = vsub.f32 %v15280_v40, %v8520_v43  ;;  %v25219_v40 = vand.u32 4294901760, %v23040_v10 }
 0x773   : > { %18444 = vmatpush3.bf16.msra.mxu0 %v22731_v57  ;;  %16198 = vmatprep.mubr.msk.f32.mxu0 %vm20278_vm7, %v25380_v46  ;;  %v18638_v57 = vpack.c.bf16 %v23016_v50, %v23014_v18 }
 0x774   : > { %18445 = vmatprep.subr.bf16.mxu0 %v25383_v8  ;;  %16491 = vmatpush3.msra.mxu1 %v23009_v32  ;;  %25400 = vst [vmem:[#allocation61_spill] sm:$0xff] %v23029_v22  ;;  %v25221_v49 = vand.u32 4294901760, %v23029_v22  ;;  %v18668_v43 = vpack.c.bf16 %v25219_v40, %v25220_v16  ;;  %v25416_v40 = vld [vmem:[#allocation36_spill] sm:$0xff] }
 0x775   : > { %16493 = vmatmul.mubr.f32.vlgmr.msra.gmra.mrb[24].mxu1 %v8582_v45  ;;  %18634 = vmatprep.subr.bf16.mxu1 %v25383_v8  ;;  %v9071_v45 = vand.u32 4294901760, %v23098_v53  ;;  %v25417_v16 = vand.u32 4294901760, %v25416_v40 }
 0x776   : > { %18636 = vmatpush3.bf16.msra.mxu1 %v18635_v25  ;;  %16534 = vmatprep.mubr.msk.f32.mxu1 %vm20278_vm7, %v25380_v46  ;;  %v23116_v25 = vpack.c.bf16 %v25406_v9, %v25405_v20  ;;  %v25411_v20 = vand.u32 4294901760, %v22526_v0  ;;  %v25412_v9 = vld [vmem:[#allocation37_spill] sm:$0xff]  ;;  %v23192_v0 = vld [vmem:[%s25090_s7 + $0x158] sm:$0xff] }
 0x777   : > { %18447 = vmatpush3.bf16.msra.mxu0 %v22733_v37  ;;  %18637 = vmatprep.subr.bf16.mxu1 %v25383_v8  ;;  %v18641_v37 = vpack.c.bf16 %v23029_v22, %v23027_v7 }
 0x778   : > { %18448 = vmatprep.subr.bf16.mxu0 %v25383_v8 }
 0x77a   : > { %18639 = vmatpush3.bf16.msra.mxu1 %v18638_v57 }
 0x77b   : > { %18450 = vmatpush3.bf16.msra.mxu0 %v22735_v30  ;;  %18640 = vmatprep.subr.bf16.mxu1 %v25383_v8  ;;  %v25225_v30 = vand.u32 4294901760, %v23002_v63 }
 0x77c   : > { %18451 = vmatprep.subr.bf16.mxu0 %v25383_v8 }
 0x77e   : > { %18642 = vmatpush3.bf16.msra.mxu1 %v18641_v37  ;;  %v23128_v37 = vld [vmem:[%s25090_s7 + $0x138] sm:$0xff] }
 0x77f   : > { %18453 = vmatpush3.bf16.msra.mxu0 %v22737_v26  ;;  %18643 = vmatprep.subr.bf16.mxu1 %v25383_v8  ;;  %v18659_v26 = vpack.c.bf16 %v25225_v30, %v25226_v1  ;;  %v25421_v1 = vld [vmem:[#allocation43_spill] sm:$0xff] }
 0x780   : > { %16196 = vmatprep.subr.mxu0 %v25380_v46 }
 0x782   : > { %18645 = vmatpush3.bf16.msra.mxu1 %v18644_v34  ;;  %v25408_v34 = vand.u32 4294901760, %v22502_v35  ;;  %v23165_v35 = vsub.f32 %v22753_v36, %v22759_v47 }
 0x783   : > { %16197 = vmatpush3.msra.mxu0 %v25403_v33  ;;  %16532 = vmatprep.subr.mxu1 %v25380_v46  ;;  %v25409_v33 = vand.u32 4294901760, %v22508_v28  ;;  %v23168_v28 = vand.u32 4294901760, %v22794_v29 }
 0x784   : > { %16199 = vmatmul.mubr.f32.vlgmr.msra.gmra.mrb[14].mxu0 %v22789_v31  ;;  %18454 = vmatprep.subr.bf16.mxu0 %v25383_v8 }
 0x785   : > { %18456 = vmatpush3.bf16.msra.mxu0 %v22630_v2  ;;  %16219 = vmatprep.mubr.msk.f32.mxu0 %vm20278_vm7, %v25380_v46  ;;  %v18662_v2 = vpack.c.bf16 %v25223_v56, %v25224_v61  ;;  %v23205_v56 = vsub.f32 %v22794_v29, %v23168_v28  ;;  %v25423_v29 = vld [vmem:[#allocation38_spill] sm:$0xff] }
 0x786   : > { %18457 = vmatprep.subr.bf16.mxu0 %v25383_v8  ;;  %16533 = vmatpush3.msra.mxu1 %v23057_v11 }
 0x787   : > { %16535 = vmatmul.mubr.f32.vlgmr.msra.gmra.mrb[26].mxu1 %v22982_v13  ;;  %18658 = vmatprep.subr.bf16.mxu1 %v25383_v8  ;;  %v25433_v22 = vand.u32 4294901760, %v23205_v56 }
 0x788   : > { %18660 = vmatpush3.bf16.msra.mxu1 %v18659_v26  ;;  %16576 = vmatprep.mubr.msk.f32.mxu1 %vm20278_vm7, %v25380_v46  ;;  %v23142_v26 = vpack.c.bf16 %v25409_v33, %v25408_v34  ;;  %v25413_v34 = vand.u32 4294901760, %v25412_v9 }
 0x789   : > { %18459 = vmatpush3.bf16.msra.mxu0 %v22653_v38  ;;  %18661 = vmatprep.subr.bf16.mxu1 %v25383_v8  ;;  %v18665_v38 = vpack.c.bf16 %v25221_v49, %v25222_v48  ;;  %v7468_v49 = vsub.f32 %v25416_v40, %v25417_v16  ;;  %v9092_v48 = vand.u32 4294901760, %v23192_v0  ;;  %v9147_v7 = vsub.f32 %v23205_v56, %v25433_v22 }
 0x78a   : > { %18460 = vmatprep.subr.bf16.mxu0 %v25383_v8  ;;  %v23178_v33 = vpack.c.bf16 %v25413_v34, %v25411_v20  ;;  %v25414_v20 = vld [vmem:[#allocation35_spill] sm:$0xff] }
 0x78b   : > { %v25415_v9 = vand.u32 4294901760, %v25414_v20 }
 0x78c   : > { %18663 = vmatpush3.bf16.msra.mxu1 %v18662_v2  ;;  %v9080_v2 = vand.u32 4294901760, %v23128_v37 }
 0x78d   : > { %18462 = vmatpush3.bf16.msra.mxu0 %v22663_v19  ;;  %18664 = vmatprep.subr.bf16.mxu1 %v25383_v8  ;;  %v23103_v19 = vld [vmem:[%s25090_s7 + $0x128] sm:$0xff]  ;;  %v7461_v34 = vsub.f32 %v25414_v20, %v25415_v9 }
 0x78e   : > { %18463 = vmatprep.subr.bf16.mxu0 %v25383_v8  ;;  %v9074_v57 = vand.u32 4294901760, %v23103_v19  ;;  %v25419_v9 = vld [vmem:[#allocation42_spill] sm:$0xff] }
 0x78f   : > { %v25420_v30 = vand.u32 4294901760, %v25419_v9  ;;  %v7482_v9 = vsub.f32 %v25425_v62, %v25426_v4  ;;  %v7462_v12 = vand.u32 4294901760, %v7461_v34  ;;  %v15292_v4 = vld [vmem:[%s25090_s7 + $0x160] sm:$0xff] }
 0x790   : > { %18666 = vmatpush3.bf16.msra.mxu1 %v18665_v38  ;;  %v23136_v15 = vpack.c.bf16 %v9074_v57, %v9071_v45  ;;  %v23155_v38 = vld [vmem:[%s25090_s7 + $0x148] sm:$0xff]  ;;  %v23239_v10 = vsub.f32 %v23103_v19, %v9074_v57 }
 0x791   : > { %18465 = vmatpush3.bf16.msra.mxu0 %v22682_v51  ;;  %18667 = vmatprep.subr.bf16.mxu1 %v25383_v8  ;;  %v23123_v51 = vld [vmem:[%s25090_s7 + $0x130] sm:$0xff]  ;;  %v9086_v36 = vand.u32 4294901760, %v23155_v38  ;;  %v7483_v34 = vand.u32 4294901760, %v7482_v9 }
 0x792   : > { %16217 = vmatprep.subr.mxu0 %v25380_v46  ;;  %25407 = vst [vmem:[#allocation65_spill] sm:$0xff] %v23136_v15 }
 0x794   : > { %18669 = vmatpush3.bf16.msra.mxu1 %v18668_v43 }
 0x795   : > { %16218 = vmatpush3.msra.mxu0 %v22697_v41  ;;  %16574 = vmatprep.subr.mxu1 %v25380_v46  ;;  %v9077_v41 = vand.u32 4294901760, %v23123_v51 }
 0x796   : > { %16220 = vmatmul.mubr.f32.vlgmr.msra.gmra.mrb[16].mxu0 %v22789_v31  ;;  %18466 = vmatprep.subr.bf16.mxu0 %v25383_v8  ;;  %v23150_v31 = vld [vmem:[%s25090_s7 + $0x140] sm:$0xff] }
 0x797   : > { %18468 = vmatpush3.bf16.msra.mxu0 %v23116_v25  ;;  %16240 = vmatprep.mubr.msk.f32.mxu0 %vm20278_vm7, %v25380_v46  ;;  %v23172_v43 = vpack.c.bf16 %v9080_v2, %v9077_v41  ;;  %v9083_v59 = vand.u32 4294901760, %v23150_v31  ;;  %v23256_v50 = vsub.f32 %v23123_v51, %v9077_v41  ;;  %v25435_v41 = vld [vmem:[#allocation44_spill] sm:$0xff] }
 0x798   : > { %18469 = vmatprep.subr.bf16.mxu0 %v25383_v8  ;;  %16575 = vmatpush3.msra.mxu1 %v25218_v52  ;;  %v23187_v52 = vld [vmem:[%s25090_s7 + $0x150] sm:$0xff] }
 0x799   : > { %16577 = vmatmul.mubr.f32.vlgmr.msra.gmra.mrb[28].mxu1 %v22964_v60  ;;  %18682 = vmatprep.subr.bf16.mxu1 %v25383_v8  ;;  %25410 = vst [vmem:[#allocation66_spill] sm:$0xff] %v23172_v43  ;;  %v23209_v61 = vpack.c.bf16 %v9086_v36, %v9083_v59  ;;  %v9089_v13 = vand.u32 4294901760, %v23187_v52  ;;  %v25429_v60 = vld [vmem:[#allocation40_spill] sm:$0xff] }
 0x79a   : > { %18684 = vmatpush3.bf16.msra.mxu1 %v23136_v15  ;;  %16618 = vmatprep.mubr.msk.f32.mxu1 %vm20278_vm7, %v25380_v46  ;;  %v25422_v15 = vand.u32 4294901760, %v25421_v1  ;;  %v7469_v1 = vand.u32 4294901760, %v7468_v49 }
 0x79b   : > { %18471 = vmatpush3.bf16.msra.mxu0 %v23142_v26  ;;  %18685 = vmatprep.subr.bf16.mxu1 %v25383_v8  ;;  %25418 = vst [vmem:[#allocation37_spill] sm:$0xff] %v23209_v61  ;;  %v23233_v11 = vpack.c.bf16 %v9092_v48, %v9089_v13 }
 0x79c   : > { %18472 = vmatprep.subr.bf16.mxu0 %v25383_v8  ;;  %v23215_v16 = vpack.c.bf16 %v25422_v15, %v25420_v30  ;;  %v25427_v30 = vand.u32 4294901760, %v23165_v35 }
 0x79d   : > { %25428 = vst [vmem:[#allocation35_spill] sm:$0xff] %v23233_v11 }
 0x79e   : > { %18687 = vmatpush3.bf16.msra.mxu1 %v23172_v43  ;;  %v25424_v43 = vand.u32 4294901760, %v25423_v29  ;;  %v7450_v15 = vsub.f32 %v23165_v35, %v25427_v30  ;;  %v18479_v30 = vpack.c.bf16 %v7469_v1, %v7462_v12  ;;  %v23260_v12 = vand.u32 4294901760, %v15292_v4 }
 0x79f   : > { %18474 = vmatpush3.bf16.msra.mxu0 %v23178_v33  ;;  %18688 = vmatprep.subr.bf16.mxu1 %v25383_v8 }
 0x7a0   : > { %18475 = vmatprep.subr.bf16.mxu0 %v25383_v8  ;;  %v7475_v32 = vsub.f32 %v25423_v29, %v25424_v43  ;;  %v23236_v43 = vsub.f32 %v23098_v53, %v9071_v45  ;;  %v25431_v53 = vld [vmem:[#allocation41_spill] sm:$0xff]  ;;  %v7451_v57 = vand.u32 4294901760, %v7450_v15  ;;  %v25436_v15 = vand.u32 4294901760, %v25435_v41 }
 0x7a1   : > { %v25432_v45 = vand.u32 4294901760, %v25431_v53 }
 0x7a2   : > { %18690 = vmatpush3.bf16.msra.mxu1 %v23209_v61  ;;  %v7476_v49 = vand.u32 4294901760, %v7475_v32  ;;  %v25430_v61 = vand.u32 4294901760, %v25429_v60  ;;  %v25434_v32 = vld [vmem:[#allocation46_spill] sm:$0xff]  ;;  %v18707_v9 = vpack.c.bf16 %v23239_v10, %v23236_v43 }
 0x7a3   : > { %18477 = vmatpush3.bf16.msra.mxu0 %v23215_v16  ;;  %18691 = vmatprep.subr.bf16.mxu1 %v25383_v8  ;;  %v7496_v19 = vsub.f32 %v25431_v53, %v25432_v45  ;;  %v7503_v45 = vsub.f32 %v25435_v41, %v25436_v15 }
 0x7a4   : > { %16238 = vmatprep.subr.mxu0 %v25380_v46  ;;  %v7489_v6 = vsub.f32 %v25429_v60, %v25430_v61  ;;  %v23263_v61 = vsub.f32 %v23128_v37, %v9080_v2  ;;  %v18482_v1 = vpack.c.bf16 %v7483_v34, %v7476_v49  ;;  %v9148_v2 = vand.u32 4294901760, %v9147_v7 }
 0x7a5   : > { %v7497_v51 = vand.u32 4294901760, %v7496_v19  ;;  %v23280_v49 = vsub.f32 %v23150_v31, %v9083_v59  ;;  %v7504_v34 = vand.u32 4294901760, %v7503_v45  ;;  %v23293_v59 = vsub.f32 %v23187_v52, %v9089_v13  ;;  %v25439_v19 = vld [vmem:[#allocation47_spill] sm:$0xff] }
 0x7a6   : > { %18693 = vmatpush3.bf16.msra.mxu1 %v23233_v11  ;;  %v7490_v22 = vand.u32 4294901760, %v7489_v6  ;;  %v25437_v11 = vld [vmem:[#allocation45_spill] sm:$0xff]  ;;  %v23283_v6 = vsub.f32 %v23155_v38, %v9086_v36  ;;  %v23296_v31 = vsub.f32 %v23192_v0, %v9092_v48  ;;  %v18491_v52 = vpack.c.bf16 %v25416_v40, %v25414_v20 }
 0x7a7   : > { %16239 = vmatpush3.msra.mxu0 %v25434_v32  ;;  %16616 = vmatprep.subr.mxu1 %v25380_v46  ;;  %v25438_v18 = vand.u32 4294901760, %v25437_v11  ;;  %v9157_v0 = vand.u32 4294901760, %v23236_v43  ;;  %v18494_v20 = vpack.c.bf16 %v25425_v62, %v25423_v29  ;;  %v18497_v29 = vpack.c.bf16 %v25431_v53, %v25429_v60 }
 0x7a8   : > { %16241 = vmatmul.mubr.f32.vlgmr.msra.gmra.mrb[18].mxu0 %v7451_v57  ;;  %18478 = vmatprep.subr.bf16.mxu0 %v25383_v8  ;;  %v18485_v7 = vpack.c.bf16 %v7497_v51, %v7490_v22  ;;  %v18713_v38 = vpack.c.bf16 %v23283_v6, %v23280_v49  ;;  %v25440_v57 = vand.u32 4294901760, %v25439_v19  ;;  %v18716_v13 = vpack.c.bf16 %v23296_v31, %v23293_v59 }
 0x7a9   : > { %18480 = vmatpush3.bf16.msra.mxu0 %v18479_v30  ;;  %v7510_v37 = vsub.f32 %v25437_v11, %v25438_v18  ;;  %16261 = vmatprep.mubr.msk.f32.mxu0 %vm20278_vm7, %v25380_v46  ;;  %v18710_v18 = vpack.c.bf16 %v23263_v61, %v23256_v50  ;;  %v23314_v22 = vsub.f32 %v15292_v4, %v23260_v12  ;;  %v9171_v51 = vand.u32 4294901760, %v23256_v50 }
 0x7aa   : > { %18481 = vmatprep.subr.bf16.mxu0 %v25383_v8  ;;  %16617 = vmatpush3.msra.mxu1 %v23260_v12  ;;  %v9178_v4 = vand.u32 4294901760, %v23263_v61  ;;  %v9185_v15 = vand.u32 4294901760, %v23280_v49  ;;  %v9192_v45 = vand.u32 4294901760, %v23283_v6  ;;  %v18500_v60 = vpack.c.bf16 %v25437_v11, %v25435_v41 }
 0x7ab   : > { %16619 = vmatmul.mubr.f32.vlgmr.msra.gmra.mrb[30].mxu1 %v9148_v2  ;;  %18706 = vmatprep.subr.bf16.mxu1 %v25383_v8  ;;  %v7511_v30 = vand.u32 4294901760, %v7510_v37  ;;  %v9199_v53 = vand.u32 4294901760, %v23293_v59  ;;  %v9206_v2 = vand.u32 4294901760, %v23296_v31  ;;  %v9213_v11 = vand.u32 4294901760, %v23314_v22 }
 0x7ac   : > { %18708 = vmatpush3.bf16.msra.mxu1 %v18707_v9  ;;  %16660 = vmatprep.mubr.msk.f32.mxu1 %vm20278_vm7, %v25380_v46  ;;  %v7517_v9 = vsub.f32 %v25439_v19, %v25440_v57  ;;  %v18734_v62 = vpack.c.bf16 %v9178_v4, %v9171_v51  ;;  %v18737_v37 = vpack.c.bf16 %v9192_v45, %v9185_v15  ;;  %v25441_v41 = vand.u32 4294901760, %v23165_v35 }
 0x7ad   : > { %18483 = vmatpush3.bf16.msra.mxu0 %v18482_v1  ;;  %18709 = vmatprep.subr.bf16.mxu1 %v25383_v8  ;;  %v18488_v36 = vpack.c.bf16 %v7511_v30, %v7504_v34  ;;  %v9164_v1 = vand.u32 4294901760, %v23239_v10 }
 0x7ae   : > { %18484 = vmatprep.subr.bf16.mxu0 %v25383_v8  ;;  %v7518_v48 = vand.u32 4294901760, %v7517_v9 }
 0x7af   : > { %v18731_v40 = vpack.c.bf16 %v9164_v1, %v9157_v0 }
 0x7b0   : > { %18711 = vmatpush3.bf16.msra.mxu1 %v18710_v18  ;;  %v18740_v18 = vpack.c.bf16 %v9206_v2, %v9199_v53 }
 0x7b1   : > { %18486 = vmatpush3.bf16.msra.mxu0 %v18485_v7  ;;  %18712 = vmatprep.subr.bf16.mxu1 %v25383_v8  ;;  %v25442_v7 = vand.u32 4294901760, %v22818_v23 }
 0x7b2   : > { %18487 = vmatprep.subr.bf16.mxu0 %v25383_v8 }
 0x7b3   : > { %v8026_v34 = vsub.f32 %v22818_v23, %v25442_v7  ;;  %v25453_v7 = vld [vmem:[#allocation50_spill] sm:$0xff] }
 0x7b4   : > { %18714 = vmatpush3.bf16.msra.mxu1 %v18713_v38 }
 0x7b5   : > { %18489 = vmatpush3.bf16.msra.mxu0 %v18488_v36  ;;  %18715 = vmatprep.subr.bf16.mxu1 %v25383_v8 }
 0x7b6   : > { %16259 = vmatprep.subr.mxu0 %v25380_v46 }
 0x7b8   : > { %18717 = vmatpush3.bf16.msra.mxu1 %v18716_v13 }
 0x7b9   : > { %16260 = vmatpush3.msra.mxu0 %v7518_v48  ;;  %16658 = vmatprep.subr.mxu1 %v25380_v46  ;;  %v25447_v48 = vand.u32 4294901760, %v22847_v5 }
 0x7ba   : > { %16262 = vmatmul.mubr.f32.vlgmr.msra.gmra.mrb[20].mxu0 %v22759_v47  ;;  %18490 = vmatprep.subr.bf16.mxu0 %v25383_v8 }
 0x7bb   : > { %18492 = vmatpush3.bf16.msra.mxu0 %v18491_v52  ;;  %16282 = vmatprep.mubr.msk.f32.mxu0 %vm20278_vm7, %v25380_v46 }
 0x7bc   : > { %18493 = vmatprep.subr.bf16.mxu0 %v25383_v8  ;;  %16659 = vmatpush3.msra.mxu1 %v23314_v22 }
 0x7bd   : > { %16661 = vmatmul.mubr.f32.vlgmr.msra.gmra.mrb[32].mxu1 %v23205_v56  ;;  %18730 = vmatprep.subr.bf16.mxu1 %v25383_v8 }
 0x7be   : > { %18732 = vmatpush3.bf16.msra.mxu1 %v18731_v40  ;;  %16702 = vmatprep.mubr.msk.f32.mxu1 %vm20278_vm7, %v25380_v46  ;;  %v25448_v40 = vand.u32 4294901760, %v22857_v14 }
 0x7bf   : > { %18495 = vmatpush3.bf16.msra.mxu0 %v18494_v20  ;;  %18733 = vmatprep.subr.bf16.mxu1 %v25383_v8 }
 0x7c0   : > { %18496 = vmatprep.subr.bf16.mxu0 %v25383_v8  ;;  %v8068_v20 = vsub.f32 %v22857_v14, %v25448_v40 }
 0x7c2   : > { %18735 = vmatpush3.bf16.msra.mxu1 %v18734_v62 }
 0x7c3   : > { %18498 = vmatpush3.bf16.msra.mxu0 %v18497_v29  ;;  %18736 = vmatprep.subr.bf16.mxu1 %v25383_v8 }
 0x7c4   : > { %18499 = vmatprep.subr.bf16.mxu0 %v25383_v8 }
 0x7c6   : > { %18738 = vmatpush3.bf16.msra.mxu1 %v18737_v37  ;;  %v25450_v37 = vand.u32 4294901760, %v22877_v42 }
 0x7c7   : > { %18501 = vmatpush3.bf16.msra.mxu0 %v18500_v60  ;;  %18739 = vmatprep.subr.bf16.mxu1 %v25383_v8 }
 0x7c8   : > { %16280 = vmatprep.subr.mxu0 %v25380_v46  ;;  %v8082_v14 = vsub.f32 %v22877_v42, %v25450_v37  ;;  %v25452_v42 = vld [vmem:[#allocation49_spill] sm:$0xff] }
 0x7ca   : > { %18741 = vmatpush3.bf16.msra.mxu1 %v18740_v18 }
 0x7cb   : > { %16281 = vmatpush3.msra.mxu0 %v25439_v19  ;;  %16700 = vmatprep.subr.mxu1 %v25380_v46  ;;  %v8027_v19 = vand.u32 4294901760, %v8026_v34 }
 0x7cc   : > { %16283 = vmatmul.mubr.f32.vlgmr.msra.gmra.mrb[22].mxu0 %v23165_v35  ;;  %18502 = vmatprep.subr.bf16.mxu0 %v25383_v8  ;;  %v25443_v35 = vand.u32 4294901760, %v22820_v44 }
 0x7cd   : > { %18504 = vmatpush3.bf16.msra.mxu0 %v23116_v25  ;;  %16303 = vmatprep.mubr.msk.f32.mxu0 %vm20278_vm7, %v25380_v46 }
 0x7ce   : > { %18505 = vmatprep.subr.bf16.mxu0 %v25383_v8  ;;  %16701 = vmatpush3.msra.mxu1 %v9213_v11  ;;  %v8033_v30 = vsub.f32 %v22820_v44, %v25443_v35 }
 0x7cf   : > { %16703 = vmatmul.mubr.f32.vlgmr.msra.gmra.mrb[34].mxu1 %v23168_v28  ;;  %16726 = vmatprep.subr.mxu1 %v25380_v46 }
 0x7d0   : > { %16728 = vmatprep.mubr.msk.f32.mxu1 %vm20278_vm7, %v25380_v46  ;;  %v8034_v57 = vand.u32 4294901760, %v8033_v30 }
 0x7d1   : > { %18507 = vmatpush3.bf16.msra.mxu0 %v23142_v26 }
 0x7d2   : > { %18508 = vmatprep.subr.bf16.mxu0 %v25383_v8  ;;  %v18551_v9 = vpack.c.bf16 %v8034_v57, %v8027_v19  ;;  %v25457_v57 = vld [vmem:[#allocation58_spill] sm:$0xff] }
 0x7d5   : > { %18510 = vmatpush3.bf16.msra.mxu0 %v23178_v33 }
 0x7d6   : > { %18511 = vmatprep.subr.bf16.mxu0 %v25383_v8 }
 0x7d9   : > { %18513 = vmatpush3.bf16.msra.mxu0 %v23215_v16 }
 0x7da   : > { %16301 = vmatprep.subr.mxu0 %v25380_v46 }
 0x7dd   : > { %16302 = vmatpush3.msra.mxu0 %v25434_v32 }
 0x7de   : > { %16304 = vmatmul.mubr.f32.vlgmr.msra.gmra.mrb[24].mxu0 %v25441_v41  ;;  %18526 = vmatprep.subr.bf16.mxu0 %v25383_v8  ;;  %v25451_v41 = vld [vmem:[#allocation48_spill] sm:$0xff] }
 0x7df   : > { %18528 = vmatpush3.bf16.msra.mxu0 %v23116_v25  ;;  %16345 = vmatprep.mubr.msk.f32.mxu0 %vm20278_vm7, %v25380_v46  ;;  %v25444_v25 = vand.u32 4294901760, %v22828_v21 }
 0x7e0   : > { %18529 = vmatprep.subr.bf16.mxu0 %v25383_v8 }
 0x7e1   : > { %v8040_v38 = vsub.f32 %v22828_v21, %v25444_v25  ;;  %v8061_v21 = vsub.f32 %v22847_v5, %v25447_v48  ;;  %v8069_v5 = vand.u32 4294901760, %v8068_v20  ;;  %v25461_v20 = vld [vmem:[#allocation60_spill] sm:$0xff] }
 0x7e3   : > { %18531 = vmatpush3.bf16.msra.mxu0 %v23142_v26  ;;  %v25445_v26 = vand.u32 4294901760, %v22831_v58  ;;  %v8041_v23 = vand.u32 4294901760, %v8040_v38  ;;  %v8062_v52 = vand.u32 4294901760, %v8061_v21  ;;  %v25454_v38 = vand.u32 4294901760, %v22804_v54 }
 0x7e4   : > { %18532 = vmatprep.subr.bf16.mxu0 %v25383_v8  ;;  %v25456_v54 = vand.u32 4294901760, %v23002_v63 }
 0x7e5   : > { %v8047_v36 = vsub.f32 %v22831_v58, %v25445_v26  ;;  %v25455_v26 = vand.u32 4294901760, %v23000_v39 }
 0x7e6   : > { %v8599_v19 = vsub.f32 %v23002_v63, %v25456_v54 }
 0x7e7   : > { %18534 = vmatpush3.bf16.msra.mxu0 %v23178_v33  ;;  %v8048_v44 = vand.u32 4294901760, %v8047_v36  ;;  %v25446_v33 = vand.u32 4294901760, %v22845_v17  ;;  %v8592_v36 = vsub.f32 %v23000_v39, %v25455_v26  ;;  %v25469_v26 = vld [vmem:[#allocation64_spill] sm:$0xff] }
 0x7e8   : > { %18535 = vmatprep.subr.bf16.mxu0 %v25383_v8  ;;  %v8600_v21 = vand.u32 4294901760, %v8599_v19 }
 0x7e9   : > { %v8054_v13 = vsub.f32 %v22845_v17, %v25446_v33  ;;  %v18554_v58 = vpack.c.bf16 %v8048_v44, %v8041_v23  ;;  %v25449_v17 = vand.u32 4294901760, %v22859_v24  ;;  %v25458_v23 = vand.u32 4294901760, %v25457_v57 }
 0x7ea   : > { %v8593_v48 = vand.u32 4294901760, %v8592_v36  ;;  %v25470_v36 = vand.u32 4294901760, %v25469_v26 }
 0x7eb   : > { %18537 = vmatpush3.bf16.msra.mxu0 %v23215_v16  ;;  %v8055_v16 = vand.u32 4294901760, %v8054_v13  ;;  %v8075_v62 = vsub.f32 %v22859_v24, %v25449_v17  ;;  %v8083_v24 = vand.u32 4294901760, %v8082_v14  ;;  %v8606_v44 = vsub.f32 %v25457_v57, %v25458_v23 }
 0x7ec   : > { %16343 = vmatprep.subr.mxu0 %v25380_v46  ;;  %v18623_v40 = vpack.c.bf16 %v8600_v21, %v8593_v48  ;;  %v25462_v17 = vand.u32 4294901760, %v25461_v20  ;;  %v8648_v54 = vsub.f32 %v25469_v26, %v25470_v36  ;;  %v25472_v48 = vld [vmem:[#allocation51_spill] sm:$0xff]  ;;  %v25473_v21 = vld [vmem:[#allocation53_spill] sm:$0xff] }
 0x7ed   : > { %v8607_v63 = vand.u32 4294901760, %v8606_v44  ;;  %v25479_v26 = vld [vmem:[#allocation65_spill] sm:$0xff] }
 0x7ee   : > { %v8649_v57 = vand.u32 4294901760, %v8648_v54  ;;  %v25482_v54 = vld [vmem:[#allocation35_spill] sm:$0xff] }
 0x7ef   : > { %16344 = vmatpush3.msra.mxu0 %v25434_v32  ;;  %v8076_v32 = vand.u32 4294901760, %v8075_v62  ;;  %v8620_v62 = vsub.f32 %v25461_v20, %v25462_v17  ;;  %v25476_v20 = vld [vmem:[#allocation57_spill] sm:$0xff] }
 0x7f0   : > { %16346 = vmatmul.mubr.f32.vlgmr.msra.gmra.mrb[26].mxu0 %v22759_v47  ;;  %18550 = vmatprep.subr.bf16.mxu0 %v25383_v8  ;;  %v18557_v47 = vpack.c.bf16 %v8062_v52, %v8055_v16 }
 0x7f1   : > { %18552 = vmatpush3.bf16.msra.mxu0 %v18551_v9  ;;  %16387 = vmatprep.mubr.msk.f32.mxu0 %vm20278_vm7, %v25380_v46  ;;  %v18560_v29 = vpack.c.bf16 %v8076_v32, %v8069_v5  ;;  %v25459_v9 = vld [vmem:[#allocation59_spill] sm:$0xff]  ;;  %v8621_v14 = vand.u32 4294901760, %v8620_v62  ;;  %v25477_v62 = vld [vmem:[#allocation54_spill] sm:$0xff] }
 0x7f2   : > { %18553 = vmatprep.subr.bf16.mxu0 %v25383_v8  ;;  %v25460_v33 = vand.u32 4294901760, %v25459_v9 }
 0x7f4   : > { %v8613_v13 = vsub.f32 %v25459_v9, %v25460_v33 }
 0x7f5   : > { %18555 = vmatpush3.bf16.msra.mxu0 %v18554_v58 }
 0x7f6   : > { %18556 = vmatprep.subr.bf16.mxu0 %v25383_v8  ;;  %v8614_v52 = vand.u32 4294901760, %v8613_v13  ;;  %v25471_v13 = vld [vmem:[#allocation52_spill] sm:$0xff] }
 0x7f8   : > { %v18626_v37 = vpack.c.bf16 %v8614_v52, %v8607_v63 }
 0x7f9   : > { %18558 = vmatpush3.bf16.msra.mxu0 %v18557_v47  ;;  %v25463_v47 = vld [vmem:[#allocation61_spill] sm:$0xff] }
 0x7fa   : > { %18559 = vmatprep.subr.bf16.mxu0 %v25383_v8  ;;  %v25464_v5 = vand.u32 4294901760, %v25463_v47 }
 0x7fc   : > { %v8627_v32 = vsub.f32 %v25463_v47, %v25464_v5  ;;  %v25478_v47 = vand.u32 4294901760, %v25477_v62  ;;  %v9158_v5 = vsub.f32 %v23236_v43, %v9157_v0 }
 0x7fd   : > { %18561 = vmatpush3.bf16.msra.mxu0 %v18560_v29 }
 0x7fe   : > { %16385 = vmatprep.subr.mxu0 %v25380_v46 }
 0x800   : > { %v23432_v60 = vpop.f32.mrb[16].mxu1 }
 0x801   : > { %16386 = vmatpush3.msra.mxu0 %v8083_v24  ;;  %v16326_v18 = vpop.f32.mrb[17].mxu1  ;;  %v8628_v24 = vand.u32 4294901760, %v8627_v32  ;;  %v9165_v32 = vsub.f32 %v23239_v10, %v9164_v1 }
 0x802   : > { %16388 = vmatmul.mubr.f32.vlgmr.msra.gmra.mrb[28].mxu0 %v22791_v27  ;;  %18574 = vmatprep.subr.bf16.mxu0 %v25383_v8  ;;  %v25465_v18 = vld [vmem:[#allocation62_spill] sm:$0xff] }
 0x803   : > { %18576 = vmatpush3.bf16.msra.mxu0 %v25451_v41  ;;  %16429 = vmatprep.mubr.msk.f32.mxu0 %vm20278_vm7, %v25380_v46 }
 0x804   : > { %18577 = vmatprep.subr.bf16.mxu0 %v25383_v8 }
 0x807   : > { %18579 = vmatpush3.bf16.msra.mxu0 %v25452_v42 }
 0x808   : > { %18580 = vmatprep.subr.bf16.mxu0 %v25383_v8 }
 0x80b   : > { %18582 = vmatpush3.bf16.msra.mxu0 %v25453_v7 }
 0x80c   : > { %18583 = vmatprep.subr.bf16.mxu0 %v25383_v8 }
 0x80f   : > { %18585 = vmatpush3.bf16.msra.mxu0 %v22809_v55  ;;  %v6901_v34 = vpop.f32.mrb[6].mxu0 }
 0x810   : > { %v16116_v35 = vpop.f32.mrb[7].mxu0  ;;  %16427 = vmatprep.subr.mxu0 %v25380_v46 }
 0x812   : > { %v23446_v30 = vpop.f32.mrb[18].mxu1 }
 0x813   : > { %16428 = vmatpush3.msra.mxu0 %v22826_v3  ;;  %v16368_v25 = vpop.f32.mrb[19].mxu1 }
 0x814   : > { %16430 = vmatmul.mubr.f32.vlgmr.msra.gmra.mrb[30].mxu0 %v25454_v38  ;;  %18598 = vmatprep.subr.bf16.mxu0 %v25383_v8 }
 0x815   : > { %18600 = vmatpush3.bf16.msra.mxu0 %v25451_v41  ;;  %16471 = vmatprep.mubr.msk.f32.mxu0 %vm20278_vm7, %v25380_v46  ;;  %v25466_v41 = vand.u32 4294901760, %v25465_v18 }
 0x816   : > { %18601 = vmatprep.subr.bf16.mxu0 %v25383_v8 }
 0x819   : > { %18603 = vmatpush3.bf16.msra.mxu0 %v25452_v42  ;;  %v8634_v42 = vsub.f32 %v25465_v18, %v25466_v41 }
 0x81a   : > { %18604 = vmatprep.subr.bf16.mxu0 %v25383_v8 }
 0x81d   : > { %18606 = vmatpush3.bf16.msra.mxu0 %v25453_v7  ;;  %v25467_v7 = vld [vmem:[#allocation63_spill] sm:$0xff] }
 0x81e   : > { %18607 = vmatprep.subr.bf16.mxu0 %v25383_v8 }
 0x821   : > { %v7017_v58 = vpop.f32.mrb[8].mxu0  ;;  %18609 = vmatpush3.bf16.msra.mxu0 %v22809_v55 }
 0x822   : > { %v7018_v39 = vadd.f32 %v7017_v58, %v6901_v34  ;;  %v16137_v16 = vpop.f32.mrb[9].mxu0  ;;  %16469 = vmatprep.subr.mxu0 %v25380_v46  ;;  %v25468_v34 = vand.u32 4294901760, %v25467_v7  ;;  %v25474_v58 = vld [vmem:[#allocation55_spill] sm:$0xff] }
 0x823   : > { %v25475_v16 = vld [vmem:[#allocation56_spill] sm:$0xff] }
 0x824   : > { %v23480_v29 = vpop.f32.mrb[20].mxu1  ;;  %v8641_v35 = vsub.f32 %v25467_v7, %v25468_v34 }
 0x825   : > { %16470 = vmatpush3.msra.mxu0 %v22826_v3  ;;  %v16410_v55 = vpop.f32.mrb[21].mxu1  ;;  %v18629_v3 = vpack.c.bf16 %v8628_v24, %v8621_v14  ;;  %v9159_v14 = vand.u32 4294901760, %v9158_v5  ;;  %v9166_v24 = vand.u32 4294901760, %v9165_v32 }
 0x826   : > { %16472 = vmatmul.mubr.f32.vlgmr.msra.gmra.mrb[32].mxu0 %v22791_v27  ;;  %18622 = vmatprep.subr.bf16.mxu0 %v25383_v8  ;;  %v8635_v27 = vand.u32 4294901760, %v8634_v42  ;;  %v8642_v25 = vand.u32 4294901760, %v8641_v35  ;;  %v9172_v55 = vsub.f32 %v23256_v50, %v9171_v51  ;;  %v9186_v50 = vsub.f32 %v23280_v49, %v9185_v15 }
 0x827   : > { %18624 = vmatpush3.bf16.msra.mxu0 %v18623_v40  ;;  %16513 = vmatprep.mubr.msk.f32.mxu0 %vm20278_vm7, %v25380_v46  ;;  %v18695_v41 = vpack.c.bf16 %v9166_v24, %v9159_v14  ;;  %v9200_v49 = vsub.f32 %v23293_v59, %v9199_v53  ;;  %v9214_v59 = vsub.f32 %v23314_v22, %v9213_v11  ;;  %v25480_v22 = vld [vmem:[#allocation66_spill] sm:$0xff]  ;;  %v25481_v11 = vld [vmem:[#allocation37_spill] sm:$0xff] }
 0x828   : > { %18625 = vmatprep.subr.bf16.mxu0 %v25383_v8  ;;  %v18632_v38 = vpack.c.bf16 %v8642_v25, %v8635_v27  ;;  %v9173_v10 = vand.u32 4294901760, %v9172_v55  ;;  %v9187_v7 = vand.u32 4294901760, %v9186_v50 }
 0x829   : > { %v9215_v53 = vand.u32 4294901760, %v9214_v59 }
 0x82b   : > { %18627 = vmatpush3.bf16.msra.mxu0 %v18626_v37  ;;  %v9179_v37 = vsub.f32 %v23263_v61, %v9178_v4  ;;  %v9193_v61 = vsub.f32 %v23283_v6, %v9192_v45  ;;  %v9207_v6 = vsub.f32 %v23296_v31, %v9206_v2  ;;  %v9201_v45 = vand.u32 4294901760, %v9200_v49 }
 0x82c   : > { %18628 = vmatprep.subr.bf16.mxu0 %v25383_v8 }
 0x82d   : > { %v9180_v1 = vand.u32 4294901760, %v9179_v37  ;;  %v9194_v34 = vand.u32 4294901760, %v9193_v61  ;;  %v9208_v35 = vand.u32 4294901760, %v9207_v6 }
 0x82f   : > { %18630 = vmatpush3.bf16.msra.mxu0 %v18629_v3  ;;  %v18698_v42 = vpack.c.bf16 %v9180_v1, %v9173_v10  ;;  %v18701_v15 = vpack.c.bf16 %v9194_v34, %v9187_v7  ;;  %v18704_v3 = vpack.c.bf16 %v9208_v35, %v9201_v45  ;;  %v23645_v45 = vld [vmem:[%s25094_s11 + $0x18] sm:$0xff] }
 0x830   : > { %18631 = vmatprep.subr.bf16.mxu0 %v25383_v8 }
 0x833   : > { %v7107_v19 = vpop.f32.mrb[10].mxu0  ;;  %18633 = vmatpush3.bf16.msra.mxu0 %v18632_v38 }
 0x834   : > { %v7108_v23 = vadd.f32 %v7107_v19, %v7018_v39  ;;  %v16158_v44 = vpop.f32.mrb[11].mxu0  ;;  %16511 = vmatprep.subr.mxu0 %v25380_v46 }
 0x836   : > { %v23500_v9 = vpop.f32.mrb[22].mxu1 }
 0x837   : > { %16512 = vmatpush3.msra.mxu0 %v8649_v57  ;;  %v16452_v33 = vpop.f32.mrb[23].mxu1 }
 0x838   : > { %16514 = vmatmul.mubr.f32.vlgmr.msra.gmra.mrb[34].mxu0 %v25471_v13  ;;  %18646 = vmatprep.subr.bf16.mxu0 %v25383_v8  ;;  %v25483_v33 = vand.u32 4294901760, %v23205_v56 }
 0x839   : > { %18648 = vmatpush3.bf16.msra.mxu0 %v25472_v48  ;;  %16555 = vmatprep.mubr.msk.f32.mxu0 %vm20278_vm7, %v25380_v46 }
 0x83a   : > { %18649 = vmatprep.subr.bf16.mxu0 %v25383_v8 }
 0x83d   : > { %18651 = vmatpush3.bf16.msra.mxu0 %v25473_v21 }
 0x83e   : > { %18652 = vmatprep.subr.bf16.mxu0 %v25383_v8 }
 0x841   : > { %18654 = vmatpush3.bf16.msra.mxu0 %v25474_v58 }
 0x842   : > { %18655 = vmatprep.subr.bf16.mxu0 %v25383_v8 }
 0x845   : > { %v7189_v39 = vpop.f32.mrb[12].mxu0  ;;  %18657 = vmatpush3.bf16.msra.mxu0 %v25475_v16 }
 0x846   : > { %v7190_v63 = vadd.f32 %v7189_v39, %v7108_v23  ;;  %v16179_v52 = vpop.f32.mrb[13].mxu0  ;;  %16553 = vmatprep.subr.mxu0 %v25380_v46 }
 0x848   : > { %v23514_v40 = vpop.f32.mrb[24].mxu1 }
 0x849   : > { %16554 = vmatpush3.msra.mxu0 %v25476_v20  ;;  %v16494_v17 = vpop.f32.mrb[25].mxu1 }
 0x84a   : > { %16556 = vmatmul.mubr.f32.vlgmr.msra.gmra.mrb[36].mxu0 %v25478_v47  ;;  %18670 = vmatprep.subr.bf16.mxu0 %v25383_v8 }
 0x84b   : > { %18672 = vmatpush3.bf16.msra.mxu0 %v25472_v48  ;;  %16597 = vmatprep.mubr.msk.f32.mxu0 %vm20278_vm7, %v25380_v46 }
 0x84c   : > { %18673 = vmatprep.subr.bf16.mxu0 %v25383_v8 }
 0x84f   : > { %18675 = vmatpush3.bf16.msra.mxu0 %v25473_v21 }
 0x850   : > { %18676 = vmatprep.subr.bf16.mxu0 %v25383_v8 }
 0x853   : > { %18678 = vmatpush3.bf16.msra.mxu0 %v25474_v58 }
 0x854   : > { %18679 = vmatprep.subr.bf16.mxu0 %v25383_v8 }
 0x857   : > { %v7287_v18 = vpop.f32.mrb[14].mxu0  ;;  %18681 = vmatpush3.bf16.msra.mxu0 %v25475_v16 }
 0x858   : > { %v7288_v43 = vadd.f32 %v7287_v18, %v7190_v63  ;;  %v16200_v0 = vpop.f32.mrb[15].mxu0  ;;  %16595 = vmatprep.subr.mxu0 %v25380_v46 }
 0x85a   : > { %v23548_v51 = vpop.f32.mrb[26].mxu1 }
 0x85b   : > { %16596 = vmatpush3.msra.mxu0 %v25476_v20  ;;  %v16536_v4 = vpop.f32.mrb[27].mxu1 }
 0x85c   : > { %16598 = vmatmul.mubr.f32.vlgmr.msra.gmra.mrb[38].mxu0 %v25471_v13  ;;  %18694 = vmatprep.subr.bf16.mxu0 %v25383_v8 }
 0x85d   : > { %18696 = vmatpush3.bf16.msra.mxu0 %v18695_v41  ;;  %16639 = vmatprep.mubr.msk.f32.mxu0 %vm20278_vm7, %v25380_v46 }
 0x85e   : > { %18697 = vmatprep.subr.bf16.mxu0 %v25383_v8 }
 0x861   : > { %18699 = vmatpush3.bf16.msra.mxu0 %v18698_v42 }
 0x862   : > { %18700 = vmatprep.subr.bf16.mxu0 %v25383_v8 }
 0x865   : > { %18702 = vmatpush3.bf16.msra.mxu0 %v18701_v15  ;;  %v23640_v15 = vld [vmem:[%s25094_s11 + $0x10] sm:$0xff] }
 0x866   : > { %18703 = vmatprep.subr.bf16.mxu0 %v25383_v8 }
 0x869   : > { %v7367_v31 = vpop.f32.mrb[16].mxu0  ;;  %18705 = vmatpush3.bf16.msra.mxu0 %v18704_v3 }
 0x86a   : > { %v7368_v2 = vadd.f32 %v7367_v31, %v7288_v43  ;;  %v16221_v27 = vpop.f32.mrb[17].mxu0  ;;  %16637 = vmatprep.subr.mxu0 %v25380_v46 }
 0x86c   : > { %v23568_v25 = vpop.f32.mrb[28].mxu1 }
 0x86d   : > { %16638 = vmatpush3.msra.mxu0 %v9215_v53  ;;  %v16578_v38 = vpop.f32.mrb[29].mxu1 }
 0x86e   : > { %16640 = vmatmul.mubr.f32.vlgmr.msra.gmra.mrb[40].mxu0 %v23168_v28  ;;  %18718 = vmatprep.subr.bf16.mxu0 %v25383_v8  ;;  %v10555_v38 = vand.u32 4294901760, %v23640_v15 }
 0x86f   : > { %18720 = vmatpush3.bf16.msra.mxu0 %v25479_v26  ;;  %16681 = vmatprep.mubr.msk.f32.mxu0 %vm20278_vm7, %v25380_v46 }
 0x870   : > { %18721 = vmatprep.subr.bf16.mxu0 %v25383_v8 }
 0x873   : > { %18723 = vmatpush3.bf16.msra.mxu0 %v25480_v22 }
 0x874   : > { %18724 = vmatprep.subr.bf16.mxu0 %v25383_v8 }
 0x877   : > { %18726 = vmatpush3.bf16.msra.mxu0 %v25481_v11 }
 0x878   : > { %18727 = vmatprep.subr.bf16.mxu0 %v25383_v8 }
 0x87b   : > { %v7453_v36 = vpop.f32.mrb[18].mxu0  ;;  %18729 = vmatpush3.bf16.msra.mxu0 %v25482_v54 }
 0x87c   : > { %v7454_v19 = vadd.f32 %v7453_v36, %v7368_v2  ;;  %v16242_v57 = vpop.f32.mrb[19].mxu0  ;;  %16679 = vmatprep.subr.mxu0 %v25380_v46 }
 0x87e   : > { %v23582_v23 = vpop.f32.mrb[30].mxu1 }
 0x87f   : > { %16680 = vmatpush3.msra.mxu0 %v23260_v12  ;;  %v16620_v44 = vpop.f32.mrb[31].mxu1 }
 0x880   : > { %16682 = vmatmul.mubr.f32.vlgmr.msra.gmra.mrb[42].mxu0 %v25483_v33  ;;  %18742 = vmatprep.subr.bf16.mxu0 %v25383_v8  ;;  %v23690_v44 = vld [vmem:[%s25094_s11 + $0x20] sm:$0xff]  ;;  %v23695_v33 = vld [vmem:[%s25094_s11 + $0x28] sm:$0xff] }
 0x881   : > { %18744 = vmatpush3.bf16.msra.mxu0 %v25479_v26  ;;  %16723 = vmatprep.mubr.msk.f32.mxu0 %vm20278_vm7, %v25380_v46  ;;  %v23671_v26 = vld [vmem:[%s25095_s12 + $0x10] sm:$0xff] }
 0x882   : > { %18745 = vmatprep.subr.bf16.mxu0 %v25383_v8  ;;  %v11156_v36 = vand.u32 4294901760, %v23671_v26 }
 0x885   : > { %18747 = vmatpush3.bf16.msra.mxu0 %v25480_v22  ;;  %v23676_v22 = vld [vmem:[%s25095_s12 + $0x18] sm:$0xff] }
 0x886   : > { %18748 = vmatprep.subr.bf16.mxu0 %v25383_v8  ;;  %v11159_v57 = vand.u32 4294901760, %v23676_v22 }
 0x889   : > { %18750 = vmatpush3.bf16.msra.mxu0 %v25481_v11  ;;  %v10558_v11 = vand.u32 4294901760, %v23645_v45 }
 0x88a   : > { %18751 = vmatprep.subr.bf16.mxu0 %v25383_v8 }
 0x88d   : > { %v7569_v13 = vpop.f32.mrb[20].mxu0  ;;  %18753 = vmatpush3.bf16.msra.mxu0 %v25482_v54 }
 0x88e   : > { %v7570_v56 = vadd.f32 %v7569_v13, %v7454_v19  ;;  %v16263_v48 = vpop.f32.mrb[21].mxu0  ;;  %16721 = vmatprep.subr.mxu0 %v25380_v46  ;;  %v23684_v19 = vsub.f32 %v23640_v15, %v10555_v38  ;;  %v23705_v13 = vsub.f32 %v23671_v26, %v11156_v36 }
 0x88f   : > { %v10561_v48 = vand.u32 4294901760, %v23690_v44 }
 0x890   : > { %v23598_v21 = vpop.f32.mrb[32].mxu1 }
 0x891   : > { %16722 = vmatpush3.msra.mxu0 %v23260_v12  ;;  %v16662_v58 = vpop.f32.mrb[33].mxu1 }
 0x892   : > { %16724 = vmatmul.mubr.f32.vlgmr.msra.gmra.mrb[44].mxu0 %v23168_v28  ;;  %16756 = vmatprep.subr.mxu0 %v25380_v46  ;;  %v10564_v58 = vand.u32 4294901760, %v23695_v33 }
 0x893   : > { %16758 = vmatprep.mubr.msk.f32.mxu0 %vm20278_vm7, %v25380_v46 }
 0x89f   : > { %v7659_v39 = vpop.f32.mrb[22].mxu0 }
 0x8a0   : > { %v7660_v16 = vadd.f32 %v7659_v39, %v7570_v56  ;;  %v16284_v63 = vpop.f32.mrb[23].mxu0  ;;  %v23710_v56 = vsub.f32 %v23676_v22, %v11159_v57  ;;  %v23717_v39 = vld [vmem:[%s25095_s12 + $0x20] sm:$0xff] }
 0x8a1   : > { %v11162_v63 = vand.u32 4294901760, %v23717_v39 }
 0x8a2   : > { %v23605_v52 = vpop.f32.mrb[34].mxu1 }
 0x8a3   : > { %v16704_v20 = vpop.f32.mrb[35].mxu1 }
 0x8b1   : > { %v7741_v17 = vpop.f32.mrb[24].mxu0 }
 0x8b2   : > { %v7742_v62 = vadd.f32 %v7741_v17, %v7660_v16  ;;  %v16305_v47 = vpop.f32.mrb[25].mxu0  ;;  %v23722_v16 = vld [vmem:[%s25095_s12 + $0x28] sm:$0xff]  ;;  %v23729_v17 = vsub.f32 %v23690_v44, %v10561_v48  ;;  %v11145_v44 = vld [vmem:[%s25095_s12 + $0x40] sm:$0xff] }
 0x8b3   : > { %v11165_v20 = vand.u32 4294901760, %v23722_v16  ;;  %v23739_v47 = vsub.f32 %v23717_v39, %v11162_v63  ;;  %v11174_v39 = vand.u32 4294901760, %v11145_v44 }
 0x8b4   : > { %v7840_v5 = vadd.f32 %v23432_v60, %v7742_v62  ;;  %v23734_v62 = vsub.f32 %v23695_v33, %v10564_v58 }
 0x8c3   : > { %v7919_v12 = vpop.f32.mrb[26].mxu0 }
 0x8c4   : > { %v7920_v32 = vadd.f32 %v7919_v12, %v7840_v5  ;;  %v16347_v55 = vpop.f32.mrb[27].mxu0  ;;  %v23744_v5 = vsub.f32 %v23722_v16, %v11165_v20 }
 0x8c6   : > { %25484 = vst [vmem:[#allocation36_spill] sm:$0xff] %v23744_v5 }
 0x8d5   : > { %v8134_v28 = vpop.f32.mrb[28].mxu0 }
 0x8d6   : > { %v8135_v37 = vadd.f32 %v8134_v28, %v23446_v30  ;;  %v16389_v14 = vpop.f32.mrb[29].mxu0  ;;  %v23616_v30 = vld [vmem:[%s25094_s11] sm:$0xff] }
 0x8d8   : > { %v8225_v24 = vadd.f32 %v23480_v29, %v8135_v37  ;;  %v23621_v29 = vld [vmem:[%s25094_s11 + $0x8] sm:$0xff] }
 0x8d9   : > { %v10552_v34 = vand.u32 4294901760, %v23621_v29 }
 0x8db   : > { %v23655_v59 = vsub.f32 %v23621_v29, %v10552_v34  ;;  %v23818_v29 = vpack.c.bf16 %v11159_v57, %v11156_v36  ;;  %v10540_v36 = vld [vmem:[%s25094_s11 + $0x40] sm:$0xff]  ;;  %v10541_v57 = vld [vmem:[%s25094_s11 + $0x48] sm:$0xff] }
 0x8dc   : > { %v10573_v33 = vand.u32 4294901760, %v10540_v36 }
 0x8e7   : > { %v8306_v18 = vpop.f32.mrb[30].mxu0 }
 0x8e8   : > { %v8307_v43 = vadd.f32 %v8306_v18, %v8225_v24  ;;  %v16431_v0 = vpop.f32.mrb[31].mxu0 }
 0x8ea   : > { %v8405_v10 = vadd.f32 %v23500_v9, %v8307_v43  ;;  %v23626_v9 = vld [vmem:[%s25095_s12] sm:$0xff] }
 0x8eb   : > { %v11150_v49 = vand.u32 4294901760, %v23626_v9 }
 0x8ed   : > { %v23660_v31 = vsub.f32 %v23626_v9, %v11150_v49  ;;  %v23830_v9 = vpack.c.bf16 %v10564_v58, %v10561_v48  ;;  %v10576_v48 = vand.u32 4294901760, %v10541_v57  ;;  %v11146_v58 = vld [vmem:[%s25095_s12 + $0x48] sm:$0xff] }
 0x8ee   : > { %v11177_v16 = vand.u32 4294901760, %v11146_v58 }
 0x8f9   : > { %v8484_v1 = vpop.f32.mrb[32].mxu0 }
 0x8fa   : > { %v8485_v41 = vadd.f32 %v8484_v1, %v8405_v10  ;;  %v16473_v50 = vpop.f32.mrb[33].mxu0 }
 0x8fb   : > { %v10081_v50 = vld [vmem:[#allocation11] sm:$0xf] }
 0x8fc   : > { %v8488_v61 = vadd.f32 %v8485_v41, %v7920_v32  ;;  %v9630_v41 = vld [vmem:[#allocation10] sm:$0xf] }
 0x90b   : > { %v8700_v4 = vpop.f32.mrb[34].mxu0 }
 0x90c   : > { %v8701_v60 = vadd.f32 %v8700_v4, %v23514_v40  ;;  %v16515_v42 = vpop.f32.mrb[35].mxu0  ;;  %v10549_v40 = vand.u32 4294901760, %v23616_v30  ;;  %v9633_v4 = vsel %vm9631_vm9, %v9630_v41, 0 }
 0x90d   : > { %v23749_v42 = vand.u32 4294901760, %v9633_v4 }
 0x90e   : > { %v8791_v7 = vadd.f32 %v23548_v51, %v8701_v60  ;;  %v23633_v51 = vld [vmem:[%s25095_s12 + $0x8] sm:$0xff]  ;;  %v23650_v3 = vsub.f32 %v23616_v30, %v10549_v40  ;;  %v10083_v60 = vsel %vm9631_vm9, %v10081_v50, 0  ;;  %v23795_v41 = vpack.c.bf16 %v10552_v34, %v10549_v40  ;;  %v10538_v34 = vld [vmem:[%s25094_s11 + $0x30] sm:$0xff] }
 0x90f   : > { %v11153_v6 = vand.u32 4294901760, %v23633_v51  ;;  %v23810_v30 = vpack.c.bf16 %v10558_v11, %v10555_v38  ;;  %v23838_v40 = vpack.c.bf16 %v11165_v20, %v11162_v63  ;;  %v23877_v63 = vpack.c.bf16 %v10576_v48, %v10573_v33 }
 0x910   : > { %v23879_v20 = vpack.c.bf16 %v11177_v16, %v11174_v39 }
 0x911   : > { %v23665_v27 = vsub.f32 %v23633_v51, %v11153_v6  ;;  %v23801_v50 = vpack.c.bf16 %v11153_v6, %v11150_v49  ;;  %v10539_v51 = vld [vmem:[%s25094_s11 + $0x38] sm:$0xff]  ;;  %v11143_v49 = vld [vmem:[%s25095_s12 + $0x30] sm:$0xff]  ;;  %v10567_v6 = vand.u32 4294901760, %v10538_v34 }
 0x912   : > { %v10570_v15 = vand.u32 4294901760, %v10539_v51  ;;  %v11168_v38 = vand.u32 4294901760, %v11143_v49 }
 0x914   : > { %v23857_v22 = vpack.c.bf16 %v10570_v15, %v10567_v6 }
 0x91d   : > { %v8872_v35 = vpop.f32.mrb[36].mxu0 }
 0x91e   : > { %v8873_v53 = vadd.f32 %v8872_v35, %v8791_v7  ;;  %v16557_v2 = vpop.f32.mrb[37].mxu0  ;;  %v23751_v7 = vand.u32 4294901760, %v10083_v60 }
 0x920   : > { %v8971_v54 = vadd.f32 %v23568_v25, %v8873_v53  ;;  %v23700_v25 = vsub.f32 %v23645_v45, %v10558_v11  ;;  %v11144_v45 = vld [vmem:[%s25095_s12 + $0x38] sm:$0xff] }
 0x921   : > { %v11171_v26 = vand.u32 4294901760, %v11144_v45 }
 0x923   : > { %v23859_v11 = vpack.c.bf16 %v11171_v26, %v11168_v38 }
 0x92f   : > { %v9050_v12 = vpop.f32.mrb[38].mxu0 }
 0x930   : > { %v9051_v32 = vadd.f32 %v9050_v12, %v8971_v54  ;;  %v16599_v55 = vpop.f32.mrb[39].mxu0  ;;  %v15293_v12 = vld [vmem:[#allocation8] ss:$0 sm:$0xff] }
 0x932   : > { %v9054_v28 = vadd.f32 %v9051_v32, %v8488_v61  ;;  %v9702_v61 = vsub.f32 %v9633_v4, %v23749_v42  ;;  %v10542_v4 = vld [vmem:[%s25094_s11 + $0x50] sm:$0xff] }
 0x941   : > { %v9266_v37 = vpop.f32.mrb[40].mxu0 }
 0x942   : > { %v9267_v14 = vadd.f32 %v9266_v37, %v23582_v23  ;;  %v16641_v24 = vpop.f32.mrb[41].mxu0  ;;  %v10152_v23 = vsub.f32 %v10083_v60, %v23751_v7  ;;  %v10543_v60 = vld [vmem:[%s25094_s11 + $0x58] sm:$0xff] }
 0x944   : > { %v9357_v18 = vadd.f32 %v23598_v21, %v9267_v14  ;;  %v9703_v21 = vand.u32 4294901760, %v9702_v61  ;;  %v10153_v53 = vand.u32 4294901760, %v10152_v23 }
 0x946   : > { %v9704_v32 = vsub.f32 %v9702_v61, %v9703_v21  ;;  %v10154_v55 = vsub.f32 %v10152_v23, %v10153_v53 }
 0x948   : > { %v9705_v24 = vand.u32 4294901760, %v9704_v32  ;;  %v23906_v32 = vsub.f32 %v10541_v57, %v10576_v48 }
 0x953   : > { %v9438_v43 = vpop.f32.mrb[42].mxu0 }
 0x954   : > { %v9439_v0 = vadd.f32 %v9438_v43, %v9357_v18  ;;  %v16683_v10 = vpop.f32.mrb[43].mxu0  ;;  %v10155_v18 = vand.u32 4294901760, %v10154_v55  ;;  %v23908_v55 = vsub.f32 %v11145_v44, %v11174_v39  ;;  %v25260_v44 = vand.u32 4294901760, %v23705_v13 }
 0x956   : > { %v9537_v1 = vadd.f32 %v23605_v52, %v9439_v0 }
 0x965   : > { %v9616_v35 = vpop.f32.mrb[44].mxu0 }
 0x966   : > { %v9617_v2 = vadd.f32 %v9616_v35, %v9537_v1  ;;  %v16725_v54 = vpop.f32.mrb[45].mxu0 }
 0x967   : > { %v23899_v54 = vsub.f32 %v11143_v49, %v11168_v38  ;;  %v25275_v49 = vand.u32 4294901760, %v23665_v27 }
 0x968   : > { %v9620_v52 = vadd.f32 %v9617_v2, %v9054_v28  ;;  %v23897_v2 = vsub.f32 %v10539_v51, %v10570_v15 }
 0x969   : > { %25487 = vst [vmem:[#allocation38_spill] sm:$0xff] %v23899_v54 }
 0x96a   : > { %v9628_v37 = vadd.f32 %v15293_v12, %v9620_v52  ;;  %25486 = vst [vmem:[#allocation43_spill] sm:$0xff] %v23897_v2  ;;  %v23901_v12 = vsub.f32 %v11144_v45, %v11171_v26  ;;  %v23904_v52 = vsub.f32 %v10540_v36, %v10573_v33  ;;  %v25266_v26 = vand.u32 4294901760, %v23700_v25 }
 0x96b   : > { %v11247_v36 = vsub.f32 %v23665_v27, %v25275_v49  ;;  %v25265_v33 = vand.u32 4294901760, %v23710_v56 }
 0x96c   : > { %v9629_v14 = vmax.f32 %v9628_v37, 0.0  ;;  %25488 = vst [vmem:[#allocation39_spill] sm:$0xff] %v23901_v12  ;;  %v23910_v37 = vsub.f32 %v11146_v58, %v11177_v16  ;;  %v10660_v39 = vsub.f32 %v23700_v25, %v25266_v26  ;;  %v25264_v16 = vand.u32 4294901760, %v23729_v17 }
 0x96d   : > { %v25273_v26 = vand.u32 4294901760, %v23904_v52 }
 0x96e   : > { %v9636_v43 = vand.u32 4294901760, %v9629_v14 }
 0x970   : > { %v9713_v0 = vsub.f32 %v9629_v14, %v9636_v43  ;;  %16727 = vmatpush3.msra.mxu1 %v9636_v43  ;;  %16757 = vmatpush3.msra.mxu0 %v9636_v43 }
 0x971   : > { %16729 = vmatmul.mubr.f32.vlgmr.msra.gmra.mrb[36].mxu1 %v9705_v24  ;;  %16759 = vmatmul.mubr.f32.vlgmr.msra.gmra.mrb[46].mxu0 %v10155_v18 }
 0x972   : > { %16731 = vmatprep.subr.mxu1 %v25380_v46  ;;  %16761 = vmatprep.subr.mxu0 %v25380_v46  ;;  %v9714_v10 = vand.u32 4294901760, %v9713_v0 }
 0x973   : > { %16733 = vmatprep.mubr.msk.f32.mxu1 %vm20278_vm7, %v25380_v46  ;;  %16763 = vmatprep.mubr.msk.f32.mxu0 %vm20278_vm7, %v25380_v46 }
 0x974   : > { %v9715_v28 = vsub.f32 %v9713_v0, %v9714_v10 }
 0x976   : > { %v9716_v1 = vand.u32 4294901760, %v9715_v28  ;;  %v25278_v28 = vand.u32 4294901760, %v23655_v59 }
 0x978   : > { %16732 = vmatpush3.msra.mxu1 %v9716_v1  ;;  %16762 = vmatpush3.msra.mxu0 %v9716_v1  ;;  %v25277_v1 = vand.u32 4294901760, %v23660_v31  ;;  %v10646_v45 = vsub.f32 %v23655_v59, %v25278_v28 }
 0x979   : > { %16734 = vmatmul.mubr.f32.vlgmr.msra.gmra.mrb[36].mxu1 %v23749_v42  ;;  %16736 = vmatprep.subr.mxu1 %v25380_v46 }
 0x97a   : > { %16764 = vmatmul.mubr.f32.vlgmr.msra.gmra.mrb[46].mxu0 %v23751_v7  ;;  %16766 = vmatprep.subr.mxu0 %v25380_v46  ;;  %v11240_v38 = vsub.f32 %v23660_v31, %v25277_v1  ;;  %v10647_v48 = vand.u32 4294901760, %v10646_v45 }
 0x97b   : > { %16737 = vmatpush3.msra.mxu1 %v9713_v0  ;;  %16767 = vmatpush3.msra.mxu0 %v9713_v0 }
 0x97c   : > { %16738 = vmatprep.mubr.msk.f32.mxu1 %vm20278_vm7, %v25380_v46  ;;  %16741 = vmatprep.subr.mxu1 %v25380_v46  ;;  %v11241_v58 = vand.u32 4294901760, %v11240_v38 }
 0x97d   : > { %16768 = vmatprep.mubr.msk.f32.mxu0 %vm20278_vm7, %v25380_v46  ;;  %16771 = vmatprep.subr.mxu0 %v25380_v46 }
 0x981   : > { %16739 = vmatmul.mubr.f32.vlgmr.msra.gmra.mrb[36].mxu1 %v9702_v61  ;;  %v10582_v61 = vand.u32 4294901760, %v10543_v60 }
 0x982   : > { %16742 = vmatpush3.msra.mxu1 %v9636_v43  ;;  %16769 = vmatmul.mubr.f32.vlgmr.msra.gmra.mrb[46].mxu0 %v10152_v23  ;;  %v11148_v23 = vld [vmem:[%s25095_s12 + $0x58] sm:$0xff] }
 0x983   : > { %16772 = vmatpush3.msra.mxu0 %v9636_v43  ;;  %16743 = vmatprep.mubr.msk.f32.mxu1 %vm20278_vm7, %v25380_v46  ;;  %v23918_v18 = vsub.f32 %v10543_v60, %v10582_v61 }
 0x984   : > { %16746 = vmatprep.subr.mxu1 %v25380_v46  ;;  %16773 = vmatprep.mubr.msk.f32.mxu0 %vm20278_vm7, %v25380_v46 }
 0x985   : > { %16776 = vmatprep.subr.mxu0 %v25380_v46 }
 0x989   : > { %16744 = vmatmul.mubr.f32.vlgmr.msra.gmra.mrb[36].mxu1 %v9703_v21  ;;  %v25280_v21 = vand.u32 4294901760, %v23650_v3 }
 0x98a   : > { %16747 = vmatpush3.msra.mxu1 %v9714_v10  ;;  %16774 = vmatmul.mubr.f32.vlgmr.msra.gmra.mrb[46].mxu0 %v10153_v53  ;;  %v23895_v53 = vsub.f32 %v10538_v34, %v10567_v6  ;;  %v25268_v6 = vand.u32 4294901760, %v23684_v19 }
 0x98b   : > { %16777 = vmatpush3.msra.mxu0 %v9714_v10  ;;  %16748 = vmatprep.mubr.msk.f32.mxu1 %vm20278_vm7, %v25380_v46  ;;  %v10639_v10 = vsub.f32 %v23650_v3, %v25280_v21 }
 0x98c   : > { %16751 = vmatprep.subr.mxu1 %v25380_v46  ;;  %16778 = vmatprep.mubr.msk.f32.mxu0 %vm20278_vm7, %v25380_v46  ;;  %25485 = vst [vmem:[#allocation42_spill] sm:$0xff] %v23895_v53  ;;  %v10653_v57 = vsub.f32 %v23684_v19, %v25268_v6 }
 0x98d   : > { %16781 = vmatprep.subr.mxu0 %v25380_v46  ;;  %v10640_v15 = vand.u32 4294901760, %v10639_v10 }
 0x98e   : > { %v10654_v60 = vand.u32 4294901760, %v10653_v57 }
 0x991   : > { %16749 = vmatmul.mubr.f32.vlgmr.msra.gmra.mrb[36].mxu1 %v23749_v42 }
 0x992   : > { %16752 = vmatpush3.msra.mxu1 %v9636_v43  ;;  %16779 = vmatmul.mubr.f32.vlgmr.msra.gmra.mrb[46].mxu0 %v23751_v7 }
 0x993   : > { %16782 = vmatpush3.msra.mxu0 %v9636_v43  ;;  %16753 = vmatprep.mubr.msk.f32.mxu1 %vm20278_vm7, %v25380_v46  ;;  %v11183_v43 = vand.u32 4294901760, %v11148_v23 }
 0x994   : > { %16783 = vmatprep.mubr.msk.f32.mxu0 %vm20278_vm7, %v25380_v46  ;;  %18754 = vmatprep.subr.bf16.mxu1 %v25383_v8 }
 0x995   : > { %18862 = vmatprep.subr.bf16.mxu0 %v25383_v8  ;;  %v23930_v51 = vsub.f32 %v11148_v23, %v11183_v43  ;;  %v10661_v23 = vand.u32 4294901760, %v10660_v39 }
 0x997   : > { %v23971_v57 = vpack.c.bf16 %v10661_v23, %v10654_v60  ;;  %v25270_v23 = vand.u32 4294901760, %v23899_v54 }
 0x999   : > { %16754 = vmatmul.mubr.f32.vlgmr.msra.gmra.mrb[36].mxu1 %v23749_v42  ;;  %v11147_v42 = vld [vmem:[%s25095_s12 + $0x50] sm:$0xff] }
 0x99a   : > { %16784 = vmatmul.mubr.f32.vlgmr.msra.gmra.mrb[46].mxu0 %v23751_v7  ;;  %18756 = vmatpush3.bf16.msra.mxu1 %v23795_v41  ;;  %v10579_v7 = vand.u32 4294901760, %v10542_v4  ;;  %v11180_v35 = vand.u32 4294901760, %v11147_v42 }
 0x99b   : > { %18864 = vmatpush3.bf16.msra.mxu0 %v23801_v50  ;;  %18757 = vmatprep.subr.bf16.mxu1 %v25383_v8 }
 0x99c   : > { %18865 = vmatprep.subr.bf16.mxu0 %v25383_v8  ;;  %16810 = vmatprep.mubr.msk.f32.mxu1 %vm20278_vm7, %v25380_v46  ;;  %v23914_v14 = vpack.c.bf16 %v10582_v61, %v10579_v7  ;;  %v23916_v24 = vsub.f32 %v10542_v4, %v10579_v7  ;;  %v23920_v0 = vsub.f32 %v11147_v42, %v11180_v35  ;;  %v11248_v4 = vand.u32 4294901760, %v11247_v36 }
 0x99d   : > { %16972 = vmatprep.mubr.msk.f32.mxu0 %vm20278_vm7, %v25380_v46  ;;  %v23928_v34 = vpack.c.bf16 %v11183_v43, %v11180_v35  ;;  %v11254_v42 = vsub.f32 %v23705_v13, %v25260_v44  ;;  %v11261_v7 = vsub.f32 %v23710_v56, %v25265_v33  ;;  %v23962_v61 = vpack.c.bf16 %v10647_v48, %v10640_v15 }
 0x99e   : > { %18759 = vmatpush3.bf16.msra.mxu1 %v23810_v30  ;;  %25489 = vst [vmem:[#allocation40_spill] sm:$0xff] %v23914_v14  ;;  %v10667_v35 = vsub.f32 %v23729_v17, %v25264_v16  ;;  %v25261_v43 = vand.u32 4294901760, %v23734_v62  ;;  %v23968_v10 = vpack.c.bf16 %v11248_v4, %v11241_v58  ;;  %v25262_v36 = vand.u32 4294901760, %v23739_v47 }
 0x99f   : > { %18867 = vmatpush3.bf16.msra.mxu0 %v23818_v29  ;;  %18760 = vmatprep.subr.bf16.mxu1 %v25383_v8  ;;  %25490 = vst [vmem:[#allocation41_spill] sm:$0xff] %v23928_v34  ;;  %v11255_v45 = vand.u32 4294901760, %v11254_v42  ;;  %v11262_v38 = vand.u32 4294901760, %v11261_v7  ;;  %v25263_v48 = vand.u32 4294901760, %v23744_v5  ;;  %v25267_v4 = vand.u32 4294901760, %v23895_v53 }
 0x9a0   : > { %18868 = vmatprep.subr.bf16.mxu0 %v25383_v8  ;;  %v10668_v44 = vand.u32 4294901760, %v10667_v35  ;;  %v10674_v15 = vsub.f32 %v23734_v62, %v25261_v43  ;;  %v11268_v58 = vsub.f32 %v23739_v47, %v25262_v36  ;;  %v25269_v42 = vand.u32 4294901760, %v23897_v2 }
 0x9a1   : > { %v23977_v39 = vpack.c.bf16 %v11262_v38, %v11255_v45  ;;  %v11275_v60 = vsub.f32 %v23744_v5, %v25263_v48  ;;  %v25271_v35 = vand.u32 4294901760, %v23901_v12  ;;  %v10681_v45 = vsub.f32 %v23895_v53, %v25267_v4 }
 0x9a2   : > { %18762 = vmatpush3.bf16.msra.mxu1 %v23830_v9  ;;  %v10675_v7 = vand.u32 4294901760, %v10674_v15  ;;  %v11269_v43 = vand.u32 4294901760, %v11268_v58  ;;  %v10688_v38 = vsub.f32 %v23897_v2, %v25269_v42  ;;  %v11282_v48 = vsub.f32 %v23899_v54, %v25270_v23 }
 0x9a3   : > { %18870 = vmatpush3.bf16.msra.mxu0 %v23838_v40  ;;  %18763 = vmatprep.subr.bf16.mxu1 %v25383_v8  ;;  %v11276_v15 = vand.u32 4294901760, %v11275_v60  ;;  %v11289_v16 = vsub.f32 %v23901_v12, %v25271_v35  ;;  %v10682_v58 = vand.u32 4294901760, %v10681_v45  ;;  %v25272_v4 = vand.u32 4294901760, %v23906_v32 }
 0x9a4   : > { %18871 = vmatprep.subr.bf16.mxu0 %v25383_v8  ;;  %v23995_v36 = vpack.c.bf16 %v10675_v7, %v10668_v44  ;;  %v10689_v33 = vand.u32 4294901760, %v10688_v38  ;;  %v11283_v42 = vand.u32 4294901760, %v11282_v48  ;;  %v25274_v7 = vand.u32 4294901760, %v23908_v55 }
 0x9a5   : > { %v24005_v6 = vpack.c.bf16 %v11276_v15, %v11269_v43  ;;  %v11290_v44 = vand.u32 4294901760, %v11289_v16  ;;  %v10695_v23 = vsub.f32 %v23904_v52, %v25273_v26  ;;  %v10702_v45 = vsub.f32 %v23906_v32, %v25272_v4 }
 0x9a6   : > { %18765 = vmatpush3.bf16.msra.mxu1 %v23857_v22  ;;  %v24008_v60 = vpack.c.bf16 %v10689_v33, %v10682_v58  ;;  %v25276_v38 = vand.u32 4294901760, %v23910_v37  ;;  %v11296_v16 = vsub.f32 %v23908_v55, %v25274_v7  ;;  %v25279_v43 = vand.u32 4294901760, %v23916_v24 }
 0x9a7   : > { %18873 = vmatpush3.bf16.msra.mxu0 %v23859_v11  ;;  %18766 = vmatprep.subr.bf16.mxu1 %v25383_v8  ;;  %v24017_v35 = vpack.c.bf16 %v11290_v44, %v11283_v42  ;;  %v25285_v33 = vand.u32 4294901760, %v23918_v18  ;;  %v10696_v48 = vand.u32 4294901760, %v10695_v23  ;;  %v10703_v15 = vand.u32 4294901760, %v10702_v45 }
 0x9a8   : > { %18874 = vmatprep.subr.bf16.mxu0 %v25383_v8  ;;  %v11303_v58 = vsub.f32 %v23910_v37, %v25276_v38  ;;  %v25287_v4 = vand.u32 4294901760, %v23920_v0  ;;  %v11297_v26 = vand.u32 4294901760, %v11296_v16  ;;  %v10709_v42 = vsub.f32 %v23916_v24, %v25279_v43 }
 0x9a9   : > { %v10716_v44 = vsub.f32 %v23918_v18, %v25285_v33  ;;  %v25286_v7 = vand.u32 4294901760, %v23930_v51  ;;  %v18785_v49 = vpack.c.bf16 %v10703_v15, %v10696_v48  ;;  %v18791_v33 = vpack.c.bf16 %v23655_v59, %v23650_v3 }
 0x9aa   : > { %18768 = vmatpush3.bf16.msra.mxu1 %v23877_v63  ;;  %v11304_v23 = vand.u32 4294901760, %v11303_v58  ;;  %v11310_v45 = vsub.f32 %v23920_v0, %v25287_v4  ;;  %v10710_v38 = vand.u32 4294901760, %v10709_v42  ;;  %v18899_v48 = vpack.c.bf16 %v23665_v27, %v23660_v31 }
 0x9ab   : > { %18876 = vmatpush3.bf16.msra.mxu0 %v23879_v20  ;;  %18769 = vmatprep.subr.bf16.mxu1 %v25383_v8  ;;  %v10717_v1 = vand.u32 4294901760, %v10716_v44  ;;  %v11317_v16 = vsub.f32 %v23930_v51, %v25286_v7  ;;  %v18794_v15 = vpack.c.bf16 %v23700_v25, %v23684_v19  ;;  %v18902_v58 = vpack.c.bf16 %v23710_v56, %v23705_v13 }
 0x9ac   : > { %18877 = vmatprep.subr.bf16.mxu0 %v25383_v8  ;;  %v18893_v28 = vpack.c.bf16 %v11304_v23, %v11297_v26  ;;  %v11311_v43 = vand.u32 4294901760, %v11310_v45  ;;  %v18797_v42 = vpack.c.bf16 %v23734_v62, %v23729_v17  ;;  %v18908_v26 = vpack.c.bf16 %v23901_v12, %v23899_v54 }
 0x9ad   : > { %v18788_v21 = vpack.c.bf16 %v10717_v1, %v10710_v38  ;;  %v18905_v1 = vpack.c.bf16 %v23744_v5, %v23739_v47  ;;  %v18806_v44 = vpack.c.bf16 %v23918_v18, %v23916_v24  ;;  %v18914_v23 = vpack.c.bf16 %v23930_v51, %v23920_v0 }
 0x9ae   : > { %18771 = vmatpush3.bf16.msra.mxu1 %v23914_v14 }
 0x9af   : > { %18772 = vmatprep.subr.bf16.mxu1 %v25383_v8  ;;  %18879 = vmatpush3.bf16.msra.mxu0 %v23928_v34  ;;  %v11318_v34 = vand.u32 4294901760, %v11317_v16 }
 0x9b0   : > { %18880 = vmatprep.subr.bf16.mxu0 %v25383_v8 }
 0x9b1   : > { %v18896_v14 = vpack.c.bf16 %v11318_v34, %v11311_v43  ;;  %v18800_v34 = vpack.c.bf16 %v23897_v2, %v23895_v53 }
 0xa6c   : > { %v10077_v45 = vpop.f32.mrb[36].mxu1 }
 0xa6d   : > { %v10527_v16 = vpop.f32.mrb[46].mxu0  ;;  %v16755_v7 = vpop.f32.mrb[37].mxu1 }
 0xa6e   : > { %v10531_v4 = vmax.f32 %v10077_v45, %v10527_v16  ;;  %v16785_v2 = vpop.f32.mrb[47].mxu0 }
 0xa6f   : > { %v25494_v2 = vld [vmem:[#allocation41_spill] sm:$0xff] }
 0xa70   : > { %v10546_v53 = vsel %vm10544_vm10, %v10531_v4, 0 }
 0xa71   : > { %v24065_v12 = vand.u32 4294901760, %v10546_v53 }
 0xa73   : > { %v10626_v38 = vsub.f32 %v10546_v53, %v24065_v12  ;;  %v25493_v53 = vld [vmem:[#allocation40_spill] sm:$0xff] }
 0xa75   : > { %v24068_v54 = vand.u32 4294901760, %v10626_v38 }
 0xa77   : > { %v10628_v43 = vsub.f32 %v10626_v38, %v24068_v54 }
 0xa79   : > { %v10629_v5 = vand.u32 4294901760, %v10628_v43 }
 0xa7b   : > { %16811 = vmatmul.mubr.f32.vlgmr.msra.gmra.mrb[38].mxu1 %v10629_v5  ;;  %16973 = vmatmul.mubr.f32.vlgmr.msra.gmra.mrb[48].mxu0 %v10629_v5  ;;  %v25491_v5 = vpack.c.bf16 %v23906_v32, %v23904_v52 }
 0xa7c   : > { %18774 = vmatpush3.bf16.msra.mxu1 %v23962_v61  ;;  %18882 = vmatpush3.bf16.msra.mxu0 %v23968_v10  ;;  %v25498_v61 = vand.u32 4294901760, %v23665_v27  ;;  %v25502_v27 = vand.u32 4294901760, %v23710_v56  ;;  %v25505_v56 = vand.u32 4294901760, %v23739_v47  ;;  %v25516_v47 = vand.u32 4294901760, %v23904_v52 }
 0xa7d   : > { %18775 = vmatprep.subr.bf16.mxu1 %v25383_v8  ;;  %18883 = vmatprep.subr.bf16.mxu0 %v25383_v8  ;;  %v25522_v52 = vand.u32 4294901760, %v23920_v0 }
 0xa7e   : > { %16837 = vmatprep.mubr.msk.f32.mxu1 %vm20278_vm7, %v25380_v46  ;;  %16999 = vmatprep.mubr.msk.f32.mxu0 %vm20278_vm7, %v25380_v46 }
 0xa80   : > { %18777 = vmatpush3.bf16.msra.mxu1 %v23971_v57  ;;  %18885 = vmatpush3.bf16.msra.mxu0 %v23977_v39 }
 0xa81   : > { %18778 = vmatprep.subr.bf16.mxu1 %v25383_v8  ;;  %18886 = vmatprep.subr.bf16.mxu0 %v25383_v8 }
 0xa84   : > { %18780 = vmatpush3.bf16.msra.mxu1 %v23995_v36  ;;  %18888 = vmatpush3.bf16.msra.mxu0 %v24005_v6  ;;  %v25497_v6 = vand.u32 4294901760, %v23660_v31  ;;  %v25501_v31 = vand.u32 4294901760, %v23705_v13 }
 0xa85   : > { %18781 = vmatprep.subr.bf16.mxu1 %v25383_v8  ;;  %18889 = vmatprep.subr.bf16.mxu0 %v25383_v8 }
 0xa86   : > { %v18935_v10 = vpack.c.bf16 %v25498_v61, %v25497_v6  ;;  %v18938_v57 = vpack.c.bf16 %v25502_v27, %v25501_v31 }
 0xa88   : > { %18783 = vmatpush3.bf16.msra.mxu1 %v24008_v60  ;;  %18891 = vmatpush3.bf16.msra.mxu0 %v24017_v35  ;;  %v25508_v35 = vld [vmem:[#allocation42_spill] sm:$0xff]  ;;  %v25510_v60 = vld [vmem:[#allocation43_spill] sm:$0xff] }
 0xa89   : > { %18784 = vmatprep.subr.bf16.mxu1 %v25383_v8  ;;  %18892 = vmatprep.subr.bf16.mxu0 %v25383_v8  ;;  %v25509_v7 = vand.u32 4294901760, %v25508_v35 }
 0xa8c   : > { %18786 = vmatpush3.bf16.msra.mxu1 %v18785_v49  ;;  %18894 = vmatpush3.bf16.msra.mxu0 %v18893_v28  ;;  %v25496_v28 = vand.u32 4294901760, %v23655_v59  ;;  %v25500_v59 = vand.u32 4294901760, %v23700_v25  ;;  %v25504_v25 = vand.u32 4294901760, %v23734_v62  ;;  %v25514_v62 = vld [vmem:[#allocation39_spill] sm:$0xff] }
 0xa8d   : > { %18787 = vmatprep.subr.bf16.mxu1 %v25383_v8  ;;  %18895 = vmatprep.subr.bf16.mxu0 %v25383_v8 }
 0xa90   : > { %18789 = vmatpush3.bf16.msra.mxu1 %v18788_v21  ;;  %18897 = vmatpush3.bf16.msra.mxu0 %v18896_v14  ;;  %v25492_v21 = vpack.c.bf16 %v23910_v37, %v23908_v55  ;;  %v25495_v14 = vand.u32 4294901760, %v23650_v3  ;;  %v25499_v3 = vand.u32 4294901760, %v23684_v19  ;;  %v25503_v19 = vand.u32 4294901760, %v23729_v17  ;;  %v25512_v17 = vld [vmem:[#allocation38_spill] sm:$0xff] }
 0xa91   : > { %18790 = vmatprep.subr.bf16.mxu1 %v25383_v8  ;;  %18898 = vmatprep.subr.bf16.mxu0 %v25383_v8 }
 0xa92   : > { %v18827_v49 = vpack.c.bf16 %v25496_v28, %v25495_v14  ;;  %v18830_v36 = vpack.c.bf16 %v25500_v59, %v25499_v3  ;;  %v18833_v13 = vpack.c.bf16 %v25504_v25, %v25503_v19 }
 0xa93   : > { %16838 = vmatmul.mubr.f32.vlgmr.msra.gmra.mrb[38].mxu1 %v24065_v12  ;;  %17000 = vmatmul.mubr.f32.vlgmr.msra.gmra.mrb[48].mxu0 %v24065_v12 }
 0xa94   : > { %18792 = vmatpush3.bf16.msra.mxu1 %v18791_v33  ;;  %18900 = vmatpush3.bf16.msra.mxu0 %v18899_v48  ;;  %v25511_v33 = vand.u32 4294901760, %v25510_v60 }
 0xa95   : > { %18793 = vmatprep.subr.bf16.mxu1 %v25383_v8  ;;  %18901 = vmatprep.subr.bf16.mxu0 %v25383_v8 }
 0xa96   : > { %16864 = vmatprep.mubr.msk.f32.mxu1 %vm20278_vm7, %v25380_v46  ;;  %17026 = vmatprep.mubr.msk.f32.mxu0 %vm20278_vm7, %v25380_v46  ;;  %v18836_v48 = vpack.c.bf16 %v25511_v33, %v25509_v7 }
 0xa98   : > { %18795 = vmatpush3.bf16.msra.mxu1 %v18794_v15  ;;  %18903 = vmatpush3.bf16.msra.mxu0 %v18902_v58  ;;  %v25513_v15 = vand.u32 4294901760, %v25512_v17  ;;  %v25515_v58 = vand.u32 4294901760, %v25514_v62 }
 0xa99   : > { %18796 = vmatprep.subr.bf16.mxu1 %v25383_v8  ;;  %18904 = vmatprep.subr.bf16.mxu0 %v25383_v8 }
 0xa9c   : > { %18798 = vmatpush3.bf16.msra.mxu1 %v18797_v42  ;;  %18906 = vmatpush3.bf16.msra.mxu0 %v18905_v1  ;;  %v18944_v42 = vpack.c.bf16 %v25515_v58, %v25513_v15  ;;  %v25517_v1 = vand.u32 4294901760, %v23906_v32  ;;  %v25523_v32 = vand.u32 4294901760, %v23930_v51 }
 0xa9d   : > { %18799 = vmatprep.subr.bf16.mxu1 %v25383_v8  ;;  %18907 = vmatprep.subr.bf16.mxu0 %v25383_v8 }
 0xa9e   : > { %v18950_v16 = vpack.c.bf16 %v25523_v32, %v25522_v52 }
 0xaa0   : > { %18801 = vmatpush3.bf16.msra.mxu1 %v18800_v34  ;;  %18909 = vmatpush3.bf16.msra.mxu0 %v18908_v26  ;;  %v18839_v34 = vpack.c.bf16 %v25517_v1, %v25516_v47  ;;  %v25518_v26 = vand.u32 4294901760, %v23908_v55 }
 0xaa1   : > { %18802 = vmatprep.subr.bf16.mxu1 %v25383_v8  ;;  %18910 = vmatprep.subr.bf16.mxu0 %v25383_v8 }
 0xaa4   : > { %18804 = vmatpush3.bf16.msra.mxu1 %v25491_v5  ;;  %18912 = vmatpush3.bf16.msra.mxu0 %v25492_v21 }
 0xaa5   : > { %18805 = vmatprep.subr.bf16.mxu1 %v25383_v8  ;;  %18913 = vmatprep.subr.bf16.mxu0 %v25383_v8 }
 0xaa8   : > { %18807 = vmatpush3.bf16.msra.mxu1 %v18806_v44  ;;  %18915 = vmatpush3.bf16.msra.mxu0 %v18914_v23  ;;  %v25520_v44 = vand.u32 4294901760, %v23916_v24  ;;  %v25521_v23 = vand.u32 4294901760, %v23918_v18  ;;  %v11745_v24 = vld [vmem:[#allocation13 + $0x28] sm:$0xff] }
 0xaa9   : > { %18808 = vmatprep.subr.bf16.mxu1 %v25383_v8  ;;  %18916 = vmatprep.subr.bf16.mxu0 %v25383_v8  ;;  %v11766_v0 = vand.u32 4294901760, %v11745_v24 }
 0xaaa   : > { %v18842_v45 = vpack.c.bf16 %v25521_v23, %v25520_v44 }
 0xaab   : > { %16865 = vmatmul.mubr.f32.vlgmr.msra.gmra.mrb[38].mxu1 %v10626_v38  ;;  %17027 = vmatmul.mubr.f32.vlgmr.msra.gmra.mrb[48].mxu0 %v10626_v38  ;;  %v25519_v38 = vand.u32 4294901760, %v23910_v37  ;;  %v11744_v37 = vld [vmem:[#allocation13 + $0x20] sm:$0xff]  ;;  %v11868_v28 = vsub.f32 %v11745_v24, %v11766_v0 }
 0xaac   : > { %18810 = vmatpush3.bf16.msra.mxu1 %v23795_v41  ;;  %18918 = vmatpush3.bf16.msra.mxu0 %v23801_v50  ;;  %v11763_v18 = vand.u32 4294901760, %v11744_v37 }
 0xaad   : > { %18811 = vmatprep.subr.bf16.mxu1 %v25383_v8  ;;  %18919 = vmatprep.subr.bf16.mxu0 %v25383_v8  ;;  %v18947_v43 = vpack.c.bf16 %v25519_v38, %v25518_v26 }
 0xaae   : > { %16891 = vmatprep.mubr.msk.f32.mxu1 %vm20278_vm7, %v25380_v46  ;;  %17053 = vmatprep.mubr.msk.f32.mxu0 %vm20278_vm7, %v25380_v46  ;;  %v11861_v14 = vsub.f32 %v11744_v37, %v11763_v18  ;;  %v12266_v37 = vld [vmem:[#allocation13 + $0x48] sm:$0xff] }
 0xab0   : > { %18813 = vmatpush3.bf16.msra.mxu1 %v23810_v30  ;;  %18921 = vmatpush3.bf16.msra.mxu0 %v23818_v29  ;;  %v11862_v25 = vand.u32 4294901760, %v11861_v14 }
 0xab1   : > { %18814 = vmatprep.subr.bf16.mxu1 %v25383_v8  ;;  %18922 = vmatprep.subr.bf16.mxu0 %v25383_v8 }
 0xab4   : > { %18816 = vmatpush3.bf16.msra.mxu1 %v23830_v9  ;;  %18924 = vmatpush3.bf16.msra.mxu0 %v23838_v40 }
 0xab5   : > { %18817 = vmatprep.subr.bf16.mxu1 %v25383_v8  ;;  %18925 = vmatprep.subr.bf16.mxu0 %v25383_v8 }
 0xab8   : > { %18819 = vmatpush3.bf16.msra.mxu1 %v23857_v22  ;;  %18927 = vmatpush3.bf16.msra.mxu0 %v23859_v11 }
 0xab9   : > { %18820 = vmatprep.subr.bf16.mxu1 %v25383_v8  ;;  %18928 = vmatprep.subr.bf16.mxu0 %v25383_v8 }
 0xabc   : > { %18822 = vmatpush3.bf16.msra.mxu1 %v23877_v63  ;;  %18930 = vmatpush3.bf16.msra.mxu0 %v23879_v20 }
 0xabd   : > { %18823 = vmatprep.subr.bf16.mxu1 %v25383_v8  ;;  %18931 = vmatprep.subr.bf16.mxu0 %v25383_v8 }
 0xac0   : > { %18825 = vmatpush3.bf16.msra.mxu1 %v25493_v53  ;;  %18933 = vmatpush3.bf16.msra.mxu0 %v25494_v2 }
 0xac1   : > { %18826 = vmatprep.subr.bf16.mxu1 %v25383_v8  ;;  %18934 = vmatprep.subr.bf16.mxu0 %v25383_v8 }
 0xac3   : > { %16892 = vmatmul.mubr.f32.vlgmr.msra.gmra.mrb[38].mxu1 %v24068_v54  ;;  %17054 = vmatmul.mubr.f32.vlgmr.msra.gmra.mrb[48].mxu0 %v24068_v54  ;;  %v25506_v54 = vld [vmem:[#allocation36_spill] sm:$0xff] }
 0xac4   : > { %18828 = vmatpush3.bf16.msra.mxu1 %v18827_v49  ;;  %18936 = vmatpush3.bf16.msra.mxu0 %v18935_v10  ;;  %v25507_v39 = vand.u32 4294901760, %v25506_v54  ;;  %v11863_v54 = vsub.f32 %v11861_v14, %v11862_v25 }
 0xac5   : > { %18829 = vmatprep.subr.bf16.mxu1 %v25383_v8  ;;  %18937 = vmatprep.subr.bf16.mxu0 %v25383_v8 }
 0xac6   : > { %16918 = vmatprep.mubr.msk.f32.mxu1 %vm20278_vm7, %v25380_v46  ;;  %17080 = vmatprep.mubr.msk.f32.mxu0 %vm20278_vm7, %v25380_v46  ;;  %v18941_v4 = vpack.c.bf16 %v25507_v39, %v25505_v56 }
 0xac8   : > { %18831 = vmatpush3.bf16.msra.mxu1 %v18830_v36  ;;  %18939 = vmatpush3.bf16.msra.mxu0 %v18938_v57 }
 0xac9   : > { %18832 = vmatprep.subr.bf16.mxu1 %v25383_v8  ;;  %18940 = vmatprep.subr.bf16.mxu0 %v25383_v8 }
 0xacc   : > { %18834 = vmatpush3.bf16.msra.mxu1 %v18833_v13  ;;  %18942 = vmatpush3.bf16.msra.mxu0 %v18941_v4  ;;  %v11869_v13 = vand.u32 4294901760, %v11868_v28  ;;  %v11864_v4 = vand.u32 4294901760, %v11863_v54 }
 0xacd   : > { %18835 = vmatprep.subr.bf16.mxu1 %v25383_v8  ;;  %18943 = vmatprep.subr.bf16.mxu0 %v25383_v8 }
 0xace   : > { %v11870_v39 = vsub.f32 %v11868_v28, %v11869_v13  ;;  %v19013_v62 = vpack.c.bf16 %v11869_v13, %v11862_v25 }
 0xad0   : > { %18837 = vmatpush3.bf16.msra.mxu1 %v18836_v48  ;;  %18945 = vmatpush3.bf16.msra.mxu0 %v18944_v42  ;;  %v11871_v35 = vand.u32 4294901760, %v11870_v39  ;;  %v18995_v48 = vpack.c.bf16 %v11868_v28, %v11861_v14 }
 0xad1   : > { %18838 = vmatprep.subr.bf16.mxu1 %v25383_v8  ;;  %18946 = vmatprep.subr.bf16.mxu0 %v25383_v8 }
 0xad2   : > { %v18986_v7 = vpack.c.bf16 %v11871_v35, %v11864_v4 }
 0xad4   : > { %18840 = vmatpush3.bf16.msra.mxu1 %v18839_v34  ;;  %18948 = vmatpush3.bf16.msra.mxu0 %v18947_v43 }
 0xad5   : > { %18841 = vmatprep.subr.bf16.mxu1 %v25383_v8  ;;  %18949 = vmatprep.subr.bf16.mxu0 %v25383_v8 }
 0xad8   : > { %18843 = vmatpush3.bf16.msra.mxu1 %v18842_v45  ;;  %18951 = vmatpush3.bf16.msra.mxu0 %v18950_v16 }
 0xad9   : > { %18844 = vmatprep.subr.bf16.mxu1 %v25383_v8  ;;  %18952 = vmatprep.subr.bf16.mxu0 %v25383_v8 }
 0xadb   : > { %16919 = vmatmul.mubr.f32.vlgmr.msra.gmra.mrb[38].mxu1 %v24065_v12  ;;  %17081 = vmatmul.mubr.f32.vlgmr.msra.gmra.mrb[48].mxu0 %v24065_v12 }
 0xadc   : > { %18846 = vmatpush3.bf16.msra.mxu1 %v23795_v41  ;;  %18954 = vmatpush3.bf16.msra.mxu0 %v23801_v50  ;;  %v11740_v41 = vld [vmem:[#allocation13] sm:$0xff]  ;;  %v11741_v50 = vld [vmem:[#allocation13 + $0x8] sm:$0xff] }
 0xadd   : > { %18847 = vmatprep.subr.bf16.mxu1 %v25383_v8  ;;  %18955 = vmatprep.subr.bf16.mxu0 %v25383_v8 }
 0xade   : > { %16945 = vmatprep.mubr.msk.f32.mxu1 %vm20278_vm7, %v25380_v46  ;;  %17107 = vmatprep.mubr.msk.f32.mxu0 %vm20278_vm7, %v25380_v46 }
 0xae0   : > { %18849 = vmatpush3.bf16.msra.mxu1 %v23810_v30  ;;  %18957 = vmatpush3.bf16.msra.mxu0 %v23818_v29  ;;  %v11751_v30 = vand.u32 4294901760, %v11740_v41  ;;  %v11754_v29 = vand.u32 4294901760, %v11741_v50 }
 0xae1   : > { %18850 = vmatprep.subr.bf16.mxu1 %v25383_v8  ;;  %18958 = vmatprep.subr.bf16.mxu0 %v25383_v8 }
 0xae4   : > { %18852 = vmatpush3.bf16.msra.mxu1 %v23830_v9  ;;  %18960 = vmatpush3.bf16.msra.mxu0 %v23838_v40  ;;  %v24255_v9 = vpack.c.bf16 %v11754_v29, %v11751_v30  ;;  %v11742_v40 = vld [vmem:[#allocation13 + $0x10] sm:$0xff] }
 0xae5   : > { %18853 = vmatprep.subr.bf16.mxu1 %v25383_v8  ;;  %18961 = vmatprep.subr.bf16.mxu0 %v25383_v8 }
 0xae8   : > { %18855 = vmatpush3.bf16.msra.mxu1 %v23857_v22  ;;  %18963 = vmatpush3.bf16.msra.mxu0 %v23859_v11  ;;  %v11743_v22 = vld [vmem:[#allocation13 + $0x18] sm:$0xff]  ;;  %v11757_v11 = vand.u32 4294901760, %v11742_v40 }
 0xae9   : > { %18856 = vmatprep.subr.bf16.mxu1 %v25383_v8  ;;  %18964 = vmatprep.subr.bf16.mxu0 %v25383_v8 }
 0xaea   : > { %v11847_v21 = vsub.f32 %v11742_v40, %v11757_v11  ;;  %v12264_v40 = vld [vmem:[#allocation13 + $0x38] sm:$0xff] }
 0xaec   : > { %18858 = vmatpush3.bf16.msra.mxu1 %v23877_v63  ;;  %18966 = vmatpush3.bf16.msra.mxu0 %v23879_v20  ;;  %v11760_v63 = vand.u32 4294901760, %v11743_v22  ;;  %v24259_v20 = vsub.f32 %v11740_v41, %v11751_v30  ;;  %v11848_v3 = vand.u32 4294901760, %v11847_v21 }
 0xaed   : > { %18859 = vmatprep.subr.bf16.mxu1 %v25383_v8  ;;  %18967 = vmatprep.subr.bf16.mxu0 %v25383_v8 }
 0xaee   : > { %v24263_v55 = vpack.c.bf16 %v11760_v63, %v11757_v11  ;;  %v11834_v51 = vand.u32 4294901760, %v24259_v20  ;;  %v11849_v31 = vsub.f32 %v11847_v21, %v11848_v3  ;;  %v12276_v11 = vand.u32 4294901760, %v12264_v40 }
 0xaf0   : > { %18861 = vmatpush3.bf16.msra.mxu1 %v25493_v53  ;;  %18969 = vmatpush3.bf16.msra.mxu0 %v25494_v2  ;;  %v11854_v53 = vsub.f32 %v11743_v22, %v11760_v63  ;;  %v24269_v2 = vpack.c.bf16 %v11766_v0, %v11763_v18  ;;  %v11835_v49 = vsub.f32 %v24259_v20, %v11834_v51  ;;  %v11850_v57 = vand.u32 4294901760, %v11849_v31  ;;  %v12267_v0 = vld [vmem:[#allocation13 + $0x50] sm:$0xff] }
 0xaf1   : > { %18970 = vmatprep.subr.bf16.mxu1 %v25383_v8  ;;  %19186 = vmatprep.subr.bf16.mxu0 %v25383_v8  ;;  %v12282_v18 = vand.u32 4294901760, %v12266_v37 }
 0xaf2   : > { %v11836_v61 = vand.u32 4294901760, %v11835_v49  ;;  %v11855_v59 = vand.u32 4294901760, %v11854_v53  ;;  %v18992_v33 = vpack.c.bf16 %v11854_v53, %v11847_v21  ;;  %v12285_v49 = vand.u32 4294901760, %v12267_v0 }
 0xaf3   : > { %16946 = vmatmul.mubr.f32.vlgmr.msra.gmra.mrb[38].mxu1 %v24065_v12  ;;  %17108 = vmatmul.mubr.f32.vlgmr.msra.gmra.mrb[48].mxu0 %v24065_v12  ;;  %v24261_v12 = vsub.f32 %v11741_v50, %v11754_v29  ;;  %v12263_v29 = vld [vmem:[#allocation13 + $0x30] sm:$0xff] }
 0xaf4   : > { %17122 = vmatprep.mubr.msk.f32.mxu1 %vm20278_vm7, %v25380_v46  ;;  %17500 = vmatprep.mubr.msk.f32.mxu0 %vm20278_vm7, %v25380_v46  ;;  %v11856_v27 = vsub.f32 %v11854_v53, %v11855_v59  ;;  %v19010_v15 = vpack.c.bf16 %v11855_v59, %v11848_v3  ;;  %v12273_v22 = vand.u32 4294901760, %v12263_v29  ;;  %v24348_v3 = vsub.f32 %v12267_v0, %v12285_v49 }
 0xaf5   : > { %18972 = vmatpush3.bf16.msra.mxu1 %v24255_v9  ;;  %v11841_v5 = vand.u32 4294901760, %v24261_v12  ;;  %v18989_v60 = vpack.c.bf16 %v24261_v12, %v24259_v20  ;;  %v24317_v20 = vsub.f32 %v12264_v40, %v12276_v11 }
 0xaf6   : > { %18973 = vmatprep.subr.bf16.mxu1 %v25383_v8  ;;  %v11857_v19 = vand.u32 4294901760, %v11856_v27  ;;  %v24315_v63 = vsub.f32 %v12263_v29, %v12273_v22  ;;  %v24327_v53 = vpack.c.bf16 %v12276_v11, %v12273_v22  ;;  %v12384_v54 = vand.u32 4294901760, %v24348_v3  ;;  %v12788_v29 = vld [vmem:[#allocation13 + $0x78] sm:$0xff] }
 0xaf7   : > { %v11842_v6 = vsub.f32 %v24261_v12, %v11841_v5  ;;  %v19007_v17 = vpack.c.bf16 %v11841_v5, %v11834_v51  ;;  %v12265_v12 = vld [vmem:[#allocation13 + $0x40] sm:$0xff]  ;;  %v12268_v51 = vld [vmem:[#allocation13 + $0x58] sm:$0xff]  ;;  %v12363_v21 = vand.u32 4294901760, %v24317_v20  ;;  %v12804_v11 = vand.u32 4294901760, %v12788_v29 }
 0xaf8   : > { %v18983_v56 = vpack.c.bf16 %v11857_v19, %v11850_v57  ;;  %v12356_v5 = vand.u32 4294901760, %v24315_v63 }
 0xaf9   : > { %18975 = vmatpush3.bf16.msra.mxu1 %v24263_v55  ;;  %v11843_v10 = vand.u32 4294901760, %v11842_v6  ;;  %v12288_v6 = vand.u32 4294901760, %v12268_v51  ;;  %v24427_v0 = vsub.f32 %v12788_v29, %v12804_v11 }
 0xafa   : > { %18976 = vmatprep.subr.bf16.mxu1 %v25383_v8 }
 0xafb   : > { %v18980_v36 = vpack.c.bf16 %v11843_v10, %v11836_v61  ;;  %v12364_v10 = vsub.f32 %v24317_v20, %v12363_v21  ;;  %v24350_v59 = vsub.f32 %v12268_v51, %v12288_v6  ;;  %v24358_v57 = vpack.c.bf16 %v12288_v6, %v12285_v49 }
 0xafc   : > { %v12899_v49 = vand.u32 4294901760, %v24427_v0 }
 0xafd   : > { %18978 = vmatpush3.bf16.msra.mxu1 %v24269_v2  ;;  %v12365_v25 = vand.u32 4294901760, %v12364_v10  ;;  %v12391_v39 = vand.u32 4294901760, %v24350_v59 }
 0xafe   : > { %18979 = vmatprep.subr.bf16.mxu1 %v25383_v8 }
 0xbc6   : > { %v11133_v58 = vpop.f32.mrb[38].mxu1  ;;  %v11734_v42 = vpop.f32.mrb[48].mxu0 }
 0xbc7   : > { %v11738_v47 = vmax.f32 %v11133_v58, %v11734_v42  ;;  %v16947_v1 = vpop.f32.mrb[39].mxu1  ;;  %v17109_v34 = vpop.f32.mrb[49].mxu0 }
 0xbc8   : > { %v19049_v34 = vpack.c.bf16 %v24350_v59, %v24348_v3 }
 0xbc9   : > { %v11748_v26 = vsel %vm11746_vm11, %v11738_v47, 0  ;;  %v12269_v38 = vrot.slane %v11738_v47, 1  ;;  %v12791_v43 = vrot.slane %v11738_v47, 2  ;;  %v13313_v44 = vrot.slane %v11738_v47, 3 }
 0xbca   : > { %v24277_v23 = vand.u32 4294901760, %v11748_v26  ;;  %v19043_v47 = vpack.c.bf16 %v24317_v20, %v24315_v63  ;;  %v12790_v20 = vld [vmem:[#allocation13 + $0x88] sm:$0xff] }
 0xbcb   : > { %v24279_v45 = vsel %vm11746_vm11, %v12269_v38, 0  ;;  %v24281_v52 = vsel %vm11746_vm11, %v12791_v43, 0  ;;  %v24283_v32 = vsel %vm11746_vm11, %v13313_v44, 0  ;;  %v19067_v43 = vpack.c.bf16 %v12391_v39, %v12384_v54  ;;  %v12785_v44 = vld [vmem:[#allocation13 + $0x60] sm:$0xff] }
 0xbcc   : > { %v11822_v16 = vsub.f32 %v11748_v26, %v24277_v23  ;;  %v24321_v24 = vand.u32 4294901760, %v24279_v45  ;;  %v19061_v26 = vpack.c.bf16 %v12363_v21, %v12356_v5  ;;  %v24417_v40 = vand.u32 4294901760, %v24281_v52 }
 0xbcd   : > { %v12810_v21 = vand.u32 4294901760, %v12790_v20 }
 0xbce   : > { %v11823_v41 = vand.u32 4294901760, %v11822_v16  ;;  %v24335_v28 = vsub.f32 %v24279_v45, %v24321_v24  ;;  %v12795_v45 = vand.u32 4294901760, %v12785_v44  ;;  %v24431_v51 = vsub.f32 %v24281_v52, %v24417_v40 }
 0xbd0   : > { %v11824_v50 = vsub.f32 %v11822_v16, %v11823_v41  ;;  %v12345_v27 = vand.u32 4294901760, %v24335_v28  ;;  %v12867_v6 = vand.u32 4294901760, %v24431_v51 }
 0xbd2   : > { %v11825_v30 = vand.u32 4294901760, %v11824_v50  ;;  %v12346_v4 = vsub.f32 %v24335_v28, %v12345_v27 }
 0xbd4   : > { %17123 = vmatmul.mubr.f32.vlgmr.msra.gmra.mrb[40].mxu1 %v11825_v30  ;;  %v12787_v30 = vld [vmem:[#allocation13 + $0x70] sm:$0xff] }
 0xbd5   : > { %18981 = vmatpush3.bf16.msra.mxu1 %v18980_v36  ;;  %17137 = vmatprep.mubr.msk.f32.mxu1 %vm20278_vm7, %v25380_v46  ;;  %v12801_v22 = vand.u32 4294901760, %v12787_v30 }
 0xbd6   : > { %18982 = vmatprep.subr.bf16.mxu1 %v25383_v8 }
 0xbd9   : > { %18984 = vmatpush3.bf16.msra.mxu1 %v18983_v56 }
 0xbda   : > { %18985 = vmatprep.subr.bf16.mxu1 %v25383_v8 }
 0xbdd   : > { %18987 = vmatpush3.bf16.msra.mxu1 %v18986_v7 }
 0xbde   : > { %18988 = vmatprep.subr.bf16.mxu1 %v25383_v8 }
 0xbe0   : > { %17138 = vmatmul.mubr.f32.vlgmr.msra.gmra.mrb[40].mxu1 %v24277_v23 }
 0xbe1   : > { %18990 = vmatpush3.bf16.msra.mxu1 %v18989_v60  ;;  %17152 = vmatprep.mubr.msk.f32.mxu1 %vm20278_vm7, %v25380_v46 }
 0xbe2   : > { %18991 = vmatprep.subr.bf16.mxu1 %v25383_v8 }
 0xbe5   : > { %18993 = vmatpush3.bf16.msra.mxu1 %v18992_v33  ;;  %v12385_v33 = vsub.f32 %v24348_v3, %v12384_v54 }
 0xbe6   : > { %18994 = vmatprep.subr.bf16.mxu1 %v25383_v8 }
 0xbe9   : > { %18996 = vmatpush3.bf16.msra.mxu1 %v18995_v48  ;;  %v12392_v48 = vsub.f32 %v24350_v59, %v12391_v39  ;;  %v12900_v59 = vsub.f32 %v24427_v0, %v12899_v49 }
 0xbea   : > { %18997 = vmatprep.subr.bf16.mxu1 %v25383_v8 }
 0xbeb   : > { %v12393_v58 = vand.u32 4294901760, %v12392_v48 }
 0xbec   : > { %17153 = vmatmul.mubr.f32.vlgmr.msra.gmra.mrb[40].mxu1 %v11822_v16 }
 0xbed   : > { %18999 = vmatpush3.bf16.msra.mxu1 %v24255_v9  ;;  %17167 = vmatprep.mubr.msk.f32.mxu1 %vm20278_vm7, %v25380_v46 }
 0xbee   : > { %19000 = vmatprep.subr.bf16.mxu1 %v25383_v8 }
 0xbf1   : > { %19002 = vmatpush3.bf16.msra.mxu1 %v24263_v55 }
 0xbf2   : > { %19003 = vmatprep.subr.bf16.mxu1 %v25383_v8 }
 0xbf5   : > { %19005 = vmatpush3.bf16.msra.mxu1 %v24269_v2 }
 0xbf6   : > { %19006 = vmatprep.subr.bf16.mxu1 %v25383_v8 }
 0xbf8   : > { %17168 = vmatmul.mubr.f32.vlgmr.msra.gmra.mrb[40].mxu1 %v11823_v41  ;;  %v24411_v41 = vsub.f32 %v12785_v44, %v12795_v45 }
 0xbf9   : > { %19008 = vmatpush3.bf16.msra.mxu1 %v19007_v17  ;;  %17182 = vmatprep.mubr.msk.f32.mxu1 %vm20278_vm7, %v25380_v46  ;;  %v12347_v17 = vand.u32 4294901760, %v12346_v4 }
 0xbfa   : > { %19009 = vmatprep.subr.bf16.mxu1 %v25383_v8 }
 0xbfd   : > { %19011 = vmatpush3.bf16.msra.mxu1 %v19010_v15 }
 0xbfe   : > { %19012 = vmatprep.subr.bf16.mxu1 %v25383_v8 }
 0xc01   : > { %19014 = vmatpush3.bf16.msra.mxu1 %v19013_v62  ;;  %v12386_v62 = vand.u32 4294901760, %v12385_v33  ;;  %v13831_v33 = vld [vmem:[%s25524_s15 + $0x10] sm:$0xff] }
 0xc02   : > { %19015 = vmatprep.subr.bf16.mxu1 %v25383_v8 }
 0xc03   : > { %v19040_v42 = vpack.c.bf16 %v12393_v58, %v12386_v62  ;;  %v13832_v62 = vld [vmem:[%s25524_s15 + $0x18] sm:$0xff]  ;;  %v13856_v58 = vand.u32 4294901760, %v13831_v33 }
 0xc04   : > { %17183 = vmatmul.mubr.f32.vlgmr.msra.gmra.mrb[40].mxu1 %v24277_v23 }
 0xc05   : > { %19017 = vmatpush3.bf16.msra.mxu1 %v24255_v9  ;;  %17197 = vmatprep.mubr.msk.f32.mxu1 %vm20278_vm7, %v25380_v46  ;;  %v12279_v9 = vand.u32 4294901760, %v12265_v12 }
 0xc06   : > { %19018 = vmatprep.subr.bf16.mxu1 %v25383_v8 }
 0xc07   : > { %v24329_v14 = vsub.f32 %v12265_v12, %v12279_v9  ;;  %v24339_v61 = vpack.c.bf16 %v12282_v18, %v12279_v9  ;;  %v12878_v12 = vand.u32 4294901760, %v24411_v41 }
 0xc09   : > { %19020 = vmatpush3.bf16.msra.mxu1 %v24263_v55  ;;  %v24331_v55 = vsub.f32 %v12266_v37, %v12282_v18  ;;  %v12370_v36 = vand.u32 4294901760, %v24329_v14  ;;  %v24425_v18 = vsub.f32 %v12787_v30, %v12801_v22 }
 0xc0a   : > { %19021 = vmatprep.subr.bf16.mxu1 %v25383_v8 }
 0xc0b   : > { %v12377_v31 = vand.u32 4294901760, %v24331_v55  ;;  %v12371_v13 = vsub.f32 %v24329_v14, %v12370_v36  ;;  %v19046_v1 = vpack.c.bf16 %v24331_v55, %v24329_v14  ;;  %v12879_v14 = vsub.f32 %v24411_v41, %v12878_v12 }
 0xc0d   : > { %19023 = vmatpush3.bf16.msra.mxu1 %v24269_v2  ;;  %v12357_v2 = vsub.f32 %v24315_v63, %v12356_v5  ;;  %v12378_v56 = vsub.f32 %v24331_v55, %v12377_v31  ;;  %v12372_v7 = vand.u32 4294901760, %v12371_v13  ;;  %v19064_v38 = vpack.c.bf16 %v12377_v31, %v12370_v36  ;;  %v12789_v63 = vld [vmem:[#allocation13 + $0x80] sm:$0xff] }
 0xc0e   : > { %19024 = vmatprep.subr.bf16.mxu1 %v25383_v8  ;;  %v12807_v5 = vand.u32 4294901760, %v12789_v63 }
 0xc0f   : > { %v12358_v19 = vand.u32 4294901760, %v12357_v2  ;;  %v12379_v60 = vand.u32 4294901760, %v12378_v56  ;;  %v12880_v2 = vand.u32 4294901760, %v12879_v14 }
 0xc10   : > { %17198 = vmatmul.mubr.f32.vlgmr.msra.gmra.mrb[40].mxu1 %v24277_v23  ;;  %v12786_v23 = vld [vmem:[#allocation13 + $0x68] sm:$0xff]  ;;  %v24444_v52 = vsub.f32 %v12789_v63, %v12807_v5 }
 0xc11   : > { %19026 = vmatpush3.bf16.msra.mxu1 %v24327_v53  ;;  %17212 = vmatprep.mubr.msk.f32.mxu1 %vm20278_vm7, %v25380_v46  ;;  %v19034_v35 = vpack.c.bf16 %v12365_v25, %v12358_v19  ;;  %v19037_v15 = vpack.c.bf16 %v12379_v60, %v12372_v7  ;;  %v12798_v16 = vand.u32 4294901760, %v12786_v23  ;;  %v12901_v25 = vand.u32 4294901760, %v12900_v59  ;;  %v13829_v7 = vld [vmem:[%s25524_s15] sm:$0xff]  ;;  %v13830_v60 = vld [vmem:[%s25524_s15 + $0x8] sm:$0xff] }
 0xc12   : > { %19027 = vmatprep.subr.bf16.mxu1 %v25383_v8  ;;  %v12906_v36 = vand.u32 4294901760, %v24444_v52 }
 0xc13   : > { %v24413_v50 = vsub.f32 %v12786_v23, %v12798_v16  ;;  %v24423_v9 = vpack.c.bf16 %v12798_v16, %v12795_v45  ;;  %v24511_v16 = vsub.f32 %v13831_v33, %v13856_v58 }
 0xc14   : > { %v12907_v13 = vsub.f32 %v24444_v52, %v12906_v36 }
 0xc15   : > { %19029 = vmatpush3.bf16.msra.mxu1 %v24339_v61  ;;  %v12885_v37 = vand.u32 4294901760, %v24413_v50 }
 0xc16   : > { %19030 = vmatprep.subr.bf16.mxu1 %v25383_v8  ;;  %v12908_v4 = vand.u32 4294901760, %v12907_v13 }
 0xc17   : > { %v12886_v55 = vsub.f32 %v24413_v50, %v12885_v37  ;;  %v19115_v59 = vpack.c.bf16 %v12885_v37, %v12878_v12  ;;  %v13308_v12 = vld [vmem:[#allocation13 + $0x98] sm:$0xff] }
 0xc19   : > { %19032 = vmatpush3.bf16.msra.mxu1 %v24358_v57  ;;  %v12887_v10 = vand.u32 4294901760, %v12886_v55  ;;  %v19100_v55 = vpack.c.bf16 %v24427_v0, %v24425_v18 }
 0xc1a   : > { %19033 = vmatprep.subr.bf16.mxu1 %v25383_v8 }
 0xc1c   : > { %17213 = vmatmul.mubr.f32.vlgmr.msra.gmra.mrb[40].mxu1 %v12347_v17  ;;  %v13850_v17 = vand.u32 4294901760, %v13829_v7 }
 0xc1d   : > { %19035 = vmatpush3.bf16.msra.mxu1 %v19034_v35  ;;  %17227 = vmatprep.mubr.msk.f32.mxu1 %vm20278_vm7, %v25380_v46 }
 0xc1e   : > { %19036 = vmatprep.subr.bf16.mxu1 %v25383_v8  ;;  %v24507_v23 = vsub.f32 %v13829_v7, %v13850_v17 }
 0xc21   : > { %19038 = vmatpush3.bf16.msra.mxu1 %v19037_v15  ;;  %v13853_v15 = vand.u32 4294901760, %v13830_v60 }
 0xc22   : > { %19039 = vmatprep.subr.bf16.mxu1 %v25383_v8 }
 0xc23   : > { %v24505_v44 = vpack.c.bf16 %v13853_v15, %v13850_v17  ;;  %v24509_v45 = vsub.f32 %v13830_v60, %v13853_v15 }
 0xc25   : > { %19041 = vmatpush3.bf16.msra.mxu1 %v19040_v42  ;;  %v13833_v42 = vld [vmem:[%s25524_s15 + $0x20] sm:$0xff]  ;;  %19188 = vmatpush3.bf16.msra.mxu0 %v24505_v44 }
 0xc26   : > { %19042 = vmatprep.subr.bf16.mxu1 %v25383_v8  ;;  %19189 = vmatprep.subr.bf16.mxu0 %v25383_v8 }
 0xc28   : > { %17228 = vmatmul.mubr.f32.vlgmr.msra.gmra.mrb[40].mxu1 %v24321_v24 }
 0xc29   : > { %19044 = vmatpush3.bf16.msra.mxu1 %v19043_v47  ;;  %17242 = vmatprep.mubr.msk.f32.mxu1 %vm20278_vm7, %v25380_v46  ;;  %v13834_v47 = vld [vmem:[%s25524_s15 + $0x28] sm:$0xff] }
 0xc2a   : > { %19045 = vmatprep.subr.bf16.mxu1 %v25383_v8 }
 0xc2d   : > { %19047 = vmatpush3.bf16.msra.mxu1 %v19046_v1  ;;  %v13859_v1 = vand.u32 4294901760, %v13832_v62 }
 0xc2e   : > { %19048 = vmatprep.subr.bf16.mxu1 %v25383_v8 }
 0xc2f   : > { %v24513_v30 = vsub.f32 %v13832_v62, %v13859_v1 }
 0xc31   : > { %19050 = vmatpush3.bf16.msra.mxu1 %v19049_v34  ;;  %v13862_v34 = vand.u32 4294901760, %v13833_v42 }
 0xc32   : > { %19051 = vmatprep.subr.bf16.mxu1 %v25383_v8 }
 0xc33   : > { %v24515_v29 = vsub.f32 %v13833_v42, %v13862_v34 }
 0xc34   : > { %17243 = vmatmul.mubr.f32.vlgmr.msra.gmra.mrb[40].mxu1 %v24335_v28  ;;  %v24446_v28 = vsub.f32 %v12790_v20, %v12810_v21 }
 0xc35   : > { %19053 = vmatpush3.bf16.msra.mxu1 %v24327_v53  ;;  %17257 = vmatprep.mubr.msk.f32.mxu1 %vm20278_vm7, %v25380_v46 }
 0xc36   : > { %19054 = vmatprep.subr.bf16.mxu1 %v25383_v8  ;;  %v12913_v31 = vand.u32 4294901760, %v24446_v28 }
 0xc38   : > { %v12914_v56 = vsub.f32 %v24446_v28, %v12913_v31 }
 0xc39   : > { %19056 = vmatpush3.bf16.msra.mxu1 %v24339_v61 }
 0xc3a   : > { %19057 = vmatprep.subr.bf16.mxu1 %v25383_v8  ;;  %v12915_v35 = vand.u32 4294901760, %v12914_v56 }
 0xc3c   : > { %v19094_v48 = vpack.c.bf16 %v12915_v35, %v12908_v4 }
 0xc3d   : > { %19059 = vmatpush3.bf16.msra.mxu1 %v24358_v57 }
 0xc3e   : > { %19060 = vmatprep.subr.bf16.mxu1 %v25383_v8 }
 0xc40   : > { %17258 = vmatmul.mubr.f32.vlgmr.msra.gmra.mrb[40].mxu1 %v12345_v27  ;;  %v12868_v27 = vsub.f32 %v24431_v51, %v12867_v6 }
 0xc41   : > { %19062 = vmatpush3.bf16.msra.mxu1 %v19061_v26  ;;  %17272 = vmatprep.mubr.msk.f32.mxu1 %vm20278_vm7, %v25380_v46  ;;  %v13865_v26 = vand.u32 4294901760, %v13834_v47 }
 0xc42   : > { %19063 = vmatprep.subr.bf16.mxu1 %v25383_v8  ;;  %v12869_v54 = vand.u32 4294901760, %v12868_v27 }
 0xc45   : > { %19065 = vmatpush3.bf16.msra.mxu1 %v19064_v38  ;;  %v13835_v38 = vld [vmem:[%s25524_s15 + $0x30] sm:$0xff] }
 0xc46   : > { %19066 = vmatprep.subr.bf16.mxu1 %v25383_v8  ;;  %v13868_v63 = vand.u32 4294901760, %v13835_v38 }
 0xc49   : > { %19068 = vmatpush3.bf16.msra.mxu1 %v19067_v43  ;;  %v13836_v43 = vld [vmem:[%s25524_s15 + $0x38] sm:$0xff] }
 0xc4a   : > { %19069 = vmatprep.subr.bf16.mxu1 %v25383_v8  ;;  %v13871_v20 = vand.u32 4294901760, %v13836_v43 }
 0xc4c   : > { %17273 = vmatmul.mubr.f32.vlgmr.msra.gmra.mrb[40].mxu1 %v24321_v24  ;;  %v24528_v14 = vsub.f32 %v13836_v43, %v13871_v20 }
 0xc4d   : > { %19071 = vmatpush3.bf16.msra.mxu1 %v24327_v53  ;;  %17287 = vmatprep.mubr.msk.f32.mxu1 %vm20278_vm7, %v25380_v46  ;;  %v24435_v53 = vpack.c.bf16 %v12804_v11, %v12801_v22  ;;  %v19097_v22 = vpack.c.bf16 %v24413_v50, %v24411_v41  ;;  %v24520_v11 = vsub.f32 %v13834_v47, %v13865_v26  ;;  %v13307_v50 = vld [vmem:[#allocation13 + $0x90] sm:$0xff] }
 0xc4e   : > { %19072 = vmatprep.subr.bf16.mxu1 %v25383_v8  ;;  %v19121_v41 = vpack.c.bf16 %v12913_v31, %v12906_v36  ;;  %v13317_v37 = vand.u32 4294901760, %v13307_v50  ;;  %v13312_v36 = vld [vmem:[#allocation13 + $0xb8] sm:$0xff] }
 0xc50   : > { %v24583_v0 = vsub.f32 %v13307_v50, %v13317_v37 }
 0xc51   : > { %19074 = vmatpush3.bf16.msra.mxu1 %v24339_v61  ;;  %v24454_v61 = vpack.c.bf16 %v12810_v21, %v12807_v5  ;;  %v24524_v5 = vpack.c.bf16 %v13859_v1, %v13856_v58  ;;  %v24526_v21 = vsub.f32 %v13835_v38, %v13868_v63 }
 0xc52   : > { %19075 = vmatprep.subr.bf16.mxu1 %v25383_v8  ;;  %v13400_v31 = vand.u32 4294901760, %v24583_v0 }
 0xc53   : > { %19191 = vmatpush3.bf16.msra.mxu0 %v24524_v5 }
 0xc54   : > { %19192 = vmatprep.subr.bf16.mxu0 %v25383_v8 }
 0xc55   : > { %19077 = vmatpush3.bf16.msra.mxu1 %v24358_v57  ;;  %v19088_v57 = vpack.c.bf16 %v12887_v10, %v12880_v2  ;;  %v24537_v2 = vpack.c.bf16 %v13865_v26, %v13862_v34  ;;  %v19103_v10 = vpack.c.bf16 %v24446_v28, %v24444_v52  ;;  %v13309_v52 = vld [vmem:[#allocation13 + $0xa0] sm:$0xff]  ;;  %v13310_v28 = vld [vmem:[#allocation13 + $0xa8] sm:$0xff] }
 0xc56   : > { %19078 = vmatprep.subr.bf16.mxu1 %v25383_v8 }
 0xc57   : > { %19194 = vmatpush3.bf16.msra.mxu0 %v24537_v2 }
 0xc58   : > { %17288 = vmatmul.mubr.f32.vlgmr.msra.gmra.mrb[40].mxu1 %v24321_v24  ;;  %v12892_v24 = vand.u32 4294901760, %v24425_v18  ;;  %19195 = vmatprep.subr.bf16.mxu0 %v25383_v8 }
 0xc59   : > { %19080 = vmatpush3.bf16.msra.mxu1 %v24423_v9  ;;  %17302 = vmatprep.mubr.msk.f32.mxu1 %vm20278_vm7, %v25380_v46 }
 0xc5a   : > { %19081 = vmatprep.subr.bf16.mxu1 %v25383_v8  ;;  %v12893_v3 = vsub.f32 %v24425_v18, %v12892_v24  ;;  %v19118_v27 = vpack.c.bf16 %v12899_v49, %v12892_v24  ;;  %v13320_v18 = vand.u32 4294901760, %v13308_v12  ;;  %v24589_v24 = vand.u32 4294901760, %v24283_v32 }
 0xc5b   : > { %v13326_v49 = vand.u32 4294901760, %v13310_v28 }
 0xc5c   : > { %v12894_v19 = vand.u32 4294901760, %v12893_v3  ;;  %v24544_v3 = vpack.c.bf16 %v13871_v20, %v13868_v63  ;;  %v24603_v13 = vsub.f32 %v24283_v32, %v24589_v24 }
 0xc5d   : > { %19083 = vmatpush3.bf16.msra.mxu1 %v24435_v53 }
 0xc5e   : > { %19084 = vmatprep.subr.bf16.mxu1 %v25383_v8  ;;  %v19091_v39 = vpack.c.bf16 %v12901_v25, %v12894_v19  ;;  %19197 = vmatpush3.bf16.msra.mxu0 %v24544_v3  ;;  %v24595_v19 = vpack.c.bf16 %v13320_v18, %v13317_v37  ;;  %v13389_v60 = vand.u32 4294901760, %v24603_v13 }
 0xc5f   : > { %19198 = vmatprep.subr.bf16.mxu0 %v25383_v8 }
 0xc60   : > { %v13390_v47 = vsub.f32 %v24603_v13, %v13389_v60 }
 0xc61   : > { %19086 = vmatpush3.bf16.msra.mxu1 %v24454_v61 }
 0xc62   : > { %19087 = vmatprep.subr.bf16.mxu1 %v25383_v8 }
 0xc64   : > { %17303 = vmatmul.mubr.f32.vlgmr.msra.gmra.mrb[40].mxu1 %v12869_v54  ;;  %v13332_v54 = vand.u32 4294901760, %v13312_v36 }
 0xc65   : > { %19089 = vmatpush3.bf16.msra.mxu1 %v19088_v57  ;;  %17317 = vmatprep.mubr.msk.f32.mxu1 %vm20278_vm7, %v25380_v46 }
 0xc66   : > { %19090 = vmatprep.subr.bf16.mxu1 %v25383_v8  ;;  %v24618_v35 = vsub.f32 %v13312_v36, %v13332_v54 }
 0xc68   : > { %v13435_v42 = vand.u32 4294901760, %v24618_v35 }
 0xc69   : > { %19092 = vmatpush3.bf16.msra.mxu1 %v19091_v39 }
 0xc6a   : > { %19093 = vmatprep.subr.bf16.mxu1 %v25383_v8  ;;  %v13436_v43 = vsub.f32 %v24618_v35, %v13435_v42 }
 0xc6d   : > { %19095 = vmatpush3.bf16.msra.mxu1 %v19094_v48 }
 0xc6e   : > { %19096 = vmatprep.subr.bf16.mxu1 %v25383_v8 }
 0xc70   : > { %17318 = vmatmul.mubr.f32.vlgmr.msra.gmra.mrb[40].mxu1 %v24417_v40 }
 0xc71   : > { %19098 = vmatpush3.bf16.msra.mxu1 %v19097_v22  ;;  %17332 = vmatprep.mubr.msk.f32.mxu1 %vm20278_vm7, %v25380_v46  ;;  %v13391_v22 = vand.u32 4294901760, %v13390_v47 }
 0xc72   : > { %19099 = vmatprep.subr.bf16.mxu1 %v25383_v8 }
 0xc75   : > { %19101 = vmatpush3.bf16.msra.mxu1 %v19100_v55  ;;  %v13437_v55 = vand.u32 4294901760, %v13436_v43 }
 0xc76   : > { %19102 = vmatprep.subr.bf16.mxu1 %v25383_v8 }
 0xc79   : > { %19104 = vmatpush3.bf16.msra.mxu1 %v19103_v10 }
 0xc7a   : > { %19105 = vmatprep.subr.bf16.mxu1 %v25383_v8 }
 0xc7c   : > { %17333 = vmatmul.mubr.f32.vlgmr.msra.gmra.mrb[40].mxu1 %v24431_v51  ;;  %v24585_v51 = vsub.f32 %v13308_v12, %v13320_v18  ;;  %v13837_v18 = vld [vmem:[%s25524_s15 + $0x40] sm:$0xff] }
 0xc7d   : > { %19107 = vmatpush3.bf16.msra.mxu1 %v24423_v9  ;;  %17347 = vmatprep.mubr.msk.f32.mxu1 %vm20278_vm7, %v25380_v46 }
 0xc7e   : > { %19108 = vmatprep.subr.bf16.mxu1 %v25383_v8  ;;  %v13407_v57 = vand.u32 4294901760, %v24585_v51 }
 0xc80   : > { %v13408_v4 = vsub.f32 %v24585_v51, %v13407_v57  ;;  %v19169_v50 = vpack.c.bf16 %v13407_v57, %v13400_v31  ;;  %v13842_v57 = vld [vmem:[%s25524_s15 + $0x68] sm:$0xff] }
 0xc81   : > { %19110 = vmatpush3.bf16.msra.mxu1 %v24435_v53 }
 0xc82   : > { %19111 = vmatprep.subr.bf16.mxu1 %v25383_v8  ;;  %v13409_v17 = vand.u32 4294901760, %v13408_v4 }
 0xc85   : > { %19113 = vmatpush3.bf16.msra.mxu1 %v24454_v61 }
 0xc86   : > { %19114 = vmatprep.subr.bf16.mxu1 %v25383_v8 }
 0xc88   : > { %17348 = vmatmul.mubr.f32.vlgmr.msra.gmra.mrb[40].mxu1 %v12867_v6  ;;  %v13311_v6 = vld [vmem:[#allocation13 + $0xb0] sm:$0xff] }
 0xc89   : > { %19116 = vmatpush3.bf16.msra.mxu1 %v19115_v59  ;;  %17362 = vmatprep.mubr.msk.f32.mxu1 %vm20278_vm7, %v25380_v46  ;;  %v13329_v56 = vand.u32 4294901760, %v13311_v6  ;;  %v19151_v59 = vpack.c.bf16 %v24585_v51, %v24583_v0  ;;  %v13874_v51 = vand.u32 4294901760, %v13837_v18 }
 0xc8a   : > { %19117 = vmatprep.subr.bf16.mxu1 %v25383_v8 }
 0xc8b   : > { %v24616_v32 = vsub.f32 %v13311_v6, %v13329_v56  ;;  %v24626_v33 = vpack.c.bf16 %v13332_v54, %v13329_v56  ;;  %v13949_v56 = vand.u32 4294901760, %v24509_v45  ;;  %v24713_v54 = vsub.f32 %v13837_v18, %v13874_v51 }
 0xc8d   : > { %19119 = vmatpush3.bf16.msra.mxu1 %v19118_v27  ;;  %v13428_v58 = vand.u32 4294901760, %v24616_v32  ;;  %v13998_v18 = vand.u32 4294901760, %v24713_v54 }
 0xc8e   : > { %19120 = vmatprep.subr.bf16.mxu1 %v25383_v8 }
 0xc8f   : > { %v13429_v38 = vsub.f32 %v24616_v32, %v13428_v58  ;;  %v19175_v37 = vpack.c.bf16 %v13435_v42, %v13428_v58 }
 0xc91   : > { %19122 = vmatpush3.bf16.msra.mxu1 %v19121_v41  ;;  %v13430_v20 = vand.u32 4294901760, %v13429_v38  ;;  %v19157_v41 = vpack.c.bf16 %v24618_v35, %v24616_v32  ;;  %v24725_v32 = vld [vmem:[%s25524_s15 + $0x70] sm:$0xff]  ;;  %v13977_v38 = vand.u32 4294901760, %v24520_v11 }
 0xc92   : > { %19123 = vmatprep.subr.bf16.mxu1 %v25383_v8 }
 0xc93   : > { %v19148_v10 = vpack.c.bf16 %v13437_v55, %v13430_v20 }
 0xc94   : > { %17363 = vmatmul.mubr.f32.vlgmr.msra.gmra.mrb[40].mxu1 %v24417_v40 }
 0xc95   : > { %19125 = vmatpush3.bf16.msra.mxu1 %v24423_v9  ;;  %17377 = vmatprep.mubr.msk.f32.mxu1 %vm20278_vm7, %v25380_v46  ;;  %v13323_v9 = vand.u32 4294901760, %v13309_v52 }
 0xc96   : > { %19126 = vmatprep.subr.bf16.mxu1 %v25383_v8 }
 0xc97   : > { %v24597_v25 = vsub.f32 %v13309_v52, %v13323_v9  ;;  %v24607_v39 = vpack.c.bf16 %v13326_v49, %v13323_v9  ;;  %v13839_v9 = vld [vmem:[%s25524_s15 + $0x50] sm:$0xff] }
 0xc99   : > { %19128 = vmatpush3.bf16.msra.mxu1 %v24435_v53  ;;  %v24599_v53 = vsub.f32 %v13310_v28, %v13326_v49  ;;  %v13880_v49 = vand.u32 4294901760, %v13839_v9 }
 0xc9a   : > { %19129 = vmatprep.subr.bf16.mxu1 %v25383_v8 }
 0xc9b   : > { %v13421_v7 = vand.u32 4294901760, %v24599_v53  ;;  %v19154_v27 = vpack.c.bf16 %v24599_v53, %v24597_v25 }
 0xc9d   : > { %19131 = vmatpush3.bf16.msra.mxu1 %v24454_v61  ;;  %v13401_v61 = vsub.f32 %v24583_v0, %v13400_v31  ;;  %v13422_v62 = vsub.f32 %v24599_v53, %v13421_v7  ;;  %v13838_v0 = vld [vmem:[%s25524_s15 + $0x48] sm:$0xff]  ;;  %v13841_v31 = vld [vmem:[%s25524_s15 + $0x60] sm:$0xff] }
 0xc9e   : > { %19132 = vmatprep.subr.bf16.mxu1 %v25383_v8  ;;  %v13877_v52 = vand.u32 4294901760, %v13838_v0 }
 0xc9f   : > { %v13402_v48 = vand.u32 4294901760, %v13401_v61  ;;  %v13423_v26 = vand.u32 4294901760, %v13422_v62  ;;  %v24717_v61 = vsub.f32 %v13839_v9, %v13880_v49 }
 0xca0   : > { %17378 = vmatmul.mubr.f32.vlgmr.msra.gmra.mrb[40].mxu1 %v24417_v40  ;;  %v13414_v40 = vand.u32 4294901760, %v24597_v25  ;;  %v24689_v28 = vpack.c.bf16 %v13877_v52, %v13874_v51 }
 0xca1   : > { %19134 = vmatpush3.bf16.msra.mxu1 %v24595_v19  ;;  %17392 = vmatprep.mubr.msk.f32.mxu1 %vm20278_vm7, %v25380_v46  ;;  %v19142_v1 = vpack.c.bf16 %v13409_v17, %v13402_v48  ;;  %v13956_v17 = vand.u32 4294901760, %v24511_v16 }
 0xca2   : > { %19135 = vmatprep.subr.bf16.mxu1 %v25383_v8  ;;  %v13415_v15 = vsub.f32 %v24597_v25, %v13414_v40  ;;  %v19172_v12 = vpack.c.bf16 %v13421_v7, %v13414_v40  ;;  %19200 = vmatpush3.bf16.msra.mxu0 %v24689_v28  ;;  %v13889_v25 = vand.u32 4294901760, %v13842_v57  ;;  %v24733_v7 = vand.u32 4294901760, %v24725_v32 }
 0xca3   : > { %19201 = vmatprep.subr.bf16.mxu0 %v25383_v8  ;;  %v13957_v58 = vsub.f32 %v24511_v16, %v13956_v17 }
 0xca4   : > { %v13416_v34 = vand.u32 4294901760, %v13415_v15  ;;  %v24729_v40 = vsub.f32 %v13842_v57, %v13889_v25  ;;  %v13963_v15 = vand.u32 4294901760, %v24513_v30 }
 0xca5   : > { %19137 = vmatpush3.bf16.msra.mxu1 %v24607_v39 }
 0xca6   : > { %19138 = vmatprep.subr.bf16.mxu1 %v25383_v8  ;;  %v19145_v63 = vpack.c.bf16 %v13423_v26, %v13416_v34  ;;  %v13964_v42 = vsub.f32 %v24513_v30, %v13963_v15  ;;  %v13970_v26 = vand.u32 4294901760, %v24515_v29 }
 0xca8   : > { %v13965_v34 = vand.u32 4294901760, %v13964_v42 }
 0xca9   : > { %19140 = vmatpush3.bf16.msra.mxu1 %v24626_v33 }
 0xcaa   : > { %19141 = vmatprep.subr.bf16.mxu1 %v25383_v8 }
 0xcac   : > { %17393 = vmatmul.mubr.f32.vlgmr.msra.gmra.mrb[40].mxu1 %v13391_v22  ;;  %v13971_v22 = vsub.f32 %v24515_v29, %v13970_v26 }
 0xcad   : > { %19143 = vmatpush3.bf16.msra.mxu1 %v19142_v1  ;;  %17407 = vmatprep.mubr.msk.f32.mxu1 %vm20278_vm7, %v25380_v46  ;;  %v13958_v1 = vand.u32 4294901760, %v13957_v58 }
 0xcae   : > { %19144 = vmatprep.subr.bf16.mxu1 %v25383_v8  ;;  %v13972_v20 = vand.u32 4294901760, %v13971_v22 }
 0xcaf   : > { %v19211_v43 = vpack.c.bf16 %v13965_v34, %v13958_v1 }
 0xcb1   : > { %19146 = vmatpush3.bf16.msra.mxu1 %v19145_v63  ;;  %v13978_v63 = vsub.f32 %v24520_v11, %v13977_v38 }
 0xcb2   : > { %19147 = vmatprep.subr.bf16.mxu1 %v25383_v8 }
 0xcb3   : > { %v13979_v55 = vand.u32 4294901760, %v13978_v63 }
 0xcb5   : > { %19149 = vmatpush3.bf16.msra.mxu1 %v19148_v10  ;;  %v13984_v10 = vand.u32 4294901760, %v24526_v21 }
 0xcb6   : > { %19150 = vmatprep.subr.bf16.mxu1 %v25383_v8 }
 0xcb8   : > { %17408 = vmatmul.mubr.f32.vlgmr.msra.gmra.mrb[40].mxu1 %v24589_v24 }
 0xcb9   : > { %19152 = vmatpush3.bf16.msra.mxu1 %v19151_v59  ;;  %17422 = vmatprep.mubr.msk.f32.mxu1 %vm20278_vm7, %v25380_v46  ;;  %v13991_v59 = vand.u32 4294901760, %v24528_v14 }
 0xcba   : > { %19153 = vmatprep.subr.bf16.mxu1 %v25383_v8 }
 0xcbd   : > { %19155 = vmatpush3.bf16.msra.mxu1 %v19154_v27  ;;  %v19214_v27 = vpack.c.bf16 %v13979_v55, %v13972_v20  ;;  %v19229_v20 = vpack.c.bf16 %v24509_v45, %v24507_v23  ;;  %v19232_v55 = vpack.c.bf16 %v24513_v30, %v24511_v16 }
 0xcbe   : > { %19156 = vmatprep.subr.bf16.mxu1 %v25383_v8 }
 0xcc1   : > { %19158 = vmatpush3.bf16.msra.mxu1 %v19157_v41  ;;  %v13985_v41 = vsub.f32 %v24526_v21, %v13984_v10 }
 0xcc2   : > { %19159 = vmatprep.subr.bf16.mxu1 %v25383_v8 }
 0xcc4   : > { %17423 = vmatmul.mubr.f32.vlgmr.msra.gmra.mrb[40].mxu1 %v24603_v13  ;;  %v13942_v13 = vand.u32 4294901760, %v24507_v23 }
 0xcc5   : > { %19161 = vmatpush3.bf16.msra.mxu1 %v24595_v19  ;;  %17437 = vmatprep.mubr.msk.f32.mxu1 %vm20278_vm7, %v25380_v46 }
 0xcc6   : > { %19162 = vmatprep.subr.bf16.mxu1 %v25383_v8 }
 0xcc9   : > { %19164 = vmatpush3.bf16.msra.mxu1 %v24607_v39 }
 0xcca   : > { %19165 = vmatprep.subr.bf16.mxu1 %v25383_v8 }
 0xccd   : > { %19167 = vmatpush3.bf16.msra.mxu1 %v24626_v33 }
 0xcce   : > { %19168 = vmatprep.subr.bf16.mxu1 %v25383_v8 }
 0xcd0   : > { %17438 = vmatmul.mubr.f32.vlgmr.msra.gmra.mrb[40].mxu1 %v13389_v60  ;;  %v13943_v60 = vsub.f32 %v24507_v23, %v13942_v13  ;;  %v19277_v23 = vpack.c.bf16 %v13977_v38, %v13970_v26 }
 0xcd1   : > { %19170 = vmatpush3.bf16.msra.mxu1 %v19169_v50  ;;  %17452 = vmatprep.mubr.msk.f32.mxu1 %vm20278_vm7, %v25380_v46  ;;  %v13992_v50 = vsub.f32 %v24528_v14, %v13991_v59 }
 0xcd2   : > { %19171 = vmatprep.subr.bf16.mxu1 %v25383_v8  ;;  %v13944_v48 = vand.u32 4294901760, %v13943_v60 }
 0xcd5   : > { %19173 = vmatpush3.bf16.msra.mxu1 %v19172_v12  ;;  %v13986_v12 = vand.u32 4294901760, %v13985_v41  ;;  %v19235_v41 = vpack.c.bf16 %v24520_v11, %v24515_v29  ;;  %v14479_v11 = vld [vmem:[%s25525_s3 + $0x8] sm:$0xff] }
 0xcd6   : > { %19174 = vmatprep.subr.bf16.mxu1 %v25383_v8 }
 0xcd9   : > { %19176 = vmatpush3.bf16.msra.mxu1 %v19175_v37  ;;  %v13993_v37 = vand.u32 4294901760, %v13992_v50  ;;  %v19238_v50 = vpack.c.bf16 %v24528_v14, %v24526_v21  ;;  %v14498_v21 = vand.u32 4294901760, %v14479_v11 }
 0xcda   : > { %19177 = vmatprep.subr.bf16.mxu1 %v25383_v8 }
 0xcdb   : > { %v19217_v51 = vpack.c.bf16 %v13993_v37, %v13986_v12 }
 0xcdc   : > { %17453 = vmatmul.mubr.f32.vlgmr.msra.gmra.mrb[40].mxu1 %v24589_v24 }
 0xcdd   : > { %19179 = vmatpush3.bf16.msra.mxu1 %v24595_v19  ;;  %17467 = vmatprep.mubr.msk.f32.mxu1 %vm20278_vm7, %v25380_v46  ;;  %v13886_v19 = vand.u32 4294901760, %v13841_v31 }
 0xcde   : > { %19180 = vmatprep.subr.bf16.mxu1 %v25383_v8 }
 0xcdf   : > { %v24709_v53 = vpack.c.bf16 %v13889_v25, %v13886_v19  ;;  %v24727_v35 = vsub.f32 %v13841_v31, %v13886_v19 }
 0xce1   : > { %19182 = vmatpush3.bf16.msra.mxu1 %v24607_v39  ;;  %v24715_v39 = vsub.f32 %v13838_v0, %v13877_v52  ;;  %v13999_v52 = vsub.f32 %v24713_v54, %v13998_v18 }
 0xce2   : > { %19183 = vmatprep.subr.bf16.mxu1 %v25383_v8 }
 0xce3   : > { %v14005_v0 = vand.u32 4294901760, %v24715_v39  ;;  %v19241_v12 = vpack.c.bf16 %v24715_v39, %v24713_v54 }
 0xce5   : > { %19185 = vmatpush3.bf16.msra.mxu1 %v24626_v33  ;;  %v13950_v33 = vsub.f32 %v24509_v45, %v13949_v56  ;;  %v14006_v9 = vsub.f32 %v24715_v39, %v14005_v0  ;;  %v19280_v45 = vpack.c.bf16 %v13991_v59, %v13984_v10  ;;  %v19283_v16 = vpack.c.bf16 %v14005_v0, %v13998_v18 }
 0xce7   : > { %v13951_v62 = vand.u32 4294901760, %v13950_v33 }
 0xce8   : > { %17468 = vmatmul.mubr.f32.vlgmr.msra.gmra.mrb[40].mxu1 %v24589_v24  ;;  %v13840_v24 = vld [vmem:[%s25524_s15 + $0x58] sm:$0xff] }
 0xce9   : > { %v13883_v6 = vand.u32 4294901760, %v13840_v24  ;;  %v19208_v47 = vpack.c.bf16 %v13951_v62, %v13944_v48  ;;  %v14026_v48 = vand.u32 4294901760, %v24727_v35  ;;  %v14033_v62 = vand.u32 4294901760, %v24729_v40 }
 0xceb   : > { %v24699_v36 = vpack.c.bf16 %v13883_v6, %v13880_v49  ;;  %v24719_v4 = vsub.f32 %v13840_v24, %v13883_v6  ;;  %v14000_v24 = vand.u32 4294901760, %v13999_v52  ;;  %v14007_v49 = vand.u32 4294901760, %v14006_v9  ;;  %v11739_v9 = vld [vmem:[#allocation14] sm:$0x1] }
 0xcec   : > { %v14012_v6 = vand.u32 4294901760, %v24717_v61  ;;  %v14027_v42 = vsub.f32 %v24727_v35, %v14026_v48  ;;  %v14034_v1 = vsub.f32 %v24729_v40, %v14033_v62  ;;  %v19247_v52 = vpack.c.bf16 %v24729_v40, %v24727_v35  ;;  %v14485_v40 = vld [vmem:[%s25525_s3 + $0x38] sm:$0xf] }
 0xced   : > { %19203 = vmatpush3.bf16.msra.mxu0 %v24699_v36  ;;  %v14019_v31 = vand.u32 4294901760, %v24719_v4  ;;  %v19220_v57 = vpack.c.bf16 %v14007_v49, %v14000_v24  ;;  %v19244_v37 = vpack.c.bf16 %v24719_v4, %v24717_v61  ;;  %v19289_v29 = vpack.c.bf16 %v14033_v62, %v14026_v48 }
 0xcee   : > { %19204 = vmatprep.subr.bf16.mxu0 %v25383_v8  ;;  %v14013_v19 = vsub.f32 %v24717_v61, %v14012_v6  ;;  %v14028_v34 = vand.u32 4294901760, %v14027_v42  ;;  %v14035_v22 = vand.u32 4294901760, %v14034_v1 }
 0xcef   : > { %v14020_v25 = vsub.f32 %v24719_v4, %v14019_v31  ;;  %v19286_v30 = vpack.c.bf16 %v14019_v31, %v14012_v6  ;;  %v24946_v4 = vsub.f32 %v14479_v11, %v14498_v21 }
 0xcf0   : > { %v14014_v60 = vand.u32 4294901760, %v14013_v19  ;;  %v19226_v63 = vpack.c.bf16 %v14035_v22, %v14028_v34 }
 0xcf1   : > { %19206 = vmatpush3.bf16.msra.mxu0 %v24709_v53  ;;  %v14021_v33 = vand.u32 4294901760, %v14020_v25  ;;  %v14587_v10 = vand.u32 4294901760, %v24946_v4 }
 0xcf2   : > { %17498 = vmatprep.subr.mxu0 %v25380_v46 }
 0xcf3   : > { %v19223_v58 = vpack.c.bf16 %v14021_v33, %v14014_v60 }
 0xcf5   : > { %17499 = vmatpush3.msra.mxu0 %v24733_v7 }
 0xcf6   : > { %19207 = vmatprep.subr.bf16.mxu0 %v25383_v8 }
 0xdbb   : > { %v13823_v24 = vpop.f32.mrb[40].mxu1 }
 0xdbc   : > { %v19384_v49 = vadd.f32 %v13823_v24, %v11739_v9  ;;  %v17469_v19 = vpop.f32.mrb[41].mxu1  ;;  %v24815_v9 = vsub.f32 %v24725_v32, %v24733_v7  ;;  %v19271_v32 = vpack.c.bf16 %v13949_v56, %v13942_v13  ;;  %v14482_v13 = vld [vmem:[%s25525_s3 + $0x20] sm:$0xff]  ;;  %v14483_v56 = vld [vmem:[%s25525_s3 + $0x28] sm:$0xff] }
 0xdbd   : > { %v14507_v54 = vand.u32 4294901760, %v14482_v13  ;;  %v14510_v39 = vand.u32 4294901760, %v14483_v56 }
 0xdbe   : > { %v13828_v25 = vmax.f32 %v19384_v49, 0.0 }
 0xdbf   : > { %v24948_v35 = vpack.c.bf16 %v14510_v39, %v14507_v54  ;;  %v24965_v0 = vsub.f32 %v14482_v13, %v14507_v54  ;;  %v24967_v6 = vsub.f32 %v14483_v56, %v14510_v39 }
 0xdc0   : > { %v13847_v60 = vsel %vm13845_vm12, %v13828_v25, 0 }
 0xdc1   : > { %v24805_v33 = vand.u32 4294901760, %v13847_v60  ;;  %v14608_v49 = vand.u32 4294901760, %v24965_v0  ;;  %v14615_v19 = vand.u32 4294901760, %v24967_v6 }
 0xdc3   : > { %v13930_v42 = vsub.f32 %v13847_v60, %v24805_v33  ;;  %v14609_v60 = vsub.f32 %v24965_v0, %v14608_v49  ;;  %v19367_v11 = vpack.c.bf16 %v14615_v19, %v14608_v49 }
 0xdc5   : > { %v13931_v1 = vand.u32 4294901760, %v13930_v42 }
 0xdc7   : > { %v13932_v34 = vsub.f32 %v13930_v42, %v13931_v1 }
 0xdc9   : > { %v13933_v22 = vand.u32 4294901760, %v13932_v34 }
 0xdcb   : > { %17501 = vmatmul.mubr.f32.vlgmr.msra.gmra.mrb[50].mxu0 %v13933_v22 }
 0xdcc   : > { %19209 = vmatpush3.bf16.msra.mxu0 %v19208_v47  ;;  %17533 = vmatprep.mubr.msk.f32.mxu0 %vm20278_vm7, %v25380_v46  ;;  %v14040_v47 = vand.u32 4294901760, %v24815_v9 }
 0xdcd   : > { %19210 = vmatprep.subr.bf16.mxu0 %v25383_v8 }
 0xdd0   : > { %19212 = vmatpush3.bf16.msra.mxu0 %v19211_v43  ;;  %v14041_v43 = vsub.f32 %v24815_v9, %v14040_v47 }
 0xdd1   : > { %19213 = vmatprep.subr.bf16.mxu0 %v25383_v8 }
 0xdd4   : > { %19215 = vmatpush3.bf16.msra.mxu0 %v19214_v27  ;;  %v14042_v27 = vand.u32 4294901760, %v14041_v43 }
 0xdd5   : > { %19216 = vmatprep.subr.bf16.mxu0 %v25383_v8 }
 0xdd8   : > { %19218 = vmatpush3.bf16.msra.mxu0 %v19217_v51  ;;  %v19274_v51 = vpack.c.bf16 %v13963_v15, %v13956_v17  ;;  %v14492_v17 = vsel %vm772_vm0, %v14485_v40, 0  ;;  %v14486_v40 = vld [vmem:[#allocation17] sm:$0x1] }
 0xdd9   : > { %19219 = vmatprep.subr.bf16.mxu0 %v25383_v8  ;;  %v14516_v26 = vand.u32 4294901760, %v14492_v17 }
 0xddb   : > { %v24973_v48 = vsub.f32 %v14492_v17, %v14516_v26 }
 0xddc   : > { %19221 = vmatpush3.bf16.msra.mxu0 %v19220_v57 }
 0xddd   : > { %19222 = vmatprep.subr.bf16.mxu0 %v25383_v8  ;;  %v14629_v22 = vand.u32 4294901760, %v24973_v48 }
 0xddf   : > { %v14630_v43 = vsub.f32 %v24973_v48, %v14629_v22 }
 0xde0   : > { %19224 = vmatpush3.bf16.msra.mxu0 %v19223_v58  ;;  %v14588_v58 = vsub.f32 %v24946_v4, %v14587_v10 }
 0xde1   : > { %19225 = vmatprep.subr.bf16.mxu0 %v25383_v8 }
 0xde4   : > { %19227 = vmatpush3.bf16.msra.mxu0 %v19226_v63 }
 0xde5   : > { %17531 = vmatprep.subr.mxu0 %v25380_v46 }
 0xde8   : > { %17532 = vmatpush3.msra.mxu0 %v14042_v27 }
 0xde9   : > { %17534 = vmatmul.mubr.f32.vlgmr.msra.gmra.mrb[50].mxu0 %v24805_v33  ;;  %19228 = vmatprep.subr.bf16.mxu0 %v25383_v8 }
 0xdea   : > { %19230 = vmatpush3.bf16.msra.mxu0 %v19229_v20  ;;  %17566 = vmatprep.mubr.msk.f32.mxu0 %vm20278_vm7, %v25380_v46 }
 0xdeb   : > { %19231 = vmatprep.subr.bf16.mxu0 %v25383_v8 }
 0xdee   : > { %19233 = vmatpush3.bf16.msra.mxu0 %v19232_v55 }
 0xdef   : > { %19234 = vmatprep.subr.bf16.mxu0 %v25383_v8 }
 0xdf2   : > { %19236 = vmatpush3.bf16.msra.mxu0 %v19235_v41  ;;  %v14589_v41 = vand.u32 4294901760, %v14588_v58 }
 0xdf3   : > { %19237 = vmatprep.subr.bf16.mxu0 %v25383_v8 }
 0xdf6   : > { %19239 = vmatpush3.bf16.msra.mxu0 %v19238_v50 }
 0xdf7   : > { %19240 = vmatprep.subr.bf16.mxu0 %v25383_v8 }
 0xdfa   : > { %19242 = vmatpush3.bf16.msra.mxu0 %v19241_v12 }
 0xdfb   : > { %19243 = vmatprep.subr.bf16.mxu0 %v25383_v8 }
 0xdfe   : > { %19245 = vmatpush3.bf16.msra.mxu0 %v19244_v37 }
 0xdff   : > { %19246 = vmatprep.subr.bf16.mxu0 %v25383_v8 }
 0xe02   : > { %19248 = vmatpush3.bf16.msra.mxu0 %v19247_v52 }
 0xe03   : > { %17564 = vmatprep.subr.mxu0 %v25380_v46 }
 0xe06   : > { %17565 = vmatpush3.msra.mxu0 %v24815_v9 }
 0xe07   : > { %17567 = vmatmul.mubr.f32.vlgmr.msra.gmra.mrb[50].mxu0 %v13930_v42  ;;  %19249 = vmatprep.subr.bf16.mxu0 %v25383_v8  ;;  %v14610_v42 = vand.u32 4294901760, %v14609_v60 }
 0xe08   : > { %19251 = vmatpush3.bf16.msra.mxu0 %v24505_v44  ;;  %17599 = vmatprep.mubr.msk.f32.mxu0 %vm20278_vm7, %v25380_v46 }
 0xe09   : > { %19252 = vmatprep.subr.bf16.mxu0 %v25383_v8 }
 0xe0c   : > { %19254 = vmatpush3.bf16.msra.mxu0 %v24524_v5 }
 0xe0d   : > { %19255 = vmatprep.subr.bf16.mxu0 %v25383_v8 }
 0xe10   : > { %19257 = vmatpush3.bf16.msra.mxu0 %v24537_v2 }
 0xe11   : > { %19258 = vmatprep.subr.bf16.mxu0 %v25383_v8 }
 0xe14   : > { %19260 = vmatpush3.bf16.msra.mxu0 %v24544_v3 }
 0xe15   : > { %19261 = vmatprep.subr.bf16.mxu0 %v25383_v8 }
 0xe18   : > { %19263 = vmatpush3.bf16.msra.mxu0 %v24689_v28 }
 0xe19   : > { %19264 = vmatprep.subr.bf16.mxu0 %v25383_v8 }
 0xe1c   : > { %19266 = vmatpush3.bf16.msra.mxu0 %v24699_v36 }
 0xe1d   : > { %19267 = vmatprep.subr.bf16.mxu0 %v25383_v8 }
 0xe20   : > { %19269 = vmatpush3.bf16.msra.mxu0 %v24709_v53 }
 0xe21   : > { %17597 = vmatprep.subr.mxu0 %v25380_v46 }
 0xe24   : > { %17598 = vmatpush3.msra.mxu0 %v24733_v7 }
 0xe25   : > { %17600 = vmatmul.mubr.f32.vlgmr.msra.gmra.mrb[50].mxu0 %v13931_v1  ;;  %19270 = vmatprep.subr.bf16.mxu0 %v25383_v8 }
 0xe26   : > { %19272 = vmatpush3.bf16.msra.mxu0 %v19271_v32  ;;  %17632 = vmatprep.mubr.msk.f32.mxu0 %vm20278_vm7, %v25380_v46  ;;  %v14631_v32 = vand.u32 4294901760, %v14630_v43 }
 0xe27   : > { %19273 = vmatprep.subr.bf16.mxu0 %v25383_v8 }
 0xe2a   : > { %19275 = vmatpush3.bf16.msra.mxu0 %v19274_v51 }
 0xe2b   : > { %19276 = vmatprep.subr.bf16.mxu0 %v25383_v8 }
 0xe2e   : > { %19278 = vmatpush3.bf16.msra.mxu0 %v19277_v23 }
 0xe2f   : > { %19279 = vmatprep.subr.bf16.mxu0 %v25383_v8 }
 0xe32   : > { %19281 = vmatpush3.bf16.msra.mxu0 %v19280_v45 }
 0xe33   : > { %19282 = vmatprep.subr.bf16.mxu0 %v25383_v8 }
 0xe36   : > { %19284 = vmatpush3.bf16.msra.mxu0 %v19283_v16  ;;  %v19343_v16 = vpack.c.bf16 %v24967_v6, %v24965_v0 }
 0xe37   : > { %19285 = vmatprep.subr.bf16.mxu0 %v25383_v8 }
 0xe3a   : > { %19287 = vmatpush3.bf16.msra.mxu0 %v19286_v30 }
 0xe3b   : > { %19288 = vmatprep.subr.bf16.mxu0 %v25383_v8 }
 0xe3e   : > { %19290 = vmatpush3.bf16.msra.mxu0 %v19289_v29 }
 0xe3f   : > { %17630 = vmatprep.subr.mxu0 %v25380_v46 }
 0xe42   : > { %17631 = vmatpush3.msra.mxu0 %v14040_v47 }
 0xe43   : > { %17633 = vmatmul.mubr.f32.vlgmr.msra.gmra.mrb[50].mxu0 %v24805_v33  ;;  %19291 = vmatprep.subr.bf16.mxu0 %v25383_v8 }
 0xe44   : > { %19293 = vmatpush3.bf16.msra.mxu0 %v24505_v44  ;;  %17665 = vmatprep.mubr.msk.f32.mxu0 %vm20278_vm7, %v25380_v46  ;;  %v14478_v44 = vld [vmem:[%s25525_s3] sm:$0xff] }
 0xe45   : > { %19294 = vmatprep.subr.bf16.mxu0 %v25383_v8 }
 0xe48   : > { %19296 = vmatpush3.bf16.msra.mxu0 %v24524_v5  ;;  %v14495_v5 = vand.u32 4294901760, %v14478_v44 }
 0xe49   : > { %19297 = vmatprep.subr.bf16.mxu0 %v25383_v8 }
 0xe4a   : > { %v24924_v14 = vpack.c.bf16 %v14498_v21, %v14495_v5  ;;  %v24944_v61 = vsub.f32 %v14478_v44, %v14495_v5  ;;  %v13844_v21 = vld [vmem:[#allocation16] sm:$0x1] }
 0xe4c   : > { %19299 = vmatpush3.bf16.msra.mxu0 %v24537_v2  ;;  %v14480_v2 = vld [vmem:[%s25525_s3 + $0x10] sm:$0xff]  ;;  %v14580_v38 = vand.u32 4294901760, %v24944_v61  ;;  %v19337_v23 = vpack.c.bf16 %v24946_v4, %v24944_v61 }
 0xe4d   : > { %19300 = vmatprep.subr.bf16.mxu0 %v25383_v8 }
 0xe4e   : > { %v14581_v62 = vsub.f32 %v24944_v61, %v14580_v38  ;;  %v19361_v29 = vpack.c.bf16 %v14587_v10, %v14580_v38 }
 0xe50   : > { %19302 = vmatpush3.bf16.msra.mxu0 %v24544_v3  ;;  %v14481_v3 = vld [vmem:[%s25525_s3 + $0x18] sm:$0xff]  ;;  %v14582_v63 = vand.u32 4294901760, %v14581_v62 }
 0xe51   : > { %19303 = vmatprep.subr.bf16.mxu0 %v25383_v8 }
 0xe52   : > { %v19325_v37 = vpack.c.bf16 %v14589_v41, %v14582_v63 }
 0xe54   : > { %19305 = vmatpush3.bf16.msra.mxu0 %v24689_v28  ;;  %v14501_v28 = vand.u32 4294901760, %v14480_v2 }
 0xe55   : > { %19306 = vmatprep.subr.bf16.mxu0 %v25383_v8 }
 0xe56   : > { %v24961_v59 = vsub.f32 %v14480_v2, %v14501_v28 }
 0xe58   : > { %19308 = vmatpush3.bf16.msra.mxu0 %v24699_v36  ;;  %v14504_v36 = vand.u32 4294901760, %v14481_v3  ;;  %v14594_v20 = vand.u32 4294901760, %v24961_v59 }
 0xe59   : > { %19309 = vmatprep.subr.bf16.mxu0 %v25383_v8 }
 0xe5a   : > { %v24963_v18 = vsub.f32 %v14481_v3, %v14504_v36  ;;  %v14595_v50 = vsub.f32 %v24961_v59, %v14594_v20 }
 0xe5c   : > { %19311 = vmatpush3.bf16.msra.mxu0 %v24709_v53  ;;  %v24934_v53 = vpack.c.bf16 %v14504_v36, %v14501_v28  ;;  %v14601_v55 = vand.u32 4294901760, %v24963_v18  ;;  %v14596_v52 = vand.u32 4294901760, %v14595_v50  ;;  %v19340_v45 = vpack.c.bf16 %v24963_v18, %v24961_v59 }
 0xe5d   : > { %17663 = vmatprep.subr.mxu0 %v25380_v46 }
 0xe5e   : > { %v14602_v12 = vsub.f32 %v24963_v18, %v14601_v55  ;;  %v19364_v44 = vpack.c.bf16 %v14601_v55, %v14594_v20 }
 0xe60   : > { %17664 = vmatpush3.msra.mxu0 %v24733_v7  ;;  %v14484_v7 = vld [vmem:[%s25525_s3 + $0x30] sm:$0xff]  ;;  %v14603_v24 = vand.u32 4294901760, %v14602_v12 }
 0xe61   : > { %17666 = vmatmul.mubr.f32.vlgmr.msra.gmra.mrb[50].mxu0 %v24805_v33  ;;  %19312 = vmatprep.subr.bf16.mxu0 %v25383_v8  ;;  %v14513_v15 = vand.u32 4294901760, %v14484_v7  ;;  %v14616_v33 = vsub.f32 %v24967_v6, %v14615_v19 }
 0xe62   : > { %17684 = vmatprep.mubr.msk.f32.mxu0 %vm20278_vm7, %v25380_v46  ;;  %19314 = vmatpush3.bf16.msra.mxu0 %v24924_v14  ;;  %v19328_v25 = vpack.c.bf16 %v14603_v24, %v14596_v52 }
 0xe63   : > { %19315 = vmatprep.subr.bf16.mxu0 %v25383_v8  ;;  %v24969_v31 = vpack.c.bf16 %v14516_v26, %v14513_v15  ;;  %v24971_v57 = vsub.f32 %v14484_v7, %v14513_v15  ;;  %v14617_v1 = vand.u32 4294901760, %v14616_v33 }
 0xe65   : > { %v14622_v34 = vand.u32 4294901760, %v24971_v57  ;;  %v19331_v9 = vpack.c.bf16 %v14617_v1, %v14610_v42  ;;  %v19346_v30 = vpack.c.bf16 %v24973_v48, %v24971_v57 }
 0xe66   : > { %19317 = vmatpush3.bf16.msra.mxu0 %v24934_v53 }
 0xe67   : > { %19318 = vmatprep.subr.bf16.mxu0 %v25383_v8  ;;  %v14623_v47 = vsub.f32 %v24971_v57, %v14622_v34  ;;  %v19370_v5 = vpack.c.bf16 %v14629_v22, %v14622_v34 }
 0xe69   : > { %v14624_v27 = vand.u32 4294901760, %v14623_v47 }
 0xe6a   : > { %19320 = vmatpush3.bf16.msra.mxu0 %v24948_v35 }
 0xe6b   : > { %19321 = vmatprep.subr.bf16.mxu0 %v25383_v8  ;;  %v19334_v51 = vpack.c.bf16 %v14631_v32, %v14624_v27 }
 0xe6e   : > { %19323 = vmatpush3.bf16.msra.mxu0 %v24969_v31 }
 0xe6f   : > { %19324 = vmatprep.subr.bf16.mxu0 %v25383_v8 }
 0xf34   : > { %v14473_v2 = vpop.f32.mrb[50].mxu0 }
 0xf35   : > { %v19385_v3 = vadd.f32 %v14473_v2, %v13844_v21  ;;  %v17667_v28 = vpop.f32.mrb[51].mxu0 }
 0xf37   : > { %v14477_v36 = vmax.f32 %v19385_v3, 0.0 }
 0xf39   : > { %v14489_v13 = vsel %vm14487_vm13, %v14477_v36, 0 }
 0xf3a   : > { %v14567_v56 = vand.u32 4294901760, %v14489_v13 }
 0xf3c   : > { %v14568_v54 = vsub.f32 %v14489_v13, %v14567_v56 }
 0xf3e   : > { %v14569_v39 = vand.u32 4294901760, %v14568_v54 }
 0xf40   : > { %v14570_v61 = vsub.f32 %v14568_v54, %v14569_v39 }
 0xf42   : > { %v14571_v4 = vand.u32 4294901760, %v14570_v61 }
 0xf44   : > { %17685 = vmatmul.mubr.f32.vlgmr.msra.gmra.mrb[52].mxu0 %v14571_v4 }
 0xf45   : > { %19326 = vmatpush3.bf16.msra.mxu0 %v19325_v37  ;;  %17703 = vmatprep.mubr.msk.f32.mxu0 %vm20278_vm7, %v25380_v46 }
 0xf46   : > { %19327 = vmatprep.subr.bf16.mxu0 %v25383_v8 }
 0xf49   : > { %19329 = vmatpush3.bf16.msra.mxu0 %v19328_v25 }
 0xf4a   : > { %19330 = vmatprep.subr.bf16.mxu0 %v25383_v8 }
 0xf4d   : > { %19332 = vmatpush3.bf16.msra.mxu0 %v19331_v9 }
 0xf4e   : > { %19333 = vmatprep.subr.bf16.mxu0 %v25383_v8 }
 0xf51   : > { %19335 = vmatpush3.bf16.msra.mxu0 %v19334_v51 }
 0xf52   : > { %19336 = vmatprep.subr.bf16.mxu0 %v25383_v8 }
 0xf54   : > { %17704 = vmatmul.mubr.f32.vlgmr.msra.gmra.mrb[52].mxu0 %v14567_v56 }
 0xf55   : > { %19338 = vmatpush3.bf16.msra.mxu0 %v19337_v23  ;;  %17722 = vmatprep.mubr.msk.f32.mxu0 %vm20278_vm7, %v25380_v46 }
 0xf56   : > { %19339 = vmatprep.subr.bf16.mxu0 %v25383_v8 }
 0xf59   : > { %19341 = vmatpush3.bf16.msra.mxu0 %v19340_v45 }
 0xf5a   : > { %19342 = vmatprep.subr.bf16.mxu0 %v25383_v8 }
 0xf5d   : > { %19344 = vmatpush3.bf16.msra.mxu0 %v19343_v16 }
 0xf5e   : > { %19345 = vmatprep.subr.bf16.mxu0 %v25383_v8 }
 0xf61   : > { %19347 = vmatpush3.bf16.msra.mxu0 %v19346_v30 }
 0xf62   : > { %19348 = vmatprep.subr.bf16.mxu0 %v25383_v8 }
 0xf64   : > { %17723 = vmatmul.mubr.f32.vlgmr.msra.gmra.mrb[52].mxu0 %v14568_v54 }
 0xf65   : > { %19350 = vmatpush3.bf16.msra.mxu0 %v24924_v14  ;;  %17741 = vmatprep.mubr.msk.f32.mxu0 %vm20278_vm7, %v25380_v46 }
 0xf66   : > { %19351 = vmatprep.subr.bf16.mxu0 %v25383_v8 }
 0xf69   : > { %19353 = vmatpush3.bf16.msra.mxu0 %v24934_v53 }
 0xf6a   : > { %19354 = vmatprep.subr.bf16.mxu0 %v25383_v8 }
 0xf6d   : > { %19356 = vmatpush3.bf16.msra.mxu0 %v24948_v35 }
 0xf6e   : > { %19357 = vmatprep.subr.bf16.mxu0 %v25383_v8 }
 0xf71   : > { %19359 = vmatpush3.bf16.msra.mxu0 %v24969_v31 }
 0xf72   : > { %19360 = vmatprep.subr.bf16.mxu0 %v25383_v8 }
 0xf74   : > { %17742 = vmatmul.mubr.f32.vlgmr.msra.gmra.mrb[52].mxu0 %v14569_v39 }
 0xf75   : > { %19362 = vmatpush3.bf16.msra.mxu0 %v19361_v29  ;;  %17760 = vmatprep.mubr.msk.f32.mxu0 %vm20278_vm7, %v25380_v46 }
 0xf76   : > { %19363 = vmatprep.subr.bf16.mxu0 %v25383_v8 }
 0xf79   : > { %19365 = vmatpush3.bf16.msra.mxu0 %v19364_v44 }
 0xf7a   : > { %19366 = vmatprep.subr.bf16.mxu0 %v25383_v8 }
 0xf7d   : > { %19368 = vmatpush3.bf16.msra.mxu0 %v19367_v11 }
 0xf7e   : > { %19369 = vmatprep.subr.bf16.mxu0 %v25383_v8 }
 0xf81   : > { %19371 = vmatpush3.bf16.msra.mxu0 %v19370_v5 }
 0xf82   : > { %19372 = vmatprep.subr.bf16.mxu0 %v25383_v8 }
 0xf84   : > { %17761 = vmatmul.mubr.f32.vlgmr.msra.gmra.mrb[52].mxu0 %v14567_v56 }
 0xf85   : > { %19374 = vmatpush3.bf16.msra.mxu0 %v24924_v14  ;;  %17779 = vmatprep.mubr.msk.f32.mxu0 %vm20278_vm7, %v25380_v46 }
 0xf86   : > { %19375 = vmatprep.subr.bf16.mxu0 %v25383_v8 }
 0xf89   : > { %19377 = vmatpush3.bf16.msra.mxu0 %v24934_v53 }
 0xf8a   : > { %19378 = vmatprep.subr.bf16.mxu0 %v25383_v8 }
 0xf8d   : > { %19380 = vmatpush3.bf16.msra.mxu0 %v24948_v35 }
 0xf8e   : > { %19381 = vmatprep.subr.bf16.mxu0 %v25383_v8 }
 0xf91   : > { %19383 = vmatpush3.bf16.msra.mxu0 %v24969_v31 }
 0xf94   : > { %17780 = vmatmul.mubr.f32.vlgmr.msra.gmra.mrb[52].mxu0 %v14567_v56 }
0x1067   : > { %v15027_v46 = vpop.f32.mrb[52].mxu0 }
0x1068   : > { %v19386_v14 = vadd.f32 %v15027_v46, %v14486_v40  ;;  %v17781_v7 = vpop.f32.mrb[53].mxu0 }
0x106a   : > { %15032 = vst.msk [vmem:[%s726_s19] sm:$0x1] %vm15031_vm14, %v19386_v14 }
0x106b   : > { %20189 = shalt.err (!%p20186_p7)
}
0x106c   : > { %s20190_s21 = scalar_lea.hbm %s25041_s0, 16  ;;  %s20194_s27 = scalar_lea.hbm %s25529_s28, 32 }
0x106d   : > { %p20191_p8 = scmp.ne.s32.totalorder %s25041_s0, %s20190_s21  ;;  %p20195_p1 = scmp.lt.u32.totalorder %s25041_s0, %s25529_s28 }
0x106e   : > { %p20196_p6 = scmp.lt.u32.totalorder %s20194_s27, %s20190_s21  ;;  %p20198_p5 = scmp.lt.u32.totalorder %s20190_s21, %s25041_s0 }
0x106f   : > { %p20192_p11 = pnand %p20191_p8, %p25530_p10 }
0x1070   : > { %p20197_p9 = por %p20196_p6, %p20195_p1 }
0x1071   : > { %p20193_p13 = pneg %p20192_p11 }
0x1072   : > { %p20199_p0 = por %p20198_p5, %p20197_p9 }
0x1074   : > { %p20200_p2 = pnand %p20199_p0, %p20193_p13 }
0x1076   : > { %20203 = shalt.err (!%p20200_p2)
}
0x1077   : > { %19787 = dma.vmem_to_hbm [thread:$0]  (%p25530_p10), %s25043_s22, 16, %s25041_s0, %s15034_s6  }
0x1078 PF: > { %s25531_s29 = sld [smem:[#allocation30_spill]]  ;;  %s25532_s1 = sld [smem:[#allocation27_spill]] }
0x1079   : > { %s25533_s24 = sld [smem:[#allocation34_spill]] }
0x107e   : > { %p19844_p3 = scmp.ge.s32.totalorder %s25531_s29, 2  ;;  %s15058_s20 = sand.u32 1, %s25532_s1  }
0x107f   : > { %p25534_p4 = scmp.ne.s32.totalorder %s25533_s24, 0  ;;  %s15059_s17 = scalar_lea.sflag [#allocation4], %s15058_s20 }
0x1081   : > { %p19821_p12 = pnand %p19844_p3, %p25534_p4 }
0x1083   : > { %20245 = dma.done.wait (!%p19821_p12), %s15059_s17, 16  }
0x1084   : > { %20247 = vsyncadd (!%p19821_p12), %s15059_s17, 4294967280  ;;  %s25535_s21 = sld [smem:[#allocation31_spill]]  ;;  %s25536_s0 = sld [smem:[#allocation28_spill]] }
0x1085   : > { %s25537_s30 = sld [smem:[#allocation29_spill]]  ;;  %s25538_s20 = sld [smem:[#allocation32_spill]] }
0x108a   : > { %p35_p7 = scmp.ge.s32.totalorder %s25535_s21, 4  }
0x108c   :  { %37 = sbr.rel (!%p35_p7) target bundleno = 19 (0x13), region = 183 }
0x1093   :  { %15063 = vsyncpa [#allocation3], 1 }
0x1094   :  { %15065 = vsyncpa [#allocation3 + $0x1], 1 }
0x1095   :  { %15066 = vsyncpa [#allocation6], 1 }
0x1096   :  { %15067 = vsyncpa [#allocation9], 1 }
0x1097   :  { %15068 = vsyncpa [#allocation12], 1 }
0x1098   :  { %15069 = vsyncpa [#allocation15], 1 }
0x1099   :  { %15070 = vsyncpa [#allocation18], 1 }
0x109a   :  { %15071 = vsyncpa [#allocation4], 1 }
0x109b   :  { %15073 = vsyncpa [#allocation4 + $0x1], 1 }

</bundles_post_ra>
